<compile_context>
chip_gen: v7x
topology: tpu7x:2x2x1
jax: 0.10.0
libtpu: 0.0.40
codegen_flags: <defaults>
</compile_context>

<pallas_src>
import functools

import jax
import jax.numpy as jnp
from jax.experimental import pallas as pl
from jax.experimental.pallas import tpu as pltpu

# Full f32 matmuls everywhere: training-mode BN (tiny batch) amplifies bf16
# rounding noise across layers, so bf16 MXU operands are not safe to verify
# against a tight tolerance for this module.
DOT_PREC = jax.lax.Precision.HIGHEST

KERNEL_SIZES = [7, 5, 5, 5, 5, 3, 3, 3]
NUM_FILTERS = [16, 16, 32, 32, 64, 64, 64, 64]
POOLING = [2, 4, 2, 4, 2, 2, 2, 2]


# ---------------------------------------------------------------------------
# Fused Conv1d('same') -> BatchNorm1d (training batch stats) -> ReLU ->
# MaxPool1d(P, stride=P), channels-last.
# ---------------------------------------------------------------------------
def _conv_bn_relu_pool_kernel(x_ref, w_ref, b_ref, g_ref, be_ref, out_ref,
                              xpad_ref, sum_ref, ssq_ref,
                              *, K, L, P, TR, left, lead, eps, inv_rows):
    # x_ref   : (L, C_in)              one sample, channels-last (N dim squeezed)
    # w_ref   : (K*C_in, C_out)        conv weight, rows ordered (k, c), f32
    # b_ref   : (1, C_out)  g_ref: (1, C_out)  be_ref: (1, C_out)   (f32)
    # out_ref : (TR//P, C_out)         pooled rows of this tile (N dim squeezed)
    # xpad_ref: (lead + L + K - 1, C_in)  zero-padded sample ('same' halo) scratch
    # sum_ref / ssq_ref: (1, C_out)    BN sum / sum-of-squares accumulators
    phase = pl.program_id(0)      # 0: conv + stats accumulation, 1: normalize/relu/pool
    n = pl.program_id(1)          # sample index
    t = pl.program_id(2)          # row tile within the sample
    TRo = TR // P
    C_out = w_ref.shape[1]

    # ---- init the BN statistics accumulators once (first grid step) ----
    @pl.when((phase == 0) & (n == 0) & (t == 0))
    def _init_stats():
        sum_ref[...] = jnp.zeros_like(sum_ref)
        ssq_ref[...] = jnp.zeros_like(ssq_ref)

    # ---- build the zero-padded ('same') copy of this sample once per (phase, n) ----
    @pl.when(t == 0)
    def _stage_sample():
        xpad_ref[...] = jnp.zeros_like(xpad_ref)
        # `lead` dead rows make lead + left a multiple of 8 -> sublane-aligned store.
        xpad_ref[lead + left:lead + left + L, :] = x_ref[...]

    # ---- conv tile: one fused MXU contraction over C_in*K (im2col) ----
    l0 = pl.multiple_of(t * TR, TR)
    cols = [xpad_ref[pl.ds(lead + l0 + k, TR), :] for k in range(K)]   # K x (TR, C_in)
    xcol = jnp.concatenate(cols, axis=1)                               # (TR, K*C_in)
    y = jnp.dot(xcol, w_ref[...], preferred_element_type=jnp.float32,
                precision=DOT_PREC)
    y = y + b_ref[...]                                                 # (TR, C_out) f32

    # ---- phase 0: one-pass BN statistics (per-channel sum / sum of squares) ----
    @pl.when(phase == 0)
    def _accumulate_stats():
        sum_ref[...] += jnp.sum(y, axis=0, keepdims=True)
        ssq_ref[...] += jnp.sum(y * y, axis=0, keepdims=True)

    # ---- phase 1: normalize with global batch stats + ReLU + MaxPool, store tile ----
    @pl.when(phase == 1)
    def _normalize_relu_pool():
        mean = sum_ref[...] * inv_rows
        var = ssq_ref[...] * inv_rows - mean * mean      # biased var (training BN)
        scale = g_ref[...] * jax.lax.rsqrt(var + eps)
        shift = be_ref[...] - mean * scale
        z = jnp.maximum(y * scale + shift, 0.0)
        # MaxPool1d(P, stride=P): group P consecutive rows; lanes (channels) untouched.
        z = z[:TRo * P, :].reshape(TRo, P, C_out)
        out_ref[...] = jnp.max(z, axis=1).astype(out_ref.dtype)


def _pick_row_tile(L, P, cap=512):
    """Largest row tile <= cap that divides L, is pool aligned and keeps the pooled
    tile height a multiple of 8; otherwise fall back to the full per-sample length."""
    if L <= cap:
        return L
    tr = cap
    while tr >= 8:
        if L % tr == 0 and tr % P == 0 and (tr // P) % 8 == 0:
            return tr
        tr //= 2
    return L


def conv_bn_relu_pool(x, w, b, gamma, beta, *, pooling_factor, eps=1e-5):
    """Fused Temporal_Block / Spatial_Block core, channels-last.

    x: (N, L, C_in) activations (channels-last).
    w: (C_out, C_in, K)  -- PyTorch Conv1d weight layout.
    b, gamma, beta: (C_out,)
    returns (N, L // pooling_factor, C_out) float32.
    """
    N, L, C_in = x.shape
    C_out, _, K = w.shape
    P = pooling_factor
    L_out = L // P
    left = (K - 1) // 2            # PyTorch padding='same' (stride 1): left = (K-1)//2
    lead = (-left) % 8             # dead rows so the in-kernel sample store is aligned
    TR = _pick_row_tile(L, P)
    TRo = TR // P
    T_l = L // TR

    # Lane-pad the channel dim to a multiple of 8 (zero channels + zero weight rows:
    # numerically exact, keeps every im2col piece 8-lane aligned).  Only the spatial
    # block (C_in = 1) actually pads here.
    C_pad = max(8, ((C_in + 7) // 8) * 8)
    x32 = x.astype(jnp.float32)
    w_t = jnp.transpose(w, (2, 1, 0)).astype(jnp.float32)          # (K, C_in, C_out)
    if C_pad != C_in:
        x32 = jnp.pad(x32, ((0, 0), (0, 0), (0, C_pad - C_in)))
        w_t = jnp.pad(w_t, ((0, 0), (0, C_pad - C_in), (0, 0)))
    # Flatten the weight once in the wrapper (no in-kernel transposes); row order (k, c).
    w_flat = w_t.reshape(K * C_pad, C_out)
    b2 = b.reshape(1, C_out).astype(jnp.float32)
    g2 = gamma.reshape(1, C_out).astype(jnp.float32)
    be2 = beta.reshape(1, C_out).astype(jnp.float32)

    kern = functools.partial(
        _conv_bn_relu_pool_kernel, K=K, L=L, P=P, TR=TR, left=left, lead=lead,
        eps=eps, inv_rows=1.0 / float(N * L))
    return pl.pallas_call(
        kern,
        out_shape=jax.ShapeDtypeStruct((N, L_out, C_out), jnp.float32),
        grid=(2, N, T_l),      # (phase, sample, row tile)
        in_specs=[
            pl.BlockSpec((None, L, C_pad), lambda p, n, t: (n, 0, 0)),
            pl.BlockSpec((K * C_pad, C_out), lambda p, n, t: (0, 0)),
            pl.BlockSpec((1, C_out), lambda p, n, t: (0, 0)),
            pl.BlockSpec((1, C_out), lambda p, n, t: (0, 0)),
            pl.BlockSpec((1, C_out), lambda p, n, t: (0, 0)),
        ],
        out_specs=pl.BlockSpec((None, TRo, C_out), lambda p, n, t: (n, t, 0)),
        scratch_shapes=[
            pltpu.VMEM((lead + L + K - 1, C_pad), jnp.float32),  # padded sample
            pltpu.VMEM((1, C_out), jnp.float32),                 # BN sum
            pltpu.VMEM((1, C_out), jnp.float32),                 # BN sum of squares
        ],
        compiler_params=pltpu.CompilerParams(
            # Global BN reduction -> all axes sequential.
            dimension_semantics=("arbitrary", "arbitrary", "arbitrary"),
            vmem_limit_bytes=32 * 1024 * 1024),
    )(x32, w_flat, b2, g2, be2)


# ---------------------------------------------------------------------------
# Fully_Connected: Linear -> BatchNorm1d(train) -> ReLU   (Dropout == identity)
# ---------------------------------------------------------------------------
def _dense_kernel(x_ref, w_ref, b_ref, g_ref, be_ref, out_ref, *, eps, bn_relu):
    y = jnp.dot(x_ref[...], w_ref[...], preferred_element_type=jnp.float32,
                precision=DOT_PREC)
    y = y + b_ref[...]
    if bn_relu:
        mean = jnp.mean(y, axis=0, keepdims=True)
        var = jnp.mean(y * y, axis=0, keepdims=True) - mean * mean   # biased variance
        y = (y - mean) * (g_ref[...] * jax.lax.rsqrt(var + eps)) + be_ref[...]
        y = jnp.maximum(y, 0.0)
    out_ref[...] = y.astype(out_ref.dtype)


def dense_block(x, w, b, gamma=None, beta=None, *, bn_relu, eps=1e-5):
    """Linear(+BN(train)+ReLU).  w is (D_in, D_out).
    # TODO(synk): training-mode Dropout(p) is stochastic; identity (inference
    # behaviour) is used so the forward pass stays deterministic."""
    N, D_in = x.shape
    D_out = w.shape[1]
    if gamma is None:
        gamma = jnp.ones((D_out,), jnp.float32)
    if beta is None:
        beta = jnp.zeros((D_out,), jnp.float32)
    kern = functools.partial(_dense_kernel, eps=eps, bn_relu=bn_relu)
    return pl.pallas_call(
        kern,
        out_shape=jax.ShapeDtypeStruct((N, D_out), jnp.float32),
        grid=(1,),
        in_specs=[
            pl.BlockSpec((N, D_in), lambda i: (0, 0)),
            pl.BlockSpec((D_in, D_out), lambda i: (0, 0)),
            pl.BlockSpec((1, D_out), lambda i: (0, 0)),
            pl.BlockSpec((1, D_out), lambda i: (0, 0)),
            pl.BlockSpec((1, D_out), lambda i: (0, 0)),
        ],
        out_specs=pl.BlockSpec((N, D_out), lambda i: (0, 0)),
        compiler_params=pltpu.CompilerParams(dimension_semantics=("arbitrary",)),
    )(x.astype(jnp.float32), w.astype(jnp.float32),
      b.reshape(1, D_out).astype(jnp.float32),
      gamma.reshape(1, D_out).astype(jnp.float32),
      beta.reshape(1, D_out).astype(jnp.float32))


# ---------------------------------------------------------------------------
# Full Attia_Net forward.
# ---------------------------------------------------------------------------
def attia_net_forward(x, params):
    """x: (N, num_leads, inp_size) -- PyTorch NCL layout."""
    N = x.shape[0]
    h = jnp.transpose(x, (0, 2, 1))                       # channels-last (N, L, C)
    for blk, P in zip(params["temporal"], POOLING):
        h = conv_bn_relu_pool(h, blk["w"], blk["b"], blk["gamma"], blk["beta"],
                              pooling_factor=P)
    # Spatial_Block: torch permutes NCL->NLC and convolves with the reduced time
    # axis as channels; in channels-last form that is one small transpose.
    h = jnp.transpose(h, (0, 2, 1))                       # (N, 64, inp_size // 1024)
    sp = params["spatial"]
    h = conv_bn_relu_pool(h, sp["w"], sp["b"], sp["gamma"], sp["beta"],
                          pooling_factor=2)               # (N, 32, 128)
    h = h.reshape(N, -1)                                  # (N, 4096) == torch reshape
    fc1, fc2, out_p = params["fc1"], params["fc2"], params["out"]
    h = dense_block(h, fc1["w"], fc1["b"], fc1["gamma"], fc1["beta"], bn_relu=True)
    h = dense_block(h, fc2["w"], fc2["b"], fc2["gamma"], fc2["beta"], bn_relu=True)
    return dense_block(h, out_p["w"], out_p["b"], bn_relu=False)        # (N, 1)


# ---------------------------------------------------------------------------
# Deterministic parameter init (PyTorch-style bounds).
# ---------------------------------------------------------------------------
def _conv_params(key, c_in, c_out, k):
    kw, kb, kg, kbe = jax.random.split(key, 4)
    bound = 1.0 / float(c_in * k) ** 0.5
    return {"w": jax.random.uniform(kw, (c_out, c_in, k), jnp.float32, -bound, bound),
            "b": jax.random.uniform(kb, (c_out,), jnp.float32, -bound, bound),
            "gamma": jax.random.uniform(kg, (c_out,), jnp.float32, 0.5, 1.5),
            "beta": jax.random.uniform(kbe, (c_out,), jnp.float32, -0.1, 0.1)}


def _linear_params(key, d_in, d_out, bn=True):
    kw, kb, kg, kbe = jax.random.split(key, 4)
    bound = 1.0 / float(d_in) ** 0.5
    p = {"w": jax.random.uniform(kw, (d_in, d_out), jnp.float32, -bound, bound),
         "b": jax.random.uniform(kb, (d_out,), jnp.float32, -bound, bound)}
    if bn:
        p["gamma"] = jax.random.uniform(kg, (d_out,), jnp.float32, 0.5, 1.5)
        p["beta"] = jax.random.uniform(kbe, (d_out,), jnp.float32, -0.1, 0.1)
    return p


def init_attia_params(key, num_leads, inp_size):
    keys = jax.random.split(key, 12)
    params = {"temporal": []}
    in_c = num_leads
    for i, (ks, nf) in enumerate(zip(KERNEL_SIZES, NUM_FILTERS)):
        params["temporal"].append(_conv_params(keys[i], in_c, nf, ks))
        in_c = nf
    params["spatial"] = _conv_params(keys[8], inp_size // 1024, 128, 12)
    params["fc1"] = _linear_params(keys[9], 4096, 128)
    params["fc2"] = _linear_params(keys[10], 128, 64)
    params["out"] = _linear_params(keys[11], 64, 1, bn=False)
    return params


# ---------------------------------------------------------------------------
# Pure-JAX references (PyTorch NCL formulation, full-f32 matmuls like the kernels).
# ---------------------------------------------------------------------------
def _ref_conv_block_ncl(x, w, b, gamma, beta, P, eps=1e-5):
    N, C_in, L = x.shape
    C_out, _, K = w.shape
    left = (K - 1) // 2
    xpad = jnp.pad(x, ((0, 0), (0, 0), (left, K - 1 - left))).astype(jnp.float32)
    wf = w.astype(jnp.float32)
    y = jnp.zeros((N, C_out, L), jnp.float32)
    for k in range(K):
        y = y + jnp.einsum("nci,oc->noi", xpad[:, :, k:k + L], wf[:, :, k],
                           precision=DOT_PREC,
                           preferred_element_type=jnp.float32)
    y = y + b[None, :, None]
    mean = jnp.mean(y, axis=(0, 2), keepdims=True)
    var = jnp.mean(y * y, axis=(0, 2), keepdims=True) - mean * mean
    scale = gamma[None, :, None] * jax.lax.rsqrt(var + eps)
    shift = beta[None, :, None] - mean * scale
    y = jnp.maximum(y * scale + shift, 0.0)
    Lo = L // P
    return jnp.max(y[:, :, :Lo * P].reshape(N, C_out, Lo, P), axis=-1)


def _ref_dense(x, w, b, gamma=None, beta=None, bn_relu=True, eps=1e-5):
    y = jnp.dot(x, w, preferred_element_type=jnp.float32,
                precision=DOT_PREC) + b[None, :]
    if bn_relu:
        mean = jnp.mean(y, axis=0, keepdims=True)
        var = jnp.mean(y * y, axis=0, keepdims=True) - mean * mean
        y = (y - mean) * (gamma[None, :] * jax.lax.rsqrt(var + eps)) + beta[None, :]
        y = jnp.maximum(y, 0.0)
    return y


def _ref_attia_net(x, params):
    h = x
    for blk, P in zip(params["temporal"], POOLING):
        h = _ref_conv_block_ncl(h, blk["w"], blk["b"], blk["gamma"], blk["beta"], P)
    h = jnp.transpose(h, (0, 2, 1))
    sp = params["spatial"]
    h = _ref_conv_block_ncl(h, sp["w"], sp["b"], sp["gamma"], sp["beta"], 2)
    h = jnp.transpose(h, (0, 2, 1))
    h = h.reshape(h.shape[0], -1)
    fc1, fc2, out_p = params["fc1"], params["fc2"], params["out"]
    h = _ref_dense(h, fc1["w"], fc1["b"], fc1["gamma"], fc1["beta"], True)
    h = _ref_dense(h, fc2["w"], fc2["b"], fc2["gamma"], fc2["beta"], True)
    return _ref_dense(h, out_p["w"], out_p["b"], bn_relu=False)


if __name__ == "__main__":
    # Smallest inp_size compatible with the FC head (the 8 pooling factors multiply
    # to 1024 and the flatten feeds a fixed Linear(4096, ...)).
    N, num_leads, inp_size = 4, 8, 1024
    key = jax.random.PRNGKey(0)
    kx, kp = jax.random.split(key)
    x = jax.random.normal(kx, (N, num_leads, inp_size), dtype=jnp.float32)
    params = init_attia_params(kp, num_leads, inp_size)

    out = jax.block_until_ready(attia_net_forward(x, params))
    assert out.shape == (N, 1), out.shape

    # --- per-block checks (same-input comparisons, no cross-layer error growth) ---
    # Temporal_Block 1
    t0 = params["temporal"][0]
    blk = conv_bn_relu_pool(jnp.transpose(x, (0, 2, 1)), t0["w"], t0["b"],
                            t0["gamma"], t0["beta"], pooling_factor=POOLING[0])
    blk_ref = _ref_conv_block_ncl(x, t0["w"], t0["b"], t0["gamma"], t0["beta"],
                                  POOLING[0])
    assert jnp.allclose(jnp.transpose(blk, (0, 2, 1)), blk_ref,
                        atol=1e-3, rtol=1e-3), "Temporal_Block kernel mismatch"

    # Spatial_Block (its channels-last input equals the NCL output of the temporal chain)
    h_ncl = x
    for blkp, P in zip(params["temporal"], POOLING):
        h_ncl = _ref_conv_block_ncl(h_ncl, blkp["w"], blkp["b"],
                                    blkp["gamma"], blkp["beta"], P)
    sp = params["spatial"]
    sp_pal = conv_bn_relu_pool(h_ncl, sp["w"], sp["b"], sp["gamma"], sp["beta"],
                               pooling_factor=2)
    sp_ref = _ref_conv_block_ncl(jnp.transpose(h_ncl, (0, 2, 1)), sp["w"], sp["b"],
                                 sp["gamma"], sp["beta"], 2)
    assert jnp.allclose(jnp.transpose(sp_pal, (0, 2, 1)), sp_ref,
                        atol=1e-3, rtol=1e-3), "Spatial_Block kernel mismatch"

    # Fully_Connected 1
    flat_ref = jnp.transpose(sp_ref, (0, 2, 1)).reshape(N, -1)
    fc1 = params["fc1"]
    d_pal = dense_block(flat_ref, fc1["w"], fc1["b"], fc1["gamma"], fc1["beta"],
                        bn_relu=True)
    d_ref = _ref_dense(flat_ref, fc1["w"], fc1["b"], fc1["gamma"], fc1["beta"], True)
    assert jnp.allclose(d_pal, d_ref, atol=1e-3, rtol=1e-3), "FC kernel mismatch"

    # --- end-to-end check of the whole Attia_Net forward ---
    ref = _ref_attia_net(x, params)
    assert jnp.allclose(out, ref, atol=1e-2, rtol=1e-2), "Attia_Net forward mismatch"

    print("KERNEL_OK")
</pallas_src>

<mosaic_0001>
module attributes {stable_mosaic.version = 11 : i64} {
  func.func @_conv_bn_relu_pool_kernel(%arg0: i32, %arg1: i32, %arg2: i32, %arg3: memref<1x1024x8xf32, #tpu.memory_space<vmem>>, %arg4: memref<56x16xf32, #tpu.memory_space<vmem>>, %arg5: memref<1x16xf32, #tpu.memory_space<vmem>>, %arg6: memref<1x16xf32, #tpu.memory_space<vmem>>, %arg7: memref<1x16xf32, #tpu.memory_space<vmem>>, %arg8: memref<1x256x16xf32, #tpu.memory_space<vmem>>, %arg9: memref<1035x8xf32, #tpu.memory_space<vmem>>, %arg10: memref<1x16xf32, #tpu.memory_space<vmem>>, %arg11: memref<1x16xf32, #tpu.memory_space<vmem>>) attributes {dimension_semantics = [#tpu.dimension_semantics<arbitrary>, #tpu.dimension_semantics<arbitrary>, #tpu.dimension_semantics<arbitrary>], iteration_bounds = array<i64: 2, 4, 2>, scalar_prefetch = 0 : i64, scratch_operands = 3 : i64, tpu.core_type = #tpu.core_type<tc>, window_params = [{transform_indices = @transform_0, window_bounds = array<i64: 1, 1024, 8>}, {pipeline_mode = #tpu.pipeline_mode<synchronous>, transform_indices = @transform_1, window_bounds = array<i64: 56, 16>}, {pipeline_mode = #tpu.pipeline_mode<synchronous>, transform_indices = @transform_2, window_bounds = array<i64: 1, 16>}, {pipeline_mode = #tpu.pipeline_mode<synchronous>, transform_indices = @transform_3, window_bounds = array<i64: 1, 16>}, {pipeline_mode = #tpu.pipeline_mode<synchronous>, transform_indices = @transform_4, window_bounds = array<i64: 1, 16>}, {transform_indices = @transform_5, window_bounds = array<i64: 1, 256, 16>}]} {
    %c0_i32 = arith.constant 0 : i32
    %0 = arith.cmpi eq, %arg0, %c0_i32 : i32
    %c0_i32_0 = arith.constant 0 : i32
    %1 = arith.cmpi eq, %arg1, %c0_i32_0 : i32
    %2 = arith.andi %0, %1 : i1
    %c0_i32_1 = arith.constant 0 : i32
    %3 = arith.cmpi eq, %arg2, %c0_i32_1 : i32
    %4 = arith.andi %2, %3 : i1
    %5 = arith.extui %4 : i1 to i32
    %c0_i32_2 = arith.constant 0 : i32
    %6 = arith.cmpi ne, %5, %c0_i32_2 : i32
    scf.if %6 {
      %cst_27 = arith.constant 0.000000e+00 : f32
      %52 = vector.broadcast %cst_27 : f32 to vector<1x16xf32>
      %c0_28 = arith.constant 0 : index
      %c0_29 = arith.constant 0 : index
      %53 = vector.load %arg10[%c0_28, %c0_29] : memref<1x16xf32, #tpu.memory_space<vmem>>, vector<1x16xf32>
      tpu.vector_store %arg10[%c0_28, %c0_29], %52 {strides = array<i32>} : memref<1x16xf32, #tpu.memory_space<vmem>>, vector<1x16xf32>,
      %cst_30 = arith.constant 0.000000e+00 : f32
      %54 = vector.broadcast %cst_30 : f32 to vector<1x16xf32>
      %c0_31 = arith.constant 0 : index
      %c0_32 = arith.constant 0 : index
      %55 = vector.load %arg11[%c0_31, %c0_32] : memref<1x16xf32, #tpu.memory_space<vmem>>, vector<1x16xf32>
      tpu.vector_store %arg11[%c0_31, %c0_32], %54 {strides = array<i32>} : memref<1x16xf32, #tpu.memory_space<vmem>>, vector<1x16xf32>,
    } else {
    }
    %c0_i32_3 = arith.constant 0 : i32
    %7 = arith.cmpi eq, %arg2, %c0_i32_3 : i32
    %8 = arith.extui %7 : i1 to i32
    %c0_i32_4 = arith.constant 0 : i32
    %9 = arith.cmpi ne, %8, %c0_i32_4 : i32
    scf.if %9 {
      %cst_27 = arith.constant 0.000000e+00 : f32
      %52 = vector.broadcast %cst_27 : f32 to vector<1035x8xf32>
      %c0_28 = arith.constant 0 : index
      %c0_29 = arith.constant 0 : index
      %53 = vector.load %arg9[%c0_28, %c0_29] : memref<1035x8xf32, #tpu.memory_space<vmem>>, vector<1035x8xf32>
      tpu.vector_store %arg9[%c0_28, %c0_29], %52 {strides = array<i32>} : memref<1035x8xf32, #tpu.memory_space<vmem>>, vector<1035x8xf32>,
      %c0_30 = arith.constant 0 : index
      %c0_31 = arith.constant 0 : index
      %c0_32 = arith.constant 0 : index
      %54 = vector.load %arg3[%c0_30, %c0_31, %c0_32] : memref<1x1024x8xf32, #tpu.memory_space<vmem>>, vector<1x1024x8xf32>
      %55 = vector.shape_cast %54 : vector<1x1024x8xf32> to vector<1024x8xf32>
      %c8 = arith.constant 8 : index
      %c0_33 = arith.constant 0 : index
      %56 = vector.load %arg9[%c8, %c0_33] : memref<1035x8xf32, #tpu.memory_space<vmem>>, vector<1024x8xf32>
      tpu.vector_store %arg9[%c8, %c0_33], %55 {strides = array<i32>} : memref<1035x8xf32, #tpu.memory_space<vmem>>, vector<1024x8xf32>,
    } else {
    }
    %c512_i32 = arith.constant 512 : i32
    %10 = arith.muli %arg2, %c512_i32 : i32
    %11 = tpu.assume_multiple %10, 512 : i32
    %c5_i32 = arith.constant 5 : i32
    %12 = arith.addi %c5_i32, %11 : i32
    %c0_i32_5 = arith.constant 0 : i32
    %13 = arith.addi %12, %c0_i32_5 : i32
    %14 = arith.index_cast %13 : i32 to index
    %c0 = arith.constant 0 : index
    %15 = vector.load %arg9[%14, %c0] : memref<1035x8xf32, #tpu.memory_space<vmem>>, vector<512x8xf32>
    %c5_i32_6 = arith.constant 5 : i32
    %16 = arith.addi %c5_i32_6, %11 : i32
    %c1_i32 = arith.constant 1 : i32
    %17 = arith.addi %16, %c1_i32 : i32
    %18 = arith.index_cast %17 : i32 to index
    %c0_7 = arith.constant 0 : index
    %19 = vector.load %arg9[%18, %c0_7] : memref<1035x8xf32, #tpu.memory_space<vmem>>, vector<512x8xf32>
    %c5_i32_8 = arith.constant 5 : i32
    %20 = arith.addi %c5_i32_8, %11 : i32
    %c2_i32 = arith.constant 2 : i32
    %21 = arith.addi %20, %c2_i32 : i32
    %22 = arith.index_cast %21 : i32 to index
    %c0_9 = arith.constant 0 : index
    %23 = vector.load %arg9[%22, %c0_9] : memref<1035x8xf32, #tpu.memory_space<vmem>>, vector<512x8xf32>
    %c5_i32_10 = arith.constant 5 : i32
    %24 = arith.addi %c5_i32_10, %11 : i32
    %c3_i32 = arith.constant 3 : i32
    %25 = arith.addi %24, %c3_i32 : i32
    %26 = arith.index_cast %25 : i32 to index
    %c0_11 = arith.constant 0 : index
    %27 = vector.load %arg9[%26, %c0_11] : memref<1035x8xf32, #tpu.memory_space<vmem>>, vector<512x8xf32>
    %c5_i32_12 = arith.constant 5 : i32
    %28 = arith.addi %c5_i32_12, %11 : i32
    %c4_i32 = arith.constant 4 : i32
    %29 = arith.addi %28, %c4_i32 : i32
    %30 = arith.index_cast %29 : i32 to index
    %c0_13 = arith.constant 0 : index
    %31 = vector.load %arg9[%30, %c0_13] : memref<1035x8xf32, #tpu.memory_space<vmem>>, vector<512x8xf32>
    %c5_i32_14 = arith.constant 5 : i32
    %32 = arith.addi %c5_i32_14, %11 : i32
    %c5_i32_15 = arith.constant 5 : i32
    %33 = arith.addi %32, %c5_i32_15 : i32
    %34 = arith.index_cast %33 : i32 to index
    %c0_16 = arith.constant 0 : index
    %35 = vector.load %arg9[%34, %c0_16] : memref<1035x8xf32, #tpu.memory_space<vmem>>, vector<512x8xf32>
    %c5_i32_17 = arith.constant 5 : i32
    %36 = arith.addi %c5_i32_17, %11 : i32
    %c6_i32 = arith.constant 6 : i32
    %37 = arith.addi %36, %c6_i32 : i32
    %38 = arith.index_cast %37 : i32 to index
    %c0_18 = arith.constant 0 : index
    %39 = vector.load %arg9[%38, %c0_18] : memref<1035x8xf32, #tpu.memory_space<vmem>>, vector<512x8xf32>
    %40 = tpu.concatenate %15, %19, %23, %27, %31, %35, %39 in 1 : vector<512x8xf32>, vector<512x8xf32>, vector<512x8xf32>, vector<512x8xf32>, vector<512x8xf32>, vector<512x8xf32>, vector<512x8xf32> -> vector<512x56xf32>
    %c0_19 = arith.constant 0 : index
    %c0_20 = arith.constant 0 : index
    %41 = vector.load %arg4[%c0_19, %c0_20] : memref<56x16xf32, #tpu.memory_space<vmem>>, vector<56x16xf32>
    %cst = arith.constant dense<0.000000e+00> : vector<512x16xf32>
    %42 = tpu.matmul %40, %41, %cst {dimension_numbers = #tpu.dot_dimension_numbers<[1], [0], [0], [1], [0, 0, 1, 1], [], []>, precision = #tpu.contract_precision<fp32>} : vector<512x56xf32>, vector<56x16xf32>, vector<512x16xf32> -> vector<512x16xf32>
    %c0_21 = arith.constant 0 : index
    %c0_22 = arith.constant 0 : index
    %43 = vector.load %arg5[%c0_21, %c0_22] : memref<1x16xf32, #tpu.memory_space<vmem>>, vector<1x16xf32>
    %44 = vector.broadcast %43 : vector<1x16xf32> to vector<512x16xf32>
    %45 = arith.addf %42, %44 : vector<512x16xf32>
    %c0_i32_23 = arith.constant 0 : i32
    %46 = arith.cmpi eq, %arg0, %c0_i32_23 : i32
    %47 = arith.extui %46 : i1 to i32
    %c0_i32_24 = arith.constant 0 : i32
    %48 = arith.cmpi ne, %47, %c0_i32_24 : i32
    scf.if %48 {
      %c0_27 = arith.constant 0 : index
      %c0_28 = arith.constant 0 : index
      %52 = vector.load %arg10[%c0_27, %c0_28] : memref<1x16xf32, #tpu.memory_space<vmem>>, vector<1x16xf32>
      %cst_29 = arith.constant dense<0.000000e+00> : vector<16xf32>
      %53 = vector.multi_reduction <add>, %45, %cst_29 [0] : vector<512x16xf32> to vector<16xf32>
      %54 = vector.shape_cast %53 : vector<16xf32> to vector<1x16xf32>
      %55 = arith.addf %52, %54 : vector<1x16xf32>
      %c0_30 = arith.constant 0 : index
      %c0_31 = arith.constant 0 : index
      %56 = vector.load %arg10[%c0_30, %c0_31] : memref<1x16xf32, #tpu.memory_space<vmem>>, vector<1x16xf32>
      tpu.vector_store %arg10[%c0_30, %c0_31], %55 {strides = array<i32>} : memref<1x16xf32, #tpu.memory_space<vmem>>, vector<1x16xf32>,
      %c0_32 = arith.constant 0 : index
      %c0_33 = arith.constant 0 : index
      %57 = vector.load %arg11[%c0_32, %c0_33] : memref<1x16xf32, #tpu.memory_space<vmem>>, vector<1x16xf32>
      %58 = arith.mulf %45, %45 : vector<512x16xf32>
      %cst_34 = arith.constant dense<0.000000e+00> : vector<16xf32>
      %59 = vector.multi_reduction <add>, %58, %cst_34 [0] : vector<512x16xf32> to vector<16xf32>
      %60 = vector.shape_cast %59 : vector<16xf32> to vector<1x16xf32>
      %61 = arith.addf %57, %60 : vector<1x16xf32>
      %c0_35 = arith.constant 0 : index
      %c0_36 = arith.constant 0 : index
      %62 = vector.load %arg11[%c0_35, %c0_36] : memref<1x16xf32, #tpu.memory_space<vmem>>, vector<1x16xf32>
      tpu.vector_store %arg11[%c0_35, %c0_36], %61 {strides = array<i32>} : memref<1x16xf32, #tpu.memory_space<vmem>>, vector<1x16xf32>,
    } else {
    }
    %c1_i32_25 = arith.constant 1 : i32
    %49 = arith.cmpi eq, %arg0, %c1_i32_25 : i32
    %50 = arith.extui %49 : i1 to i32
    %c0_i32_26 = arith.constant 0 : i32
    %51 = arith.cmpi ne, %50, %c0_i32_26 : i32
    scf.if %51 {
      %c0_27 = arith.constant 0 : index
      %c0_28 = arith.constant 0 : index
      %52 = vector.load %arg10[%c0_27, %c0_28] : memref<1x16xf32, #tpu.memory_space<vmem>>, vector<1x16xf32>
      %cst_29 = arith.constant 2.44140625E-4 : f32
      %53 = vector.broadcast %cst_29 : f32 to vector<1x16xf32>
      %54 = arith.mulf %52, %53 : vector<1x16xf32>
      %c0_30 = arith.constant 0 : index
      %c0_31 = arith.constant 0 : index
      %55 = vector.load %arg11[%c0_30, %c0_31] : memref<1x16xf32, #tpu.memory_space<vmem>>, vector<1x16xf32>
      %cst_32 = arith.constant 2.44140625E-4 : f32
      %56 = vector.broadcast %cst_32 : f32 to vector<1x16xf32>
      %57 = arith.mulf %55, %56 : vector<1x16xf32>
      %58 = arith.mulf %54, %54 : vector<1x16xf32>
      %59 = arith.subf %57, %58 : vector<1x16xf32>
      %c0_33 = arith.constant 0 : index
      %c0_34 = arith.constant 0 : index
      %60 = vector.load %arg6[%c0_33, %c0_34] : memref<1x16xf32, #tpu.memory_space<vmem>>, vector<1x16xf32>
      %cst_35 = arith.constant 9.99999974E-6 : f32
      %61 = vector.broadcast %cst_35 : f32 to vector<1x16xf32>
      %62 = arith.addf %59, %61 : vector<1x16xf32>
      %63 = math.rsqrt %62 : vector<1x16xf32>
      %64 = arith.mulf %60, %63 : vector<1x16xf32>
      %c0_36 = arith.constant 0 : index
      %c0_37 = arith.constant 0 : index
      %65 = vector.load %arg7[%c0_36, %c0_37] : memref<1x16xf32, #tpu.memory_space<vmem>>, vector<1x16xf32>
      %66 = arith.mulf %54, %64 : vector<1x16xf32>
      %67 = arith.subf %65, %66 : vector<1x16xf32>
      %68 = vector.broadcast %64 : vector<1x16xf32> to vector<512x16xf32>
      %69 = arith.mulf %45, %68 : vector<512x16xf32>
      %70 = vector.broadcast %67 : vector<1x16xf32> to vector<512x16xf32>
      %71 = arith.addf %69, %70 : vector<512x16xf32>
      %cst_38 = arith.constant 0.000000e+00 : f32
      %72 = vector.broadcast %cst_38 : f32 to vector<512x16xf32>
      %73 = arith.maximumf %71, %72 : vector<512x16xf32>
      %74 = vector.shape_cast %73 : vector<512x16xf32> to vector<256x2x16xf32>
      %cst_39 = arith.constant dense<0xFF800000> : vector<256x16xf32>
      %75 = vector.multi_reduction <maximumf>, %74, %cst_39 [1] : vector<256x2x16xf32> to vector<256x16xf32>
      %c0_40 = arith.constant 0 : index
      %c0_41 = arith.constant 0 : index
      %c0_42 = arith.constant 0 : index
      %76 = vector.load %arg8[%c0_40, %c0_41, %c0_42] : memref<1x256x16xf32, #tpu.memory_space<vmem>>, vector<1x256x16xf32>
      %77 = vector.shape_cast %76 : vector<1x256x16xf32> to vector<256x16xf32>
      %78 = vector.shape_cast %75 : vector<256x16xf32> to vector<1x256x16xf32>
      tpu.vector_store %arg8[%c0_40, %c0_41, %c0_42], %78 {strides = array<i32>} : memref<1x256x16xf32, #tpu.memory_space<vmem>>, vector<1x256x16xf32>,
    } else {
    }
    return
  }
  func.func @transform_0(%arg0: i32, %arg1: i32, %arg2: i32) -> (i32, i32, i32) {
    %c0_i32 = arith.constant 0 : i32
    %c0_i32_0 = arith.constant 0 : i32
    %c0_i32_1 = arith.constant 0 : i32
    return %arg1, %c0_i32, %c0_i32_0 : i32, i32, i32
  }
  func.func @transform_1(%arg0: i32, %arg1: i32, %arg2: i32) -> (i32, i32) {
    %c0_i32 = arith.constant 0 : i32
    %c0_i32_0 = arith.constant 0 : i32
    %c0_i32_1 = arith.constant 0 : i32
    return %c0_i32, %c0_i32_0 : i32, i32
  }
  func.func @transform_2(%arg0: i32, %arg1: i32, %arg2: i32) -> (i32, i32) {
    %c0_i32 = arith.constant 0 : i32
    %c0_i32_0 = arith.constant 0 : i32
    %c0_i32_1 = arith.constant 0 : i32
    return %c0_i32, %c0_i32_0 : i32, i32
  }
  func.func @transform_3(%arg0: i32, %arg1: i32, %arg2: i32) -> (i32, i32) {
    %c0_i32 = arith.constant 0 : i32
    %c0_i32_0 = arith.constant 0 : i32
    %c0_i32_1 = arith.constant 0 : i32
    return %c0_i32, %c0_i32_0 : i32, i32
  }
  func.func @transform_4(%arg0: i32, %arg1: i32, %arg2: i32) -> (i32, i32) {
    %c0_i32 = arith.constant 0 : i32
    %c0_i32_0 = arith.constant 0 : i32
    %c0_i32_1 = arith.constant 0 : i32
    return %c0_i32, %c0_i32_0 : i32, i32
  }
  func.func @transform_5(%arg0: i32, %arg1: i32, %arg2: i32) -> (i32, i32, i32) {
    %c0_i32 = arith.constant 0 : i32
    %c0_i32_0 = arith.constant 0 : i32
    return %arg1, %arg2, %c0_i32 : i32, i32, i32
  }
}

</mosaic_0001>

<bundles_post_ra>
// kernel: tpu_custom_call.1
= control target key start
LH: loop header
LB: loop body
LE: loop exit
PB: predicated region body
PF: predicated region fallthrough
CT: control target
= control target key end

     0   :  { %s13094_s18 = smov 0   ;;  %s13096_s19 = smov 0   ;;  %s20089_s0 = inlined_call_operand.vmem [shape: f32[4,1024,8], index: 0, kind: input, shape index: {}]   ;;  %s20090_s1 = inlined_call_operand.vmem [shape: f32[56,16], index: 1, kind: input, shape index: {}]   ;;  %s20091_s2 = inlined_call_operand.vmem [shape: f32[1,16], index: 2, kind: input, shape index: {}]   ;;  %s20092_s3 = inlined_call_operand.vmem [shape: f32[1,16], index: 3, kind: input, shape index: {}]   ;;  %s20093_s4 = inlined_call_operand.vmem [shape: f32[1,16], index: 4, kind: input, shape index: {}]   ;;  %s20094_s5 = inlined_call_operand.vmem [shape: f32[4,512,16], index: 5, kind: output, shape index: {}]  }
   0x1   :  { %s13098_s20 = smov 0   ;;  %s13100_s21 = smov 0  }
   0x2   :  { %s13102_s22 = smov 0   ;;  %s13104_s23 = smov 0  }
   0x3   :  { %s13106_s24 = smov 0  }
   0x4 LB: > { %s27_s25 = sadd.s32 1, %s13041_s21  ;;  %s30_s26 = sadd.s32 1, %s13045_s22  ;;  %s13053_s24 = sphi %s13106_s24, %s15_s24   ;;  %s13049_s23 = sphi %s13104_s23, %s21597_s23   ;;  %s13045_s22 = sphi %s13102_s22, %s21596_s22   ;;  %s13041_s21 = sphi %s13100_s21, %s21595_s21   ;;  %s13037_s20 = sphi %s13098_s20, %s21594_s20   ;;  %s13033_s19 = sphi %s13096_s19, %s21593_s19   ;;  %s13029_s18 = sphi %s13094_s18, %s21592_s18  }
   0x5   : > { %p28_p0 = scmp.ge.s32.totalorder %s27_s25, 2  ;;  %p10915_p1 = scmp.ge.s32.totalorder %s13053_s24, 1 }
   0x6   : > { %p208_p2 = scmp.lt.s32.totalorder %s13053_s24, 17  ;;  %s34_s27 = sadd.s32 1, %s13049_s23 }
   0x7   : > { %s21599_s25 = smov (%p28_p0, %s27_s25), 0  ;;  %s21601_s26 = smov (!%p28_p0, %s30_s26), %s13045_s22 }
   0x8   : > { %p209_p3 = pnand %p10915_p1, %p208_p2  ;;  %p32_p4 = scmp.ge.s32.totalorder %s21601_s26, 4 }
   0xa   : > { %s21603_s26 = smov (%p32_p4, %s21601_s26), 0  ;;  %s21605_s27 = smov (!%p32_p4, %s34_s27), %s13049_s23 }
   0xb   : > { %p36_p5 = scmp.ge.s32.totalorder %s21605_s27, 2  ;;  %212 = sbr.rel (%p209_p3) target bundleno = 2411 (0x96b), region = 40 }
   0xd   : > { %s21607_s27 = smov (%p36_p5, %s21605_s27), 0 }
  0x12   : > { %p240_p6 = scmp.lt.s32.totalorder %s13033_s19, 3  ;;  %s10918_s28 = sshll.u32 %s13029_s18, 5 }
  0x13   : > { %p248_p7 = scmp.lt.s32.totalorder %s10918_s28, 63  ;;  %p255_p8 = scmp.eq.s32.totalorder %s13037_s20, 0 }
  0x14   : > { %s241_s29 = scalar_select %p240_p6, %s13033_s19, 3 }
  0x15   : > { %s21609_s28 = smov (!%p248_p7, %s10918_s28), 63  ;;  %p256_p9 = scmp.eq.s32.totalorder %s13033_s19, 0 }
  0x16   : > { %s11382_s30 = sshll.u32 %s241_s29, 10  ;;  %s10919_s6 = sshll.u32 %s241_s29, 6 }
  0x17   : > { %s13149_s9 = scalar_lea.vmem %s20089_s0, %s11382_s30  ;;  %s251_s10 = sadd.s32 %s10919_s6, %s21609_s28 }
  0x18   : > { %s10920_s11 = sshll.u32 %s251_s10, 3  ;;  %p257_p10 = pnand %p256_p9, %p255_p8 }
  0x19   : > { %s13155_s14 = scalar_lea.vmem %s20094_s5, %s10920_s11  ;;  %p259_p11 = scmp.eq.s32.totalorder %s13029_s18, 0 }
  0x1a   : > { %p258_p12 = pneg %p257_p10 }
  0x1c   : > { %p260_p13 = pnand %p259_p11, %p258_p12 }
  0x1d   : > { %vm264_vm0 = vcmask (!%p260_p13), 122880   ;;  %v13055_v0 = vmov (!%p260_p13), 0.0  }
  0x1e   : > { %263 = sbr.rel (%p260_p13) target bundleno = 37 (0x25), region = 44  ;;  %265 = vst.msk [vmem:[#allocation3] sm:$0x1] (!%p260_p13), %vm264_vm0, %v13055_v0  ;;  %266 = vst.msk [vmem:[#allocation4] sm:$0x1] (!%p260_p13), %vm264_vm0, %v13055_v0 }
  0x25 PF: > { %p10921_p0 = scmp.ne.s32.totalorder %s13029_s18, 0 }
  0x26   : > { %vm270_vm1 = vcmask (!%p10921_p0), 64512   ;;  %vm400_vm2 = vcmask (!%p10921_p0), 59392   ;;  %v13160_v1 = vld [vmem:[%s13149_s9] sm:$0xff] (!%p10921_p0)  ;;  %v13163_v2 = vld [vmem:[%s13149_s9 + $0x8] sm:$0xff] (!%p10921_p0)  ;;  %v13166_v3 = vld [vmem:[%s13149_s9 + $0x10] sm:$0xff] (!%p10921_p0)  ;;  %v13056_v4 = vmov (!%p10921_p0), 0.0  }
  0x27   : > { %269 = sbr.rel (%p10921_p0) target bundleno = 169 (0xa9), region = 48  ;;  %272 = vst.msk [vmem:[#allocation2 + $0x8] sm:$0xff] (!%p10921_p0), %vm270_vm1, %v13056_v4  ;;  %271 = vst.msk [vmem:[#allocation2] sm:$0xff] (!%p10921_p0), %vm270_vm1, %v13056_v4  ;;  %v405_v5 = vld [vmem:[%s13149_s9 + $0x18] sm:$0xff] (!%p10921_p0)  ;;  %v406_v6 = vld [vmem:[%s13149_s9 + $0x20] sm:$0xff] (!%p10921_p0) }
  0x28   : > { %273 = vst.msk [vmem:[#allocation2 + $0x10] sm:$0xff] (!%p10921_p0), %vm270_vm1, %v13056_v4  ;;  %274 = vst.msk [vmem:[#allocation2 + $0x18] sm:$0xff] (!%p10921_p0), %vm270_vm1, %v13056_v4  ;;  %v407_v7 = vld [vmem:[%s13149_s9 + $0x28] sm:$0xff] (!%p10921_p0)  ;;  %v408_v8 = vld [vmem:[%s13149_s9 + $0x30] sm:$0xff] (!%p10921_p0) }
  0x29   : > { %275 = vst.msk [vmem:[#allocation2 + $0x20] sm:$0xff] (!%p10921_p0), %vm270_vm1, %v13056_v4  ;;  %276 = vst.msk [vmem:[#allocation2 + $0x28] sm:$0xff] (!%p10921_p0), %vm270_vm1, %v13056_v4  ;;  %v409_v9 = vld [vmem:[%s13149_s9 + $0x38] sm:$0xff] (!%p10921_p0)  ;;  %v410_v10 = vld [vmem:[%s13149_s9 + $0x40] sm:$0xff] (!%p10921_p0) }
  0x2a   : > { %277 = vst.msk [vmem:[#allocation2 + $0x30] sm:$0xff] (!%p10921_p0), %vm270_vm1, %v13056_v4  ;;  %278 = vst.msk [vmem:[#allocation2 + $0x38] sm:$0xff] (!%p10921_p0), %vm270_vm1, %v13056_v4  ;;  %v411_v11 = vld [vmem:[%s13149_s9 + $0x48] sm:$0xff] (!%p10921_p0)  ;;  %v412_v12 = vld [vmem:[%s13149_s9 + $0x50] sm:$0xff] (!%p10921_p0) }
  0x2b   : > { %279 = vst.msk [vmem:[#allocation2 + $0x40] sm:$0xff] (!%p10921_p0), %vm270_vm1, %v13056_v4  ;;  %280 = vst.msk [vmem:[#allocation2 + $0x48] sm:$0xff] (!%p10921_p0), %vm270_vm1, %v13056_v4  ;;  %v413_v13 = vld [vmem:[%s13149_s9 + $0x58] sm:$0xff] (!%p10921_p0)  ;;  %v414_v14 = vld [vmem:[%s13149_s9 + $0x60] sm:$0xff] (!%p10921_p0) }
  0x2c   : > { %281 = vst.msk [vmem:[#allocation2 + $0x50] sm:$0xff] (!%p10921_p0), %vm270_vm1, %v13056_v4  ;;  %282 = vst.msk [vmem:[#allocation2 + $0x58] sm:$0xff] (!%p10921_p0), %vm270_vm1, %v13056_v4  ;;  %v415_v15 = vld [vmem:[%s13149_s9 + $0x68] sm:$0xff] (!%p10921_p0)  ;;  %v416_v16 = vld [vmem:[%s13149_s9 + $0x70] sm:$0xff] (!%p10921_p0) }
  0x2d   : > { %283 = vst.msk [vmem:[#allocation2 + $0x60] sm:$0xff] (!%p10921_p0), %vm270_vm1, %v13056_v4  ;;  %284 = vst.msk [vmem:[#allocation2 + $0x68] sm:$0xff] (!%p10921_p0), %vm270_vm1, %v13056_v4  ;;  %v417_v17 = vld [vmem:[%s13149_s9 + $0x78] sm:$0xff] (!%p10921_p0)  ;;  %v418_v18 = vld [vmem:[%s13149_s9 + $0x80] sm:$0xff] (!%p10921_p0) }
  0x2e   : > { %285 = vst.msk [vmem:[#allocation2 + $0x70] sm:$0xff] %vm270_vm1, %v13056_v4  ;;  %286 = vst.msk [vmem:[#allocation2 + $0x78] sm:$0xff] %vm270_vm1, %v13056_v4  ;;  %v419_v19 = vld [vmem:[%s13149_s9 + $0x88] sm:$0xff]  ;;  %v420_v20 = vld [vmem:[%s13149_s9 + $0x90] sm:$0xff] }
  0x2f   : > { %287 = vst.msk [vmem:[#allocation2 + $0x80] sm:$0xff] %vm270_vm1, %v13056_v4  ;;  %288 = vst.msk [vmem:[#allocation2 + $0x88] sm:$0xff] %vm270_vm1, %v13056_v4  ;;  %v421_v21 = vld [vmem:[%s13149_s9 + $0x98] sm:$0xff]  ;;  %v422_v22 = vld [vmem:[%s13149_s9 + $0xa0] sm:$0xff] }
  0x30   : > { %289 = vst.msk [vmem:[#allocation2 + $0x90] sm:$0xff] %vm270_vm1, %v13056_v4  ;;  %290 = vst.msk [vmem:[#allocation2 + $0x98] sm:$0xff] %vm270_vm1, %v13056_v4  ;;  %v423_v23 = vld [vmem:[%s13149_s9 + $0xa8] sm:$0xff]  ;;  %v424_v24 = vld [vmem:[%s13149_s9 + $0xb0] sm:$0xff] }
  0x31   : > { %291 = vst.msk [vmem:[#allocation2 + $0xa0] sm:$0xff] %vm270_vm1, %v13056_v4  ;;  %292 = vst.msk [vmem:[#allocation2 + $0xa8] sm:$0xff] %vm270_vm1, %v13056_v4  ;;  %v425_v25 = vld [vmem:[%s13149_s9 + $0xb8] sm:$0xff]  ;;  %v426_v26 = vld [vmem:[%s13149_s9 + $0xc0] sm:$0xff] }
  0x32   : > { %293 = vst.msk [vmem:[#allocation2 + $0xb0] sm:$0xff] %vm270_vm1, %v13056_v4  ;;  %294 = vst.msk [vmem:[#allocation2 + $0xb8] sm:$0xff] %vm270_vm1, %v13056_v4  ;;  %v427_v27 = vld [vmem:[%s13149_s9 + $0xc8] sm:$0xff]  ;;  %v428_v28 = vld [vmem:[%s13149_s9 + $0xd0] sm:$0xff] }
  0x33   : > { %295 = vst.msk [vmem:[#allocation2 + $0xc0] sm:$0xff] %vm270_vm1, %v13056_v4  ;;  %296 = vst.msk [vmem:[#allocation2 + $0xc8] sm:$0xff] %vm270_vm1, %v13056_v4  ;;  %v429_v29 = vld [vmem:[%s13149_s9 + $0xd8] sm:$0xff]  ;;  %v430_v30 = vld [vmem:[%s13149_s9 + $0xe0] sm:$0xff] }
  0x34   : > { %297 = vst.msk [vmem:[#allocation2 + $0xd0] sm:$0xff] %vm270_vm1, %v13056_v4  ;;  %298 = vst.msk [vmem:[#allocation2 + $0xd8] sm:$0xff] %vm270_vm1, %v13056_v4  ;;  %v431_v31 = vld [vmem:[%s13149_s9 + $0xe8] sm:$0xff]  ;;  %v432_v32 = vld [vmem:[%s13149_s9 + $0xf0] sm:$0xff] }
  0x35   : > { %299 = vst.msk [vmem:[#allocation2 + $0xe0] sm:$0xff] %vm270_vm1, %v13056_v4  ;;  %300 = vst.msk [vmem:[#allocation2 + $0xe8] sm:$0xff] %vm270_vm1, %v13056_v4  ;;  %v433_v33 = vld [vmem:[%s13149_s9 + $0xf8] sm:$0xff]  ;;  %v434_v34 = vld [vmem:[%s13149_s9 + $0x100] sm:$0xff] }
  0x36   : > { %301 = vst.msk [vmem:[#allocation2 + $0xf0] sm:$0xff] %vm270_vm1, %v13056_v4  ;;  %302 = vst.msk [vmem:[#allocation2 + $0xf8] sm:$0xff] %vm270_vm1, %v13056_v4  ;;  %v435_v35 = vld [vmem:[%s13149_s9 + $0x108] sm:$0xff]  ;;  %v436_v36 = vld [vmem:[%s13149_s9 + $0x110] sm:$0xff] }
  0x37   : > { %303 = vst.msk [vmem:[#allocation2 + $0x100] sm:$0xff] %vm270_vm1, %v13056_v4  ;;  %304 = vst.msk [vmem:[#allocation2 + $0x108] sm:$0xff] %vm270_vm1, %v13056_v4  ;;  %v437_v37 = vld [vmem:[%s13149_s9 + $0x118] sm:$0xff]  ;;  %v438_v38 = vld [vmem:[%s13149_s9 + $0x120] sm:$0xff] }
  0x38   : > { %305 = vst.msk [vmem:[#allocation2 + $0x110] sm:$0xff] %vm270_vm1, %v13056_v4  ;;  %306 = vst.msk [vmem:[#allocation2 + $0x118] sm:$0xff] %vm270_vm1, %v13056_v4  ;;  %v439_v39 = vld [vmem:[%s13149_s9 + $0x128] sm:$0xff]  ;;  %v440_v40 = vld [vmem:[%s13149_s9 + $0x130] sm:$0xff] }
  0x39   : > { %307 = vst.msk [vmem:[#allocation2 + $0x120] sm:$0xff] %vm270_vm1, %v13056_v4  ;;  %308 = vst.msk [vmem:[#allocation2 + $0x128] sm:$0xff] %vm270_vm1, %v13056_v4  ;;  %v441_v41 = vld [vmem:[%s13149_s9 + $0x138] sm:$0xff]  ;;  %v442_v42 = vld [vmem:[%s13149_s9 + $0x140] sm:$0xff] }
  0x3a   : > { %309 = vst.msk [vmem:[#allocation2 + $0x130] sm:$0xff] %vm270_vm1, %v13056_v4  ;;  %310 = vst.msk [vmem:[#allocation2 + $0x138] sm:$0xff] %vm270_vm1, %v13056_v4  ;;  %v443_v43 = vld [vmem:[%s13149_s9 + $0x148] sm:$0xff]  ;;  %v444_v44 = vld [vmem:[%s13149_s9 + $0x150] sm:$0xff] }
  0x3b   : > { %311 = vst.msk [vmem:[#allocation2 + $0x140] sm:$0xff] %vm270_vm1, %v13056_v4  ;;  %312 = vst.msk [vmem:[#allocation2 + $0x148] sm:$0xff] %vm270_vm1, %v13056_v4  ;;  %v445_v45 = vld [vmem:[%s13149_s9 + $0x158] sm:$0xff]  ;;  %v446_v46 = vld [vmem:[%s13149_s9 + $0x160] sm:$0xff] }
  0x3c   : > { %313 = vst.msk [vmem:[#allocation2 + $0x150] sm:$0xff] %vm270_vm1, %v13056_v4  ;;  %314 = vst.msk [vmem:[#allocation2 + $0x158] sm:$0xff] %vm270_vm1, %v13056_v4  ;;  %v447_v47 = vld [vmem:[%s13149_s9 + $0x168] sm:$0xff]  ;;  %v448_v48 = vld [vmem:[%s13149_s9 + $0x170] sm:$0xff] }
  0x3d   : > { %315 = vst.msk [vmem:[#allocation2 + $0x160] sm:$0xff] %vm270_vm1, %v13056_v4  ;;  %316 = vst.msk [vmem:[#allocation2 + $0x168] sm:$0xff] %vm270_vm1, %v13056_v4  ;;  %v449_v49 = vld [vmem:[%s13149_s9 + $0x178] sm:$0xff]  ;;  %v450_v50 = vld [vmem:[%s13149_s9 + $0x180] sm:$0xff] }
  0x3e   : > { %317 = vst.msk [vmem:[#allocation2 + $0x170] sm:$0xff] %vm270_vm1, %v13056_v4  ;;  %318 = vst.msk [vmem:[#allocation2 + $0x178] sm:$0xff] %vm270_vm1, %v13056_v4  ;;  %v451_v51 = vld [vmem:[%s13149_s9 + $0x188] sm:$0xff]  ;;  %v452_v52 = vld [vmem:[%s13149_s9 + $0x190] sm:$0xff] }
  0x3f   : > { %319 = vst.msk [vmem:[#allocation2 + $0x180] sm:$0xff] %vm270_vm1, %v13056_v4  ;;  %320 = vst.msk [vmem:[#allocation2 + $0x188] sm:$0xff] %vm270_vm1, %v13056_v4  ;;  %v453_v53 = vld [vmem:[%s13149_s9 + $0x198] sm:$0xff]  ;;  %v454_v54 = vld [vmem:[%s13149_s9 + $0x1a0] sm:$0xff] }
  0x40   : > { %321 = vst.msk [vmem:[#allocation2 + $0x190] sm:$0xff] %vm270_vm1, %v13056_v4  ;;  %322 = vst.msk [vmem:[#allocation2 + $0x198] sm:$0xff] %vm270_vm1, %v13056_v4  ;;  %v455_v55 = vld [vmem:[%s13149_s9 + $0x1a8] sm:$0xff]  ;;  %v456_v56 = vld [vmem:[%s13149_s9 + $0x1b0] sm:$0xff] }
  0x41   : > { %323 = vst.msk [vmem:[#allocation2 + $0x1a0] sm:$0xff] %vm270_vm1, %v13056_v4  ;;  %324 = vst.msk [vmem:[#allocation2 + $0x1a8] sm:$0xff] %vm270_vm1, %v13056_v4  ;;  %v457_v57 = vld [vmem:[%s13149_s9 + $0x1b8] sm:$0xff]  ;;  %v458_v58 = vld [vmem:[%s13149_s9 + $0x1c0] sm:$0xff] }
  0x42   : > { %325 = vst.msk [vmem:[#allocation2 + $0x1b0] sm:$0xff] %vm270_vm1, %v13056_v4  ;;  %326 = vst.msk [vmem:[#allocation2 + $0x1b8] sm:$0xff] %vm270_vm1, %v13056_v4  ;;  %v459_v59 = vld [vmem:[%s13149_s9 + $0x1c8] sm:$0xff]  ;;  %v460_v60 = vld [vmem:[%s13149_s9 + $0x1d0] sm:$0xff] }
  0x43   : > { %327 = vst.msk [vmem:[#allocation2 + $0x1c0] sm:$0xff] %vm270_vm1, %v13056_v4  ;;  %328 = vst.msk [vmem:[#allocation2 + $0x1c8] sm:$0xff] %vm270_vm1, %v13056_v4  ;;  %v461_v61 = vld [vmem:[%s13149_s9 + $0x1d8] sm:$0xff]  ;;  %v462_v62 = vld [vmem:[%s13149_s9 + $0x1e0] sm:$0xff] }
  0x44   : > { %329 = vst.msk [vmem:[#allocation2 + $0x1d0] sm:$0xff] %vm270_vm1, %v13056_v4  ;;  %330 = vst.msk [vmem:[#allocation2 + $0x1d8] sm:$0xff] %vm270_vm1, %v13056_v4  ;;  %v463_v63 = vld [vmem:[%s13149_s9 + $0x1e8] sm:$0xff]  ;;  %v464_v0 = vld [vmem:[%s13149_s9 + $0x1f0] sm:$0xff] }
  0x45   : > { %331 = vst.msk [vmem:[#allocation2 + $0x1e0] sm:$0xff] %vm270_vm1, %v13056_v4  ;;  %332 = vst.msk [vmem:[#allocation2 + $0x1e8] sm:$0xff] %vm270_vm1, %v13056_v4 }
  0x46   : > { %333 = vst.msk [vmem:[#allocation2 + $0x1f0] sm:$0xff] %vm270_vm1, %v13056_v4  ;;  %334 = vst.msk [vmem:[#allocation2 + $0x1f8] sm:$0xff] %vm270_vm1, %v13056_v4 }
  0x47   : > { %335 = vst.msk [vmem:[#allocation2 + $0x200] sm:$0xff] %vm270_vm1, %v13056_v4  ;;  %336 = vst.msk [vmem:[#allocation2 + $0x208] sm:$0xff] %vm270_vm1, %v13056_v4 }
  0x48   : > { %337 = vst.msk [vmem:[#allocation2 + $0x210] sm:$0xff] %vm270_vm1, %v13056_v4  ;;  %338 = vst.msk [vmem:[#allocation2 + $0x218] sm:$0xff] %vm270_vm1, %v13056_v4 }
  0x49   : > { %339 = vst.msk [vmem:[#allocation2 + $0x220] sm:$0xff] %vm270_vm1, %v13056_v4  ;;  %340 = vst.msk [vmem:[#allocation2 + $0x228] sm:$0xff] %vm270_vm1, %v13056_v4 }
  0x4a   : > { %341 = vst.msk [vmem:[#allocation2 + $0x230] sm:$0xff] %vm270_vm1, %v13056_v4  ;;  %342 = vst.msk [vmem:[#allocation2 + $0x238] sm:$0xff] %vm270_vm1, %v13056_v4 }
  0x4b   : > { %343 = vst.msk [vmem:[#allocation2 + $0x240] sm:$0xff] %vm270_vm1, %v13056_v4  ;;  %344 = vst.msk [vmem:[#allocation2 + $0x248] sm:$0xff] %vm270_vm1, %v13056_v4 }
  0x4c   : > { %345 = vst.msk [vmem:[#allocation2 + $0x250] sm:$0xff] %vm270_vm1, %v13056_v4  ;;  %346 = vst.msk [vmem:[#allocation2 + $0x258] sm:$0xff] %vm270_vm1, %v13056_v4 }
  0x4d   : > { %347 = vst.msk [vmem:[#allocation2 + $0x260] sm:$0xff] %vm270_vm1, %v13056_v4  ;;  %348 = vst.msk [vmem:[#allocation2 + $0x268] sm:$0xff] %vm270_vm1, %v13056_v4 }
  0x4e   : > { %349 = vst.msk [vmem:[#allocation2 + $0x270] sm:$0xff] %vm270_vm1, %v13056_v4  ;;  %350 = vst.msk [vmem:[#allocation2 + $0x278] sm:$0xff] %vm270_vm1, %v13056_v4 }
  0x4f   : > { %351 = vst.msk [vmem:[#allocation2 + $0x280] sm:$0xff] %vm270_vm1, %v13056_v4  ;;  %352 = vst.msk [vmem:[#allocation2 + $0x288] sm:$0xff] %vm270_vm1, %v13056_v4 }
  0x50   : > { %353 = vst.msk [vmem:[#allocation2 + $0x290] sm:$0xff] %vm270_vm1, %v13056_v4  ;;  %354 = vst.msk [vmem:[#allocation2 + $0x298] sm:$0xff] %vm270_vm1, %v13056_v4 }
  0x51   : > { %355 = vst.msk [vmem:[#allocation2 + $0x2a0] sm:$0xff] %vm270_vm1, %v13056_v4  ;;  %356 = vst.msk [vmem:[#allocation2 + $0x2a8] sm:$0xff] %vm270_vm1, %v13056_v4 }
  0x52   : > { %357 = vst.msk [vmem:[#allocation2 + $0x2b0] sm:$0xff] %vm270_vm1, %v13056_v4  ;;  %358 = vst.msk [vmem:[#allocation2 + $0x2b8] sm:$0xff] %vm270_vm1, %v13056_v4 }
  0x53   : > { %359 = vst.msk [vmem:[#allocation2 + $0x2c0] sm:$0xff] %vm270_vm1, %v13056_v4  ;;  %360 = vst.msk [vmem:[#allocation2 + $0x2c8] sm:$0xff] %vm270_vm1, %v13056_v4 }
  0x54   : > { %361 = vst.msk [vmem:[#allocation2 + $0x2d0] sm:$0xff] %vm270_vm1, %v13056_v4  ;;  %362 = vst.msk [vmem:[#allocation2 + $0x2d8] sm:$0xff] %vm270_vm1, %v13056_v4 }
  0x55   : > { %363 = vst.msk [vmem:[#allocation2 + $0x2e0] sm:$0xff] %vm270_vm1, %v13056_v4  ;;  %364 = vst.msk [vmem:[#allocation2 + $0x2e8] sm:$0xff] %vm270_vm1, %v13056_v4 }
  0x56   : > { %365 = vst.msk [vmem:[#allocation2 + $0x2f0] sm:$0xff] %vm270_vm1, %v13056_v4  ;;  %366 = vst.msk [vmem:[#allocation2 + $0x2f8] sm:$0xff] %vm270_vm1, %v13056_v4 }
  0x57   : > { %367 = vst.msk [vmem:[#allocation2 + $0x300] sm:$0xff] %vm270_vm1, %v13056_v4  ;;  %368 = vst.msk [vmem:[#allocation2 + $0x308] sm:$0xff] %vm270_vm1, %v13056_v4 }
  0x58   : > { %369 = vst.msk [vmem:[#allocation2 + $0x310] sm:$0xff] %vm270_vm1, %v13056_v4  ;;  %370 = vst.msk [vmem:[#allocation2 + $0x318] sm:$0xff] %vm270_vm1, %v13056_v4 }
  0x59   : > { %371 = vst.msk [vmem:[#allocation2 + $0x320] sm:$0xff] %vm270_vm1, %v13056_v4  ;;  %372 = vst.msk [vmem:[#allocation2 + $0x328] sm:$0xff] %vm270_vm1, %v13056_v4 }
  0x5a   : > { %373 = vst.msk [vmem:[#allocation2 + $0x330] sm:$0xff] %vm270_vm1, %v13056_v4  ;;  %374 = vst.msk [vmem:[#allocation2 + $0x338] sm:$0xff] %vm270_vm1, %v13056_v4 }
  0x5b   : > { %375 = vst.msk [vmem:[#allocation2 + $0x340] sm:$0xff] %vm270_vm1, %v13056_v4  ;;  %376 = vst.msk [vmem:[#allocation2 + $0x348] sm:$0xff] %vm270_vm1, %v13056_v4 }
  0x5c   : > { %377 = vst.msk [vmem:[#allocation2 + $0x350] sm:$0xff] %vm270_vm1, %v13056_v4  ;;  %378 = vst.msk [vmem:[#allocation2 + $0x358] sm:$0xff] %vm270_vm1, %v13056_v4 }
  0x5d   : > { %379 = vst.msk [vmem:[#allocation2 + $0x360] sm:$0xff] %vm270_vm1, %v13056_v4  ;;  %380 = vst.msk [vmem:[#allocation2 + $0x368] sm:$0xff] %vm270_vm1, %v13056_v4 }
  0x5e   : > { %381 = vst.msk [vmem:[#allocation2 + $0x370] sm:$0xff] %vm270_vm1, %v13056_v4  ;;  %382 = vst.msk [vmem:[#allocation2 + $0x378] sm:$0xff] %vm270_vm1, %v13056_v4 }
  0x5f   : > { %383 = vst.msk [vmem:[#allocation2 + $0x380] sm:$0xff] %vm270_vm1, %v13056_v4  ;;  %384 = vst.msk [vmem:[#allocation2 + $0x388] sm:$0xff] %vm270_vm1, %v13056_v4 }
  0x60   : > { %385 = vst.msk [vmem:[#allocation2 + $0x390] sm:$0xff] %vm270_vm1, %v13056_v4  ;;  %386 = vst.msk [vmem:[#allocation2 + $0x398] sm:$0xff] %vm270_vm1, %v13056_v4 }
  0x61   : > { %387 = vst.msk [vmem:[#allocation2 + $0x3a0] sm:$0xff] %vm270_vm1, %v13056_v4  ;;  %388 = vst.msk [vmem:[#allocation2 + $0x3a8] sm:$0xff] %vm270_vm1, %v13056_v4 }
  0x62   : > { %389 = vst.msk [vmem:[#allocation2 + $0x3b0] sm:$0xff] %vm270_vm1, %v13056_v4  ;;  %390 = vst.msk [vmem:[#allocation2 + $0x3b8] sm:$0xff] %vm270_vm1, %v13056_v4 }
  0x63   : > { %391 = vst.msk [vmem:[#allocation2 + $0x3c0] sm:$0xff] %vm270_vm1, %v13056_v4  ;;  %392 = vst.msk [vmem:[#allocation2 + $0x3c8] sm:$0xff] %vm270_vm1, %v13056_v4 }
  0x64   : > { %393 = vst.msk [vmem:[#allocation2 + $0x3d0] sm:$0xff] %vm270_vm1, %v13056_v4  ;;  %394 = vst.msk [vmem:[#allocation2 + $0x3d8] sm:$0xff] %vm270_vm1, %v13056_v4 }
  0x65   : > { %395 = vst.msk [vmem:[#allocation2 + $0x3e0] sm:$0xff] %vm270_vm1, %v13056_v4  ;;  %396 = vst.msk [vmem:[#allocation2 + $0x3e8] sm:$0xff] %vm270_vm1, %v13056_v4 }
  0x66   : > { %397 = vst.msk [vmem:[#allocation2 + $0x3f0] sm:$0xff] %vm270_vm1, %v13056_v4  ;;  %398 = vst.msk [vmem:[#allocation2 + $0x3f8] sm:$0xff] %vm270_vm1, %v13056_v4 }
  0x67   : > { %399 = vst.msk [vmem:[#allocation2 + $0x400] sm:$0xff] %vm270_vm1, %v13056_v4  ;;  %530 = vst.msk [vmem:[#allocation2 + $0x8] sm:$0xff] %vm270_vm1, %v13160_v1  ;;  %v465_v1 = vld [vmem:[%s13149_s9 + $0x1f8] sm:$0xff] }
  0x68   : > { %401 = vst.msk [vmem:[#allocation2 + $0x408] sm:$0x7] %vm400_vm2, %v13056_v4  ;;  %v468_v4 = vld [vmem:[%s13149_s9 + $0x210] sm:$0xff] }
  0x69   : > { %531 = vst.msk [vmem:[#allocation2 + $0x10] sm:$0xff] %vm270_vm1, %v13163_v2  ;;  %532 = vst.msk [vmem:[#allocation2 + $0x18] sm:$0xff] %vm270_vm1, %v13166_v3  ;;  %v466_v2 = vld [vmem:[%s13149_s9 + $0x200] sm:$0xff]  ;;  %v467_v3 = vld [vmem:[%s13149_s9 + $0x208] sm:$0xff] }
  0x6a   : > { %533 = vst.msk [vmem:[#allocation2 + $0x20] sm:$0xff] %vm270_vm1, %v405_v5  ;;  %534 = vst.msk [vmem:[#allocation2 + $0x28] sm:$0xff] %vm270_vm1, %v406_v6  ;;  %v469_v5 = vld [vmem:[%s13149_s9 + $0x218] sm:$0xff]  ;;  %v470_v6 = vld [vmem:[%s13149_s9 + $0x220] sm:$0xff] }
  0x6b   : > { %535 = vst.msk [vmem:[#allocation2 + $0x30] sm:$0xff] %vm270_vm1, %v407_v7  ;;  %536 = vst.msk [vmem:[#allocation2 + $0x38] sm:$0xff] %vm270_vm1, %v408_v8  ;;  %v471_v7 = vld [vmem:[%s13149_s9 + $0x228] sm:$0xff]  ;;  %v472_v8 = vld [vmem:[%s13149_s9 + $0x230] sm:$0xff] }
  0x6c   : > { %537 = vst.msk [vmem:[#allocation2 + $0x40] sm:$0xff] %vm270_vm1, %v409_v9  ;;  %538 = vst.msk [vmem:[#allocation2 + $0x48] sm:$0xff] %vm270_vm1, %v410_v10  ;;  %v473_v9 = vld [vmem:[%s13149_s9 + $0x238] sm:$0xff]  ;;  %v474_v10 = vld [vmem:[%s13149_s9 + $0x240] sm:$0xff] }
  0x6d   : > { %539 = vst.msk [vmem:[#allocation2 + $0x50] sm:$0xff] %vm270_vm1, %v411_v11  ;;  %540 = vst.msk [vmem:[#allocation2 + $0x58] sm:$0xff] %vm270_vm1, %v412_v12  ;;  %v475_v11 = vld [vmem:[%s13149_s9 + $0x248] sm:$0xff]  ;;  %v476_v12 = vld [vmem:[%s13149_s9 + $0x250] sm:$0xff] }
  0x6e   : > { %541 = vst.msk [vmem:[#allocation2 + $0x60] sm:$0xff] %vm270_vm1, %v413_v13  ;;  %542 = vst.msk [vmem:[#allocation2 + $0x68] sm:$0xff] %vm270_vm1, %v414_v14  ;;  %v477_v13 = vld [vmem:[%s13149_s9 + $0x258] sm:$0xff]  ;;  %v478_v14 = vld [vmem:[%s13149_s9 + $0x260] sm:$0xff] }
  0x6f   : > { %543 = vst.msk [vmem:[#allocation2 + $0x70] sm:$0xff] %vm270_vm1, %v415_v15  ;;  %544 = vst.msk [vmem:[#allocation2 + $0x78] sm:$0xff] %vm270_vm1, %v416_v16  ;;  %v479_v15 = vld [vmem:[%s13149_s9 + $0x268] sm:$0xff]  ;;  %v480_v16 = vld [vmem:[%s13149_s9 + $0x270] sm:$0xff] }
  0x70   : > { %545 = vst.msk [vmem:[#allocation2 + $0x80] sm:$0xff] %vm270_vm1, %v417_v17  ;;  %546 = vst.msk [vmem:[#allocation2 + $0x88] sm:$0xff] %vm270_vm1, %v418_v18  ;;  %v481_v17 = vld [vmem:[%s13149_s9 + $0x278] sm:$0xff]  ;;  %v482_v18 = vld [vmem:[%s13149_s9 + $0x280] sm:$0xff] }
  0x71   : > { %547 = vst.msk [vmem:[#allocation2 + $0x90] sm:$0xff] %vm270_vm1, %v419_v19  ;;  %548 = vst.msk [vmem:[#allocation2 + $0x98] sm:$0xff] %vm270_vm1, %v420_v20  ;;  %v483_v19 = vld [vmem:[%s13149_s9 + $0x288] sm:$0xff]  ;;  %v484_v20 = vld [vmem:[%s13149_s9 + $0x290] sm:$0xff] }
  0x72   : > { %549 = vst.msk [vmem:[#allocation2 + $0xa0] sm:$0xff] %vm270_vm1, %v421_v21  ;;  %550 = vst.msk [vmem:[#allocation2 + $0xa8] sm:$0xff] %vm270_vm1, %v422_v22  ;;  %v485_v21 = vld [vmem:[%s13149_s9 + $0x298] sm:$0xff]  ;;  %v486_v22 = vld [vmem:[%s13149_s9 + $0x2a0] sm:$0xff] }
  0x73   : > { %551 = vst.msk [vmem:[#allocation2 + $0xb0] sm:$0xff] %vm270_vm1, %v423_v23  ;;  %552 = vst.msk [vmem:[#allocation2 + $0xb8] sm:$0xff] %vm270_vm1, %v424_v24  ;;  %v487_v23 = vld [vmem:[%s13149_s9 + $0x2a8] sm:$0xff]  ;;  %v488_v24 = vld [vmem:[%s13149_s9 + $0x2b0] sm:$0xff] }
  0x74   : > { %553 = vst.msk [vmem:[#allocation2 + $0xc0] sm:$0xff] %vm270_vm1, %v425_v25  ;;  %554 = vst.msk [vmem:[#allocation2 + $0xc8] sm:$0xff] %vm270_vm1, %v426_v26  ;;  %v489_v25 = vld [vmem:[%s13149_s9 + $0x2b8] sm:$0xff]  ;;  %v490_v26 = vld [vmem:[%s13149_s9 + $0x2c0] sm:$0xff] }
  0x75   : > { %555 = vst.msk [vmem:[#allocation2 + $0xd0] sm:$0xff] %vm270_vm1, %v427_v27  ;;  %556 = vst.msk [vmem:[#allocation2 + $0xd8] sm:$0xff] %vm270_vm1, %v428_v28  ;;  %v491_v27 = vld [vmem:[%s13149_s9 + $0x2c8] sm:$0xff]  ;;  %v492_v28 = vld [vmem:[%s13149_s9 + $0x2d0] sm:$0xff] }
  0x76   : > { %557 = vst.msk [vmem:[#allocation2 + $0xe0] sm:$0xff] %vm270_vm1, %v429_v29  ;;  %558 = vst.msk [vmem:[#allocation2 + $0xe8] sm:$0xff] %vm270_vm1, %v430_v30  ;;  %v493_v29 = vld [vmem:[%s13149_s9 + $0x2d8] sm:$0xff]  ;;  %v494_v30 = vld [vmem:[%s13149_s9 + $0x2e0] sm:$0xff] }
  0x77   : > { %559 = vst.msk [vmem:[#allocation2 + $0xf0] sm:$0xff] %vm270_vm1, %v431_v31  ;;  %560 = vst.msk [vmem:[#allocation2 + $0xf8] sm:$0xff] %vm270_vm1, %v432_v32  ;;  %v495_v31 = vld [vmem:[%s13149_s9 + $0x2e8] sm:$0xff]  ;;  %v496_v32 = vld [vmem:[%s13149_s9 + $0x2f0] sm:$0xff] }
  0x78   : > { %561 = vst.msk [vmem:[#allocation2 + $0x100] sm:$0xff] %vm270_vm1, %v433_v33  ;;  %562 = vst.msk [vmem:[#allocation2 + $0x108] sm:$0xff] %vm270_vm1, %v434_v34  ;;  %v497_v33 = vld [vmem:[%s13149_s9 + $0x2f8] sm:$0xff]  ;;  %v498_v34 = vld [vmem:[%s13149_s9 + $0x300] sm:$0xff] }
  0x79   : > { %563 = vst.msk [vmem:[#allocation2 + $0x110] sm:$0xff] %vm270_vm1, %v435_v35  ;;  %564 = vst.msk [vmem:[#allocation2 + $0x118] sm:$0xff] %vm270_vm1, %v436_v36  ;;  %v499_v35 = vld [vmem:[%s13149_s9 + $0x308] sm:$0xff]  ;;  %v500_v36 = vld [vmem:[%s13149_s9 + $0x310] sm:$0xff] }
  0x7a   : > { %565 = vst.msk [vmem:[#allocation2 + $0x120] sm:$0xff] %vm270_vm1, %v437_v37  ;;  %566 = vst.msk [vmem:[#allocation2 + $0x128] sm:$0xff] %vm270_vm1, %v438_v38  ;;  %v501_v37 = vld [vmem:[%s13149_s9 + $0x318] sm:$0xff]  ;;  %v502_v38 = vld [vmem:[%s13149_s9 + $0x320] sm:$0xff] }
  0x7b   : > { %567 = vst.msk [vmem:[#allocation2 + $0x130] sm:$0xff] %vm270_vm1, %v439_v39  ;;  %568 = vst.msk [vmem:[#allocation2 + $0x138] sm:$0xff] %vm270_vm1, %v440_v40  ;;  %v503_v39 = vld [vmem:[%s13149_s9 + $0x328] sm:$0xff]  ;;  %v504_v40 = vld [vmem:[%s13149_s9 + $0x330] sm:$0xff] }
  0x7c   : > { %569 = vst.msk [vmem:[#allocation2 + $0x140] sm:$0xff] %vm270_vm1, %v441_v41  ;;  %570 = vst.msk [vmem:[#allocation2 + $0x148] sm:$0xff] %vm270_vm1, %v442_v42  ;;  %v505_v41 = vld [vmem:[%s13149_s9 + $0x338] sm:$0xff]  ;;  %v506_v42 = vld [vmem:[%s13149_s9 + $0x340] sm:$0xff] }
  0x7d   : > { %571 = vst.msk [vmem:[#allocation2 + $0x150] sm:$0xff] %vm270_vm1, %v443_v43  ;;  %572 = vst.msk [vmem:[#allocation2 + $0x158] sm:$0xff] %vm270_vm1, %v444_v44  ;;  %v507_v43 = vld [vmem:[%s13149_s9 + $0x348] sm:$0xff]  ;;  %v508_v44 = vld [vmem:[%s13149_s9 + $0x350] sm:$0xff] }
  0x7e   : > { %573 = vst.msk [vmem:[#allocation2 + $0x160] sm:$0xff] %vm270_vm1, %v445_v45  ;;  %574 = vst.msk [vmem:[#allocation2 + $0x168] sm:$0xff] %vm270_vm1, %v446_v46  ;;  %v509_v45 = vld [vmem:[%s13149_s9 + $0x358] sm:$0xff]  ;;  %v510_v46 = vld [vmem:[%s13149_s9 + $0x360] sm:$0xff] }
  0x7f   : > { %575 = vst.msk [vmem:[#allocation2 + $0x170] sm:$0xff] %vm270_vm1, %v447_v47  ;;  %576 = vst.msk [vmem:[#allocation2 + $0x178] sm:$0xff] %vm270_vm1, %v448_v48  ;;  %v511_v47 = vld [vmem:[%s13149_s9 + $0x368] sm:$0xff]  ;;  %v512_v48 = vld [vmem:[%s13149_s9 + $0x370] sm:$0xff] }
  0x80   : > { %577 = vst.msk [vmem:[#allocation2 + $0x180] sm:$0xff] %vm270_vm1, %v449_v49  ;;  %578 = vst.msk [vmem:[#allocation2 + $0x188] sm:$0xff] %vm270_vm1, %v450_v50  ;;  %v513_v49 = vld [vmem:[%s13149_s9 + $0x378] sm:$0xff]  ;;  %v514_v50 = vld [vmem:[%s13149_s9 + $0x380] sm:$0xff] }
  0x81   : > { %579 = vst.msk [vmem:[#allocation2 + $0x190] sm:$0xff] %vm270_vm1, %v451_v51  ;;  %580 = vst.msk [vmem:[#allocation2 + $0x198] sm:$0xff] %vm270_vm1, %v452_v52  ;;  %v515_v51 = vld [vmem:[%s13149_s9 + $0x388] sm:$0xff]  ;;  %v516_v52 = vld [vmem:[%s13149_s9 + $0x390] sm:$0xff] }
  0x82   : > { %581 = vst.msk [vmem:[#allocation2 + $0x1a0] sm:$0xff] %vm270_vm1, %v453_v53  ;;  %582 = vst.msk [vmem:[#allocation2 + $0x1a8] sm:$0xff] %vm270_vm1, %v454_v54  ;;  %v517_v53 = vld [vmem:[%s13149_s9 + $0x398] sm:$0xff]  ;;  %v518_v54 = vld [vmem:[%s13149_s9 + $0x3a0] sm:$0xff] }
  0x83   : > { %583 = vst.msk [vmem:[#allocation2 + $0x1b0] sm:$0xff] %vm270_vm1, %v455_v55  ;;  %584 = vst.msk [vmem:[#allocation2 + $0x1b8] sm:$0xff] %vm270_vm1, %v456_v56  ;;  %v519_v55 = vld [vmem:[%s13149_s9 + $0x3a8] sm:$0xff]  ;;  %v520_v56 = vld [vmem:[%s13149_s9 + $0x3b0] sm:$0xff] }
  0x84   : > { %585 = vst.msk [vmem:[#allocation2 + $0x1c0] sm:$0xff] %vm270_vm1, %v457_v57  ;;  %586 = vst.msk [vmem:[#allocation2 + $0x1c8] sm:$0xff] %vm270_vm1, %v458_v58  ;;  %v521_v57 = vld [vmem:[%s13149_s9 + $0x3b8] sm:$0xff]  ;;  %v522_v58 = vld [vmem:[%s13149_s9 + $0x3c0] sm:$0xff] }
  0x85   : > { %587 = vst.msk [vmem:[#allocation2 + $0x1d0] sm:$0xff] %vm270_vm1, %v459_v59  ;;  %588 = vst.msk [vmem:[#allocation2 + $0x1d8] sm:$0xff] %vm270_vm1, %v460_v60  ;;  %v523_v59 = vld [vmem:[%s13149_s9 + $0x3c8] sm:$0xff]  ;;  %v524_v60 = vld [vmem:[%s13149_s9 + $0x3d0] sm:$0xff] }
  0x86   : > { %589 = vst.msk [vmem:[#allocation2 + $0x1e0] sm:$0xff] %vm270_vm1, %v461_v61  ;;  %590 = vst.msk [vmem:[#allocation2 + $0x1e8] sm:$0xff] %vm270_vm1, %v462_v62  ;;  %v525_v61 = vld [vmem:[%s13149_s9 + $0x3d8] sm:$0xff]  ;;  %v526_v62 = vld [vmem:[%s13149_s9 + $0x3e0] sm:$0xff] }
  0x87   : > { %591 = vst.msk [vmem:[#allocation2 + $0x1f0] sm:$0xff] %vm270_vm1, %v463_v63  ;;  %592 = vst.msk [vmem:[#allocation2 + $0x1f8] sm:$0xff] %vm270_vm1, %v464_v0  ;;  %v527_v63 = vld [vmem:[%s13149_s9 + $0x3e8] sm:$0xff]  ;;  %v528_v0 = vld [vmem:[%s13149_s9 + $0x3f0] sm:$0xff] }
  0x88   : > { %593 = vst.msk [vmem:[#allocation2 + $0x200] sm:$0xff] %vm270_vm1, %v465_v1  ;;  %594 = vst.msk [vmem:[#allocation2 + $0x208] sm:$0xff] %vm270_vm1, %v466_v2  ;;  %v529_v1 = vld [vmem:[%s13149_s9 + $0x3f8] sm:$0xff] }
  0x89   : > { %595 = vst.msk [vmem:[#allocation2 + $0x210] sm:$0xff] %vm270_vm1, %v467_v3  ;;  %596 = vst.msk [vmem:[#allocation2 + $0x218] sm:$0xff] %vm270_vm1, %v468_v4 }
  0x8a   : > { %597 = vst.msk [vmem:[#allocation2 + $0x220] sm:$0xff] %vm270_vm1, %v469_v5  ;;  %598 = vst.msk [vmem:[#allocation2 + $0x228] sm:$0xff] %vm270_vm1, %v470_v6 }
  0x8b   : > { %599 = vst.msk [vmem:[#allocation2 + $0x230] sm:$0xff] %vm270_vm1, %v471_v7  ;;  %600 = vst.msk [vmem:[#allocation2 + $0x238] sm:$0xff] %vm270_vm1, %v472_v8 }
  0x8c   : > { %601 = vst.msk [vmem:[#allocation2 + $0x240] sm:$0xff] %vm270_vm1, %v473_v9  ;;  %602 = vst.msk [vmem:[#allocation2 + $0x248] sm:$0xff] %vm270_vm1, %v474_v10 }
  0x8d   : > { %603 = vst.msk [vmem:[#allocation2 + $0x250] sm:$0xff] %vm270_vm1, %v475_v11  ;;  %604 = vst.msk [vmem:[#allocation2 + $0x258] sm:$0xff] %vm270_vm1, %v476_v12 }
  0x8e   : > { %605 = vst.msk [vmem:[#allocation2 + $0x260] sm:$0xff] %vm270_vm1, %v477_v13  ;;  %606 = vst.msk [vmem:[#allocation2 + $0x268] sm:$0xff] %vm270_vm1, %v478_v14 }
  0x8f   : > { %607 = vst.msk [vmem:[#allocation2 + $0x270] sm:$0xff] %vm270_vm1, %v479_v15  ;;  %608 = vst.msk [vmem:[#allocation2 + $0x278] sm:$0xff] %vm270_vm1, %v480_v16 }
  0x90   : > { %609 = vst.msk [vmem:[#allocation2 + $0x280] sm:$0xff] %vm270_vm1, %v481_v17  ;;  %610 = vst.msk [vmem:[#allocation2 + $0x288] sm:$0xff] %vm270_vm1, %v482_v18 }
  0x91   : > { %611 = vst.msk [vmem:[#allocation2 + $0x290] sm:$0xff] %vm270_vm1, %v483_v19  ;;  %612 = vst.msk [vmem:[#allocation2 + $0x298] sm:$0xff] %vm270_vm1, %v484_v20 }
  0x92   : > { %613 = vst.msk [vmem:[#allocation2 + $0x2a0] sm:$0xff] %vm270_vm1, %v485_v21  ;;  %614 = vst.msk [vmem:[#allocation2 + $0x2a8] sm:$0xff] %vm270_vm1, %v486_v22 }
  0x93   : > { %615 = vst.msk [vmem:[#allocation2 + $0x2b0] sm:$0xff] %vm270_vm1, %v487_v23  ;;  %616 = vst.msk [vmem:[#allocation2 + $0x2b8] sm:$0xff] %vm270_vm1, %v488_v24 }
  0x94   : > { %617 = vst.msk [vmem:[#allocation2 + $0x2c0] sm:$0xff] %vm270_vm1, %v489_v25  ;;  %618 = vst.msk [vmem:[#allocation2 + $0x2c8] sm:$0xff] %vm270_vm1, %v490_v26 }
  0x95   : > { %619 = vst.msk [vmem:[#allocation2 + $0x2d0] sm:$0xff] %vm270_vm1, %v491_v27  ;;  %620 = vst.msk [vmem:[#allocation2 + $0x2d8] sm:$0xff] %vm270_vm1, %v492_v28 }
  0x96   : > { %621 = vst.msk [vmem:[#allocation2 + $0x2e0] sm:$0xff] %vm270_vm1, %v493_v29  ;;  %622 = vst.msk [vmem:[#allocation2 + $0x2e8] sm:$0xff] %vm270_vm1, %v494_v30 }
  0x97   : > { %623 = vst.msk [vmem:[#allocation2 + $0x2f0] sm:$0xff] %vm270_vm1, %v495_v31  ;;  %624 = vst.msk [vmem:[#allocation2 + $0x2f8] sm:$0xff] %vm270_vm1, %v496_v32 }
  0x98   : > { %625 = vst.msk [vmem:[#allocation2 + $0x300] sm:$0xff] %vm270_vm1, %v497_v33  ;;  %626 = vst.msk [vmem:[#allocation2 + $0x308] sm:$0xff] %vm270_vm1, %v498_v34 }
  0x99   : > { %627 = vst.msk [vmem:[#allocation2 + $0x310] sm:$0xff] %vm270_vm1, %v499_v35  ;;  %628 = vst.msk [vmem:[#allocation2 + $0x318] sm:$0xff] %vm270_vm1, %v500_v36 }
  0x9a   : > { %629 = vst.msk [vmem:[#allocation2 + $0x320] sm:$0xff] %vm270_vm1, %v501_v37  ;;  %630 = vst.msk [vmem:[#allocation2 + $0x328] sm:$0xff] %vm270_vm1, %v502_v38 }
  0x9b   : > { %631 = vst.msk [vmem:[#allocation2 + $0x330] sm:$0xff] %vm270_vm1, %v503_v39  ;;  %632 = vst.msk [vmem:[#allocation2 + $0x338] sm:$0xff] %vm270_vm1, %v504_v40 }
  0x9c   : > { %633 = vst.msk [vmem:[#allocation2 + $0x340] sm:$0xff] %vm270_vm1, %v505_v41  ;;  %634 = vst.msk [vmem:[#allocation2 + $0x348] sm:$0xff] %vm270_vm1, %v506_v42 }
  0x9d   : > { %635 = vst.msk [vmem:[#allocation2 + $0x350] sm:$0xff] %vm270_vm1, %v507_v43  ;;  %636 = vst.msk [vmem:[#allocation2 + $0x358] sm:$0xff] %vm270_vm1, %v508_v44 }
  0x9e   : > { %637 = vst.msk [vmem:[#allocation2 + $0x360] sm:$0xff] %vm270_vm1, %v509_v45  ;;  %638 = vst.msk [vmem:[#allocation2 + $0x368] sm:$0xff] %vm270_vm1, %v510_v46 }
  0x9f   : > { %639 = vst.msk [vmem:[#allocation2 + $0x370] sm:$0xff] %vm270_vm1, %v511_v47  ;;  %640 = vst.msk [vmem:[#allocation2 + $0x378] sm:$0xff] %vm270_vm1, %v512_v48 }
  0xa0   : > { %641 = vst.msk [vmem:[#allocation2 + $0x380] sm:$0xff] %vm270_vm1, %v513_v49  ;;  %642 = vst.msk [vmem:[#allocation2 + $0x388] sm:$0xff] %vm270_vm1, %v514_v50 }
  0xa1   : > { %643 = vst.msk [vmem:[#allocation2 + $0x390] sm:$0xff] %vm270_vm1, %v515_v51  ;;  %644 = vst.msk [vmem:[#allocation2 + $0x398] sm:$0xff] %vm270_vm1, %v516_v52 }
  0xa2   : > { %645 = vst.msk [vmem:[#allocation2 + $0x3a0] sm:$0xff] %vm270_vm1, %v517_v53  ;;  %646 = vst.msk [vmem:[#allocation2 + $0x3a8] sm:$0xff] %vm270_vm1, %v518_v54 }
  0xa3   : > { %647 = vst.msk [vmem:[#allocation2 + $0x3b0] sm:$0xff] %vm270_vm1, %v519_v55  ;;  %648 = vst.msk [vmem:[#allocation2 + $0x3b8] sm:$0xff] %vm270_vm1, %v520_v56 }
  0xa4   : > { %649 = vst.msk [vmem:[#allocation2 + $0x3c0] sm:$0xff] %vm270_vm1, %v521_v57  ;;  %650 = vst.msk [vmem:[#allocation2 + $0x3c8] sm:$0xff] %vm270_vm1, %v522_v58 }
  0xa5   : > { %651 = vst.msk [vmem:[#allocation2 + $0x3d0] sm:$0xff] %vm270_vm1, %v523_v59  ;;  %652 = vst.msk [vmem:[#allocation2 + $0x3d8] sm:$0xff] %vm270_vm1, %v524_v60 }
  0xa6   : > { %653 = vst.msk [vmem:[#allocation2 + $0x3e0] sm:$0xff] %vm270_vm1, %v525_v61  ;;  %654 = vst.msk [vmem:[#allocation2 + $0x3e8] sm:$0xff] %vm270_vm1, %v526_v62 }
  0xa7   : > { %655 = vst.msk [vmem:[#allocation2 + $0x3f0] sm:$0xff] %vm270_vm1, %v527_v63  ;;  %656 = vst.msk [vmem:[#allocation2 + $0x3f8] sm:$0xff] %vm270_vm1, %v528_v0 }
  0xa8   : > { %657 = vst.msk [vmem:[#allocation2 + $0x400] sm:$0xff] %vm270_vm1, %v529_v1 }
  0xa9 PF: > { %s10922_s15 = sshll.u32 %s13029_s18, 9  ;;  %s13057_s17 = smov 8   ;;  %v13790_v52 = vld [vmem:[%s20090_s1] sm:$0xff]  ;;  %v13795_v53 = vld [vmem:[%s20090_s1 + $0x8] sm:$0xff]  ;;  %v13812_v59 = vld [vmem:[%s20090_s1 + $0x10] sm:$0xff]  ;;  %vm2657_vm3 = vcmask 64512  }
  0xaa   : > { %s13685_s16 = scalar_lea.vmem [#allocation2], %s10922_s15  ;;  %s13058_s18 = smov 16   ;;  %v20100_v56 = vand.u32 4294901760, %v13790_v52  ;;  %v20099_v57 = vand.u32 4294901760, %v13795_v53  ;;  %20480 = vst [vmem:[#allocation6_spill] sm:$0xff] %v13812_v59  ;;  %v13817_v60 = vld [vmem:[%s20090_s1 + $0x18] sm:$0xff] }
  0xab   : > { %s13059_s6 = smov 24   ;;  %20481 = vst [vmem:[#allocation7_spill] sm:$0xff] %v13817_v60  ;;  %v20098_v63 = vand.u32 4294901760, %v13812_v59  ;;  %v20097_v0 = vand.u32 4294901760, %v13817_v60  ;;  %s13060_s11 = smov 32   ;;  %vm2722_vm4 = vcmask 130048  }
  0xac   : > { %v13805_v58 = vpack.c.bf16 %v20099_v57, %v20100_v56  ;;  %s13061_s28 = smov 40   ;;  %s13062_s7 = smov 48   ;;  %vm2787_vm5 = vcmask 195584   ;;  %vm2852_vm6 = vcmask 261120   ;;  %vm2917_vm7 = vcmask 326656  }
  0xad   : > { %v13831_v1 = vpack.c.bf16 %v20097_v0, %v20098_v63  ;;  %vm2982_vm8 = vcmask 392192   ;;  %vm3061_vm9 = vcmask 457728   ;;  %p11378_p1 = scmp.ne.s32.totalorder %s13037_s20, 0 }
  0xae   : > { %20479 = vst [vmem:[#allocation5_spill] sm:$0xff] %v13805_v58  ;;  %12506 = vmatprep.subr.bf16.mxu0 %v13805_v58  ;;  %12470 = vmatprep.subr.bf16.mxu1 %v13805_v58  ;;  %vm6625_vm10 = vcmask (!%p11378_p1), 122880  }
  0xaf   : > { %v10990_v2 = vld [vmem:[%s13685_s16 + $0x16] sm:$0xff]  ;;  %v10988_v3 = vld [vmem:[%s13685_s16 + $0x6] sm:$0xff]  ;;  %v10991_v4 = vld [vmem:[%s13685_s16 + $0x1e] sm:$0xff]  ;;  %12508 = vmatpush3.bf16.msra.mxu0 %v13805_v58  ;;  %12472 = vmatpush3.bf16.msra.mxu1 %v13805_v58  ;;  %20482 = vst [vmem:[#allocation8_spill] sm:$0xff] %v13831_v1 }
  0xb0   : > { %1189 = vrot.lane.b32.xlu1 %v10990_v2, %s13057_s17  ;;  %1185 = vrot.lane.b32.xlu0 %v10988_v3, %s13057_s17  ;;  %v10989_v5 = vld [vmem:[%s13685_s16 + $0xe] sm:$0xff]  ;;  %v10992_v7 = vld [vmem:[%s13685_s16 + $0x26] sm:$0xff] }
  0xb1   : > { %v10993_v6 = vld [vmem:[%s13685_s16 + $0x2e] sm:$0xff]  ;;  %v10995_v8 = vld [vmem:[%s13685_s16 + $0x3e] sm:$0xff]  ;;  %v10994_v9 = vld [vmem:[%s13685_s16 + $0x36] sm:$0xff]  ;;  %12510 = vmatprep.subr.bf16.mxu0 %v13831_v1  ;;  %12474 = vmatprep.subr.bf16.mxu1 %v13831_v1 }
  0xb2   : > { %v10997_v10 = vld [vmem:[%s13685_s16 + $0x4e] sm:$0xff]  ;;  %v10996_v11 = vld [vmem:[%s13685_s16 + $0x46] sm:$0xff]  ;;  %v10999_v12 = vld [vmem:[%s13685_s16 + $0x5e] sm:$0xff] }
  0xb3   : > { %v10998_v13 = vld [vmem:[%s13685_s16 + $0x56] sm:$0xff]  ;;  %v11001_v14 = vld [vmem:[%s13685_s16 + $0x6e] sm:$0xff]  ;;  %v11000_v15 = vld [vmem:[%s13685_s16 + $0x66] sm:$0xff]  ;;  %12512 = vmatpush3.bf16.msra.mxu0 %v13831_v1  ;;  %12476 = vmatpush3.bf16.msra.mxu1 %v13831_v1 }
  0xb4   : > { %1191 = vrot.lane.b32.xlu1 %v10991_v4, %s13057_s17  ;;  %1187 = vrot.lane.b32.xlu0 %v10989_v5, %s13057_s17  ;;  %v11003_v16 = vld [vmem:[%s13685_s16 + $0x7e] sm:$0xff]  ;;  %v11002_v17 = vld [vmem:[%s13685_s16 + $0x76] sm:$0xff] }
  0xb5   : > { %v11005_v18 = vld [vmem:[%s13685_s16 + $0x8e] sm:$0xff]  ;;  %v11004_v19 = vld [vmem:[%s13685_s16 + $0x86] sm:$0xff]  ;;  %v11007_v20 = vld [vmem:[%s13685_s16 + $0x9e] sm:$0xff] }
  0xb6   : > { %v11006_v21 = vld [vmem:[%s13685_s16 + $0x96] sm:$0xff]  ;;  %v11009_v22 = vld [vmem:[%s13685_s16 + $0xae] sm:$0xff]  ;;  %v11008_v23 = vld [vmem:[%s13685_s16 + $0xa6] sm:$0xff] }
  0xb7   : > { %v11011_v24 = vld [vmem:[%s13685_s16 + $0xbe] sm:$0xff]  ;;  %v11010_v25 = vld [vmem:[%s13685_s16 + $0xb6] sm:$0xff]  ;;  %v11013_v26 = vld [vmem:[%s13685_s16 + $0xce] sm:$0xff] }
  0xb8   : > { %1195 = vrot.lane.b32.xlu1 %v10993_v6, %s13057_s17  ;;  %1193 = vrot.lane.b32.xlu0 %v10992_v7, %s13057_s17  ;;  %v11012_v27 = vld [vmem:[%s13685_s16 + $0xc6] sm:$0xff]  ;;  %v11015_v28 = vld [vmem:[%s13685_s16 + $0xde] sm:$0xff] }
  0xb9   : > { %v11014_v29 = vld [vmem:[%s13685_s16 + $0xd6] sm:$0xff]  ;;  %v11017_v30 = vld [vmem:[%s13685_s16 + $0xee] sm:$0xff]  ;;  %v11016_v31 = vld [vmem:[%s13685_s16 + $0xe6] sm:$0xff] }
  0xba   : > { %v11019_v32 = vld [vmem:[%s13685_s16 + $0xfe] sm:$0xff]  ;;  %v11018_v33 = vld [vmem:[%s13685_s16 + $0xf6] sm:$0xff]  ;;  %v11021_v34 = vld [vmem:[%s13685_s16 + $0x10e] sm:$0xff] }
  0xbb   : > { %v11020_v35 = vld [vmem:[%s13685_s16 + $0x106] sm:$0xff]  ;;  %v11023_v36 = vld [vmem:[%s13685_s16 + $0x11e] sm:$0xff]  ;;  %v11022_v37 = vld [vmem:[%s13685_s16 + $0x116] sm:$0xff] }
  0xbc   : > { %1199 = vrot.lane.b32.xlu1 %v10995_v8, %s13057_s17  ;;  %1197 = vrot.lane.b32.xlu0 %v10994_v9, %s13057_s17  ;;  %v11025_v38 = vld [vmem:[%s13685_s16 + $0x12e] sm:$0xff]  ;;  %v11024_v39 = vld [vmem:[%s13685_s16 + $0x126] sm:$0xff] }
  0xbd   : > { %v11027_v40 = vld [vmem:[%s13685_s16 + $0x13e] sm:$0xff]  ;;  %v11026_v41 = vld [vmem:[%s13685_s16 + $0x136] sm:$0xff]  ;;  %v11029_v42 = vld [vmem:[%s13685_s16 + $0x14e] sm:$0xff] }
  0xbe   : > { %v11028_v43 = vld [vmem:[%s13685_s16 + $0x146] sm:$0xff]  ;;  %v11031_v44 = vld [vmem:[%s13685_s16 + $0x15e] sm:$0xff]  ;;  %v11030_v45 = vld [vmem:[%s13685_s16 + $0x156] sm:$0xff] }
  0xbf   : > { %v11033_v46 = vld [vmem:[%s13685_s16 + $0x16e] sm:$0xff]  ;;  %v11032_v47 = vld [vmem:[%s13685_s16 + $0x166] sm:$0xff]  ;;  %v11035_v48 = vld [vmem:[%s13685_s16 + $0x17e] sm:$0xff] }
  0xc0   : > { %1203 = vrot.lane.b32.xlu1 %v10997_v10, %s13057_s17  ;;  %1201 = vrot.lane.b32.xlu0 %v10996_v11, %s13057_s17  ;;  %v11034_v49 = vld [vmem:[%s13685_s16 + $0x176] sm:$0xff]  ;;  %v11053_v50 = vld [vmem:[%s13685_s16 + $0x7] sm:$0xff] }
  0xc1   : > { %v11036_v51 = vld [vmem:[%s13685_s16 + $0x186] sm:$0xff]  ;;  %v11054_v55 = vld [vmem:[%s13685_s16 + $0xf] sm:$0xff]  ;;  %v11055_v10 = vld [vmem:[%s13685_s16 + $0x17] sm:$0xff] }
  0xc2   : > { %v11118_v54 = vld [vmem:[%s13685_s16 + $0x8] sm:$0xff]  ;;  %v11119_v62 = vld [vmem:[%s13685_s16 + $0x10] sm:$0xff]  ;;  %v13838_v2 = vld [vmem:[%s20090_s1 + $0x20] sm:$0xff] }
  0xc3   : > { %v11183_v61 = vld [vmem:[%s13685_s16 + $0x9] sm:$0xff]  ;;  %20483 = vst [vmem:[#allocation9_spill] sm:$0xff] %v13838_v2  ;;  %v11184_v5 = vld [vmem:[%s13685_s16 + $0x11] sm:$0xff]  ;;  %v20096_v6 = vand.u32 4294901760, %v13838_v2  ;;  %v11194_v63 = vld [vmem:[%s13685_s16 + $0x61] sm:$0xff] }
  0xc4   : > { %1207 = vrot.lane.b32.xlu1 %v10999_v12, %s13057_s17  ;;  %1205 = vrot.lane.b32.xlu0 %v10998_v13, %s13057_s17  ;;  %v13843_v3 = vld [vmem:[%s20090_s1 + $0x28] sm:$0xff]  ;;  %v11249_v9 = vld [vmem:[%s13685_s16 + $0x12] sm:$0xff] }
  0xc5   : > { %20484 = vst [vmem:[#allocation10_spill] sm:$0xff] %v13843_v3  ;;  %v11248_v4 = vld [vmem:[%s13685_s16 + $0xa] sm:$0xff]  ;;  %v20095_v7 = vand.u32 4294901760, %v13843_v3  ;;  %v11056_v13 = vld [vmem:[%s13685_s16 + $0x1f] sm:$0xff] }
  0xc6   : > { %v3053_v11 = vld [vmem:[%s20090_s1 + $0x30] sm:$0xff]  ;;  %v11065_v56 = vld [vmem:[%s13685_s16 + $0x67] sm:$0xff] }
  0xc7   : > { %v13857_v8 = vpack.c.bf16 %v20095_v7, %v20096_v6  ;;  %v13870_v12 = vand.u32 4294901760, %v3053_v11  ;;  %v11129_v6 = vld [vmem:[%s13685_s16 + $0x60] sm:$0xff]  ;;  %v10924_v59 = vld [vmem:[%s13685_s16 + $0xd] sm:$0xff] }
  0xc8   : > { %1211 = vrot.lane.b32.xlu1 %v11001_v14, %s13057_s17  ;;  %1209 = vrot.lane.b32.xlu0 %v11000_v15, %s13057_s17  ;;  %v11313_v14 = vld [vmem:[%s13685_s16 + $0xb] sm:$0xff] }
  0xc9   : > { %20485 = vst [vmem:[#allocation11_spill] sm:$0xff] %v13857_v8  ;;  %12514 = vmatprep.subr.bf16.mxu0 %v13857_v8  ;;  %12478 = vmatprep.subr.bf16.mxu1 %v13857_v8  ;;  %20486 = vst [vmem:[#allocation12_spill] sm:$0xff] %v13870_v12 }
  0xca   : > { %12516 = vmatpush3.bf16.msra.mxu0 %v13857_v8  ;;  %12480 = vmatpush3.bf16.msra.mxu1 %v13857_v8 }
  0xcb   : > { %12151 = vmatprep.subr.mxu0 %v13870_v12  ;;  %11821 = vmatprep.subr.mxu1 %v13870_v12 }
  0xcc   : > { %1215 = vrot.lane.b32.xlu1 %v11003_v16, %s13057_s17  ;;  %1213 = vrot.lane.b32.xlu0 %v11002_v17, %s13057_s17  ;;  %v11314_v17 = vld [vmem:[%s13685_s16 + $0x13] sm:$0xff] }
  0xce   : > { %12152 = vmatpush3.msra.mxu0 %v13870_v12  ;;  %11822 = vmatpush3.msra.mxu1 %v13870_v12 }
  0xd0   : > { %1219 = vrot.lane.b32.xlu1 %v11005_v18, %s13057_s17  ;;  %1217 = vrot.lane.b32.xlu0 %v11004_v19, %s13057_s17  ;;  %v11120_v18 = vld [vmem:[%s13685_s16 + $0x18] sm:$0xff] }
  0xd4   : > { %1223 = vrot.lane.b32.xlu1 %v11007_v20, %s13057_s17  ;;  %1221 = vrot.lane.b32.xlu0 %v11006_v21, %s13057_s17  ;;  %v11185_v21 = vld [vmem:[%s13685_s16 + $0x19] sm:$0xff] }
  0xd8   : > { %1227 = vrot.lane.b32.xlu1 %v11009_v22, %s13057_s17  ;;  %1225 = vrot.lane.b32.xlu0 %v11008_v23, %s13057_s17  ;;  %v11121_v22 = vld [vmem:[%s13685_s16 + $0x20] sm:$0xff] }
  0xdc   : > { %1231 = vrot.lane.b32.xlu1 %v11011_v24, %s13057_s17  ;;  %1229 = vrot.lane.b32.xlu0 %v11010_v25, %s13057_s17  ;;  %v11250_v25 = vld [vmem:[%s13685_s16 + $0x1a] sm:$0xff] }
  0xe0   : > { %1235 = vrot.lane.b32.xlu1 %v11013_v26, %s13057_s17  ;;  %1233 = vrot.lane.b32.xlu0 %v11012_v27, %s13057_s17  ;;  %v11186_v26 = vld [vmem:[%s13685_s16 + $0x21] sm:$0xff] }
  0xe4   : > { %1239 = vrot.lane.b32.xlu1 %v11015_v28, %s13057_s17  ;;  %1237 = vrot.lane.b32.xlu0 %v11014_v29, %s13057_s17  ;;  %v11251_v29 = vld [vmem:[%s13685_s16 + $0x22] sm:$0xff] }
  0xe8   : > { %1243 = vrot.lane.b32.xlu1 %v11017_v30, %s13057_s17  ;;  %1241 = vrot.lane.b32.xlu0 %v11016_v31, %s13057_s17  ;;  %v11057_v30 = vld [vmem:[%s13685_s16 + $0x27] sm:$0xff] }
  0xec   : > { %1247 = vrot.lane.b32.xlu1 %v11019_v32, %s13057_s17  ;;  %1245 = vrot.lane.b32.xlu0 %v11018_v33, %s13057_s17  ;;  %v11058_v33 = vld [vmem:[%s13685_s16 + $0x2f] sm:$0xff] }
  0xf0   : > { %1251 = vrot.lane.b32.xlu1 %v11021_v34, %s13057_s17  ;;  %1249 = vrot.lane.b32.xlu0 %v11020_v35, %s13057_s17  ;;  %v11315_v34 = vld [vmem:[%s13685_s16 + $0x1b] sm:$0xff] }
  0xf4   : > { %1255 = vrot.lane.b32.xlu1 %v11023_v36, %s13057_s17  ;;  %1253 = vrot.lane.b32.xlu0 %v11022_v37, %s13057_s17  ;;  %v11316_v37 = vld [vmem:[%s13685_s16 + $0x23] sm:$0xff] }
  0xf8   : > { %1259 = vrot.lane.b32.xlu1 %v11025_v38, %s13057_s17  ;;  %1257 = vrot.lane.b32.xlu0 %v11024_v39, %s13057_s17  ;;  %v11122_v38 = vld [vmem:[%s13685_s16 + $0x28] sm:$0xff] }
  0xfc   : > { %1263 = vrot.lane.b32.xlu1 %v11027_v40, %s13057_s17  ;;  %1261 = vrot.lane.b32.xlu0 %v11026_v41, %s13057_s17  ;;  %v11187_v41 = vld [vmem:[%s13685_s16 + $0x29] sm:$0xff] }
 0x100   : > { %1267 = vrot.lane.b32.xlu1 %v11029_v42, %s13057_s17  ;;  %1265 = vrot.lane.b32.xlu0 %v11028_v43, %s13057_s17  ;;  %v11123_v42 = vld [vmem:[%s13685_s16 + $0x30] sm:$0xff] }
 0x104   : > { %1271 = vrot.lane.b32.xlu1 %v11031_v44, %s13057_s17  ;;  %1269 = vrot.lane.b32.xlu0 %v11030_v45, %s13057_s17  ;;  %v11252_v45 = vld [vmem:[%s13685_s16 + $0x2a] sm:$0xff] }
 0x108   : > { %1275 = vrot.lane.b32.xlu1 %v11033_v46, %s13057_s17  ;;  %1273 = vrot.lane.b32.xlu0 %v11032_v47, %s13057_s17  ;;  %v11188_v46 = vld [vmem:[%s13685_s16 + $0x31] sm:$0xff] }
 0x10c   : > { %1279 = vrot.lane.b32.xlu1 %v11035_v48, %s13057_s17  ;;  %1277 = vrot.lane.b32.xlu0 %v11034_v49, %s13057_s17  ;;  %v11253_v49 = vld [vmem:[%s13685_s16 + $0x32] sm:$0xff] }
 0x110   : > { %1441 = vrot.lane.b32.xlu1 %v11053_v50, %s13058_s18  ;;  %1281 = vrot.lane.b32.xlu0 %v11036_v51, %s13057_s17  ;;  %v11059_v50 = vld [vmem:[%s13685_s16 + $0x37] sm:$0xff] }
 0x114   : > { %1697 = vrot.lane.b32.xlu1 %v11118_v54, %s13059_s6  ;;  %1443 = vrot.lane.b32.xlu0 %v11054_v55, %s13058_s18  ;;  %v11060_v55 = vld [vmem:[%s13685_s16 + $0x3f] sm:$0xff] }
 0x118   : > { %1953 = vrot.lane.b32.xlu1 %v11183_v61, %s13060_s11  ;;  %1699 = vrot.lane.b32.xlu0 %v11119_v62, %s13059_s6  ;;  %v11317_v61 = vld [vmem:[%s13685_s16 + $0x2b] sm:$0xff] }
 0x11c   : > { %2209 = vrot.lane.b32.xlu1 %v11248_v4, %s13061_s28  ;;  %1955 = vrot.lane.b32.xlu0 %v11184_v5, %s13060_s11  ;;  %v11318_v5 = vld [vmem:[%s13685_s16 + $0x33] sm:$0xff] }
 0x120   : > { %2211 = vrot.lane.b32.xlu1 %v11249_v9, %s13061_s28  ;;  %1445 = vrot.lane.b32.xlu0 %v11055_v10, %s13058_s18  ;;  %v11124_v9 = vld [vmem:[%s13685_s16 + $0x38] sm:$0xff] }
 0x122   : > { %v13878_v15 = vpop.permute.xlu1 %1189  ;;  %v13880_v16 = vpop.permute.xlu0 %1185 }
 0x124   : > { %1447 = vrot.lane.b32.xlu1 %v11056_v13, %s13058_s18  ;;  %2465 = vrot.lane.b32.xlu0 %v11313_v14, %s13062_s7  ;;  %v11189_v13 = vld [vmem:[%s13685_s16 + $0x39] sm:$0xff] }
 0x125   : > { %v11125_v14 = vld [vmem:[%s13685_s16 + $0x40] sm:$0xff] }
 0x126   : > { %v13888_v19 = vpop.permute.xlu1 %1191  ;;  %v13890_v20 = vpop.permute.xlu0 %1187 }
 0x128   : > { %2467 = vrot.lane.b32.xlu1 %v11314_v17, %s13062_s7  ;;  %1701 = vrot.lane.b32.xlu0 %v11120_v18, %s13059_s6 }
 0x12a   : > { %v13896_v23 = vpop.permute.xlu1 %1195  ;;  %v13898_v24 = vpop.permute.xlu0 %1193 }
 0x12c   : > { %1957 = vrot.lane.b32.xlu1 %v11185_v21, %s13060_s11  ;;  %1703 = vrot.lane.b32.xlu0 %v11121_v22, %s13059_s6  ;;  %v11254_v21 = vld [vmem:[%s13685_s16 + $0x3a] sm:$0xff] }
 0x12d   : > { %v11190_v22 = vld [vmem:[%s13685_s16 + $0x41] sm:$0xff] }
 0x12e   : > { %v13904_v27 = vpop.permute.xlu1 %1199  ;;  %v13906_v28 = vpop.permute.xlu0 %1197 }
 0x130   : > { %2213 = vrot.lane.b32.xlu1 %v11250_v25, %s13061_s28  ;;  %1959 = vrot.lane.b32.xlu0 %v11186_v26, %s13060_s11 }
 0x132   : > { %v13912_v31 = vpop.permute.xlu1 %1203  ;;  %v13914_v32 = vpop.permute.xlu0 %1201 }
 0x134   : > { %2215 = vrot.lane.b32.xlu1 %v11251_v29, %s13061_s28  ;;  %1449 = vrot.lane.b32.xlu0 %v11057_v30, %s13058_s18  ;;  %v11255_v29 = vld [vmem:[%s13685_s16 + $0x42] sm:$0xff] }
 0x135   : > { %v11061_v30 = vld [vmem:[%s13685_s16 + $0x47] sm:$0xff] }
 0x136   : > { %v13920_v35 = vpop.permute.xlu1 %1207  ;;  %v13922_v36 = vpop.permute.xlu0 %1205 }
 0x138   : > { %1451 = vrot.lane.b32.xlu1 %v11058_v33, %s13058_s18  ;;  %2469 = vrot.lane.b32.xlu0 %v11315_v34, %s13062_s7 }
 0x13a   : > { %v13928_v39 = vpop.permute.xlu1 %1211  ;;  %v13930_v40 = vpop.permute.xlu0 %1209 }
 0x13c   : > { %2471 = vrot.lane.b32.xlu1 %v11316_v37, %s13062_s7  ;;  %1705 = vrot.lane.b32.xlu0 %v11122_v38, %s13059_s6  ;;  %v11062_v37 = vld [vmem:[%s13685_s16 + $0x4f] sm:$0xff]  ;;  %v11319_v38 = vld [vmem:[%s13685_s16 + $0x3b] sm:$0xff] }
 0x13e   : > { %v13936_v43 = vpop.permute.xlu1 %1215  ;;  %v13938_v44 = vpop.permute.xlu0 %1213 }
 0x140   : > { %1961 = vrot.lane.b32.xlu1 %v11187_v41, %s13060_s11  ;;  %1707 = vrot.lane.b32.xlu0 %v11123_v42, %s13059_s6 }
 0x142   : > { %v13944_v47 = vpop.permute.xlu1 %1219  ;;  %v13946_v48 = vpop.permute.xlu0 %1217 }
 0x144   : > { %2217 = vrot.lane.b32.xlu1 %v11252_v45, %s13061_s28  ;;  %1963 = vrot.lane.b32.xlu0 %v11188_v46, %s13060_s11  ;;  %v11320_v45 = vld [vmem:[%s13685_s16 + $0x43] sm:$0xff] }
 0x145   : > { %v11126_v46 = vld [vmem:[%s13685_s16 + $0x48] sm:$0xff] }
 0x146   : > { %v13952_v51 = vpop.permute.xlu1 %1223  ;;  %v13954_v54 = vpop.permute.xlu0 %1221 }
 0x148   : > { %2219 = vrot.lane.b32.xlu1 %v11253_v49, %s13061_s28  ;;  %1453 = vrot.lane.b32.xlu0 %v11059_v50, %s13058_s18 }
 0x14a   : > { %v13960_v62 = vpop.permute.xlu1 %1227  ;;  %v13962_v4 = vpop.permute.xlu0 %1225 }
 0x14c   : > { %1455 = vrot.lane.b32.xlu1 %v11060_v55, %s13058_s18  ;;  %2473 = vrot.lane.b32.xlu0 %v11317_v61, %s13062_s7  ;;  %v11191_v55 = vld [vmem:[%s13685_s16 + $0x49] sm:$0xff] }
 0x14d   : > { %v11127_v61 = vld [vmem:[%s13685_s16 + $0x50] sm:$0xff] }
 0x14e   : > { %v13968_v10 = vpop.permute.xlu1 %1231  ;;  %v13970_v11 = vpop.permute.xlu0 %1229 }
 0x150   : > { %2475 = vrot.lane.b32.xlu1 %v11318_v5, %s13062_s7  ;;  %1709 = vrot.lane.b32.xlu0 %v11124_v9, %s13059_s6 }
 0x152   : > { %v13976_v17 = vpop.permute.xlu1 %1235  ;;  %v13978_v18 = vpop.permute.xlu0 %1233 }
 0x154   : > { %1965 = vrot.lane.b32.xlu1 %v11189_v13, %s13060_s11  ;;  %1711 = vrot.lane.b32.xlu0 %v11125_v14, %s13059_s6  ;;  %v11256_v13 = vld [vmem:[%s13685_s16 + $0x4a] sm:$0xff] }
 0x155   : > { %v11192_v14 = vld [vmem:[%s13685_s16 + $0x51] sm:$0xff] }
 0x156   : > { %v13984_v25 = vpop.permute.xlu1 %1239  ;;  %v13986_v26 = vpop.permute.xlu0 %1237 }
 0x158   : > { %2221 = vrot.lane.b32.xlu1 %v11254_v21, %s13061_s28  ;;  %1967 = vrot.lane.b32.xlu0 %v11190_v22, %s13060_s11 }
 0x15a   : > { %v13992_v33 = vpop.permute.xlu1 %1243  ;;  %v13994_v34 = vpop.permute.xlu0 %1241 }
 0x15c   : > { %2223 = vrot.lane.b32.xlu1 %v11255_v29, %s13061_s28  ;;  %1457 = vrot.lane.b32.xlu0 %v11061_v30, %s13058_s18  ;;  %v11257_v29 = vld [vmem:[%s13685_s16 + $0x52] sm:$0xff] }
 0x15d   : > { %v11063_v30 = vld [vmem:[%s13685_s16 + $0x57] sm:$0xff] }
 0x15e   : > { %v14000_v41 = vpop.permute.xlu1 %1247  ;;  %v14002_v42 = vpop.permute.xlu0 %1245 }
 0x160   : > { %1459 = vrot.lane.b32.xlu1 %v11062_v37, %s13058_s18  ;;  %2477 = vrot.lane.b32.xlu0 %v11319_v38, %s13062_s7 }
 0x162   : > { %v14008_v49 = vpop.permute.xlu1 %1251  ;;  %v14010_v50 = vpop.permute.xlu0 %1249 }
 0x164   : > { %2479 = vrot.lane.b32.xlu1 %v11320_v45, %s13062_s7  ;;  %1713 = vrot.lane.b32.xlu0 %v11126_v46, %s13059_s6  ;;  %v11064_v45 = vld [vmem:[%s13685_s16 + $0x5f] sm:$0xff]  ;;  %v11321_v46 = vld [vmem:[%s13685_s16 + $0x4b] sm:$0xff] }
 0x166   : > { %v14016_v5 = vpop.permute.xlu1 %1255  ;;  %v14018_v9 = vpop.permute.xlu0 %1253 }
 0x168   : > { %1969 = vrot.lane.b32.xlu1 %v11191_v55, %s13060_s11  ;;  %1715 = vrot.lane.b32.xlu0 %v11127_v61, %s13059_s6 }
 0x16a   : > { %v14024_v21 = vpop.permute.xlu1 %1259  ;;  %v14026_v22 = vpop.permute.xlu0 %1257 }
 0x16c   : > { %2225 = vrot.lane.b32.xlu1 %v11256_v13, %s13061_s28  ;;  %1971 = vrot.lane.b32.xlu0 %v11192_v14, %s13060_s11  ;;  %v11322_v13 = vld [vmem:[%s13685_s16 + $0x53] sm:$0xff] }
 0x16d   : > { %v11128_v14 = vld [vmem:[%s13685_s16 + $0x58] sm:$0xff] }
 0x16e   : > { %v14032_v37 = vpop.permute.xlu1 %1263  ;;  %v14034_v38 = vpop.permute.xlu0 %1261 }
 0x170   : > { %2227 = vrot.lane.b32.xlu1 %v11257_v29, %s13061_s28  ;;  %1461 = vrot.lane.b32.xlu0 %v11063_v30, %s13058_s18  ;;  %v11193_v30 = vld [vmem:[%s13685_s16 + $0x59] sm:$0xff] }
 0x172   : > { %v14040_v55 = vpop.permute.xlu1 %1267  ;;  %v14042_v61 = vpop.permute.xlu0 %1265 }
 0x174   : > { %1463 = vrot.lane.b32.xlu1 %v11064_v45, %s13058_s18  ;;  %2481 = vrot.lane.b32.xlu0 %v11321_v46, %s13062_s7  ;;  %v11258_v46 = vld [vmem:[%s13685_s16 + $0x5a] sm:$0xff] }
 0x176   : > { %v14048_v7 = vpop.permute.xlu1 %1271  ;;  %v14050_v29 = vpop.permute.xlu0 %1269 }
 0x177   : > { %20487 = vst [vmem:[#allocation13_spill] sm:$0xff] %v14048_v7  ;;  %v10926_v7 = vld [vmem:[%s13685_s16 + $0x1d] sm:$0xff] }
 0x178   : > { %2483 = vrot.lane.b32.xlu1 %v11322_v13, %s13062_s7  ;;  %1717 = vrot.lane.b32.xlu0 %v11128_v14, %s13059_s6  ;;  %v11259_v14 = vld [vmem:[%s13685_s16 + $0x62] sm:$0xff] }
 0x17a   : > { %v14056_v0 = vpop.permute.xlu1 %1275  ;;  %v14058_v45 = vpop.permute.xlu0 %1273 }
 0x17b   : > { %20488 = vst [vmem:[#allocation14_spill] sm:$0xff] %v14056_v0  ;;  %20489 = vst [vmem:[#allocation15_spill] sm:$0xff] %v14058_v45  ;;  %v2659_v45 = vsel %vm2657_vm3, %v10924_v59, %v13890_v20  ;;  %v11068_v20 = vld [vmem:[%s13685_s16 + $0x7f] sm:$0xff] }
 0x17c   : > { %1973 = vrot.lane.b32.xlu1 %v11193_v30, %s13060_s11  ;;  %1719 = vrot.lane.b32.xlu0 %v11129_v6, %s13059_s6  ;;  %v11066_v6 = vld [vmem:[%s13685_s16 + $0x6f] sm:$0xff]  ;;  %v11323_v30 = vld [vmem:[%s13685_s16 + $0x5b] sm:$0xff] }
 0x17e   : > { %v14064_v57 = vpop.permute.xlu1 %1279  ;;  %v14066_v13 = vpop.permute.xlu0 %1277 }
 0x17f   : > { %20490 = vst [vmem:[#allocation16_spill] sm:$0xff] %v14064_v57  ;;  %20491 = vst [vmem:[#allocation17_spill] sm:$0xff] %v14066_v13  ;;  %v10923_v13 = vld [vmem:[%s13685_s16 + $0x5] sm:$0xff] }
 0x180   : > { %2229 = vrot.lane.b32.xlu1 %v11258_v46, %s13061_s28  ;;  %1975 = vrot.lane.b32.xlu0 %v11194_v63, %s13060_s11  ;;  %v11324_v63 = vld [vmem:[%s13685_s16 + $0x63] sm:$0xff] }
 0x181   : > { %v11130_v46 = vld [vmem:[%s13685_s16 + $0x68] sm:$0xff] }
 0x182   : > { %v1442_v8 = vpop.permute.xlu1 %1441  ;;  %v14072_v1 = vpop.permute.xlu0 %1281 }
 0x183   : > { %20492 = vst [vmem:[#allocation18_spill] sm:$0xff] %v14072_v1 }
 0x184   : > { %2231 = vrot.lane.b32.xlu1 %v11259_v14, %s13061_s28  ;;  %1465 = vrot.lane.b32.xlu0 %v11065_v56, %s13058_s18  ;;  %v11195_v56 = vld [vmem:[%s13685_s16 + $0x69] sm:$0xff] }
 0x185   : > { %v11131_v14 = vld [vmem:[%s13685_s16 + $0x70] sm:$0xff] }
 0x186   : > { %v1698_v58 = vpop.permute.xlu1 %1697  ;;  %v1444_v12 = vpop.permute.xlu0 %1443 }
 0x188   : > { %1467 = vrot.lane.b32.xlu1 %v11066_v6, %s13058_s18  ;;  %2485 = vrot.lane.b32.xlu0 %v11323_v30, %s13062_s7  ;;  %v11260_v6 = vld [vmem:[%s13685_s16 + $0x6a] sm:$0xff] }
 0x189   : > { %v11196_v30 = vld [vmem:[%s13685_s16 + $0x71] sm:$0xff] }
 0x18a   : > { %v1954_v3 = vpop.permute.xlu1 %1953  ;;  %v1700_v1 = vpop.permute.xlu0 %1699 }
 0x18c   : > { %2487 = vrot.lane.b32.xlu1 %v11324_v63, %s13062_s7  ;;  %1721 = vrot.lane.b32.xlu0 %v11130_v46, %s13059_s6  ;;  %v2658_v63 = vsel %vm2657_vm3, %v10923_v13, %v13880_v16  ;;  %v11261_v16 = vld [vmem:[%s13685_s16 + $0x72] sm:$0xff] }
 0x18d   : > { %v2723_v0 = vsel %vm2722_vm4, %v2658_v63, %v1442_v8  ;;  %v11067_v13 = vld [vmem:[%s13685_s16 + $0x77] sm:$0xff] }
 0x18e   : > { %v2210_v2 = vpop.permute.xlu1 %2209  ;;  %v1956_v57 = vpop.permute.xlu0 %1955 }
 0x190   : > { %1977 = vrot.lane.b32.xlu1 %v11195_v56, %s13060_s11  ;;  %1723 = vrot.lane.b32.xlu0 %v11131_v14, %s13059_s6  ;;  %v2788_v56 = vsel %vm2787_vm5, %v2723_v0, %v1698_v58  ;;  %v2724_v0 = vsel %vm2722_vm4, %v2659_v45, %v1444_v12 }
 0x191   : > { %v2853_v14 = vsel %vm2852_vm6, %v2788_v56, %v1954_v3  ;;  %v11325_v56 = vld [vmem:[%s13685_s16 + $0x6b] sm:$0xff] }
 0x192   : > { %v2212_v46 = vpop.permute.xlu1 %2211  ;;  %v14093_v60 = vpop.permute.xlu0 %1445  ;;  %v2918_v8 = vsel %vm2917_vm7, %v2853_v14, %v2210_v2 }
 0x194   : > { %2233 = vrot.lane.b32.xlu1 %v11260_v6, %s13061_s28  ;;  %1979 = vrot.lane.b32.xlu0 %v11196_v30, %s13060_s11  ;;  %v2789_v30 = vsel %vm2787_vm5, %v2724_v0, %v1700_v1 }
 0x195   : > { %v2854_v59 = vsel %vm2852_vm6, %v2789_v30, %v1956_v57 }
 0x196   : > { %v14106_v63 = vpop.permute.xlu1 %1447  ;;  %v2466_v58 = vpop.permute.xlu0 %2465  ;;  %v2919_v12 = vsel %vm2917_vm7, %v2854_v59, %v2212_v46  ;;  %v11326_v46 = vld [vmem:[%s13685_s16 + $0x73] sm:$0xff] }
 0x197   : > { %v2983_v6 = vsel %vm2982_vm8, %v2918_v8, %v2466_v58  ;;  %v11132_v58 = vld [vmem:[%s13685_s16 + $0x78] sm:$0xff] }
 0x198   : > { %v3063_v3 = vsel %vm3061_vm9, %v2983_v6, 0  ;;  %2235 = vrot.lane.b32.xlu1 %v11261_v16, %s13061_s28  ;;  %1469 = vrot.lane.b32.xlu0 %v11067_v13, %s13058_s18 }
 0x199   : > { %v14115_v2 = vand.u32 4294901760, %v3063_v3 }
 0x19a   : > { %v2468_v45 = vpop.permute.xlu1 %2467  ;;  %v1702_v14 = vpop.permute.xlu0 %1701 }
 0x19b   : > { %20493 = vst [vmem:[#allocation19_spill] sm:$0xff] %v14115_v2  ;;  %v14121_v1 = vsub.f32 %v3063_v3, %v14115_v2  ;;  %v2984_v8 = vsel %vm2982_vm8, %v2919_v12, %v2468_v45  ;;  %v11133_v12 = vld [vmem:[%s13685_s16 + $0x80] sm:$0xff]  ;;  %v10925_v2 = vld [vmem:[%s13685_s16 + $0x15] sm:$0xff] }
 0x19c   : > { %v3066_v16 = vsel %vm3061_vm9, %v2984_v8, 0  ;;  %1471 = vrot.lane.b32.xlu1 %v11068_v20, %s13058_s18  ;;  %2489 = vrot.lane.b32.xlu0 %v11325_v56, %s13062_s7  ;;  %v11197_v56 = vld [vmem:[%s13685_s16 + $0x79] sm:$0xff] }
 0x19d   : > { %20494 = vst [vmem:[#allocation20_spill] sm:$0xff] %v14121_v1  ;;  %v14127_v57 = vand.u32 4294901760, %v3066_v16  ;;  %v3328_v13 = vand.u32 4294901760, %v14121_v1 }
 0x19e   : > { %v1958_v0 = vpop.permute.xlu1 %1957  ;;  %v1704_v6 = vpop.permute.xlu0 %1703 }
 0x19f   : > { %20495 = vst [vmem:[#allocation21_spill] sm:$0xff] %v14127_v57  ;;  %v14133_v30 = vsub.f32 %v3066_v16, %v14127_v57  ;;  %12153 = vmatprep.mubr.f32.mxu0 %v3328_v13  ;;  %v3329_v3 = vsub.f32 %v14121_v1, %v3328_v13 }
 0x1a0   : > { %2491 = vrot.lane.b32.xlu1 %v11326_v46, %s13062_s7  ;;  %1725 = vrot.lane.b32.xlu0 %v11132_v58, %s13059_s6  ;;  %v11262_v46 = vld [vmem:[%s13685_s16 + $0x7a] sm:$0xff] }
 0x1a1   : > { %20496 = vst [vmem:[#allocation22_spill] sm:$0xff] %v14133_v30  ;;  %v3330_v59 = vand.u32 4294901760, %v3329_v3  ;;  %v3338_v20 = vand.u32 4294901760, %v14133_v30  ;;  %v11198_v58 = vld [vmem:[%s13685_s16 + $0x81] sm:$0xff]  ;;  %v2660_v3 = vsel %vm2657_vm3, %v10925_v2, %v13878_v15  ;;  %v2661_v2 = vsel %vm2657_vm3, %v10926_v7, %v13888_v19 }
 0x1a2   : > { %v2214_v45 = vpop.permute.xlu1 %2213  ;;  %v1960_v8 = vpop.permute.xlu0 %1959  ;;  %v11069_v15 = vld [vmem:[%s13685_s16 + $0x87] sm:$0xff] }
 0x1a3   : > { %11823 = vmatprep.mubr.f32.mxu1 %v3330_v59  ;;  %12154 = vmatmul.mubr.f32.vlgmr.msra.gmra.mrb[0].mxu0 %v3338_v20  ;;  %v3339_v16 = vsub.f32 %v14133_v30, %v3338_v20  ;;  %v2725_v59 = vsel %vm2722_vm4, %v2660_v3, %v14093_v60 }
 0x1a4   : > { %1981 = vrot.lane.b32.xlu1 %v11197_v56, %s13060_s11  ;;  %1727 = vrot.lane.b32.xlu0 %v11133_v12, %s13059_s6  ;;  %v2790_v20 = vsel %vm2787_vm5, %v2725_v59, %v1702_v14  ;;  %v11263_v12 = vld [vmem:[%s13685_s16 + $0x82] sm:$0xff]  ;;  %v2726_v14 = vsel %vm2722_vm4, %v2661_v2, %v14106_v63 }
 0x1a5   : > { %v3340_v13 = vand.u32 4294901760, %v3339_v16  ;;  %v2855_v56 = vsel %vm2852_vm6, %v2790_v20, %v1958_v0 }
 0x1a6   : > { %v2216_v1 = vpop.permute.xlu1 %2215  ;;  %v14149_v57 = vpop.permute.xlu0 %1449  ;;  %v2920_v16 = vsel %vm2917_vm7, %v2855_v56, %v2214_v45  ;;  %v11070_v45 = vld [vmem:[%s13685_s16 + $0x8f] sm:$0xff] }
 0x1a7   : > { %11824 = vmatmul.mubr.f32.vlgmr.msra.gmra.mrb[0].mxu1 %v3340_v13 }
 0x1a8   : > { %2237 = vrot.lane.b32.xlu1 %v11262_v46, %s13061_s28  ;;  %1983 = vrot.lane.b32.xlu0 %v11198_v58, %s13060_s11  ;;  %v2791_v46 = vsel %vm2787_vm5, %v2726_v14, %v1704_v6  ;;  %v11327_v58 = vld [vmem:[%s13685_s16 + $0x7b] sm:$0xff] }
 0x1a9   : > { %v2856_v7 = vsel %vm2852_vm6, %v2791_v46, %v1960_v8 }
 0x1aa   : > { %v14163_v30 = vpop.permute.xlu1 %1451  ;;  %v2470_v60 = vpop.permute.xlu0 %2469  ;;  %v2921_v63 = vsel %vm2917_vm7, %v2856_v7, %v2216_v1  ;;  %v11328_v1 = vld [vmem:[%s13685_s16 + $0x83] sm:$0xff]  ;;  %v11135_v7 = vld [vmem:[%s13685_s16 + $0x90] sm:$0xff] }
 0x1ab   : > { %v2985_v13 = vsel %vm2982_vm8, %v2920_v16, %v2470_v60 }
 0x1ac   : > { %v3069_v0 = vsel %vm3061_vm9, %v2985_v13, 0  ;;  %2239 = vrot.lane.b32.xlu1 %v11263_v12, %s13061_s28  ;;  %1473 = vrot.lane.b32.xlu0 %v11069_v15, %s13058_s18  ;;  %v11134_v15 = vld [vmem:[%s13685_s16 + $0x88] sm:$0xff] }
 0x1ad   : > { %v14173_v19 = vand.u32 4294901760, %v3069_v0 }
 0x1ae   : > { %v2472_v3 = vpop.permute.xlu1 %2471  ;;  %v1706_v59 = vpop.permute.xlu0 %1705 }
 0x1af   : > { %v14179_v6 = vsub.f32 %v3069_v0, %v14173_v19  ;;  %v2986_v20 = vsel %vm2982_vm8, %v2921_v63, %v2472_v3  ;;  %v11199_v0 = vld [vmem:[%s13685_s16 + $0x89] sm:$0xff] }
 0x1b0   : > { %v3072_v56 = vsel %vm3061_vm9, %v2986_v20, 0  ;;  %1475 = vrot.lane.b32.xlu1 %v11070_v45, %s13058_s18  ;;  %2493 = vrot.lane.b32.xlu0 %v11327_v58, %s13062_s7  ;;  %v10927_v63 = vld [vmem:[%s13685_s16 + $0x25] sm:$0xff] }
 0x1b1   : > { %20497 = vst [vmem:[#allocation23_spill] sm:$0xff] %v14179_v6  ;;  %v14185_v8 = vand.u32 4294901760, %v3072_v56  ;;  %v3348_v12 = vand.u32 4294901760, %v14179_v6 }
 0x1b2   : > { %v1962_v2 = vpop.permute.xlu1 %1961  ;;  %v1708_v16 = vpop.permute.xlu0 %1707 }
 0x1b3   : > { %v14191_v60 = vsub.f32 %v3072_v56, %v14185_v8  ;;  %12156 = vmatprep.mubr.f32.mxu0 %v3348_v12  ;;  %v3349_v14 = vsub.f32 %v14179_v6, %v3348_v12  ;;  %v11264_v56 = vld [vmem:[%s13685_s16 + $0x8a] sm:$0xff] }
 0x1b4   : > { %2495 = vrot.lane.b32.xlu1 %v11328_v1, %s13062_s7  ;;  %1729 = vrot.lane.b32.xlu0 %v11134_v15, %s13059_s6  ;;  %v11200_v12 = vld [vmem:[%s13685_s16 + $0x91] sm:$0xff]  ;;  %v2662_v1 = vsel %vm2657_vm3, %v10927_v63, %v13898_v24 }
 0x1b5   : > { %20498 = vst [vmem:[#allocation24_spill] sm:$0xff] %v14191_v60  ;;  %v3350_v13 = vand.u32 4294901760, %v3349_v14  ;;  %v3358_v46 = vand.u32 4294901760, %v14191_v60  ;;  %v10928_v6 = vld [vmem:[%s13685_s16 + $0x2d] sm:$0xff]  ;;  %v11071_v24 = vld [vmem:[%s13685_s16 + $0x97] sm:$0xff] }
 0x1b6   : > { %v2218_v45 = vpop.permute.xlu1 %2217  ;;  %v1964_v58 = vpop.permute.xlu0 %1963  ;;  %v2663_v63 = vsel %vm2657_vm3, %v10928_v6, %v13896_v23 }
 0x1b7   : > { %11826 = vmatprep.mubr.f32.mxu1 %v3350_v13  ;;  %12157 = vmatmul.mubr.f32.gmra.mrb[2].mxu0 %v3358_v46  ;;  %v3359_v3 = vsub.f32 %v14191_v60, %v3358_v46  ;;  %v2727_v13 = vsel %vm2722_vm4, %v2662_v1, %v14149_v57 }
 0x1b8   : > { %1985 = vrot.lane.b32.xlu1 %v11199_v0, %s13060_s11  ;;  %1731 = vrot.lane.b32.xlu0 %v11135_v7, %s13059_s6  ;;  %v2792_v46 = vsel %vm2787_vm5, %v2727_v13, %v1706_v59  ;;  %v11265_v7 = vld [vmem:[%s13685_s16 + $0x92] sm:$0xff]  ;;  %v2728_v59 = vsel %vm2722_vm4, %v2663_v63, %v14163_v30 }
 0x1b9   : > { %v3360_v20 = vand.u32 4294901760, %v3359_v3  ;;  %v2857_v0 = vsel %vm2852_vm6, %v2792_v46, %v1962_v2 }
 0x1ba   : > { %v2220_v15 = vpop.permute.xlu1 %2219  ;;  %v14207_v14 = vpop.permute.xlu0 %1453  ;;  %v2922_v3 = vsel %vm2917_vm7, %v2857_v0, %v2218_v45  ;;  %v11072_v45 = vld [vmem:[%s13685_s16 + $0x9f] sm:$0xff] }
 0x1bb   : > { %11827 = vmatmul.mubr.f32.gmra.mrb[2].mxu1 %v3360_v20 }
 0x1bc   : > { %2241 = vrot.lane.b32.xlu1 %v11264_v56, %s13061_s28  ;;  %1987 = vrot.lane.b32.xlu0 %v11200_v12, %s13060_s11  ;;  %v2793_v56 = vsel %vm2787_vm5, %v2728_v59, %v1708_v16  ;;  %v11329_v12 = vld [vmem:[%s13685_s16 + $0x8b] sm:$0xff] }
 0x1bd   : > { %v2858_v23 = vsel %vm2852_vm6, %v2793_v56, %v1964_v58 }
 0x1be   : > { %v14221_v60 = vpop.permute.xlu1 %1455  ;;  %v2474_v57 = vpop.permute.xlu0 %2473  ;;  %v2923_v30 = vsel %vm2917_vm7, %v2858_v23, %v2220_v15  ;;  %v11330_v15 = vld [vmem:[%s13685_s16 + $0x93] sm:$0xff]  ;;  %v11137_v23 = vld [vmem:[%s13685_s16 + $0xa0] sm:$0xff] }
 0x1bf   : > { %v2987_v20 = vsel %vm2982_vm8, %v2922_v3, %v2474_v57 }
 0x1c0   : > { %v3075_v2 = vsel %vm3061_vm9, %v2987_v20, 0  ;;  %2243 = vrot.lane.b32.xlu1 %v11265_v7, %s13061_s28  ;;  %1477 = vrot.lane.b32.xlu0 %v11071_v24, %s13058_s18  ;;  %v11136_v24 = vld [vmem:[%s13685_s16 + $0x98] sm:$0xff] }
 0x1c1   : > { %v14231_v6 = vand.u32 4294901760, %v3075_v2 }
 0x1c2   : > { %v2476_v1 = vpop.permute.xlu1 %2475  ;;  %v1710_v13 = vpop.permute.xlu0 %1709 }
 0x1c3   : > { %v14237_v16 = vsub.f32 %v3075_v2, %v14231_v6  ;;  %v2988_v46 = vsel %vm2982_vm8, %v2923_v30, %v2476_v1  ;;  %v11201_v2 = vld [vmem:[%s13685_s16 + $0x99] sm:$0xff] }
 0x1c4   : > { %v3078_v0 = vsel %vm3061_vm9, %v2988_v46, 0  ;;  %1479 = vrot.lane.b32.xlu1 %v11072_v45, %s13058_s18  ;;  %2497 = vrot.lane.b32.xlu0 %v11329_v12, %s13062_s7  ;;  %v10929_v30 = vld [vmem:[%s13685_s16 + $0x35] sm:$0xff] }
 0x1c5   : > { %20499 = vst [vmem:[#allocation25_spill] sm:$0xff] %v14237_v16  ;;  %v14243_v58 = vand.u32 4294901760, %v3078_v0  ;;  %v3368_v7 = vand.u32 4294901760, %v14237_v16 }
 0x1c6   : > { %v1966_v63 = vpop.permute.xlu1 %1965  ;;  %v1712_v3 = vpop.permute.xlu0 %1711 }
 0x1c7   : > { %v14249_v57 = vsub.f32 %v3078_v0, %v14243_v58  ;;  %12159 = vmatprep.mubr.f32.mxu0 %v3368_v7  ;;  %v3369_v59 = vsub.f32 %v14237_v16, %v3368_v7  ;;  %v11266_v0 = vld [vmem:[%s13685_s16 + $0x9a] sm:$0xff] }
 0x1c8   : > { %2499 = vrot.lane.b32.xlu1 %v11330_v15, %s13062_s7  ;;  %1733 = vrot.lane.b32.xlu0 %v11136_v24, %s13059_s6  ;;  %v11202_v7 = vld [vmem:[%s13685_s16 + $0xa1] sm:$0xff]  ;;  %v2664_v15 = vsel %vm2657_vm3, %v10929_v30, %v13906_v28 }
 0x1c9   : > { %20500 = vst [vmem:[#allocation26_spill] sm:$0xff] %v14249_v57  ;;  %v3370_v20 = vand.u32 4294901760, %v3369_v59  ;;  %v3378_v56 = vand.u32 4294901760, %v14249_v57  ;;  %v10930_v16 = vld [vmem:[%s13685_s16 + $0x3d] sm:$0xff]  ;;  %v11073_v28 = vld [vmem:[%s13685_s16 + $0xa7] sm:$0xff] }
 0x1ca   : > { %v2222_v45 = vpop.permute.xlu1 %2221  ;;  %v1968_v12 = vpop.permute.xlu0 %1967  ;;  %v2665_v30 = vsel %vm2657_vm3, %v10930_v16, %v13904_v27 }
 0x1cb   : > { %11829 = vmatprep.mubr.f32.mxu1 %v3370_v20  ;;  %12160 = vmatmul.mubr.f32.gmra.mrb[4].mxu0 %v3378_v56  ;;  %v3379_v1 = vsub.f32 %v14249_v57, %v3378_v56  ;;  %v2729_v20 = vsel %vm2722_vm4, %v2664_v15, %v14207_v14 }
 0x1cc   : > { %1989 = vrot.lane.b32.xlu1 %v11201_v2, %s13060_s11  ;;  %1735 = vrot.lane.b32.xlu0 %v11137_v23, %s13059_s6  ;;  %v2794_v56 = vsel %vm2787_vm5, %v2729_v20, %v1710_v13  ;;  %v11267_v23 = vld [vmem:[%s13685_s16 + $0xa2] sm:$0xff]  ;;  %v2730_v13 = vsel %vm2722_vm4, %v2665_v30, %v14221_v60 }
 0x1cd   : > { %v3380_v46 = vand.u32 4294901760, %v3379_v1  ;;  %v2859_v2 = vsel %vm2852_vm6, %v2794_v56, %v1966_v63 }
 0x1ce   : > { %v2224_v24 = vpop.permute.xlu1 %2223  ;;  %v14265_v59 = vpop.permute.xlu0 %1457  ;;  %v2924_v1 = vsel %vm2917_vm7, %v2859_v2, %v2222_v45  ;;  %v11074_v45 = vld [vmem:[%s13685_s16 + $0xaf] sm:$0xff] }
 0x1cf   : > { %11830 = vmatmul.mubr.f32.gmra.mrb[4].mxu1 %v3380_v46 }
 0x1d0   : > { %2245 = vrot.lane.b32.xlu1 %v11266_v0, %s13061_s28  ;;  %1991 = vrot.lane.b32.xlu0 %v11202_v7, %s13060_s11  ;;  %v2795_v0 = vsel %vm2787_vm5, %v2730_v13, %v1712_v3  ;;  %v11331_v7 = vld [vmem:[%s13685_s16 + $0x9b] sm:$0xff] }
 0x1d1   : > { %v2860_v27 = vsel %vm2852_vm6, %v2795_v0, %v1968_v12 }
 0x1d2   : > { %v14279_v57 = vpop.permute.xlu1 %1459  ;;  %v2478_v14 = vpop.permute.xlu0 %2477  ;;  %v2925_v60 = vsel %vm2917_vm7, %v2860_v27, %v2224_v24  ;;  %v11332_v24 = vld [vmem:[%s13685_s16 + $0xa3] sm:$0xff]  ;;  %v11139_v27 = vld [vmem:[%s13685_s16 + $0xb0] sm:$0xff] }
 0x1d3   : > { %v2989_v46 = vsel %vm2982_vm8, %v2924_v1, %v2478_v14 }
 0x1d4   : > { %v3081_v63 = vsel %vm3061_vm9, %v2989_v46, 0  ;;  %2247 = vrot.lane.b32.xlu1 %v11267_v23, %s13061_s28  ;;  %1481 = vrot.lane.b32.xlu0 %v11073_v28, %s13058_s18  ;;  %v11138_v28 = vld [vmem:[%s13685_s16 + $0xa8] sm:$0xff] }
 0x1d5   : > { %v14289_v16 = vand.u32 4294901760, %v3081_v63 }
 0x1d6   : > { %v2480_v15 = vpop.permute.xlu1 %2479  ;;  %v1714_v20 = vpop.permute.xlu0 %1713 }
 0x1d7   : > { %v14295_v3 = vsub.f32 %v3081_v63, %v14289_v16  ;;  %v2990_v56 = vsel %vm2982_vm8, %v2925_v60, %v2480_v15  ;;  %v11203_v63 = vld [vmem:[%s13685_s16 + $0xa9] sm:$0xff] }
 0x1d8   : > { %v3084_v2 = vsel %vm3061_vm9, %v2990_v56, 0  ;;  %1483 = vrot.lane.b32.xlu1 %v11074_v45, %s13058_s18  ;;  %2501 = vrot.lane.b32.xlu0 %v11331_v7, %s13062_s7  ;;  %v10931_v60 = vld [vmem:[%s13685_s16 + $0x45] sm:$0xff] }
 0x1d9   : > { %20501 = vst [vmem:[#allocation27_spill] sm:$0xff] %v14295_v3  ;;  %v14301_v12 = vand.u32 4294901760, %v3084_v2  ;;  %v3388_v23 = vand.u32 4294901760, %v14295_v3 }
 0x1da   : > { %v1970_v30 = vpop.permute.xlu1 %1969  ;;  %v1716_v1 = vpop.permute.xlu0 %1715 }
 0x1db   : > { %v14307_v14 = vsub.f32 %v3084_v2, %v14301_v12  ;;  %12162 = vmatprep.mubr.f32.mxu0 %v3388_v23  ;;  %v3389_v13 = vsub.f32 %v14295_v3, %v3388_v23  ;;  %v11268_v2 = vld [vmem:[%s13685_s16 + $0xaa] sm:$0xff] }
 0x1dc   : > { %2503 = vrot.lane.b32.xlu1 %v11332_v24, %s13062_s7  ;;  %1737 = vrot.lane.b32.xlu0 %v11138_v28, %s13059_s6  ;;  %v11204_v23 = vld [vmem:[%s13685_s16 + $0xb1] sm:$0xff]  ;;  %v2666_v24 = vsel %vm2657_vm3, %v10931_v60, %v13914_v32 }
 0x1dd   : > { %20502 = vst [vmem:[#allocation28_spill] sm:$0xff] %v14307_v14  ;;  %v3390_v46 = vand.u32 4294901760, %v3389_v13  ;;  %v3398_v0 = vand.u32 4294901760, %v14307_v14  ;;  %v10932_v3 = vld [vmem:[%s13685_s16 + $0x4d] sm:$0xff]  ;;  %v11075_v32 = vld [vmem:[%s13685_s16 + $0xb7] sm:$0xff] }
 0x1de   : > { %v2226_v45 = vpop.permute.xlu1 %2225  ;;  %v1972_v7 = vpop.permute.xlu0 %1971  ;;  %v2667_v60 = vsel %vm2657_vm3, %v10932_v3, %v13912_v31 }
 0x1df   : > { %11832 = vmatprep.mubr.f32.mxu1 %v3390_v46  ;;  %12163 = vmatmul.mubr.f32.gmra.mrb[6].mxu0 %v3398_v0  ;;  %v3399_v15 = vsub.f32 %v14307_v14, %v3398_v0  ;;  %v2731_v46 = vsel %vm2722_vm4, %v2666_v24, %v14265_v59 }
 0x1e0   : > { %1993 = vrot.lane.b32.xlu1 %v11203_v63, %s13060_s11  ;;  %1739 = vrot.lane.b32.xlu0 %v11139_v27, %s13059_s6  ;;  %v2796_v0 = vsel %vm2787_vm5, %v2731_v46, %v1714_v20  ;;  %v11269_v27 = vld [vmem:[%s13685_s16 + $0xb2] sm:$0xff]  ;;  %v2732_v20 = vsel %vm2722_vm4, %v2667_v60, %v14279_v57 }
 0x1e1   : > { %v3400_v56 = vand.u32 4294901760, %v3399_v15  ;;  %v2861_v63 = vsel %vm2852_vm6, %v2796_v0, %v1970_v30 }
 0x1e2   : > { %v2228_v28 = vpop.permute.xlu1 %2227  ;;  %v14323_v13 = vpop.permute.xlu0 %1461  ;;  %v2926_v15 = vsel %vm2917_vm7, %v2861_v63, %v2226_v45  ;;  %v11076_v45 = vld [vmem:[%s13685_s16 + $0xbf] sm:$0xff] }
 0x1e3   : > { %11833 = vmatmul.mubr.f32.gmra.mrb[6].mxu1 %v3400_v56 }
 0x1e4   : > { %2249 = vrot.lane.b32.xlu1 %v11268_v2, %s13061_s28  ;;  %1995 = vrot.lane.b32.xlu0 %v11204_v23, %s13060_s11  ;;  %v2797_v2 = vsel %vm2787_vm5, %v2732_v20, %v1716_v1  ;;  %v11333_v23 = vld [vmem:[%s13685_s16 + $0xab] sm:$0xff] }
 0x1e5   : > { %v2862_v31 = vsel %vm2852_vm6, %v2797_v2, %v1972_v7 }
 0x1e6   : > { %v14337_v14 = vpop.permute.xlu1 %1463  ;;  %v2482_v59 = vpop.permute.xlu0 %2481  ;;  %v2927_v57 = vsel %vm2917_vm7, %v2862_v31, %v2228_v28  ;;  %v11334_v28 = vld [vmem:[%s13685_s16 + $0xb3] sm:$0xff]  ;;  %v11141_v31 = vld [vmem:[%s13685_s16 + $0xc0] sm:$0xff] }
 0x1e7   : > { %v2991_v56 = vsel %vm2982_vm8, %v2926_v15, %v2482_v59 }
 0x1e8   : > { %v3087_v30 = vsel %vm3061_vm9, %v2991_v56, 0  ;;  %2251 = vrot.lane.b32.xlu1 %v11269_v27, %s13061_s28  ;;  %1485 = vrot.lane.b32.xlu0 %v11075_v32, %s13058_s18  ;;  %v11140_v32 = vld [vmem:[%s13685_s16 + $0xb8] sm:$0xff] }
 0x1e9   : > { %v14347_v3 = vand.u32 4294901760, %v3087_v30 }
 0x1ea   : > { %v2484_v24 = vpop.permute.xlu1 %2483  ;;  %v1718_v46 = vpop.permute.xlu0 %1717 }
 0x1eb   : > { %v14353_v1 = vsub.f32 %v3087_v30, %v14347_v3  ;;  %v2992_v0 = vsel %vm2982_vm8, %v2927_v57, %v2484_v24  ;;  %v11205_v30 = vld [vmem:[%s13685_s16 + $0xb9] sm:$0xff] }
 0x1ec   : > { %v3090_v63 = vsel %vm3061_vm9, %v2992_v0, 0  ;;  %1487 = vrot.lane.b32.xlu1 %v11076_v45, %s13058_s18  ;;  %2505 = vrot.lane.b32.xlu0 %v11333_v23, %s13062_s7  ;;  %v10933_v57 = vld [vmem:[%s13685_s16 + $0x55] sm:$0xff] }
 0x1ed   : > { %20503 = vst [vmem:[#allocation29_spill] sm:$0xff] %v14353_v1  ;;  %v14359_v7 = vand.u32 4294901760, %v3090_v63  ;;  %v3408_v27 = vand.u32 4294901760, %v14353_v1 }
 0x1ee   : > { %v1974_v60 = vpop.permute.xlu1 %1973  ;;  %v1720_v15 = vpop.permute.xlu0 %1719 }
 0x1ef   : > { %v14365_v59 = vsub.f32 %v3090_v63, %v14359_v7  ;;  %12165 = vmatprep.mubr.f32.mxu0 %v3408_v27  ;;  %v3409_v20 = vsub.f32 %v14353_v1, %v3408_v27  ;;  %v11270_v63 = vld [vmem:[%s13685_s16 + $0xba] sm:$0xff] }
 0x1f0   : > { %2507 = vrot.lane.b32.xlu1 %v11334_v28, %s13062_s7  ;;  %1741 = vrot.lane.b32.xlu0 %v11140_v32, %s13059_s6  ;;  %v11206_v27 = vld [vmem:[%s13685_s16 + $0xc1] sm:$0xff]  ;;  %v2668_v28 = vsel %vm2657_vm3, %v10933_v57, %v13922_v36 }
 0x1f1   : > { %20504 = vst [vmem:[#allocation30_spill] sm:$0xff] %v14365_v59  ;;  %v3410_v56 = vand.u32 4294901760, %v3409_v20  ;;  %v3418_v2 = vand.u32 4294901760, %v14365_v59  ;;  %v10934_v1 = vld [vmem:[%s13685_s16 + $0x5d] sm:$0xff]  ;;  %v11077_v36 = vld [vmem:[%s13685_s16 + $0xc7] sm:$0xff] }
 0x1f2   : > { %v2230_v45 = vpop.permute.xlu1 %2229  ;;  %v1976_v23 = vpop.permute.xlu0 %1975  ;;  %v2669_v57 = vsel %vm2657_vm3, %v10934_v1, %v13920_v35 }
 0x1f3   : > { %11835 = vmatprep.mubr.f32.mxu1 %v3410_v56  ;;  %12166 = vmatmul.mubr.f32.gmra.mrb[8].mxu0 %v3418_v2  ;;  %v3419_v24 = vsub.f32 %v14365_v59, %v3418_v2  ;;  %v2733_v56 = vsel %vm2722_vm4, %v2668_v28, %v14323_v13 }
 0x1f4   : > { %1997 = vrot.lane.b32.xlu1 %v11205_v30, %s13060_s11  ;;  %1743 = vrot.lane.b32.xlu0 %v11141_v31, %s13059_s6  ;;  %v2798_v2 = vsel %vm2787_vm5, %v2733_v56, %v1718_v46  ;;  %v11271_v31 = vld [vmem:[%s13685_s16 + $0xc2] sm:$0xff]  ;;  %v2734_v46 = vsel %vm2722_vm4, %v2669_v57, %v14337_v14 }
 0x1f5   : > { %v3420_v0 = vand.u32 4294901760, %v3419_v24  ;;  %v2863_v30 = vsel %vm2852_vm6, %v2798_v2, %v1974_v60 }
 0x1f6   : > { %v2232_v32 = vpop.permute.xlu1 %2231  ;;  %v14381_v20 = vpop.permute.xlu0 %1465  ;;  %v2928_v24 = vsel %vm2917_vm7, %v2863_v30, %v2230_v45  ;;  %v11078_v45 = vld [vmem:[%s13685_s16 + $0xcf] sm:$0xff] }
 0x1f7   : > { %11836 = vmatmul.mubr.f32.gmra.mrb[8].mxu1 %v3420_v0 }
 0x1f8   : > { %2253 = vrot.lane.b32.xlu1 %v11270_v63, %s13061_s28  ;;  %1999 = vrot.lane.b32.xlu0 %v11206_v27, %s13060_s11  ;;  %v2799_v63 = vsel %vm2787_vm5, %v2734_v46, %v1720_v15  ;;  %v11335_v27 = vld [vmem:[%s13685_s16 + $0xbb] sm:$0xff] }
 0x1f9   : > { %v2864_v35 = vsel %vm2852_vm6, %v2799_v63, %v1976_v23 }
 0x1fa   : > { %v14395_v59 = vpop.permute.xlu1 %1467  ;;  %v2486_v13 = vpop.permute.xlu0 %2485  ;;  %v2929_v14 = vsel %vm2917_vm7, %v2864_v35, %v2232_v32  ;;  %v11336_v32 = vld [vmem:[%s13685_s16 + $0xc3] sm:$0xff]  ;;  %v11143_v35 = vld [vmem:[%s13685_s16 + $0xd0] sm:$0xff] }
 0x1fb   : > { %v2993_v0 = vsel %vm2982_vm8, %v2928_v24, %v2486_v13 }
 0x1fc   : > { %v3093_v60 = vsel %vm3061_vm9, %v2993_v0, 0  ;;  %2255 = vrot.lane.b32.xlu1 %v11271_v31, %s13061_s28  ;;  %1489 = vrot.lane.b32.xlu0 %v11077_v36, %s13058_s18  ;;  %v11142_v36 = vld [vmem:[%s13685_s16 + $0xc8] sm:$0xff] }
 0x1fd   : > { %v14405_v1 = vand.u32 4294901760, %v3093_v60 }
 0x1fe   : > { %v2488_v28 = vpop.permute.xlu1 %2487  ;;  %v1722_v56 = vpop.permute.xlu0 %1721 }
 0x1ff   : > { %v14411_v15 = vsub.f32 %v3093_v60, %v14405_v1  ;;  %v2994_v2 = vsel %vm2982_vm8, %v2929_v14, %v2488_v28  ;;  %v11207_v60 = vld [vmem:[%s13685_s16 + $0xc9] sm:$0xff] }
 0x200   : > { %v3096_v30 = vsel %vm3061_vm9, %v2994_v2, 0  ;;  %1491 = vrot.lane.b32.xlu1 %v11078_v45, %s13058_s18  ;;  %2509 = vrot.lane.b32.xlu0 %v11335_v27, %s13062_s7  ;;  %v10935_v14 = vld [vmem:[%s13685_s16 + $0x65] sm:$0xff] }
 0x201   : > { %20505 = vst [vmem:[#allocation31_spill] sm:$0xff] %v14411_v15  ;;  %v14417_v23 = vand.u32 4294901760, %v3096_v30  ;;  %v3428_v31 = vand.u32 4294901760, %v14411_v15 }
 0x202   : > { %v1978_v57 = vpop.permute.xlu1 %1977  ;;  %v1724_v24 = vpop.permute.xlu0 %1723 }
 0x203   : > { %v14423_v13 = vsub.f32 %v3096_v30, %v14417_v23  ;;  %12168 = vmatprep.mubr.f32.mxu0 %v3428_v31  ;;  %v3429_v46 = vsub.f32 %v14411_v15, %v3428_v31  ;;  %v11272_v30 = vld [vmem:[%s13685_s16 + $0xca] sm:$0xff] }
 0x204   : > { %2511 = vrot.lane.b32.xlu1 %v11336_v32, %s13062_s7  ;;  %1745 = vrot.lane.b32.xlu0 %v11142_v36, %s13059_s6  ;;  %v11208_v31 = vld [vmem:[%s13685_s16 + $0xd1] sm:$0xff]  ;;  %v2670_v32 = vsel %vm2657_vm3, %v10935_v14, %v13930_v40 }
 0x205   : > { %20506 = vst [vmem:[#allocation32_spill] sm:$0xff] %v14423_v13  ;;  %v3430_v0 = vand.u32 4294901760, %v3429_v46  ;;  %v3438_v63 = vand.u32 4294901760, %v14423_v13  ;;  %v10936_v15 = vld [vmem:[%s13685_s16 + $0x6d] sm:$0xff]  ;;  %v11079_v40 = vld [vmem:[%s13685_s16 + $0xd7] sm:$0xff] }
 0x206   : > { %v2234_v45 = vpop.permute.xlu1 %2233  ;;  %v1980_v27 = vpop.permute.xlu0 %1979  ;;  %v2671_v14 = vsel %vm2657_vm3, %v10936_v15, %v13928_v39 }
 0x207   : > { %11838 = vmatprep.mubr.f32.mxu1 %v3430_v0  ;;  %12169 = vmatmul.mubr.f32.gmra.mrb[10].mxu0 %v3438_v63  ;;  %v3439_v28 = vsub.f32 %v14423_v13, %v3438_v63  ;;  %v2735_v0 = vsel %vm2722_vm4, %v2670_v32, %v14381_v20 }
 0x208   : > { %2001 = vrot.lane.b32.xlu1 %v11207_v60, %s13060_s11  ;;  %1747 = vrot.lane.b32.xlu0 %v11143_v35, %s13059_s6  ;;  %v2800_v63 = vsel %vm2787_vm5, %v2735_v0, %v1722_v56  ;;  %v11273_v35 = vld [vmem:[%s13685_s16 + $0xd2] sm:$0xff]  ;;  %v2736_v56 = vsel %vm2722_vm4, %v2671_v14, %v14395_v59 }
 0x209   : > { %v3440_v2 = vand.u32 4294901760, %v3439_v28  ;;  %v2865_v60 = vsel %vm2852_vm6, %v2800_v63, %v1978_v57 }
 0x20a   : > { %v2236_v36 = vpop.permute.xlu1 %2235  ;;  %v14439_v46 = vpop.permute.xlu0 %1469  ;;  %v2930_v28 = vsel %vm2917_vm7, %v2865_v60, %v2234_v45  ;;  %v11080_v45 = vld [vmem:[%s13685_s16 + $0xdf] sm:$0xff] }
 0x20b   : > { %11839 = vmatmul.mubr.f32.gmra.mrb[10].mxu1 %v3440_v2 }
 0x20c   : > { %2257 = vrot.lane.b32.xlu1 %v11272_v30, %s13061_s28  ;;  %2003 = vrot.lane.b32.xlu0 %v11208_v31, %s13060_s11  ;;  %v2801_v30 = vsel %vm2787_vm5, %v2736_v56, %v1724_v24  ;;  %v11337_v31 = vld [vmem:[%s13685_s16 + $0xcb] sm:$0xff] }
 0x20d   : > { %v2866_v39 = vsel %vm2852_vm6, %v2801_v30, %v1980_v27 }
 0x20e   : > { %v14453_v13 = vpop.permute.xlu1 %1471  ;;  %v2490_v20 = vpop.permute.xlu0 %2489  ;;  %v2931_v59 = vsel %vm2917_vm7, %v2866_v39, %v2236_v36  ;;  %v11338_v36 = vld [vmem:[%s13685_s16 + $0xd3] sm:$0xff]  ;;  %v11145_v39 = vld [vmem:[%s13685_s16 + $0xe0] sm:$0xff] }
 0x20f   : > { %v2995_v2 = vsel %vm2982_vm8, %v2930_v28, %v2490_v20 }
 0x210   : > { %v3099_v57 = vsel %vm3061_vm9, %v2995_v2, 0  ;;  %2259 = vrot.lane.b32.xlu1 %v11273_v35, %s13061_s28  ;;  %1493 = vrot.lane.b32.xlu0 %v11079_v40, %s13058_s18  ;;  %v11144_v40 = vld [vmem:[%s13685_s16 + $0xd8] sm:$0xff] }
 0x211   : > { %v14463_v15 = vand.u32 4294901760, %v3099_v57 }
 0x212   : > { %v2492_v32 = vpop.permute.xlu1 %2491  ;;  %v1726_v0 = vpop.permute.xlu0 %1725 }
 0x213   : > { %v14469_v24 = vsub.f32 %v3099_v57, %v14463_v15  ;;  %v2996_v63 = vsel %vm2982_vm8, %v2931_v59, %v2492_v32  ;;  %v11209_v57 = vld [vmem:[%s13685_s16 + $0xd9] sm:$0xff] }
 0x214   : > { %v3102_v60 = vsel %vm3061_vm9, %v2996_v63, 0  ;;  %1495 = vrot.lane.b32.xlu1 %v11080_v45, %s13058_s18  ;;  %2513 = vrot.lane.b32.xlu0 %v11337_v31, %s13062_s7  ;;  %v10937_v59 = vld [vmem:[%s13685_s16 + $0x75] sm:$0xff] }
 0x215   : > { %20507 = vst [vmem:[#allocation33_spill] sm:$0xff] %v14469_v24  ;;  %v14475_v27 = vand.u32 4294901760, %v3102_v60  ;;  %v3448_v35 = vand.u32 4294901760, %v14469_v24 }
 0x216   : > { %v1982_v14 = vpop.permute.xlu1 %1981  ;;  %v1728_v28 = vpop.permute.xlu0 %1727 }
 0x217   : > { %v14481_v20 = vsub.f32 %v3102_v60, %v14475_v27  ;;  %12171 = vmatprep.mubr.f32.mxu0 %v3448_v35  ;;  %v3449_v56 = vsub.f32 %v14469_v24, %v3448_v35  ;;  %v11274_v60 = vld [vmem:[%s13685_s16 + $0xda] sm:$0xff] }
 0x218   : > { %2515 = vrot.lane.b32.xlu1 %v11338_v36, %s13062_s7  ;;  %1749 = vrot.lane.b32.xlu0 %v11144_v40, %s13059_s6  ;;  %v11210_v35 = vld [vmem:[%s13685_s16 + $0xe1] sm:$0xff]  ;;  %v2672_v36 = vsel %vm2657_vm3, %v10937_v59, %v13938_v44 }
 0x219   : > { %20508 = vst [vmem:[#allocation34_spill] sm:$0xff] %v14481_v20  ;;  %v3450_v2 = vand.u32 4294901760, %v3449_v56  ;;  %v3458_v30 = vand.u32 4294901760, %v14481_v20  ;;  %v10938_v24 = vld [vmem:[%s13685_s16 + $0x7d] sm:$0xff]  ;;  %v11081_v44 = vld [vmem:[%s13685_s16 + $0xe7] sm:$0xff] }
 0x21a   : > { %v2238_v45 = vpop.permute.xlu1 %2237  ;;  %v1984_v31 = vpop.permute.xlu0 %1983  ;;  %v2673_v59 = vsel %vm2657_vm3, %v10938_v24, %v13936_v43 }
 0x21b   : > { %11841 = vmatprep.mubr.f32.mxu1 %v3450_v2  ;;  %12172 = vmatmul.mubr.f32.gmra.mrb[12].mxu0 %v3458_v30  ;;  %v3459_v32 = vsub.f32 %v14481_v20, %v3458_v30  ;;  %v2737_v2 = vsel %vm2722_vm4, %v2672_v36, %v14439_v46 }
 0x21c   : > { %2005 = vrot.lane.b32.xlu1 %v11209_v57, %s13060_s11  ;;  %1751 = vrot.lane.b32.xlu0 %v11145_v39, %s13059_s6  ;;  %v2802_v30 = vsel %vm2787_vm5, %v2737_v2, %v1726_v0  ;;  %v11275_v39 = vld [vmem:[%s13685_s16 + $0xe2] sm:$0xff]  ;;  %v2738_v0 = vsel %vm2722_vm4, %v2673_v59, %v14453_v13 }
 0x21d   : > { %v3460_v63 = vand.u32 4294901760, %v3459_v32  ;;  %v2867_v57 = vsel %vm2852_vm6, %v2802_v30, %v1982_v14 }
 0x21e   : > { %v2240_v40 = vpop.permute.xlu1 %2239  ;;  %v14497_v56 = vpop.permute.xlu0 %1473  ;;  %v2932_v32 = vsel %vm2917_vm7, %v2867_v57, %v2238_v45  ;;  %v11082_v45 = vld [vmem:[%s13685_s16 + $0xef] sm:$0xff] }
 0x21f   : > { %11842 = vmatmul.mubr.f32.gmra.mrb[12].mxu1 %v3460_v63 }
 0x220   : > { %2261 = vrot.lane.b32.xlu1 %v11274_v60, %s13061_s28  ;;  %2007 = vrot.lane.b32.xlu0 %v11210_v35, %s13060_s11  ;;  %v2803_v60 = vsel %vm2787_vm5, %v2738_v0, %v1728_v28  ;;  %v11339_v35 = vld [vmem:[%s13685_s16 + $0xdb] sm:$0xff] }
 0x221   : > { %v2868_v43 = vsel %vm2852_vm6, %v2803_v60, %v1984_v31 }
 0x222   : > { %v14511_v20 = vpop.permute.xlu1 %1475  ;;  %v2494_v46 = vpop.permute.xlu0 %2493  ;;  %v2933_v13 = vsel %vm2917_vm7, %v2868_v43, %v2240_v40  ;;  %v11340_v40 = vld [vmem:[%s13685_s16 + $0xe3] sm:$0xff]  ;;  %v11147_v43 = vld [vmem:[%s13685_s16 + $0xf0] sm:$0xff] }
 0x223   : > { %v2997_v63 = vsel %vm2982_vm8, %v2932_v32, %v2494_v46 }
 0x224   : > { %v3105_v14 = vsel %vm3061_vm9, %v2997_v63, 0  ;;  %2263 = vrot.lane.b32.xlu1 %v11275_v39, %s13061_s28  ;;  %1497 = vrot.lane.b32.xlu0 %v11081_v44, %s13058_s18  ;;  %v11146_v44 = vld [vmem:[%s13685_s16 + $0xe8] sm:$0xff] }
 0x225   : > { %v14521_v24 = vand.u32 4294901760, %v3105_v14 }
 0x226   : > { %v2496_v36 = vpop.permute.xlu1 %2495  ;;  %v1730_v2 = vpop.permute.xlu0 %1729 }
 0x227   : > { %v14527_v28 = vsub.f32 %v3105_v14, %v14521_v24  ;;  %v2998_v30 = vsel %vm2982_vm8, %v2933_v13, %v2496_v36  ;;  %v11211_v14 = vld [vmem:[%s13685_s16 + $0xe9] sm:$0xff] }
 0x228   : > { %v3108_v57 = vsel %vm3061_vm9, %v2998_v30, 0  ;;  %1499 = vrot.lane.b32.xlu1 %v11082_v45, %s13058_s18  ;;  %2517 = vrot.lane.b32.xlu0 %v11339_v35, %s13062_s7  ;;  %v10939_v13 = vld [vmem:[%s13685_s16 + $0x85] sm:$0xff] }
 0x229   : > { %20509 = vst [vmem:[#allocation35_spill] sm:$0xff] %v14527_v28  ;;  %v14533_v31 = vand.u32 4294901760, %v3108_v57  ;;  %v3468_v39 = vand.u32 4294901760, %v14527_v28 }
 0x22a   : > { %v1986_v59 = vpop.permute.xlu1 %1985  ;;  %v1732_v32 = vpop.permute.xlu0 %1731 }
 0x22b   : > { %v14539_v46 = vsub.f32 %v3108_v57, %v14533_v31  ;;  %12174 = vmatprep.mubr.f32.mxu0 %v3468_v39  ;;  %v3469_v0 = vsub.f32 %v14527_v28, %v3468_v39  ;;  %v11276_v57 = vld [vmem:[%s13685_s16 + $0xea] sm:$0xff] }
 0x22c   : > { %2519 = vrot.lane.b32.xlu1 %v11340_v40, %s13062_s7  ;;  %1753 = vrot.lane.b32.xlu0 %v11146_v44, %s13059_s6  ;;  %v11212_v39 = vld [vmem:[%s13685_s16 + $0xf1] sm:$0xff]  ;;  %v2674_v40 = vsel %vm2657_vm3, %v10939_v13, %v13946_v48 }
 0x22d   : > { %20510 = vst [vmem:[#allocation36_spill] sm:$0xff] %v14539_v46  ;;  %v3470_v63 = vand.u32 4294901760, %v3469_v0  ;;  %v3478_v60 = vand.u32 4294901760, %v14539_v46  ;;  %v10940_v28 = vld [vmem:[%s13685_s16 + $0x8d] sm:$0xff]  ;;  %v11083_v48 = vld [vmem:[%s13685_s16 + $0xf7] sm:$0xff] }
 0x22e   : > { %v2242_v45 = vpop.permute.xlu1 %2241  ;;  %v1988_v35 = vpop.permute.xlu0 %1987  ;;  %v2675_v13 = vsel %vm2657_vm3, %v10940_v28, %v13944_v47 }
 0x22f   : > { %11844 = vmatprep.mubr.f32.mxu1 %v3470_v63  ;;  %12175 = vmatmul.mubr.f32.gmra.mrb[14].mxu0 %v3478_v60  ;;  %v3479_v36 = vsub.f32 %v14539_v46, %v3478_v60  ;;  %v2739_v63 = vsel %vm2722_vm4, %v2674_v40, %v14497_v56 }
 0x230   : > { %2009 = vrot.lane.b32.xlu1 %v11211_v14, %s13060_s11  ;;  %1755 = vrot.lane.b32.xlu0 %v11147_v43, %s13059_s6  ;;  %v2804_v60 = vsel %vm2787_vm5, %v2739_v63, %v1730_v2  ;;  %v11277_v43 = vld [vmem:[%s13685_s16 + $0xf2] sm:$0xff]  ;;  %v2740_v2 = vsel %vm2722_vm4, %v2675_v13, %v14511_v20 }
 0x231   : > { %v3480_v30 = vand.u32 4294901760, %v3479_v36  ;;  %v2869_v14 = vsel %vm2852_vm6, %v2804_v60, %v1986_v59 }
 0x232   : > { %v2244_v44 = vpop.permute.xlu1 %2243  ;;  %v14555_v0 = vpop.permute.xlu0 %1477  ;;  %v2934_v36 = vsel %vm2917_vm7, %v2869_v14, %v2242_v45  ;;  %v11084_v45 = vld [vmem:[%s13685_s16 + $0xff] sm:$0xff] }
 0x233   : > { %11845 = vmatmul.mubr.f32.gmra.mrb[14].mxu1 %v3480_v30 }
 0x234   : > { %2265 = vrot.lane.b32.xlu1 %v11276_v57, %s13061_s28  ;;  %2011 = vrot.lane.b32.xlu0 %v11212_v39, %s13060_s11  ;;  %v2805_v57 = vsel %vm2787_vm5, %v2740_v2, %v1732_v32  ;;  %v11341_v39 = vld [vmem:[%s13685_s16 + $0xeb] sm:$0xff] }
 0x235   : > { %v2870_v47 = vsel %vm2852_vm6, %v2805_v57, %v1988_v35 }
 0x236   : > { %v14569_v46 = vpop.permute.xlu1 %1479  ;;  %v2498_v56 = vpop.permute.xlu0 %2497  ;;  %v2935_v20 = vsel %vm2917_vm7, %v2870_v47, %v2244_v44  ;;  %v11342_v44 = vld [vmem:[%s13685_s16 + $0xf3] sm:$0xff]  ;;  %v11149_v47 = vld [vmem:[%s13685_s16 + $0x100] sm:$0xff] }
 0x237   : > { %v2999_v30 = vsel %vm2982_vm8, %v2934_v36, %v2498_v56 }
 0x238   : > { %v3111_v59 = vsel %vm3061_vm9, %v2999_v30, 0  ;;  %2267 = vrot.lane.b32.xlu1 %v11277_v43, %s13061_s28  ;;  %1501 = vrot.lane.b32.xlu0 %v11083_v48, %s13058_s18  ;;  %v11148_v48 = vld [vmem:[%s13685_s16 + $0xf8] sm:$0xff] }
 0x239   : > { %v14579_v28 = vand.u32 4294901760, %v3111_v59 }
 0x23a   : > { %v2500_v40 = vpop.permute.xlu1 %2499  ;;  %v1734_v63 = vpop.permute.xlu0 %1733 }
 0x23b   : > { %v14585_v32 = vsub.f32 %v3111_v59, %v14579_v28  ;;  %v3000_v60 = vsel %vm2982_vm8, %v2935_v20, %v2500_v40  ;;  %v11213_v59 = vld [vmem:[%s13685_s16 + $0xf9] sm:$0xff] }
 0x23c   : > { %v3114_v14 = vsel %vm3061_vm9, %v3000_v60, 0  ;;  %1503 = vrot.lane.b32.xlu1 %v11084_v45, %s13058_s18  ;;  %2521 = vrot.lane.b32.xlu0 %v11341_v39, %s13062_s7  ;;  %v10941_v20 = vld [vmem:[%s13685_s16 + $0x95] sm:$0xff] }
 0x23d   : > { %20511 = vst [vmem:[#allocation37_spill] sm:$0xff] %v14585_v32  ;;  %v14591_v35 = vand.u32 4294901760, %v3114_v14  ;;  %v3488_v43 = vand.u32 4294901760, %v14585_v32 }
 0x23e   : > { %v1990_v13 = vpop.permute.xlu1 %1989  ;;  %v1736_v36 = vpop.permute.xlu0 %1735 }
 0x23f   : > { %v14597_v56 = vsub.f32 %v3114_v14, %v14591_v35  ;;  %12177 = vmatprep.mubr.f32.mxu0 %v3488_v43  ;;  %v3489_v2 = vsub.f32 %v14585_v32, %v3488_v43  ;;  %v11278_v14 = vld [vmem:[%s13685_s16 + $0xfa] sm:$0xff] }
 0x240   : > { %2523 = vrot.lane.b32.xlu1 %v11342_v44, %s13062_s7  ;;  %1757 = vrot.lane.b32.xlu0 %v11148_v48, %s13059_s6  ;;  %v11214_v43 = vld [vmem:[%s13685_s16 + $0x101] sm:$0xff]  ;;  %v2676_v44 = vsel %vm2657_vm3, %v10941_v20, %v13954_v54 }
 0x241   : > { %20512 = vst [vmem:[#allocation38_spill] sm:$0xff] %v14597_v56  ;;  %v3490_v30 = vand.u32 4294901760, %v3489_v2  ;;  %v3498_v57 = vand.u32 4294901760, %v14597_v56  ;;  %v10942_v32 = vld [vmem:[%s13685_s16 + $0x9d] sm:$0xff]  ;;  %v11085_v54 = vld [vmem:[%s13685_s16 + $0x107] sm:$0xff] }
 0x242   : > { %v2246_v45 = vpop.permute.xlu1 %2245  ;;  %v1992_v39 = vpop.permute.xlu0 %1991  ;;  %v2677_v20 = vsel %vm2657_vm3, %v10942_v32, %v13952_v51 }
 0x243   : > { %11847 = vmatprep.mubr.f32.mxu1 %v3490_v30  ;;  %12178 = vmatmul.mubr.f32.gmra.mrb[16].mxu0 %v3498_v57  ;;  %v3499_v40 = vsub.f32 %v14597_v56, %v3498_v57  ;;  %v2741_v30 = vsel %vm2722_vm4, %v2676_v44, %v14555_v0 }
 0x244   : > { %2013 = vrot.lane.b32.xlu1 %v11213_v59, %s13060_s11  ;;  %1759 = vrot.lane.b32.xlu0 %v11149_v47, %s13059_s6  ;;  %v2806_v57 = vsel %vm2787_vm5, %v2741_v30, %v1734_v63  ;;  %v11279_v47 = vld [vmem:[%s13685_s16 + $0x102] sm:$0xff]  ;;  %v2742_v63 = vsel %vm2722_vm4, %v2677_v20, %v14569_v46 }
 0x245   : > { %v3500_v60 = vand.u32 4294901760, %v3499_v40  ;;  %v2871_v59 = vsel %vm2852_vm6, %v2806_v57, %v1990_v13 }
 0x246   : > { %v2248_v48 = vpop.permute.xlu1 %2247  ;;  %v14613_v2 = vpop.permute.xlu0 %1481  ;;  %v2936_v40 = vsel %vm2917_vm7, %v2871_v59, %v2246_v45  ;;  %v11086_v45 = vld [vmem:[%s13685_s16 + $0x10f] sm:$0xff] }
 0x247   : > { %11848 = vmatmul.mubr.f32.gmra.mrb[16].mxu1 %v3500_v60 }
 0x248   : > { %2269 = vrot.lane.b32.xlu1 %v11278_v14, %s13061_s28  ;;  %2015 = vrot.lane.b32.xlu0 %v11214_v43, %s13060_s11  ;;  %v2807_v14 = vsel %vm2787_vm5, %v2742_v63, %v1736_v36  ;;  %v11343_v43 = vld [vmem:[%s13685_s16 + $0xfb] sm:$0xff] }
 0x249   : > { %v2872_v51 = vsel %vm2852_vm6, %v2807_v14, %v1992_v39 }
 0x24a   : > { %v14627_v56 = vpop.permute.xlu1 %1483  ;;  %v2502_v0 = vpop.permute.xlu0 %2501  ;;  %v2937_v46 = vsel %vm2917_vm7, %v2872_v51, %v2248_v48  ;;  %v11344_v48 = vld [vmem:[%s13685_s16 + $0x103] sm:$0xff]  ;;  %v11151_v51 = vld [vmem:[%s13685_s16 + $0x110] sm:$0xff] }
 0x24b   : > { %v3001_v60 = vsel %vm2982_vm8, %v2936_v40, %v2502_v0 }
 0x24c   : > { %v3117_v13 = vsel %vm3061_vm9, %v3001_v60, 0  ;;  %2271 = vrot.lane.b32.xlu1 %v11279_v47, %s13061_s28  ;;  %1505 = vrot.lane.b32.xlu0 %v11085_v54, %s13058_s18  ;;  %v11150_v54 = vld [vmem:[%s13685_s16 + $0x108] sm:$0xff] }
 0x24d   : > { %v14637_v32 = vand.u32 4294901760, %v3117_v13 }
 0x24e   : > { %v2504_v44 = vpop.permute.xlu1 %2503  ;;  %v1738_v30 = vpop.permute.xlu0 %1737 }
 0x24f   : > { %v14643_v36 = vsub.f32 %v3117_v13, %v14637_v32  ;;  %v3002_v57 = vsel %vm2982_vm8, %v2937_v46, %v2504_v44  ;;  %v11215_v13 = vld [vmem:[%s13685_s16 + $0x109] sm:$0xff] }
 0x250   : > { %v3120_v59 = vsel %vm3061_vm9, %v3002_v57, 0  ;;  %1507 = vrot.lane.b32.xlu1 %v11086_v45, %s13058_s18  ;;  %2525 = vrot.lane.b32.xlu0 %v11343_v43, %s13062_s7  ;;  %v10943_v46 = vld [vmem:[%s13685_s16 + $0xa5] sm:$0xff] }
 0x251   : > { %20513 = vst [vmem:[#allocation39_spill] sm:$0xff] %v14643_v36  ;;  %v14649_v39 = vand.u32 4294901760, %v3120_v59  ;;  %v3508_v47 = vand.u32 4294901760, %v14643_v36 }
 0x252   : > { %v1994_v20 = vpop.permute.xlu1 %1993  ;;  %v1740_v40 = vpop.permute.xlu0 %1739 }
 0x253   : > { %v14655_v0 = vsub.f32 %v3120_v59, %v14649_v39  ;;  %12180 = vmatprep.mubr.f32.mxu0 %v3508_v47  ;;  %v3509_v63 = vsub.f32 %v14643_v36, %v3508_v47  ;;  %v11280_v59 = vld [vmem:[%s13685_s16 + $0x10a] sm:$0xff] }
 0x254   : > { %2527 = vrot.lane.b32.xlu1 %v11344_v48, %s13062_s7  ;;  %1761 = vrot.lane.b32.xlu0 %v11150_v54, %s13059_s6  ;;  %v11216_v47 = vld [vmem:[%s13685_s16 + $0x111] sm:$0xff]  ;;  %v2678_v48 = vsel %vm2657_vm3, %v10943_v46, %v13962_v4 }
 0x255   : > { %20514 = vst [vmem:[#allocation40_spill] sm:$0xff] %v14655_v0  ;;  %v3510_v60 = vand.u32 4294901760, %v3509_v63  ;;  %v3518_v14 = vand.u32 4294901760, %v14655_v0  ;;  %v10944_v36 = vld [vmem:[%s13685_s16 + $0xad] sm:$0xff]  ;;  %v11087_v4 = vld [vmem:[%s13685_s16 + $0x117] sm:$0xff] }
 0x256   : > { %v2250_v45 = vpop.permute.xlu1 %2249  ;;  %v1996_v43 = vpop.permute.xlu0 %1995  ;;  %v2679_v46 = vsel %vm2657_vm3, %v10944_v36, %v13960_v62 }
 0x257   : > { %11850 = vmatprep.mubr.f32.mxu1 %v3510_v60  ;;  %12181 = vmatmul.mubr.f32.gmra.mrb[18].mxu0 %v3518_v14  ;;  %v3519_v44 = vsub.f32 %v14655_v0, %v3518_v14  ;;  %v2743_v60 = vsel %vm2722_vm4, %v2678_v48, %v14613_v2 }
 0x258   : > { %2017 = vrot.lane.b32.xlu1 %v11215_v13, %s13060_s11  ;;  %1763 = vrot.lane.b32.xlu0 %v11151_v51, %s13059_s6  ;;  %v2808_v14 = vsel %vm2787_vm5, %v2743_v60, %v1738_v30  ;;  %v11281_v51 = vld [vmem:[%s13685_s16 + $0x112] sm:$0xff]  ;;  %v2744_v30 = vsel %vm2722_vm4, %v2679_v46, %v14627_v56 }
 0x259   : > { %v3520_v57 = vand.u32 4294901760, %v3519_v44  ;;  %v2873_v13 = vsel %vm2852_vm6, %v2808_v14, %v1994_v20 }
 0x25a   : > { %v2252_v54 = vpop.permute.xlu1 %2251  ;;  %v14671_v63 = vpop.permute.xlu0 %1485  ;;  %v2938_v44 = vsel %vm2917_vm7, %v2873_v13, %v2250_v45  ;;  %v11088_v45 = vld [vmem:[%s13685_s16 + $0x11f] sm:$0xff] }
 0x25b   : > { %11851 = vmatmul.mubr.f32.gmra.mrb[18].mxu1 %v3520_v57 }
 0x25c   : > { %2273 = vrot.lane.b32.xlu1 %v11280_v59, %s13061_s28  ;;  %2019 = vrot.lane.b32.xlu0 %v11216_v47, %s13060_s11  ;;  %v2809_v59 = vsel %vm2787_vm5, %v2744_v30, %v1740_v40  ;;  %v11345_v47 = vld [vmem:[%s13685_s16 + $0x10b] sm:$0xff] }
 0x25d   : > { %v2874_v62 = vsel %vm2852_vm6, %v2809_v59, %v1996_v43 }
 0x25e   : > { %v14685_v0 = vpop.permute.xlu1 %1487  ;;  %v2506_v2 = vpop.permute.xlu0 %2505  ;;  %v2939_v56 = vsel %vm2917_vm7, %v2874_v62, %v2252_v54  ;;  %v11346_v54 = vld [vmem:[%s13685_s16 + $0x113] sm:$0xff]  ;;  %v11153_v62 = vld [vmem:[%s13685_s16 + $0x120] sm:$0xff] }
 0x25f   : > { %v3003_v57 = vsel %vm2982_vm8, %v2938_v44, %v2506_v2 }
 0x260   : > { %v3123_v20 = vsel %vm3061_vm9, %v3003_v57, 0  ;;  %2275 = vrot.lane.b32.xlu1 %v11281_v51, %s13061_s28  ;;  %1509 = vrot.lane.b32.xlu0 %v11087_v4, %s13058_s18  ;;  %v11152_v4 = vld [vmem:[%s13685_s16 + $0x118] sm:$0xff] }
 0x261   : > { %v14695_v36 = vand.u32 4294901760, %v3123_v20 }
 0x262   : > { %v2508_v48 = vpop.permute.xlu1 %2507  ;;  %v1742_v60 = vpop.permute.xlu0 %1741 }
 0x263   : > { %v14701_v40 = vsub.f32 %v3123_v20, %v14695_v36  ;;  %v3004_v14 = vsel %vm2982_vm8, %v2939_v56, %v2508_v48  ;;  %v11217_v20 = vld [vmem:[%s13685_s16 + $0x119] sm:$0xff] }
 0x264   : > { %v3126_v13 = vsel %vm3061_vm9, %v3004_v14, 0  ;;  %1511 = vrot.lane.b32.xlu1 %v11088_v45, %s13058_s18  ;;  %2529 = vrot.lane.b32.xlu0 %v11345_v47, %s13062_s7  ;;  %v10945_v56 = vld [vmem:[%s13685_s16 + $0xb5] sm:$0xff] }
 0x265   : > { %20515 = vst [vmem:[#allocation41_spill] sm:$0xff] %v14701_v40  ;;  %v14707_v43 = vand.u32 4294901760, %v3126_v13  ;;  %v3528_v51 = vand.u32 4294901760, %v14701_v40 }
 0x266   : > { %v1998_v46 = vpop.permute.xlu1 %1997  ;;  %v1744_v44 = vpop.permute.xlu0 %1743 }
 0x267   : > { %v14713_v2 = vsub.f32 %v3126_v13, %v14707_v43  ;;  %12183 = vmatprep.mubr.f32.mxu0 %v3528_v51  ;;  %v3529_v30 = vsub.f32 %v14701_v40, %v3528_v51  ;;  %v11282_v13 = vld [vmem:[%s13685_s16 + $0x11a] sm:$0xff] }
 0x268   : > { %2531 = vrot.lane.b32.xlu1 %v11346_v54, %s13062_s7  ;;  %1765 = vrot.lane.b32.xlu0 %v11152_v4, %s13059_s6  ;;  %v11218_v51 = vld [vmem:[%s13685_s16 + $0x121] sm:$0xff]  ;;  %v2680_v54 = vsel %vm2657_vm3, %v10945_v56, %v13970_v11 }
 0x269   : > { %20516 = vst [vmem:[#allocation42_spill] sm:$0xff] %v14713_v2  ;;  %v3530_v57 = vand.u32 4294901760, %v3529_v30  ;;  %v3538_v59 = vand.u32 4294901760, %v14713_v2  ;;  %v10946_v40 = vld [vmem:[%s13685_s16 + $0xbd] sm:$0xff]  ;;  %v11089_v11 = vld [vmem:[%s13685_s16 + $0x127] sm:$0xff] }
 0x26a   : > { %v2254_v45 = vpop.permute.xlu1 %2253  ;;  %v2000_v47 = vpop.permute.xlu0 %1999  ;;  %v2681_v56 = vsel %vm2657_vm3, %v10946_v40, %v13968_v10 }
 0x26b   : > { %11853 = vmatprep.mubr.f32.mxu1 %v3530_v57  ;;  %12184 = vmatmul.mubr.f32.gmra.mrb[20].mxu0 %v3538_v59  ;;  %v3539_v48 = vsub.f32 %v14713_v2, %v3538_v59  ;;  %v2745_v57 = vsel %vm2722_vm4, %v2680_v54, %v14671_v63 }
 0x26c   : > { %2021 = vrot.lane.b32.xlu1 %v11217_v20, %s13060_s11  ;;  %1767 = vrot.lane.b32.xlu0 %v11153_v62, %s13059_s6  ;;  %v2810_v59 = vsel %vm2787_vm5, %v2745_v57, %v1742_v60  ;;  %v11283_v62 = vld [vmem:[%s13685_s16 + $0x122] sm:$0xff]  ;;  %v2746_v60 = vsel %vm2722_vm4, %v2681_v56, %v14685_v0 }
 0x26d   : > { %v3540_v14 = vand.u32 4294901760, %v3539_v48  ;;  %v2875_v20 = vsel %vm2852_vm6, %v2810_v59, %v1998_v46 }
 0x26e   : > { %v2256_v4 = vpop.permute.xlu1 %2255  ;;  %v14729_v30 = vpop.permute.xlu0 %1489  ;;  %v2940_v48 = vsel %vm2917_vm7, %v2875_v20, %v2254_v45  ;;  %v11090_v45 = vld [vmem:[%s13685_s16 + $0x12f] sm:$0xff] }
 0x26f   : > { %11854 = vmatmul.mubr.f32.gmra.mrb[20].mxu1 %v3540_v14 }
 0x270   : > { %2277 = vrot.lane.b32.xlu1 %v11282_v13, %s13061_s28  ;;  %2023 = vrot.lane.b32.xlu0 %v11218_v51, %s13060_s11  ;;  %v2811_v13 = vsel %vm2787_vm5, %v2746_v60, %v1744_v44  ;;  %v11347_v51 = vld [vmem:[%s13685_s16 + $0x11b] sm:$0xff] }
 0x271   : > { %v2876_v10 = vsel %vm2852_vm6, %v2811_v13, %v2000_v47 }
 0x272   : > { %v14743_v2 = vpop.permute.xlu1 %1491  ;;  %v2510_v63 = vpop.permute.xlu0 %2509  ;;  %v2941_v0 = vsel %vm2917_vm7, %v2876_v10, %v2256_v4  ;;  %v11348_v4 = vld [vmem:[%s13685_s16 + $0x123] sm:$0xff]  ;;  %v11155_v10 = vld [vmem:[%s13685_s16 + $0x130] sm:$0xff] }
 0x273   : > { %v3005_v14 = vsel %vm2982_vm8, %v2940_v48, %v2510_v63 }
 0x274   : > { %v3129_v46 = vsel %vm3061_vm9, %v3005_v14, 0  ;;  %2279 = vrot.lane.b32.xlu1 %v11283_v62, %s13061_s28  ;;  %1513 = vrot.lane.b32.xlu0 %v11089_v11, %s13058_s18  ;;  %v11154_v11 = vld [vmem:[%s13685_s16 + $0x128] sm:$0xff] }
 0x275   : > { %v14753_v40 = vand.u32 4294901760, %v3129_v46 }
 0x276   : > { %v2512_v54 = vpop.permute.xlu1 %2511  ;;  %v1746_v57 = vpop.permute.xlu0 %1745 }
 0x277   : > { %v14759_v44 = vsub.f32 %v3129_v46, %v14753_v40  ;;  %v3006_v59 = vsel %vm2982_vm8, %v2941_v0, %v2512_v54  ;;  %v11219_v46 = vld [vmem:[%s13685_s16 + $0x129] sm:$0xff] }
 0x278   : > { %v3132_v20 = vsel %vm3061_vm9, %v3006_v59, 0  ;;  %1515 = vrot.lane.b32.xlu1 %v11090_v45, %s13058_s18  ;;  %2533 = vrot.lane.b32.xlu0 %v11347_v51, %s13062_s7  ;;  %v10947_v0 = vld [vmem:[%s13685_s16 + $0xc5] sm:$0xff] }
 0x279   : > { %20517 = vst [vmem:[#allocation43_spill] sm:$0xff] %v14759_v44  ;;  %v14765_v47 = vand.u32 4294901760, %v3132_v20  ;;  %v3548_v62 = vand.u32 4294901760, %v14759_v44 }
 0x27a   : > { %v2002_v56 = vpop.permute.xlu1 %2001  ;;  %v1748_v48 = vpop.permute.xlu0 %1747 }
 0x27b   : > { %v14771_v63 = vsub.f32 %v3132_v20, %v14765_v47  ;;  %12186 = vmatprep.mubr.f32.mxu0 %v3548_v62  ;;  %v3549_v60 = vsub.f32 %v14759_v44, %v3548_v62  ;;  %v11284_v20 = vld [vmem:[%s13685_s16 + $0x12a] sm:$0xff] }
 0x27c   : > { %2535 = vrot.lane.b32.xlu1 %v11348_v4, %s13062_s7  ;;  %1769 = vrot.lane.b32.xlu0 %v11154_v11, %s13059_s6  ;;  %v11220_v62 = vld [vmem:[%s13685_s16 + $0x131] sm:$0xff]  ;;  %v2682_v4 = vsel %vm2657_vm3, %v10947_v0, %v13978_v18 }
 0x27d   : > { %20518 = vst [vmem:[#allocation44_spill] sm:$0xff] %v14771_v63  ;;  %v3550_v14 = vand.u32 4294901760, %v3549_v60  ;;  %v3558_v13 = vand.u32 4294901760, %v14771_v63  ;;  %v10948_v44 = vld [vmem:[%s13685_s16 + $0xcd] sm:$0xff]  ;;  %v11091_v18 = vld [vmem:[%s13685_s16 + $0x137] sm:$0xff] }
 0x27e   : > { %v2258_v45 = vpop.permute.xlu1 %2257  ;;  %v2004_v51 = vpop.permute.xlu0 %2003  ;;  %v2683_v0 = vsel %vm2657_vm3, %v10948_v44, %v13976_v17 }
 0x27f   : > { %11856 = vmatprep.mubr.f32.mxu1 %v3550_v14  ;;  %12187 = vmatmul.mubr.f32.gmra.mrb[22].mxu0 %v3558_v13  ;;  %v3559_v54 = vsub.f32 %v14771_v63, %v3558_v13  ;;  %v2747_v14 = vsel %vm2722_vm4, %v2682_v4, %v14729_v30 }
 0x280   : > { %2025 = vrot.lane.b32.xlu1 %v11219_v46, %s13060_s11  ;;  %1771 = vrot.lane.b32.xlu0 %v11155_v10, %s13059_s6  ;;  %v2812_v13 = vsel %vm2787_vm5, %v2747_v14, %v1746_v57  ;;  %v11285_v10 = vld [vmem:[%s13685_s16 + $0x132] sm:$0xff]  ;;  %v2748_v57 = vsel %vm2722_vm4, %v2683_v0, %v14743_v2 }
 0x281   : > { %v3560_v59 = vand.u32 4294901760, %v3559_v54  ;;  %v2877_v46 = vsel %vm2852_vm6, %v2812_v13, %v2002_v56 }
 0x282   : > { %v2260_v11 = vpop.permute.xlu1 %2259  ;;  %v14787_v60 = vpop.permute.xlu0 %1493  ;;  %v2942_v54 = vsel %vm2917_vm7, %v2877_v46, %v2258_v45  ;;  %v11092_v45 = vld [vmem:[%s13685_s16 + $0x13f] sm:$0xff] }
 0x283   : > { %11857 = vmatmul.mubr.f32.gmra.mrb[22].mxu1 %v3560_v59 }
 0x284   : > { %2281 = vrot.lane.b32.xlu1 %v11284_v20, %s13061_s28  ;;  %2027 = vrot.lane.b32.xlu0 %v11220_v62, %s13060_s11  ;;  %v2813_v20 = vsel %vm2787_vm5, %v2748_v57, %v1748_v48  ;;  %v11349_v62 = vld [vmem:[%s13685_s16 + $0x12b] sm:$0xff] }
 0x285   : > { %v2878_v17 = vsel %vm2852_vm6, %v2813_v20, %v2004_v51 }
 0x286   : > { %v14801_v63 = vpop.permute.xlu1 %1495  ;;  %v2514_v30 = vpop.permute.xlu0 %2513  ;;  %v2943_v2 = vsel %vm2917_vm7, %v2878_v17, %v2260_v11  ;;  %v11350_v11 = vld [vmem:[%s13685_s16 + $0x133] sm:$0xff]  ;;  %v11157_v17 = vld [vmem:[%s13685_s16 + $0x140] sm:$0xff] }
 0x287   : > { %v3007_v59 = vsel %vm2982_vm8, %v2942_v54, %v2514_v30 }
 0x288   : > { %v3135_v56 = vsel %vm3061_vm9, %v3007_v59, 0  ;;  %2283 = vrot.lane.b32.xlu1 %v11285_v10, %s13061_s28  ;;  %1517 = vrot.lane.b32.xlu0 %v11091_v18, %s13058_s18  ;;  %v11156_v18 = vld [vmem:[%s13685_s16 + $0x138] sm:$0xff] }
 0x289   : > { %v14811_v44 = vand.u32 4294901760, %v3135_v56 }
 0x28a   : > { %v2516_v4 = vpop.permute.xlu1 %2515  ;;  %v1750_v14 = vpop.permute.xlu0 %1749 }
 0x28b   : > { %v14817_v48 = vsub.f32 %v3135_v56, %v14811_v44  ;;  %v3008_v13 = vsel %vm2982_vm8, %v2943_v2, %v2516_v4  ;;  %v11221_v56 = vld [vmem:[%s13685_s16 + $0x139] sm:$0xff] }
 0x28c   : > { %v3138_v46 = vsel %vm3061_vm9, %v3008_v13, 0  ;;  %1519 = vrot.lane.b32.xlu1 %v11092_v45, %s13058_s18  ;;  %2537 = vrot.lane.b32.xlu0 %v11349_v62, %s13062_s7  ;;  %v10949_v2 = vld [vmem:[%s13685_s16 + $0xd5] sm:$0xff] }
 0x28d   : > { %20519 = vst [vmem:[#allocation45_spill] sm:$0xff] %v14817_v48  ;;  %v14823_v51 = vand.u32 4294901760, %v3138_v46  ;;  %v3568_v10 = vand.u32 4294901760, %v14817_v48 }
 0x28e   : > { %v2006_v0 = vpop.permute.xlu1 %2005  ;;  %v1752_v54 = vpop.permute.xlu0 %1751 }
 0x28f   : > { %v14829_v30 = vsub.f32 %v3138_v46, %v14823_v51  ;;  %12189 = vmatprep.mubr.f32.mxu0 %v3568_v10  ;;  %v3569_v57 = vsub.f32 %v14817_v48, %v3568_v10  ;;  %v11286_v46 = vld [vmem:[%s13685_s16 + $0x13a] sm:$0xff] }
 0x290   : > { %2539 = vrot.lane.b32.xlu1 %v11350_v11, %s13062_s7  ;;  %1773 = vrot.lane.b32.xlu0 %v11156_v18, %s13059_s6  ;;  %v11222_v10 = vld [vmem:[%s13685_s16 + $0x141] sm:$0xff]  ;;  %v2684_v11 = vsel %vm2657_vm3, %v10949_v2, %v13986_v26 }
 0x291   : > { %20520 = vst [vmem:[#allocation46_spill] sm:$0xff] %v14829_v30  ;;  %v3570_v59 = vand.u32 4294901760, %v3569_v57  ;;  %v3578_v20 = vand.u32 4294901760, %v14829_v30  ;;  %v10950_v48 = vld [vmem:[%s13685_s16 + $0xdd] sm:$0xff]  ;;  %v11093_v26 = vld [vmem:[%s13685_s16 + $0x147] sm:$0xff] }
 0x292   : > { %v2262_v45 = vpop.permute.xlu1 %2261  ;;  %v2008_v62 = vpop.permute.xlu0 %2007  ;;  %v2685_v2 = vsel %vm2657_vm3, %v10950_v48, %v13984_v25 }
 0x293   : > { %11859 = vmatprep.mubr.f32.mxu1 %v3570_v59  ;;  %12190 = vmatmul.mubr.f32.gmra.mrb[24].mxu0 %v3578_v20  ;;  %v3579_v4 = vsub.f32 %v14829_v30, %v3578_v20  ;;  %v2749_v59 = vsel %vm2722_vm4, %v2684_v11, %v14787_v60 }
 0x294   : > { %2029 = vrot.lane.b32.xlu1 %v11221_v56, %s13060_s11  ;;  %1775 = vrot.lane.b32.xlu0 %v11157_v17, %s13059_s6  ;;  %v2814_v20 = vsel %vm2787_vm5, %v2749_v59, %v1750_v14  ;;  %v11287_v17 = vld [vmem:[%s13685_s16 + $0x142] sm:$0xff]  ;;  %v2750_v14 = vsel %vm2722_vm4, %v2685_v2, %v14801_v63 }
 0x295   : > { %v3580_v13 = vand.u32 4294901760, %v3579_v4  ;;  %v2879_v56 = vsel %vm2852_vm6, %v2814_v20, %v2006_v0 }
 0x296   : > { %v2264_v18 = vpop.permute.xlu1 %2263  ;;  %v14845_v57 = vpop.permute.xlu0 %1497  ;;  %v2944_v4 = vsel %vm2917_vm7, %v2879_v56, %v2262_v45  ;;  %v11094_v45 = vld [vmem:[%s13685_s16 + $0x14f] sm:$0xff] }
 0x297   : > { %11860 = vmatmul.mubr.f32.gmra.mrb[24].mxu1 %v3580_v13 }
 0x298   : > { %2285 = vrot.lane.b32.xlu1 %v11286_v46, %s13061_s28  ;;  %2031 = vrot.lane.b32.xlu0 %v11222_v10, %s13060_s11  ;;  %v2815_v46 = vsel %vm2787_vm5, %v2750_v14, %v1752_v54  ;;  %v11351_v10 = vld [vmem:[%s13685_s16 + $0x13b] sm:$0xff] }
 0x299   : > { %v2880_v25 = vsel %vm2852_vm6, %v2815_v46, %v2008_v62 }
 0x29a   : > { %v14859_v30 = vpop.permute.xlu1 %1499  ;;  %v2518_v60 = vpop.permute.xlu0 %2517  ;;  %v2945_v63 = vsel %vm2917_vm7, %v2880_v25, %v2264_v18  ;;  %v11352_v18 = vld [vmem:[%s13685_s16 + $0x143] sm:$0xff]  ;;  %v11159_v25 = vld [vmem:[%s13685_s16 + $0x150] sm:$0xff] }
 0x29b   : > { %v3009_v13 = vsel %vm2982_vm8, %v2944_v4, %v2518_v60 }
 0x29c   : > { %v3141_v0 = vsel %vm3061_vm9, %v3009_v13, 0  ;;  %2287 = vrot.lane.b32.xlu1 %v11287_v17, %s13061_s28  ;;  %1521 = vrot.lane.b32.xlu0 %v11093_v26, %s13058_s18  ;;  %v11158_v26 = vld [vmem:[%s13685_s16 + $0x148] sm:$0xff] }
 0x29d   : > { %v14869_v48 = vand.u32 4294901760, %v3141_v0 }
 0x29e   : > { %v2520_v11 = vpop.permute.xlu1 %2519  ;;  %v1754_v59 = vpop.permute.xlu0 %1753 }
 0x29f   : > { %v14875_v54 = vsub.f32 %v3141_v0, %v14869_v48  ;;  %v3010_v20 = vsel %vm2982_vm8, %v2945_v63, %v2520_v11  ;;  %v11223_v0 = vld [vmem:[%s13685_s16 + $0x149] sm:$0xff] }
 0x2a0   : > { %v3144_v56 = vsel %vm3061_vm9, %v3010_v20, 0  ;;  %1523 = vrot.lane.b32.xlu1 %v11094_v45, %s13058_s18  ;;  %2541 = vrot.lane.b32.xlu0 %v11351_v10, %s13062_s7  ;;  %v10951_v63 = vld [vmem:[%s13685_s16 + $0xe5] sm:$0xff] }
 0x2a1   : > { %20521 = vst [vmem:[#allocation47_spill] sm:$0xff] %v14875_v54  ;;  %v14881_v62 = vand.u32 4294901760, %v3144_v56  ;;  %v3588_v17 = vand.u32 4294901760, %v14875_v54 }
 0x2a2   : > { %v2010_v2 = vpop.permute.xlu1 %2009  ;;  %v1756_v4 = vpop.permute.xlu0 %1755 }
 0x2a3   : > { %v14887_v60 = vsub.f32 %v3144_v56, %v14881_v62  ;;  %12192 = vmatprep.mubr.f32.mxu0 %v3588_v17  ;;  %v3589_v14 = vsub.f32 %v14875_v54, %v3588_v17  ;;  %v11288_v56 = vld [vmem:[%s13685_s16 + $0x14a] sm:$0xff] }
 0x2a4   : > { %2543 = vrot.lane.b32.xlu1 %v11352_v18, %s13062_s7  ;;  %1777 = vrot.lane.b32.xlu0 %v11158_v26, %s13059_s6  ;;  %v11224_v17 = vld [vmem:[%s13685_s16 + $0x151] sm:$0xff]  ;;  %v2686_v18 = vsel %vm2657_vm3, %v10951_v63, %v13994_v34 }
 0x2a5   : > { %20522 = vst [vmem:[#allocation48_spill] sm:$0xff] %v14887_v60  ;;  %v3590_v13 = vand.u32 4294901760, %v3589_v14  ;;  %v3598_v46 = vand.u32 4294901760, %v14887_v60  ;;  %v10952_v54 = vld [vmem:[%s13685_s16 + $0xed] sm:$0xff]  ;;  %v11095_v34 = vld [vmem:[%s13685_s16 + $0x157] sm:$0xff] }
 0x2a6   : > { %v2266_v45 = vpop.permute.xlu1 %2265  ;;  %v2012_v10 = vpop.permute.xlu0 %2011  ;;  %v2687_v63 = vsel %vm2657_vm3, %v10952_v54, %v13992_v33 }
 0x2a7   : > { %11862 = vmatprep.mubr.f32.mxu1 %v3590_v13  ;;  %12193 = vmatmul.mubr.f32.gmra.mrb[26].mxu0 %v3598_v46  ;;  %v3599_v11 = vsub.f32 %v14887_v60, %v3598_v46  ;;  %v2751_v13 = vsel %vm2722_vm4, %v2686_v18, %v14845_v57 }
 0x2a8   : > { %2033 = vrot.lane.b32.xlu1 %v11223_v0, %s13060_s11  ;;  %1779 = vrot.lane.b32.xlu0 %v11159_v25, %s13059_s6  ;;  %v2816_v46 = vsel %vm2787_vm5, %v2751_v13, %v1754_v59  ;;  %v11289_v25 = vld [vmem:[%s13685_s16 + $0x152] sm:$0xff]  ;;  %v2752_v59 = vsel %vm2722_vm4, %v2687_v63, %v14859_v30 }
 0x2a9   : > { %v3600_v20 = vand.u32 4294901760, %v3599_v11  ;;  %v2881_v0 = vsel %vm2852_vm6, %v2816_v46, %v2010_v2 }
 0x2aa   : > { %v2268_v26 = vpop.permute.xlu1 %2267  ;;  %v14903_v14 = vpop.permute.xlu0 %1501  ;;  %v2946_v11 = vsel %vm2917_vm7, %v2881_v0, %v2266_v45  ;;  %v11096_v45 = vld [vmem:[%s13685_s16 + $0x15f] sm:$0xff] }
 0x2ab   : > { %11863 = vmatmul.mubr.f32.gmra.mrb[26].mxu1 %v3600_v20 }
 0x2ac   : > { %2289 = vrot.lane.b32.xlu1 %v11288_v56, %s13061_s28  ;;  %2035 = vrot.lane.b32.xlu0 %v11224_v17, %s13060_s11  ;;  %v2817_v56 = vsel %vm2787_vm5, %v2752_v59, %v1756_v4  ;;  %v11353_v17 = vld [vmem:[%s13685_s16 + $0x14b] sm:$0xff] }
 0x2ad   : > { %v2882_v33 = vsel %vm2852_vm6, %v2817_v56, %v2012_v10 }
 0x2ae   : > { %v14917_v60 = vpop.permute.xlu1 %1503  ;;  %v2522_v57 = vpop.permute.xlu0 %2521  ;;  %v2947_v30 = vsel %vm2917_vm7, %v2882_v33, %v2268_v26  ;;  %v11354_v26 = vld [vmem:[%s13685_s16 + $0x153] sm:$0xff]  ;;  %v11161_v33 = vld [vmem:[%s13685_s16 + $0x160] sm:$0xff] }
 0x2af   : > { %v3011_v20 = vsel %vm2982_vm8, %v2946_v11, %v2522_v57 }
 0x2b0   : > { %v3147_v2 = vsel %vm3061_vm9, %v3011_v20, 0  ;;  %2291 = vrot.lane.b32.xlu1 %v11289_v25, %s13061_s28  ;;  %1525 = vrot.lane.b32.xlu0 %v11095_v34, %s13058_s18  ;;  %v11160_v34 = vld [vmem:[%s13685_s16 + $0x158] sm:$0xff] }
 0x2b1   : > { %v14927_v54 = vand.u32 4294901760, %v3147_v2 }
 0x2b2   : > { %v2524_v18 = vpop.permute.xlu1 %2523  ;;  %v1758_v13 = vpop.permute.xlu0 %1757 }
 0x2b3   : > { %v14933_v4 = vsub.f32 %v3147_v2, %v14927_v54  ;;  %v3012_v46 = vsel %vm2982_vm8, %v2947_v30, %v2524_v18  ;;  %v11225_v2 = vld [vmem:[%s13685_s16 + $0x159] sm:$0xff] }
 0x2b4   : > { %v3150_v0 = vsel %vm3061_vm9, %v3012_v46, 0  ;;  %1527 = vrot.lane.b32.xlu1 %v11096_v45, %s13058_s18  ;;  %2545 = vrot.lane.b32.xlu0 %v11353_v17, %s13062_s7  ;;  %v10953_v30 = vld [vmem:[%s13685_s16 + $0xf5] sm:$0xff] }
 0x2b5   : > { %20523 = vst [vmem:[#allocation49_spill] sm:$0xff] %v14933_v4  ;;  %v14939_v10 = vand.u32 4294901760, %v3150_v0  ;;  %v3608_v25 = vand.u32 4294901760, %v14933_v4 }
 0x2b6   : > { %v2014_v63 = vpop.permute.xlu1 %2013  ;;  %v1760_v11 = vpop.permute.xlu0 %1759 }
 0x2b7   : > { %v14945_v57 = vsub.f32 %v3150_v0, %v14939_v10  ;;  %12195 = vmatprep.mubr.f32.mxu0 %v3608_v25  ;;  %v3609_v59 = vsub.f32 %v14933_v4, %v3608_v25  ;;  %v11290_v0 = vld [vmem:[%s13685_s16 + $0x15a] sm:$0xff] }
 0x2b8   : > { %2547 = vrot.lane.b32.xlu1 %v11354_v26, %s13062_s7  ;;  %1781 = vrot.lane.b32.xlu0 %v11160_v34, %s13059_s6  ;;  %v11226_v25 = vld [vmem:[%s13685_s16 + $0x161] sm:$0xff]  ;;  %v2688_v26 = vsel %vm2657_vm3, %v10953_v30, %v14002_v42 }
 0x2b9   : > { %20524 = vst [vmem:[#allocation50_spill] sm:$0xff] %v14945_v57  ;;  %v3610_v20 = vand.u32 4294901760, %v3609_v59  ;;  %v3618_v56 = vand.u32 4294901760, %v14945_v57  ;;  %v10954_v4 = vld [vmem:[%s13685_s16 + $0xfd] sm:$0xff]  ;;  %v11097_v42 = vld [vmem:[%s13685_s16 + $0x167] sm:$0xff] }
 0x2ba   : > { %v2270_v45 = vpop.permute.xlu1 %2269  ;;  %v2016_v17 = vpop.permute.xlu0 %2015  ;;  %v2689_v30 = vsel %vm2657_vm3, %v10954_v4, %v14000_v41 }
 0x2bb   : > { %11865 = vmatprep.mubr.f32.mxu1 %v3610_v20  ;;  %12196 = vmatmul.mubr.f32.gmra.mrb[28].mxu0 %v3618_v56  ;;  %v3619_v18 = vsub.f32 %v14945_v57, %v3618_v56  ;;  %v2753_v20 = vsel %vm2722_vm4, %v2688_v26, %v14903_v14 }
 0x2bc   : > { %2037 = vrot.lane.b32.xlu1 %v11225_v2, %s13060_s11  ;;  %1783 = vrot.lane.b32.xlu0 %v11161_v33, %s13059_s6  ;;  %v2818_v56 = vsel %vm2787_vm5, %v2753_v20, %v1758_v13  ;;  %v11291_v33 = vld [vmem:[%s13685_s16 + $0x162] sm:$0xff]  ;;  %v2754_v13 = vsel %vm2722_vm4, %v2689_v30, %v14917_v60 }
 0x2bd   : > { %v3620_v46 = vand.u32 4294901760, %v3619_v18  ;;  %v2883_v2 = vsel %vm2852_vm6, %v2818_v56, %v2014_v63 }
 0x2be   : > { %v2272_v34 = vpop.permute.xlu1 %2271  ;;  %v14961_v59 = vpop.permute.xlu0 %1505  ;;  %v2948_v18 = vsel %vm2917_vm7, %v2883_v2, %v2270_v45  ;;  %v11098_v45 = vld [vmem:[%s13685_s16 + $0x16f] sm:$0xff] }
 0x2bf   : > { %11866 = vmatmul.mubr.f32.gmra.mrb[28].mxu1 %v3620_v46 }
 0x2c0   : > { %2293 = vrot.lane.b32.xlu1 %v11290_v0, %s13061_s28  ;;  %2039 = vrot.lane.b32.xlu0 %v11226_v25, %s13060_s11  ;;  %v2819_v0 = vsel %vm2787_vm5, %v2754_v13, %v1760_v11  ;;  %v11355_v25 = vld [vmem:[%s13685_s16 + $0x15b] sm:$0xff] }
 0x2c1   : > { %v2884_v41 = vsel %vm2852_vm6, %v2819_v0, %v2016_v17 }
 0x2c2   : > { %v14975_v57 = vpop.permute.xlu1 %1507  ;;  %v2526_v14 = vpop.permute.xlu0 %2525  ;;  %v2949_v60 = vsel %vm2917_vm7, %v2884_v41, %v2272_v34  ;;  %v11356_v34 = vld [vmem:[%s13685_s16 + $0x163] sm:$0xff]  ;;  %v11163_v41 = vld [vmem:[%s13685_s16 + $0x170] sm:$0xff] }
 0x2c3   : > { %v3013_v46 = vsel %vm2982_vm8, %v2948_v18, %v2526_v14 }
 0x2c4   : > { %v3153_v63 = vsel %vm3061_vm9, %v3013_v46, 0  ;;  %2295 = vrot.lane.b32.xlu1 %v11291_v33, %s13061_s28  ;;  %1529 = vrot.lane.b32.xlu0 %v11097_v42, %s13058_s18  ;;  %v11162_v42 = vld [vmem:[%s13685_s16 + $0x168] sm:$0xff] }
 0x2c5   : > { %v14985_v4 = vand.u32 4294901760, %v3153_v63 }
 0x2c6   : > { %v2528_v26 = vpop.permute.xlu1 %2527  ;;  %v1762_v20 = vpop.permute.xlu0 %1761 }
 0x2c7   : > { %v14991_v11 = vsub.f32 %v3153_v63, %v14985_v4  ;;  %v3014_v56 = vsel %vm2982_vm8, %v2949_v60, %v2528_v26  ;;  %v11227_v63 = vld [vmem:[%s13685_s16 + $0x169] sm:$0xff] }
 0x2c8   : > { %v3156_v2 = vsel %vm3061_vm9, %v3014_v56, 0  ;;  %1531 = vrot.lane.b32.xlu1 %v11098_v45, %s13058_s18  ;;  %2549 = vrot.lane.b32.xlu0 %v11355_v25, %s13062_s7  ;;  %v10955_v60 = vld [vmem:[%s13685_s16 + $0x105] sm:$0xff] }
 0x2c9   : > { %20525 = vst [vmem:[#allocation51_spill] sm:$0xff] %v14991_v11  ;;  %v14997_v17 = vand.u32 4294901760, %v3156_v2  ;;  %v3628_v33 = vand.u32 4294901760, %v14991_v11 }
 0x2ca   : > { %v2018_v30 = vpop.permute.xlu1 %2017  ;;  %v1764_v18 = vpop.permute.xlu0 %1763 }
 0x2cb   : > { %v15003_v14 = vsub.f32 %v3156_v2, %v14997_v17  ;;  %12198 = vmatprep.mubr.f32.mxu0 %v3628_v33  ;;  %v3629_v13 = vsub.f32 %v14991_v11, %v3628_v33  ;;  %v11292_v2 = vld [vmem:[%s13685_s16 + $0x16a] sm:$0xff] }
 0x2cc   : > { %2551 = vrot.lane.b32.xlu1 %v11356_v34, %s13062_s7  ;;  %1785 = vrot.lane.b32.xlu0 %v11162_v42, %s13059_s6  ;;  %v11228_v33 = vld [vmem:[%s13685_s16 + $0x171] sm:$0xff]  ;;  %v2690_v34 = vsel %vm2657_vm3, %v10955_v60, %v14010_v50 }
 0x2cd   : > { %20526 = vst [vmem:[#allocation52_spill] sm:$0xff] %v15003_v14  ;;  %v3630_v46 = vand.u32 4294901760, %v3629_v13  ;;  %v3638_v0 = vand.u32 4294901760, %v15003_v14  ;;  %v10956_v11 = vld [vmem:[%s13685_s16 + $0x10d] sm:$0xff]  ;;  %v11099_v50 = vld [vmem:[%s13685_s16 + $0x177] sm:$0xff] }
 0x2ce   : > { %v2274_v45 = vpop.permute.xlu1 %2273  ;;  %v2020_v25 = vpop.permute.xlu0 %2019  ;;  %v2691_v60 = vsel %vm2657_vm3, %v10956_v11, %v14008_v49 }
 0x2cf   : > { %11868 = vmatprep.mubr.f32.mxu1 %v3630_v46  ;;  %12199 = vmatmul.mubr.f32.gmra.mrb[30].mxu0 %v3638_v0  ;;  %v3639_v26 = vsub.f32 %v15003_v14, %v3638_v0  ;;  %v2755_v46 = vsel %vm2722_vm4, %v2690_v34, %v14961_v59 }
 0x2d0   : > { %2041 = vrot.lane.b32.xlu1 %v11227_v63, %s13060_s11  ;;  %1787 = vrot.lane.b32.xlu0 %v11163_v41, %s13059_s6  ;;  %v2820_v0 = vsel %vm2787_vm5, %v2755_v46, %v1762_v20  ;;  %v11293_v41 = vld [vmem:[%s13685_s16 + $0x172] sm:$0xff]  ;;  %v2756_v20 = vsel %vm2722_vm4, %v2691_v60, %v14975_v57 }
 0x2d1   : > { %v3640_v56 = vand.u32 4294901760, %v3639_v26  ;;  %v2885_v63 = vsel %vm2852_vm6, %v2820_v0, %v2018_v30 }
 0x2d2   : > { %v2276_v42 = vpop.permute.xlu1 %2275  ;;  %v15019_v13 = vpop.permute.xlu0 %1509  ;;  %v2950_v26 = vsel %vm2917_vm7, %v2885_v63, %v2274_v45  ;;  %v11100_v45 = vld [vmem:[%s13685_s16 + $0x17f] sm:$0xff] }
 0x2d3   : > { %11869 = vmatmul.mubr.f32.gmra.mrb[30].mxu1 %v3640_v56 }
 0x2d4   : > { %2297 = vrot.lane.b32.xlu1 %v11292_v2, %s13061_s28  ;;  %2043 = vrot.lane.b32.xlu0 %v11228_v33, %s13060_s11  ;;  %v2821_v2 = vsel %vm2787_vm5, %v2756_v20, %v1764_v18  ;;  %v11357_v33 = vld [vmem:[%s13685_s16 + $0x16b] sm:$0xff] }
 0x2d5   : > { %v2886_v49 = vsel %vm2852_vm6, %v2821_v2, %v2020_v25 }
 0x2d6   : > { %v15033_v14 = vpop.permute.xlu1 %1511  ;;  %v2530_v59 = vpop.permute.xlu0 %2529  ;;  %v2951_v57 = vsel %vm2917_vm7, %v2886_v49, %v2276_v42  ;;  %v11358_v42 = vld [vmem:[%s13685_s16 + $0x173] sm:$0xff]  ;;  %v11165_v49 = vld [vmem:[%s13685_s16 + $0x180] sm:$0xff] }
 0x2d7   : > { %v3015_v56 = vsel %vm2982_vm8, %v2950_v26, %v2530_v59 }
 0x2d8   : > { %v3159_v30 = vsel %vm3061_vm9, %v3015_v56, 0  ;;  %2299 = vrot.lane.b32.xlu1 %v11293_v41, %s13061_s28  ;;  %1533 = vrot.lane.b32.xlu0 %v11099_v50, %s13058_s18  ;;  %v11164_v50 = vld [vmem:[%s13685_s16 + $0x178] sm:$0xff] }
 0x2d9   : > { %v15043_v11 = vand.u32 4294901760, %v3159_v30 }
 0x2da   : > { %v2532_v34 = vpop.permute.xlu1 %2531  ;;  %v1766_v46 = vpop.permute.xlu0 %1765 }
 0x2db   : > { %20527 = vst [vmem:[#allocation53_spill] sm:$0xff] %v15043_v11  ;;  %v15049_v18 = vsub.f32 %v3159_v30, %v15043_v11  ;;  %v3016_v0 = vsel %vm2982_vm8, %v2951_v57, %v2532_v34  ;;  %v11229_v30 = vld [vmem:[%s13685_s16 + $0x179] sm:$0xff] }
 0x2dc   : > { %v3162_v63 = vsel %vm3061_vm9, %v3016_v0, 0  ;;  %1535 = vrot.lane.b32.xlu1 %v11100_v45, %s13058_s18  ;;  %2553 = vrot.lane.b32.xlu0 %v11357_v33, %s13062_s7  ;;  %v10957_v57 = vld [vmem:[%s13685_s16 + $0x115] sm:$0xff] }
 0x2dd   : > { %20528 = vst [vmem:[#allocation54_spill] sm:$0xff] %v15049_v18  ;;  %v15055_v25 = vand.u32 4294901760, %v3162_v63  ;;  %v3648_v41 = vand.u32 4294901760, %v15049_v18 }
 0x2de   : > { %v2022_v60 = vpop.permute.xlu1 %2021  ;;  %v1768_v26 = vpop.permute.xlu0 %1767 }
 0x2df   : > { %20529 = vst [vmem:[#allocation55_spill] sm:$0xff] %v15055_v25  ;;  %v15061_v59 = vsub.f32 %v3162_v63, %v15055_v25  ;;  %12201 = vmatprep.mubr.f32.mxu0 %v3648_v41  ;;  %v3649_v20 = vsub.f32 %v15049_v18, %v3648_v41  ;;  %v11294_v63 = vld [vmem:[%s13685_s16 + $0x17a] sm:$0xff] }
 0x2e0   : > { %2555 = vrot.lane.b32.xlu1 %v11358_v42, %s13062_s7  ;;  %1789 = vrot.lane.b32.xlu0 %v11164_v50, %s13059_s6  ;;  %v11230_v41 = vld [vmem:[%s13685_s16 + $0x181] sm:$0xff]  ;;  %v2692_v42 = vsel %vm2657_vm3, %v10957_v57, %v14018_v9  ;;  %v11037_v9 = vld [vmem:[%s13685_s16 + $0x18e] sm:$0xff] }
 0x2e1   : > { %20530 = vst [vmem:[#allocation56_spill] sm:$0xff] %v15061_v59  ;;  %v3650_v56 = vand.u32 4294901760, %v3649_v20  ;;  %v3658_v2 = vand.u32 4294901760, %v15061_v59  ;;  %v10958_v18 = vld [vmem:[%s13685_s16 + $0x11d] sm:$0xff] }
 0x2e2   : > { %v2278_v45 = vpop.permute.xlu1 %2277  ;;  %v2024_v33 = vpop.permute.xlu0 %2023  ;;  %v2693_v57 = vsel %vm2657_vm3, %v10958_v18, %v14016_v5 }
 0x2e3   : > { %11871 = vmatprep.mubr.f32.mxu1 %v3650_v56  ;;  %12202 = vmatmul.mubr.f32.gmra.mrb[32].mxu0 %v3658_v2  ;;  %v3659_v34 = vsub.f32 %v15061_v59, %v3658_v2  ;;  %v2757_v56 = vsel %vm2722_vm4, %v2692_v42, %v15019_v13 }
 0x2e4   : > { %2045 = vrot.lane.b32.xlu1 %v11229_v30, %s13060_s11  ;;  %1791 = vrot.lane.b32.xlu0 %v11165_v49, %s13059_s6  ;;  %v2822_v2 = vsel %vm2787_vm5, %v2757_v56, %v1766_v46  ;;  %v11101_v49 = vld [vmem:[%s13685_s16 + $0x187] sm:$0xff]  ;;  %v2758_v46 = vsel %vm2722_vm4, %v2693_v57, %v15033_v14 }
 0x2e5   : > { %v3660_v0 = vand.u32 4294901760, %v3659_v34  ;;  %v2887_v30 = vsel %vm2852_vm6, %v2822_v2, %v2022_v60 }
 0x2e6   : > { %v2280_v50 = vpop.permute.xlu1 %2279  ;;  %v15077_v20 = vpop.permute.xlu0 %1513  ;;  %v2952_v34 = vsel %vm2917_vm7, %v2887_v30, %v2278_v45  ;;  %v11359_v45 = vld [vmem:[%s13685_s16 + $0x17b] sm:$0xff] }
 0x2e7   : > { %11872 = vmatmul.mubr.f32.gmra.mrb[32].mxu1 %v3660_v0 }
 0x2e8   : > { %2301 = vrot.lane.b32.xlu1 %v11294_v63, %s13061_s28  ;;  %2047 = vrot.lane.b32.xlu0 %v11230_v41, %s13060_s11  ;;  %v2823_v63 = vsel %vm2787_vm5, %v2758_v46, %v1768_v26  ;;  %v11295_v41 = vld [vmem:[%s13685_s16 + $0x182] sm:$0xff] }
 0x2e9   : > { %v2888_v5 = vsel %vm2852_vm6, %v2823_v63, %v2024_v33 }
 0x2ea   : > { %v15091_v59 = vpop.permute.xlu1 %1515  ;;  %v2534_v13 = vpop.permute.xlu0 %2533  ;;  %v2953_v14 = vsel %vm2917_vm7, %v2888_v5, %v2280_v50  ;;  %v11166_v50 = vld [vmem:[%s13685_s16 + $0x188] sm:$0xff] }
 0x2eb   : > { %v3017_v0 = vsel %vm2982_vm8, %v2952_v34, %v2534_v13  ;;  %v11360_v5 = vld [vmem:[%s13685_s16 + $0x183] sm:$0xff] }
 0x2ec   : > { %v3165_v60 = vsel %vm3061_vm9, %v3017_v0, 0  ;;  %1537 = vrot.lane.b32.xlu1 %v11101_v49, %s13058_s18  ;;  %1283 = vrot.lane.b32.xlu0 %v11037_v9, %s13057_s17  ;;  %v11102_v9 = vld [vmem:[%s13685_s16 + $0x18f] sm:$0xff] }
 0x2ed   : > { %v15101_v18 = vand.u32 4294901760, %v3165_v60 }
 0x2ee   : > { %v2536_v42 = vpop.permute.xlu1 %2535  ;;  %v1770_v56 = vpop.permute.xlu0 %1769 }
 0x2ef   : > { %20531 = vst [vmem:[#allocation57_spill] sm:$0xff] %v15101_v18  ;;  %v15107_v26 = vsub.f32 %v3165_v60, %v15101_v18  ;;  %v3018_v2 = vsel %vm2982_vm8, %v2953_v14, %v2536_v42  ;;  %v11167_v60 = vld [vmem:[%s13685_s16 + $0x190] sm:$0xff]  ;;  %v10959_v14 = vld [vmem:[%s13685_s16 + $0x125] sm:$0xff] }
 0x2f0   : > { %v3168_v30 = vsel %vm3061_vm9, %v3018_v2, 0  ;;  %2557 = vrot.lane.b32.xlu1 %v11359_v45, %s13062_s7  ;;  %2303 = vrot.lane.b32.xlu0 %v11295_v41, %s13061_s28 }
 0x2f1   : > { %20532 = vst [vmem:[#allocation58_spill] sm:$0xff] %v15107_v26  ;;  %v15113_v33 = vand.u32 4294901760, %v3168_v30  ;;  %v3668_v49 = vand.u32 4294901760, %v15107_v26 }
 0x2f2   : > { %v2026_v57 = vpop.permute.xlu1 %2025  ;;  %v1772_v34 = vpop.permute.xlu0 %1771 }
 0x2f3   : > { %20533 = vst [vmem:[#allocation59_spill] sm:$0xff] %v15113_v33  ;;  %v15119_v13 = vsub.f32 %v3168_v30, %v15113_v33  ;;  %12204 = vmatprep.mubr.f32.mxu0 %v3668_v49  ;;  %v3669_v46 = vsub.f32 %v15107_v26, %v3668_v49  ;;  %v11038_v30 = vld [vmem:[%s13685_s16 + $0x196] sm:$0xff]  ;;  %v11231_v49 = vld [vmem:[%s13685_s16 + $0x189] sm:$0xff] }
 0x2f4   : > { %1793 = vrot.lane.b32.xlu1 %v11166_v50, %s13059_s6  ;;  %1539 = vrot.lane.b32.xlu0 %v11102_v9, %s13058_s18  ;;  %v2694_v50 = vsel %vm2657_vm3, %v10959_v14, %v14026_v22  ;;  %v10960_v26 = vld [vmem:[%s13685_s16 + $0x12d] sm:$0xff]  ;;  %v20574_v33 = vld [vmem:[#allocation18_spill] sm:$0xff] }
 0x2f5   : > { %20534 = vst [vmem:[#allocation60_spill] sm:$0xff] %v15119_v13  ;;  %v3670_v0 = vand.u32 4294901760, %v3669_v46  ;;  %v3678_v63 = vand.u32 4294901760, %v15119_v13  ;;  %v11232_v22 = vld [vmem:[%s13685_s16 + $0x191] sm:$0xff]  ;;  %v2695_v14 = vsel %vm2657_vm3, %v10960_v26, %v14024_v21 }
 0x2f6   : > { %v2282_v45 = vpop.permute.xlu1 %2281  ;;  %v2028_v41 = vpop.permute.xlu0 %2027 }
 0x2f7   : > { %11874 = vmatprep.mubr.f32.mxu1 %v3670_v0  ;;  %12205 = vmatmul.mubr.f32.gmra.mrb[34].mxu0 %v3678_v63  ;;  %v3679_v42 = vsub.f32 %v15119_v13, %v3678_v63  ;;  %v2759_v0 = vsel %vm2722_vm4, %v2694_v50, %v15077_v20 }
 0x2f8   : > { %1795 = vrot.lane.b32.xlu1 %v11167_v60, %s13059_s6  ;;  %2559 = vrot.lane.b32.xlu0 %v11360_v5, %s13062_s7  ;;  %v2824_v63 = vsel %vm2787_vm5, %v2759_v0, %v1770_v56  ;;  %v11296_v5 = vld [vmem:[%s13685_s16 + $0x18a] sm:$0xff]  ;;  %v2760_v56 = vsel %vm2722_vm4, %v2695_v14, %v15091_v59 }
 0x2f9   : > { %v3680_v2 = vand.u32 4294901760, %v3679_v42  ;;  %v2889_v60 = vsel %vm2852_vm6, %v2824_v63, %v2026_v57 }
 0x2fa   : > { %v2284_v9 = vpop.permute.xlu1 %2283  ;;  %v15135_v46 = vpop.permute.xlu0 %1517  ;;  %v2954_v42 = vsel %vm2917_vm7, %v2889_v60, %v2282_v45  ;;  %v11103_v45 = vld [vmem:[%s13685_s16 + $0x197] sm:$0xff] }
 0x2fb   : > { %11875 = vmatmul.mubr.f32.gmra.mrb[34].mxu1 %v3680_v2 }
 0x2fc   : > { %1285 = vrot.lane.b32.xlu1 %v11038_v30, %s13057_s17  ;;  %2049 = vrot.lane.b32.xlu0 %v11231_v49, %s13060_s11  ;;  %v2825_v30 = vsel %vm2787_vm5, %v2760_v56, %v1772_v34  ;;  %v11039_v49 = vld [vmem:[%s13685_s16 + $0x19e] sm:$0xff] }
 0x2fd   : > { %v2890_v21 = vsel %vm2852_vm6, %v2825_v30, %v2028_v41 }
 0x2fe   : > { %v15149_v13 = vpop.permute.xlu1 %1519  ;;  %v2538_v20 = vpop.permute.xlu0 %2537  ;;  %v2955_v59 = vsel %vm2917_vm7, %v2890_v21, %v2284_v9  ;;  %v11361_v9 = vld [vmem:[%s13685_s16 + $0x18b] sm:$0xff]  ;;  %v11104_v21 = vld [vmem:[%s13685_s16 + $0x19f] sm:$0xff] }
 0x2ff   : > { %v3019_v2 = vsel %vm2982_vm8, %v2954_v42, %v2538_v20 }
 0x300   : > { %v3171_v57 = vsel %vm3061_vm9, %v3019_v2, 0  ;;  %2305 = vrot.lane.b32.xlu1 %v11296_v5, %s13061_s28  ;;  %2051 = vrot.lane.b32.xlu0 %v11232_v22, %s13060_s11  ;;  %v11297_v22 = vld [vmem:[%s13685_s16 + $0x192] sm:$0xff] }
 0x301   : > { %v15159_v26 = vand.u32 4294901760, %v3171_v57 }
 0x302   : > { %v2540_v50 = vpop.permute.xlu1 %2539  ;;  %v1774_v0 = vpop.permute.xlu0 %1773 }
 0x303   : > { %20535 = vst [vmem:[#allocation61_spill] sm:$0xff] %v15159_v26  ;;  %v15165_v34 = vsub.f32 %v3171_v57, %v15159_v26  ;;  %v3020_v63 = vsel %vm2982_vm8, %v2955_v59, %v2540_v50  ;;  %v11168_v57 = vld [vmem:[%s13685_s16 + $0x198] sm:$0xff] }
 0x304   : > { %v3174_v60 = vsel %vm3061_vm9, %v3020_v63, 0  ;;  %1541 = vrot.lane.b32.xlu1 %v11103_v45, %s13058_s18  ;;  %1287 = vrot.lane.b32.xlu0 %v11039_v49, %s13057_s17  ;;  %v10961_v59 = vld [vmem:[%s13685_s16 + $0x135] sm:$0xff] }
 0x305   : > { %20536 = vst [vmem:[#allocation62_spill] sm:$0xff] %v15165_v34  ;;  %v15171_v41 = vand.u32 4294901760, %v3174_v60  ;;  %v3688_v5 = vand.u32 4294901760, %v15165_v34 }
 0x306   : > { %v2030_v14 = vpop.permute.xlu1 %2029  ;;  %v1776_v42 = vpop.permute.xlu0 %1775 }
 0x307   : > { %20537 = vst [vmem:[#allocation63_spill] sm:$0xff] %v15171_v41  ;;  %v15177_v20 = vsub.f32 %v3174_v60, %v15171_v41  ;;  %12207 = vmatprep.mubr.f32.mxu0 %v3688_v5  ;;  %v3689_v56 = vsub.f32 %v15165_v34, %v3688_v5  ;;  %v11169_v60 = vld [vmem:[%s13685_s16 + $0x1a0] sm:$0xff]  ;;  %v11362_v5 = vld [vmem:[%s13685_s16 + $0x193] sm:$0xff] }
 0x308   : > { %2561 = vrot.lane.b32.xlu1 %v11361_v9, %s13062_s7  ;;  %2307 = vrot.lane.b32.xlu0 %v11297_v22, %s13061_s28  ;;  %v2696_v9 = vsel %vm2657_vm3, %v10961_v59, %v14034_v38  ;;  %v10962_v34 = vld [vmem:[%s13685_s16 + $0x13d] sm:$0xff] }
 0x309   : > { %20538 = vst [vmem:[#allocation64_spill] sm:$0xff] %v15177_v20  ;;  %v3690_v2 = vand.u32 4294901760, %v3689_v56  ;;  %v3698_v30 = vand.u32 4294901760, %v15177_v20  ;;  %v11233_v38 = vld [vmem:[%s13685_s16 + $0x199] sm:$0xff]  ;;  %v2697_v59 = vsel %vm2657_vm3, %v10962_v34, %v14032_v37  ;;  %v11242_v41 = vld [vmem:[%s13685_s16 + $0x1e1] sm:$0xff] }
 0x30a   : > { %v2286_v45 = vpop.permute.xlu1 %2285  ;;  %v2032_v49 = vpop.permute.xlu0 %2031 }
 0x30b   : > { %11877 = vmatprep.mubr.f32.mxu1 %v3690_v2  ;;  %12208 = vmatmul.mubr.f32.gmra.mrb[36].mxu0 %v3698_v30  ;;  %v3699_v50 = vsub.f32 %v15177_v20, %v3698_v30  ;;  %v2761_v2 = vsel %vm2722_vm4, %v2696_v9, %v15135_v46 }
 0x30c   : > { %1797 = vrot.lane.b32.xlu1 %v11168_v57, %s13059_s6  ;;  %1543 = vrot.lane.b32.xlu0 %v11104_v21, %s13058_s18  ;;  %v2826_v30 = vsel %vm2787_vm5, %v2761_v2, %v1774_v0  ;;  %v11040_v21 = vld [vmem:[%s13685_s16 + $0x1a6] sm:$0xff]  ;;  %v2762_v0 = vsel %vm2722_vm4, %v2697_v59, %v15149_v13 }
 0x30d   : > { %v3700_v63 = vand.u32 4294901760, %v3699_v50  ;;  %v2891_v57 = vsel %vm2852_vm6, %v2826_v30, %v2030_v14 }
 0x30e   : > { %v2288_v22 = vpop.permute.xlu1 %2287  ;;  %v15193_v56 = vpop.permute.xlu0 %1521  ;;  %v2956_v50 = vsel %vm2917_vm7, %v2891_v57, %v2286_v45  ;;  %v11298_v45 = vld [vmem:[%s13685_s16 + $0x19a] sm:$0xff] }
 0x30f   : > { %11878 = vmatmul.mubr.f32.gmra.mrb[36].mxu1 %v3700_v63 }
 0x310   : > { %1799 = vrot.lane.b32.xlu1 %v11169_v60, %s13059_s6  ;;  %2563 = vrot.lane.b32.xlu0 %v11362_v5, %s13062_s7  ;;  %v2827_v60 = vsel %vm2787_vm5, %v2762_v0, %v1776_v42  ;;  %v11234_v5 = vld [vmem:[%s13685_s16 + $0x1a1] sm:$0xff] }
 0x311   : > { %v2892_v37 = vsel %vm2852_vm6, %v2827_v60, %v2032_v49 }
 0x312   : > { %v15207_v20 = vpop.permute.xlu1 %1523  ;;  %v2542_v46 = vpop.permute.xlu0 %2541  ;;  %v2957_v13 = vsel %vm2917_vm7, %v2892_v37, %v2288_v22  ;;  %v11105_v22 = vld [vmem:[%s13685_s16 + $0x1a7] sm:$0xff] }
 0x313   : > { %v3021_v63 = vsel %vm2982_vm8, %v2956_v50, %v2542_v46  ;;  %v11299_v37 = vld [vmem:[%s13685_s16 + $0x1a2] sm:$0xff] }
 0x314   : > { %v3177_v14 = vsel %vm3061_vm9, %v3021_v63, 0  ;;  %1289 = vrot.lane.b32.xlu1 %v11040_v21, %s13057_s17  ;;  %2053 = vrot.lane.b32.xlu0 %v11233_v38, %s13060_s11  ;;  %v11041_v38 = vld [vmem:[%s13685_s16 + $0x1ae] sm:$0xff] }
 0x315   : > { %v15217_v34 = vand.u32 4294901760, %v3177_v14 }
 0x316   : > { %v2544_v9 = vpop.permute.xlu1 %2543  ;;  %v1778_v2 = vpop.permute.xlu0 %1777 }
 0x317   : > { %20539 = vst [vmem:[#allocation65_spill] sm:$0xff] %v15217_v34  ;;  %v15223_v42 = vsub.f32 %v3177_v14, %v15217_v34  ;;  %v3022_v30 = vsel %vm2982_vm8, %v2957_v13, %v2544_v9  ;;  %v11363_v14 = vld [vmem:[%s13685_s16 + $0x19b] sm:$0xff]  ;;  %v10963_v13 = vld [vmem:[%s13685_s16 + $0x145] sm:$0xff] }
 0x318   : > { %v3180_v57 = vsel %vm3061_vm9, %v3022_v30, 0  ;;  %2309 = vrot.lane.b32.xlu1 %v11298_v45, %s13061_s28  ;;  %2055 = vrot.lane.b32.xlu0 %v11234_v5, %s13060_s11  ;;  %v11306_v34 = vld [vmem:[%s13685_s16 + $0x1da] sm:$0xff] }
 0x319   : > { %20540 = vst [vmem:[#allocation66_spill] sm:$0xff] %v15223_v42  ;;  %v15229_v49 = vand.u32 4294901760, %v3180_v57  ;;  %v3708_v21 = vand.u32 4294901760, %v15223_v42 }
 0x31a   : > { %v2034_v59 = vpop.permute.xlu1 %2033  ;;  %v1780_v50 = vpop.permute.xlu0 %1779 }
 0x31b   : > { %20541 = vst [vmem:[#allocation67_spill] sm:$0xff] %v15229_v49  ;;  %v15235_v46 = vsub.f32 %v3180_v57, %v15229_v49  ;;  %12210 = vmatprep.mubr.f32.mxu0 %v3708_v21  ;;  %v3709_v0 = vsub.f32 %v15223_v42, %v3708_v21  ;;  %v11170_v57 = vld [vmem:[%s13685_s16 + $0x1a8] sm:$0xff] }
 0x31c   : > { %1545 = vrot.lane.b32.xlu1 %v11105_v22, %s13058_s18  ;;  %1291 = vrot.lane.b32.xlu0 %v11041_v38, %s13057_s17  ;;  %v11106_v21 = vld [vmem:[%s13685_s16 + $0x1af] sm:$0xff]  ;;  %v2698_v22 = vsel %vm2657_vm3, %v10963_v13, %v14042_v61  ;;  %v11364_v61 = vld [vmem:[%s13685_s16 + $0x1a3] sm:$0xff] }
 0x31d   : > { %20542 = vst [vmem:[#allocation68_spill] sm:$0xff] %v15235_v46  ;;  %v3710_v63 = vand.u32 4294901760, %v3709_v0  ;;  %v3718_v60 = vand.u32 4294901760, %v15235_v46  ;;  %v10964_v42 = vld [vmem:[%s13685_s16 + $0x14d] sm:$0xff] }
 0x31e   : > { %v2290_v45 = vpop.permute.xlu1 %2289  ;;  %v2036_v5 = vpop.permute.xlu0 %2035  ;;  %v2699_v13 = vsel %vm2657_vm3, %v10964_v42, %v14040_v55 }
 0x31f   : > { %11880 = vmatprep.mubr.f32.mxu1 %v3710_v63  ;;  %12211 = vmatmul.mubr.f32.gmra.mrb[38].mxu0 %v3718_v60  ;;  %v3719_v9 = vsub.f32 %v15235_v46, %v3718_v60  ;;  %v2763_v63 = vsel %vm2722_vm4, %v2698_v22, %v15193_v56 }
 0x320   : > { %2565 = vrot.lane.b32.xlu1 %v11363_v14, %s13062_s7  ;;  %2311 = vrot.lane.b32.xlu0 %v11299_v37, %s13061_s28  ;;  %v2828_v60 = vsel %vm2787_vm5, %v2763_v63, %v1778_v2  ;;  %v11171_v37 = vld [vmem:[%s13685_s16 + $0x1b0] sm:$0xff]  ;;  %v2764_v2 = vsel %vm2722_vm4, %v2699_v13, %v15207_v20 }
 0x321   : > { %v3720_v30 = vand.u32 4294901760, %v3719_v9  ;;  %v2893_v14 = vsel %vm2852_vm6, %v2828_v60, %v2034_v59 }
 0x322   : > { %v2292_v38 = vpop.permute.xlu1 %2291  ;;  %v15251_v0 = vpop.permute.xlu0 %1525  ;;  %v2958_v9 = vsel %vm2917_vm7, %v2893_v14, %v2290_v45  ;;  %v11042_v45 = vld [vmem:[%s13685_s16 + $0x1b6] sm:$0xff] }
 0x323   : > { %11881 = vmatmul.mubr.f32.gmra.mrb[38].mxu1 %v3720_v30 }
 0x324   : > { %1801 = vrot.lane.b32.xlu1 %v11170_v57, %s13059_s6  ;;  %1547 = vrot.lane.b32.xlu0 %v11106_v21, %s13058_s18  ;;  %v2829_v57 = vsel %vm2787_vm5, %v2764_v2, %v1780_v50  ;;  %v11235_v21 = vld [vmem:[%s13685_s16 + $0x1a9] sm:$0xff] }
 0x325   : > { %v2894_v55 = vsel %vm2852_vm6, %v2829_v57, %v2036_v5  ;;  %v20547_v57 = vand.u32 4294901760, %v13790_v52 }
 0x326   : > { %v15265_v46 = vpop.permute.xlu1 %1527  ;;  %v2546_v56 = vpop.permute.xlu0 %2545  ;;  %v2959_v20 = vsel %vm2917_vm7, %v2894_v55, %v2292_v38  ;;  %v11236_v38 = vld [vmem:[%s13685_s16 + $0x1b1] sm:$0xff]  ;;  %v12991_v55 = vld [vmem:[%s20090_s1 + $0x8] sm:$0xff] }
 0x327   : > { %v3023_v30 = vsel %vm2982_vm8, %v2958_v9, %v2546_v56 }
 0x328   : > { %v3183_v59 = vsel %vm3061_vm9, %v3023_v30, 0  ;;  %1803 = vrot.lane.b32.xlu1 %v11171_v37, %s13059_s6  ;;  %2567 = vrot.lane.b32.xlu0 %v11364_v61, %s13062_s7  ;;  %v11300_v61 = vld [vmem:[%s13685_s16 + $0x1aa] sm:$0xff]  ;;  %v12990_v30 = vld [vmem:[%s20090_s1] sm:$0xff] }
 0x329   : > { %v15275_v42 = vand.u32 4294901760, %v3183_v59 }
 0x32a   : > { %v2548_v22 = vpop.permute.xlu1 %2547  ;;  %v1782_v63 = vpop.permute.xlu0 %1781 }
 0x32b   : > { %20543 = vst [vmem:[#allocation69_spill] sm:$0xff] %v15275_v42  ;;  %v15281_v50 = vsub.f32 %v3183_v59, %v15275_v42  ;;  %v3024_v60 = vsel %vm2982_vm8, %v2959_v20, %v2548_v22  ;;  %v15303_v59 = vsub.f32 %v12990_v30, %v20547_v57  ;;  %v10965_v30 = vld [vmem:[%s13685_s16 + $0x155] sm:$0xff] }
 0x32c   : > { %v3186_v14 = vsel %vm3061_vm9, %v3024_v60, 0  ;;  %1293 = vrot.lane.b32.xlu1 %v11042_v45, %s13057_s17  ;;  %2057 = vrot.lane.b32.xlu0 %v11235_v21, %s13060_s11  ;;  %v20548_v45 = vand.u32 4294901760, %v13795_v53  ;;  %v11107_v60 = vld [vmem:[%s13685_s16 + $0x1b7] sm:$0xff] }
 0x32d   : > { %20544 = vst [vmem:[#allocation70_spill] sm:$0xff] %v15281_v50  ;;  %v15287_v5 = vand.u32 4294901760, %v3186_v14  ;;  %v3728_v37 = vand.u32 4294901760, %v15281_v50  ;;  %v3969_v52 = vand.u32 4294901760, %v15303_v59 }
 0x32e   : > { %v2038_v13 = vpop.permute.xlu1 %2037  ;;  %v1784_v9 = vpop.permute.xlu0 %1783  ;;  %v15310_v21 = vsub.f32 %v12991_v55, %v20548_v45 }
 0x32f   : > { %20545 = vst [vmem:[#allocation71_spill] sm:$0xff] %v15287_v5  ;;  %v15293_v56 = vsub.f32 %v3186_v14, %v15287_v5  ;;  %12213 = vmatprep.mubr.f32.mxu0 %v3728_v37  ;;  %v3729_v2 = vsub.f32 %v15281_v50, %v3728_v37  ;;  %v11043_v14 = vld [vmem:[%s13685_s16 + $0x1be] sm:$0xff]  ;;  %v11365_v50 = vld [vmem:[%s13685_s16 + $0x1ab] sm:$0xff] }
 0x330   : > { %2313 = vrot.lane.b32.xlu1 %v11300_v61, %s13061_s28  ;;  %2059 = vrot.lane.b32.xlu0 %v11236_v38, %s13060_s11  ;;  %v3976_v38 = vand.u32 4294901760, %v15310_v21  ;;  %v11301_v5 = vld [vmem:[%s13685_s16 + $0x1b2] sm:$0xff] }
 0x331   : > { %20546 = vst [vmem:[#allocation72_spill] sm:$0xff] %v15293_v56  ;;  %v3730_v20 = vand.u32 4294901760, %v3729_v2  ;;  %v3738_v22 = vand.u32 4294901760, %v15293_v56  ;;  %v3970_v2 = vsub.f32 %v15303_v59, %v3969_v52 }
 0x332   : > { %v2294_v37 = vpop.permute.xlu1 %2293  ;;  %v2040_v61 = vpop.permute.xlu0 %2039  ;;  %v3977_v57 = vsub.f32 %v15310_v21, %v3976_v38  ;;  %v12517_v55 = vpack.c.bf16 %v3976_v38, %v3969_v52 }
 0x333   : > { %11883 = vmatprep.mubr.f32.mxu1 %v3730_v20  ;;  %12214 = vmatmul.mubr.f32.gmra.mrb[40].mxu0 %v3738_v22  ;;  %v3739_v53 = vsub.f32 %v15293_v56, %v3738_v22  ;;  %v2700_v20 = vsel %vm2657_vm3, %v10965_v30, %v14050_v29  ;;  %v3971_v22 = vand.u32 4294901760, %v3970_v2  ;;  %v11172_v30 = vld [vmem:[%s13685_s16 + $0x1b8] sm:$0xff] }
 0x334   : > { %1549 = vrot.lane.b32.xlu1 %v11107_v60, %s13058_s18  ;;  %1295 = vrot.lane.b32.xlu0 %v11043_v14, %s13057_s17  ;;  %v3978_v60 = vand.u32 4294901760, %v3977_v57  ;;  %v10966_v14 = vld [vmem:[%s13685_s16 + $0x15d] sm:$0xff]  ;;  %v2765_v56 = vsel %vm2722_vm4, %v2700_v20, %v15251_v0  ;;  %v20549_v2 = vld [vmem:[#allocation13_spill] sm:$0xff] }
 0x335   : > { %v3740_v45 = vand.u32 4294901760, %v3739_v53  ;;  %12518 = vmatprep.subr.bf16.mxu0 %v12517_v55  ;;  %v2830_v52 = vsel %vm2787_vm5, %v2765_v56, %v1782_v63  ;;  %v11108_v53 = vld [vmem:[%s13685_s16 + $0x1bf] sm:$0xff]  ;;  %v2701_v57 = vsel %vm2657_vm3, %v10966_v14, %v20549_v2 }
 0x336   : > { %v2296_v42 = vpop.permute.xlu1 %2295  ;;  %v15327_v49 = vpop.permute.xlu0 %1529  ;;  %12520 = vmatpush3.bf16.msra.mxu0 %v12517_v55  ;;  %v12481_v29 = vpack.c.bf16 %v3978_v60, %v3971_v22  ;;  %v2895_v38 = vsel %vm2852_vm6, %v2830_v52, %v2038_v13  ;;  %v2766_v63 = vsel %vm2722_vm4, %v2701_v57, %v15265_v46  ;;  %v11173_v20 = vld [vmem:[%s13685_s16 + $0x1c0] sm:$0xff]  ;;  %v11366_v22 = vld [vmem:[%s13685_s16 + $0x1b3] sm:$0xff] }
 0x337   : > { %11884 = vmatmul.mubr.f32.gmra.mrb[40].mxu1 %v3740_v45  ;;  %v2960_v0 = vsel %vm2917_vm7, %v2895_v38, %v2294_v37 }
 0x338   : > { %2569 = vrot.lane.b32.xlu1 %v11365_v50, %s13062_s7  ;;  %2315 = vrot.lane.b32.xlu0 %v11301_v5, %s13061_s28  ;;  %v2831_v5 = vsel %vm2787_vm5, %v2766_v63, %v1784_v9 }
 0x339   : > { %12482 = vmatprep.subr.bf16.mxu1 %v12481_v29  ;;  %v2896_v56 = vsel %vm2852_vm6, %v2831_v5, %v2040_v61  ;;  %v11238_v5 = vld [vmem:[%s13685_s16 + $0x1c1] sm:$0xff] }
 0x33a   : > { %v15341_v45 = vpop.permute.xlu1 %1531  ;;  %v2550_v55 = vpop.permute.xlu0 %2549  ;;  %12484 = vmatpush3.bf16.msra.mxu1 %v12481_v29  ;;  %v2961_v46 = vsel %vm2917_vm7, %v2896_v56, %v2296_v42  ;;  %v11044_v42 = vld [vmem:[%s13685_s16 + $0x1c6] sm:$0xff] }
 0x33b   : > { %v3025_v50 = vsel %vm2982_vm8, %v2960_v0, %v2550_v55 }
 0x33c   : > { %v3189_v13 = vsel %vm3061_vm9, %v3025_v50, 0  ;;  %1805 = vrot.lane.b32.xlu1 %v11172_v30, %s13059_s6  ;;  %1551 = vrot.lane.b32.xlu0 %v11108_v53, %s13058_s18  ;;  %v11237_v30 = vld [vmem:[%s13685_s16 + $0x1b9] sm:$0xff] }
 0x33d   : > { %v15351_v37 = vand.u32 4294901760, %v3189_v13  ;;  %v11302_v50 = vld [vmem:[%s13685_s16 + $0x1ba] sm:$0xff] }
 0x33e   : > { %v2552_v60 = vpop.permute.xlu1 %2551  ;;  %v1786_v14 = vpop.permute.xlu0 %1785 }
 0x33f   : > { %20550 = vst [vmem:[#allocation13_spill] sm:$0xff] %v15351_v37  ;;  %v15357_v9 = vsub.f32 %v3189_v13, %v15351_v37  ;;  %v3026_v52 = vsel %vm2982_vm8, %v2961_v46, %v2552_v60  ;;  %v11109_v60 = vld [vmem:[%s13685_s16 + $0x1c7] sm:$0xff] }
 0x340   : > { %v3192_v29 = vsel %vm3061_vm9, %v3026_v52, 0  ;;  %1807 = vrot.lane.b32.xlu1 %v11173_v20, %s13059_s6  ;;  %2571 = vrot.lane.b32.xlu0 %v11366_v22, %s13062_s7  ;;  %v10967_v20 = vld [vmem:[%s13685_s16 + $0x165] sm:$0xff]  ;;  %v11045_v52 = vld [vmem:[%s13685_s16 + $0x1ce] sm:$0xff] }
 0x341   : > { %20551 = vst [vmem:[#allocation73_spill] sm:$0xff] %v15357_v9  ;;  %v15363_v61 = vand.u32 4294901760, %v3192_v29  ;;  %v3748_v38 = vand.u32 4294901760, %v15357_v9 }
 0x342   : > { %v2042_v53 = vpop.permute.xlu1 %2041  ;;  %v1788_v2 = vpop.permute.xlu0 %1787 }
 0x343   : > { %20552 = vst [vmem:[#allocation74_spill] sm:$0xff] %v15363_v61  ;;  %v15369_v57 = vsub.f32 %v3192_v29, %v15363_v61  ;;  %12216 = vmatprep.mubr.f32.mxu0 %v3748_v38  ;;  %v3749_v0 = vsub.f32 %v15357_v9, %v3748_v38  ;;  %v20554_v29 = vld [vmem:[#allocation15_spill] sm:$0xff] }
 0x344   : > { %1297 = vrot.lane.b32.xlu1 %v11044_v42, %s13057_s17  ;;  %2061 = vrot.lane.b32.xlu0 %v11237_v30, %s13060_s11  ;;  %v2702_v38 = vsel %vm2657_vm3, %v10967_v20, %v20554_v29 }
 0x345   : > { %20553 = vst [vmem:[#allocation75_spill] sm:$0xff] %v15369_v57  ;;  %v3750_v55 = vand.u32 4294901760, %v3749_v0  ;;  %v3758_v63 = vand.u32 4294901760, %v15369_v57  ;;  %v10968_v0 = vld [vmem:[%s13685_s16 + $0x16d] sm:$0xff] }
 0x346   : > { %v2298_v13 = vpop.permute.xlu1 %2297  ;;  %v2044_v56 = vpop.permute.xlu0 %2043 }
 0x347   : > { %11886 = vmatprep.mubr.f32.mxu1 %v3750_v55  ;;  %12217 = vmatmul.mubr.f32.gmra.mrb[42].mxu0 %v3758_v63  ;;  %v3759_v22 = vsub.f32 %v15369_v57, %v3758_v63  ;;  %v2767_v55 = vsel %vm2722_vm4, %v2702_v38, %v15327_v49  ;;  %v20555_v57 = vld [vmem:[#allocation14_spill] sm:$0xff] }
 0x348   : > { %2317 = vrot.lane.b32.xlu1 %v11302_v50, %s13061_s28  ;;  %2063 = vrot.lane.b32.xlu0 %v11238_v5, %s13060_s11  ;;  %v2832_v63 = vsel %vm2787_vm5, %v2767_v55, %v1786_v14  ;;  %v11367_v5 = vld [vmem:[%s13685_s16 + $0x1bb] sm:$0xff]  ;;  %v2703_v20 = vsel %vm2657_vm3, %v10968_v0, %v20555_v57 }
 0x349   : > { %v3760_v46 = vand.u32 4294901760, %v3759_v22  ;;  %v2897_v50 = vsel %vm2852_vm6, %v2832_v63, %v2042_v53  ;;  %v11303_v22 = vld [vmem:[%s13685_s16 + $0x1c2] sm:$0xff]  ;;  %v2768_v14 = vsel %vm2722_vm4, %v2703_v20, %v15341_v45  ;;  %v12992_v53 = vld [vmem:[%s20090_s1 + $0x10] sm:$0xff]  ;;  %v12993_v57 = vld [vmem:[%s20090_s1 + $0x18] sm:$0xff] }
 0x34a   : > { %v2300_v42 = vpop.permute.xlu1 %2299  ;;  %v15385_v30 = vpop.permute.xlu0 %1533  ;;  %v2962_v29 = vsel %vm2917_vm7, %v2897_v50, %v2298_v13  ;;  %v20558_v13 = vld [vmem:[#allocation7_spill] sm:$0xff]  ;;  %v2833_v45 = vsel %vm2787_vm5, %v2768_v14, %v1788_v2 }
 0x34b   : > { %11887 = vmatmul.mubr.f32.gmra.mrb[42].mxu1 %v3760_v46  ;;  %v20559_v0 = vand.u32 4294901760, %v20558_v13  ;;  %v2898_v50 = vsel %vm2852_vm6, %v2833_v45, %v2044_v56  ;;  %v11175_v45 = vld [vmem:[%s13685_s16 + $0x1d0] sm:$0xff] }
 0x34c   : > { %1553 = vrot.lane.b32.xlu1 %v11109_v60, %s13058_s18  ;;  %1299 = vrot.lane.b32.xlu0 %v11045_v52, %s13057_s17  ;;  %v20556_v60 = vld [vmem:[#allocation6_spill] sm:$0xff]  ;;  %v2963_v2 = vsel %vm2917_vm7, %v2898_v50, %v2300_v42 }
 0x34d   : > { %v20557_v52 = vand.u32 4294901760, %v20556_v60  ;;  %v15416_v55 = vsub.f32 %v12993_v57, %v20559_v0 }
 0x34e   : > { %v15399_v9 = vpop.permute.xlu1 %1535  ;;  %v2554_v49 = vpop.permute.xlu0 %2553 }
 0x34f   : > { %v3027_v46 = vsel %vm2982_vm8, %v2962_v29, %v2554_v49  ;;  %v15409_v38 = vsub.f32 %v12992_v53, %v20557_v52  ;;  %v11174_v29 = vld [vmem:[%s13685_s16 + $0x1c8] sm:$0xff]  ;;  %v3990_v60 = vand.u32 4294901760, %v15416_v55 }
 0x350   : > { %v3195_v63 = vsel %vm3061_vm9, %v3027_v46, 0  ;;  %2573 = vrot.lane.b32.xlu1 %v11367_v5, %s13062_s7  ;;  %2319 = vrot.lane.b32.xlu0 %v11303_v22, %s13061_s28  ;;  %v11110_v49 = vld [vmem:[%s13685_s16 + $0x1cf] sm:$0xff] }
 0x351   : > { %v15423_v20 = vand.u32 4294901760, %v3195_v63  ;;  %v3983_v53 = vand.u32 4294901760, %v15409_v38  ;;  %v3991_v57 = vsub.f32 %v15416_v55, %v3990_v60 }
 0x352   : > { %v2556_v14 = vpop.permute.xlu1 %2555  ;;  %v1790_v46 = vpop.permute.xlu0 %1789 }
 0x353   : > { %20560 = vst [vmem:[#allocation15_spill] sm:$0xff] %v15423_v20  ;;  %v15431_v5 = vsub.f32 %v3195_v63, %v15423_v20  ;;  %v3028_v22 = vsel %vm2982_vm8, %v2963_v2, %v2556_v14  ;;  %v3984_v56 = vsub.f32 %v15409_v38, %v3983_v53  ;;  %v12521_v13 = vpack.c.bf16 %v3990_v60, %v3983_v53  ;;  %v11368_v63 = vld [vmem:[%s13685_s16 + $0x1c3] sm:$0xff] }
 0x354   : > { %v3198_v52 = vsel %vm3061_vm9, %v3028_v22, 0  ;;  %1809 = vrot.lane.b32.xlu1 %v11174_v29, %s13059_s6  ;;  %1555 = vrot.lane.b32.xlu0 %v11110_v49, %s13058_s18  ;;  %v3992_v20 = vand.u32 4294901760, %v3991_v57  ;;  %v11239_v57 = vld [vmem:[%s13685_s16 + $0x1c9] sm:$0xff] }
 0x355   : > { %20561 = vst [vmem:[#allocation14_spill] sm:$0xff] %v15431_v5  ;;  %v15439_v0 = vand.u32 4294901760, %v3198_v52  ;;  %v3768_v42 = vand.u32 4294901760, %v15431_v5  ;;  %v3985_v50 = vand.u32 4294901760, %v3984_v56  ;;  %12522 = vmatprep.subr.bf16.mxu0 %v12521_v13  ;;  %v11046_v56 = vld [vmem:[%s13685_s16 + $0x1d6] sm:$0xff] }
 0x356   : > { %v2046_v2 = vpop.permute.xlu1 %2045  ;;  %v1792_v14 = vpop.permute.xlu0 %1791  ;;  %12524 = vmatpush3.bf16.msra.mxu0 %v12521_v13  ;;  %v20564_v13 = vld [vmem:[#allocation17_spill] sm:$0xff] }
 0x357   : > { %20562 = vst [vmem:[#allocation6_spill] sm:$0xff] %v15439_v0  ;;  %v15445_v29 = vsub.f32 %v3198_v52, %v15439_v0  ;;  %12219 = vmatprep.mubr.f32.mxu0 %v3768_v42  ;;  %v3769_v49 = vsub.f32 %v15431_v5, %v3768_v42  ;;  %v12485_v53 = vpack.c.bf16 %v3992_v20, %v3985_v50  ;;  %v10969_v52 = vld [vmem:[%s13685_s16 + $0x175] sm:$0xff]  ;;  %v10970_v5 = vld [vmem:[%s13685_s16 + $0x17d] sm:$0xff] }
 0x358   : > { %1811 = vrot.lane.b32.xlu1 %v11175_v45, %s13059_s6  ;;  %2575 = vrot.lane.b32.xlu0 %v11368_v63, %s13062_s7  ;;  %v11304_v45 = vld [vmem:[%s13685_s16 + $0x1ca] sm:$0xff]  ;;  %v2704_v50 = vsel %vm2657_vm3, %v10969_v52, %v20564_v13  ;;  %v11047_v52 = vld [vmem:[%s13685_s16 + $0x1de] sm:$0xff] }
 0x359   : > { %20563 = vst [vmem:[#allocation7_spill] sm:$0xff] %v15445_v29  ;;  %v3770_v60 = vand.u32 4294901760, %v3769_v49  ;;  %v3778_v22 = vand.u32 4294901760, %v15445_v29  ;;  %12486 = vmatprep.subr.bf16.mxu1 %v12485_v53  ;;  %v11240_v63 = vld [vmem:[%s13685_s16 + $0x1d1] sm:$0xff] }
 0x35a   : > { %v2302_v61 = vpop.permute.xlu1 %2301  ;;  %v2048_v37 = vpop.permute.xlu0 %2047  ;;  %12488 = vmatpush3.bf16.msra.mxu1 %v12485_v53 }
 0x35b   : > { %11889 = vmatprep.mubr.f32.mxu1 %v3770_v60  ;;  %12220 = vmatmul.mubr.f32.gmra.mrb[44].mxu0 %v3778_v22  ;;  %v3779_v42 = vsub.f32 %v15445_v29, %v3778_v22  ;;  %v2769_v22 = vsel %vm2722_vm4, %v2704_v50, %v15385_v30 }
 0x35c   : > { %1301 = vrot.lane.b32.xlu1 %v11046_v56, %s13057_s17  ;;  %2065 = vrot.lane.b32.xlu0 %v11239_v57, %s13060_s11  ;;  %v2834_v56 = vsel %vm2787_vm5, %v2769_v22, %v1790_v46  ;;  %v11111_v57 = vld [vmem:[%s13685_s16 + $0x1d7] sm:$0xff] }
 0x35d   : > { %v3780_v20 = vand.u32 4294901760, %v3779_v42  ;;  %v2899_v53 = vsel %vm2852_vm6, %v2834_v56, %v2046_v2  ;;  %v11369_v2 = vld [vmem:[%s13685_s16 + $0x1cb] sm:$0xff] }
 0x35e   : > { %v15461_v49 = vpop.permute.xlu1 %1537  ;;  %v15463_v60 = vpop.permute.xlu0 %1283  ;;  %v2964_v42 = vsel %vm2917_vm7, %v2899_v53, %v2302_v61 }
 0x35f   : > { %11890 = vmatmul.mubr.f32.gmra.mrb[44].mxu1 %v3780_v20 }
 0x360   : > { %2321 = vrot.lane.b32.xlu1 %v11304_v45, %s13061_s28  ;;  %2067 = vrot.lane.b32.xlu0 %v11240_v63, %s13060_s11  ;;  %v11305_v45 = vld [vmem:[%s13685_s16 + $0x1d2] sm:$0xff]  ;;  %v20566_v63 = vld [vmem:[#allocation16_spill] sm:$0xff] }
 0x361   : > { %v2705_v61 = vsel %vm2657_vm3, %v10970_v5, %v20566_v63 }
 0x362   : > { %v2558_v13 = vpop.permute.xlu1 %2557  ;;  %v2304_v29 = vpop.permute.xlu0 %2303  ;;  %v2770_v56 = vsel %vm2722_vm4, %v2705_v61, %v15399_v9  ;;  %v11370_v61 = vld [vmem:[%s13685_s16 + $0x1d3] sm:$0xff] }
 0x363   : > { %v3029_v30 = vsel %vm2982_vm8, %v2964_v42, %v2558_v13  ;;  %v11176_v42 = vld [vmem:[%s13685_s16 + $0x1d8] sm:$0xff] }
 0x364   : > { %v3201_v20 = vsel %vm3061_vm9, %v3029_v30, 0  ;;  %1557 = vrot.lane.b32.xlu1 %v11111_v57, %s13058_s18  ;;  %1303 = vrot.lane.b32.xlu0 %v11047_v52, %s13057_s17  ;;  %v2835_v57 = vsel %vm2787_vm5, %v2770_v56, %v1792_v14  ;;  %v11112_v13 = vld [vmem:[%s13685_s16 + $0x1df] sm:$0xff] }
 0x365   : > { %v15479_v46 = vand.u32 4294901760, %v3201_v20  ;;  %v2900_v52 = vsel %vm2852_vm6, %v2835_v57, %v2048_v37 }
 0x366   : > { %v1794_v50 = vpop.permute.xlu1 %1793  ;;  %v15485_v22 = vpop.permute.xlu0 %1539  ;;  %v2965_v30 = vsel %vm2917_vm7, %v2900_v52, %v2304_v29  ;;  %v11177_v29 = vld [vmem:[%s13685_s16 + $0x1e0] sm:$0xff] }
 0x367   : > { %20565 = vst [vmem:[#allocation17_spill] sm:$0xff] %v15479_v46  ;;  %v15490_v53 = vsub.f32 %v3201_v20, %v15479_v46 }
 0x368   : > { %2577 = vrot.lane.b32.xlu1 %v11369_v2, %s13062_s7  ;;  %2323 = vrot.lane.b32.xlu0 %v11305_v45, %s13061_s28 }
 0x369   : > { %20567 = vst [vmem:[#allocation16_spill] sm:$0xff] %v15490_v53  ;;  %v3788_v5 = vand.u32 4294901760, %v15490_v53 }
 0x36a   : > { %v15500_v9 = vpop.permute.xlu1 %1795  ;;  %v2560_v20 = vpop.permute.xlu0 %2559 }
 0x36b   : > { %v3030_v63 = vsel %vm2982_vm8, %v2965_v30, %v2560_v20  ;;  %12222 = vmatprep.mubr.f32.mxu0 %v3788_v5  ;;  %v3789_v14 = vsub.f32 %v15490_v53, %v3788_v5  ;;  %v12994_v5 = vld [vmem:[%s20090_s1 + $0x20] sm:$0xff]  ;;  %v12995_v20 = vld [vmem:[%s20090_s1 + $0x28] sm:$0xff] }
 0x36c   : > { %v3204_v2 = vsel %vm3061_vm9, %v3030_v63, 0  ;;  %1813 = vrot.lane.b32.xlu1 %v11176_v42, %s13059_s6  ;;  %1559 = vrot.lane.b32.xlu0 %v11112_v13, %s13058_s18  ;;  %v20570_v42 = vld [vmem:[#allocation9_spill] sm:$0xff]  ;;  %v20572_v63 = vld [vmem:[#allocation10_spill] sm:$0xff]  ;;  %v11048_v53 = vld [vmem:[%s13685_s16 + $0x1e6] sm:$0xff] }
 0x36d   : > { %v15507_v37 = vand.u32 4294901760, %v3204_v2  ;;  %v3790_v45 = vand.u32 4294901760, %v3789_v14  ;;  %v20571_v13 = vand.u32 4294901760, %v20570_v42  ;;  %v20573_v14 = vand.u32 4294901760, %v20572_v63  ;;  %v11241_v42 = vld [vmem:[%s13685_s16 + $0x1d9] sm:$0xff] }
 0x36e   : > { %v15511_v56 = vpop.permute.xlu1 %1285  ;;  %v2050_v57 = vpop.permute.xlu0 %2049 }
 0x36f   : > { %20568 = vst [vmem:[#allocation76_spill] sm:$0xff] %v15507_v37  ;;  %v15514_v52 = vsub.f32 %v3204_v2, %v15507_v37  ;;  %11892 = vmatprep.mubr.f32.mxu1 %v3790_v45  ;;  %v15521_v30 = vsub.f32 %v12994_v5, %v20571_v13  ;;  %v15530_v2 = vsub.f32 %v12995_v20, %v20573_v14  ;;  %v10971_v37 = vld [vmem:[%s13685_s16 + $0x185] sm:$0xff] }
 0x370   : > { %1815 = vrot.lane.b32.xlu1 %v11177_v29, %s13059_s6  ;;  %2579 = vrot.lane.b32.xlu0 %v11370_v61, %s13062_s7  ;;  %v2706_v18 = vsel %vm2657_vm3, %v10971_v37, %v20574_v33 }
 0x371   : > { %20569 = vst [vmem:[#allocation77_spill] sm:$0xff] %v15514_v52  ;;  %v3798_v45 = vand.u32 4294901760, %v15514_v52  ;;  %v3997_v5 = vand.u32 4294901760, %v15521_v30  ;;  %v4004_v61 = vand.u32 4294901760, %v15530_v2 }
 0x372   : > { %v2306_v13 = vpop.permute.xlu1 %2305  ;;  %v2052_v29 = vpop.permute.xlu0 %2051 }
 0x373   : > { %12223 = vmatmul.mubr.f32.gmra.mrb[46].mxu0 %v3798_v45  ;;  %v3799_v46 = vsub.f32 %v15514_v52, %v3798_v45  ;;  %v3998_v63 = vsub.f32 %v15521_v30, %v3997_v5  ;;  %v4005_v20 = vsub.f32 %v15530_v2, %v4004_v61  ;;  %v12525_v14 = vpack.c.bf16 %v4004_v61, %v3997_v5  ;;  %v11049_v5 = vld [vmem:[%s13685_s16 + $0x1ee] sm:$0xff] }
 0x374   : > { %1305 = vrot.lane.b32.xlu1 %v11048_v53, %s13057_s17  ;;  %2069 = vrot.lane.b32.xlu0 %v11241_v42, %s13060_s11  ;;  %v2771_v53 = vsel %vm2722_vm4, %v2706_v18, %v15461_v49  ;;  %v11113_v42 = vld [vmem:[%s13685_s16 + $0x1e7] sm:$0xff] }
 0x375   : > { %v3800_v0 = vand.u32 4294901760, %v3799_v46  ;;  %v3999_v26 = vand.u32 4294901760, %v3998_v63  ;;  %v4006_v52 = vand.u32 4294901760, %v4005_v20  ;;  %12526 = vmatprep.subr.bf16.mxu0 %v12525_v14  ;;  %v2836_v46 = vsel %vm2787_vm5, %v2771_v53, %v1794_v50  ;;  %v10972_v18 = vld [vmem:[%s13685_s16 + $0x18d] sm:$0xff]  ;;  %v11307_v49 = vld [vmem:[%s13685_s16 + $0x1e2] sm:$0xff] }
 0x376   : > { %v15547_v25 = vpop.permute.xlu1 %1541  ;;  %v15549_v45 = vpop.permute.xlu0 %1287  ;;  %12528 = vmatpush3.bf16.msra.mxu0 %v12525_v14  ;;  %v2901_v37 = vsel %vm2852_vm6, %v2836_v46, %v2050_v57  ;;  %v2707_v50 = vsel %vm2657_vm3, %v10972_v18, %v15463_v60  ;;  %v11179_v18 = vld [vmem:[%s13685_s16 + $0x1f0] sm:$0xff] }
 0x377   : > { %11893 = vmatmul.mubr.f32.gmra.mrb[46].mxu1 %v3800_v0  ;;  %v12489_v33 = vpack.c.bf16 %v4006_v52, %v3999_v26  ;;  %v2966_v61 = vsel %vm2917_vm7, %v2901_v37, %v2306_v13  ;;  %v2772_v13 = vsel %vm2722_vm4, %v2707_v50, %v15485_v22  ;;  %v11114_v37 = vld [vmem:[%s13685_s16 + $0x1ef] sm:$0xff] }
 0x378   : > { %2325 = vrot.lane.b32.xlu1 %v11306_v34, %s13061_s28  ;;  %2071 = vrot.lane.b32.xlu0 %v11242_v41, %s13060_s11  ;;  %v11371_v41 = vld [vmem:[%s13685_s16 + $0x1db] sm:$0xff]  ;;  %v2837_v53 = vsel %vm2787_vm5, %v2772_v13, %v15500_v9 }
 0x379   : > { %12490 = vmatprep.subr.bf16.mxu1 %v12489_v33  ;;  %v2902_v46 = vsel %vm2852_vm6, %v2837_v53, %v2052_v29  ;;  %v11050_v13 = vld [vmem:[%s13685_s16 + $0x1f6] sm:$0xff]  ;;  %v11243_v53 = vld [vmem:[%s13685_s16 + $0x1e9] sm:$0xff] }
 0x37a   : > { %v2562_v63 = vpop.permute.xlu1 %2561  ;;  %v2308_v20 = vpop.permute.xlu0 %2307  ;;  %12492 = vmatpush3.bf16.msra.mxu1 %v12489_v33  ;;  %v11178_v33 = vld [vmem:[%s13685_s16 + $0x1e8] sm:$0xff] }
 0x37b   : > { %v3031_v0 = vsel %vm2982_vm8, %v2966_v61, %v2562_v63  ;;  %v2967_v22 = vsel %vm2917_vm7, %v2902_v46, %v2308_v20 }
 0x37c   : > { %v3207_v34 = vsel %vm3061_vm9, %v3031_v0, 0  ;;  %1561 = vrot.lane.b32.xlu1 %v11113_v42, %s13058_s18  ;;  %1307 = vrot.lane.b32.xlu0 %v11049_v5, %s13057_s17  ;;  %v11372_v0 = vld [vmem:[%s13685_s16 + $0x1e3] sm:$0xff] }
 0x37d   : > { %v15565_v26 = vand.u32 4294901760, %v3207_v34 }
 0x37e   : > { %v1798_v57 = vpop.permute.xlu1 %1797  ;;  %v15571_v52 = vpop.permute.xlu0 %1543 }
 0x37f   : > { %20575 = vst [vmem:[#allocation9_spill] sm:$0xff] %v15565_v26  ;;  %v15576_v14 = vsub.f32 %v3207_v34, %v15565_v26  ;;  %v10976_v26 = vld [vmem:[%s13685_s16 + $0x1ad] sm:$0xff] }
 0x380   : > { %2581 = vrot.lane.b32.xlu1 %v11371_v41, %s13062_s7  ;;  %2327 = vrot.lane.b32.xlu0 %v11307_v49, %s13061_s28 }
 0x381   : > { %20576 = vst [vmem:[#allocation10_spill] sm:$0xff] %v15576_v14  ;;  %v3808_v60 = vand.u32 4294901760, %v15576_v14 }
 0x382   : > { %v15587_v42 = vpop.permute.xlu1 %1799  ;;  %v2564_v5 = vpop.permute.xlu0 %2563 }
 0x383   : > { %v3032_v61 = vsel %vm2982_vm8, %v2967_v22, %v2564_v5  ;;  %12225 = vmatprep.mubr.f32.mxu0 %v3808_v60  ;;  %v3809_v9 = vsub.f32 %v15576_v14, %v3808_v60  ;;  %v11308_v5 = vld [vmem:[%s13685_s16 + $0x1ea] sm:$0xff] }
 0x384   : > { %v3210_v63 = vsel %vm3061_vm9, %v3032_v61, 0  ;;  %1817 = vrot.lane.b32.xlu1 %v11178_v33, %s13059_s6  ;;  %1563 = vrot.lane.b32.xlu0 %v11114_v37, %s13058_s18  ;;  %v10973_v33 = vld [vmem:[%s13685_s16 + $0x195] sm:$0xff] }
 0x385   : > { %v15594_v29 = vand.u32 4294901760, %v3210_v63  ;;  %v3810_v20 = vand.u32 4294901760, %v3809_v9  ;;  %v11244_v61 = vld [vmem:[%s13685_s16 + $0x1f1] sm:$0xff]  ;;  %v2708_v9 = vsel %vm2657_vm3, %v10973_v33, %v15511_v56 }
 0x386   : > { %v15598_v34 = vpop.permute.xlu1 %1289  ;;  %v2054_v41 = vpop.permute.xlu0 %2053  ;;  %v11115_v33 = vld [vmem:[%s13685_s16 + $0x1f7] sm:$0xff] }
 0x387   : > { %20577 = vst [vmem:[#allocation18_spill] sm:$0xff] %v15594_v29  ;;  %v15601_v49 = vsub.f32 %v3210_v63, %v15594_v29  ;;  %11895 = vmatprep.mubr.f32.mxu1 %v3810_v20 }
 0x388   : > { %1819 = vrot.lane.b32.xlu1 %v11179_v18, %s13059_s6  ;;  %2583 = vrot.lane.b32.xlu0 %v11372_v0, %s13062_s7  ;;  %v2773_v18 = vsel %vm2722_vm4, %v2708_v9, %v15547_v25  ;;  %v12996_v0 = vld [vmem:[%s20090_s1 + $0x30] sm:$0xff]  ;;  %v11051_v25 = vld [vmem:[%s13685_s16 + $0x1fe] sm:$0xff] }
 0x389   : > { %20578 = vst [vmem:[#allocation78_spill] sm:$0xff] %v15601_v49  ;;  %v3818_v50 = vand.u32 4294901760, %v15601_v49 }
 0x38a   : > { %v2310_v46 = vpop.permute.xlu1 %2309  ;;  %v2056_v60 = vpop.permute.xlu0 %2055 }
 0x38b   : > { %12226 = vmatmul.mubr.f32.gmra.mrb[48].mxu0 %v3818_v50  ;;  %v3819_v37 = vsub.f32 %v15601_v49, %v3818_v50  ;;  %v20579_v50 = vld [vmem:[#allocation12_spill] sm:$0xff] }
 0x38c   : > { %1309 = vrot.lane.b32.xlu1 %v11050_v13, %s13057_s17  ;;  %2073 = vrot.lane.b32.xlu0 %v11243_v53, %s13060_s11  ;;  %v15626_v13 = vsub.f32 %v12996_v0, %v20579_v50  ;;  %v2838_v53 = vsel %vm2787_vm5, %v2773_v18, %v1798_v57  ;;  %v10974_v0 = vld [vmem:[%s13685_s16 + $0x19d] sm:$0xff]  ;;  %v11309_v18 = vld [vmem:[%s13685_s16 + $0x1f2] sm:$0xff] }
 0x38d   : > { %v3820_v22 = vand.u32 4294901760, %v3819_v37  ;;  %v2903_v56 = vsel %vm2852_vm6, %v2838_v53, %v2054_v41  ;;  %v2709_v53 = vsel %vm2657_vm3, %v10974_v0, %v15549_v45  ;;  %v11180_v0 = vld [vmem:[%s13685_s16 + $0x1f8] sm:$0xff] }
 0x38e   : > { %v15616_v63 = vpop.permute.xlu1 %1545  ;;  %v15618_v20 = vpop.permute.xlu0 %1291  ;;  %v4011_v37 = vand.u32 4294901760, %v15626_v13 }
 0x38f   : > { %11896 = vmatmul.mubr.f32.gmra.mrb[48].mxu1 %v3820_v22  ;;  %v2968_v22 = vsel %vm2917_vm7, %v2903_v56, %v2310_v46 }
 0x390   : > { %2329 = vrot.lane.b32.xlu1 %v11308_v5, %s13061_s28  ;;  %2075 = vrot.lane.b32.xlu0 %v11244_v61, %s13060_s11  ;;  %v4012_v57 = vsub.f32 %v15626_v13, %v4011_v37  ;;  %v11373_v61 = vld [vmem:[%s13685_s16 + $0x1eb] sm:$0xff] }
 0x391   : > { %12261 = vmatprep.subr.mxu0 %v4011_v37 }
 0x392   : > { %v2566_v9 = vpop.permute.xlu1 %2565  ;;  %v2312_v49 = vpop.permute.xlu0 %2311  ;;  %v4013_v46 = vand.u32 4294901760, %v4012_v57  ;;  %12262 = vmatpush3.msra.mxu0 %v4011_v37  ;;  %v11116_v57 = vld [vmem:[%s13685_s16 + $0x1ff] sm:$0xff] }
 0x393   : > { %v3033_v14 = vsel %vm2982_vm8, %v2968_v22, %v2566_v9  ;;  %v20581_v9 = vld [vmem:[#allocation5_spill] sm:$0xff] }
 0x394   : > { %v3213_v5 = vsel %vm3061_vm9, %v3033_v14, 0  ;;  %1565 = vrot.lane.b32.xlu1 %v11115_v33, %s13058_s18  ;;  %1311 = vrot.lane.b32.xlu0 %v11051_v25, %s13057_s17  ;;  %v2774_v14 = vsel %vm2722_vm4, %v2709_v53, %v15571_v52 }
 0x395   : > { %v15642_v41 = vand.u32 4294901760, %v3213_v5  ;;  %12530 = vmatprep.subr.bf16.mxu0 %v20581_v9  ;;  %11931 = vmatprep.subr.mxu1 %v4013_v46  ;;  %v2839_v25 = vsel %vm2787_vm5, %v2774_v14, %v15587_v42 }
 0x396   : > { %v1802_v56 = vpop.permute.xlu1 %1801  ;;  %v15648_v22 = vpop.permute.xlu0 %1547  ;;  %v2904_v45 = vsel %vm2852_vm6, %v2839_v25, %v2056_v60  ;;  %11932 = vmatpush3.msra.mxu1 %v4013_v46  ;;  %v11374_v46 = vld [vmem:[%s13685_s16 + $0x1f3] sm:$0xff] }
 0x397   : > { %20580 = vst [vmem:[#allocation12_spill] sm:$0xff] %v15642_v41  ;;  %v15654_v33 = vsub.f32 %v3213_v5, %v15642_v41  ;;  %v2969_v52 = vsel %vm2917_vm7, %v2904_v45, %v2312_v49  ;;  %v11181_v49 = vld [vmem:[%s13685_s16 + $0x200] sm:$0xff] }
 0x398   : > { %2585 = vrot.lane.b32.xlu1 %v11373_v61, %s13062_s7  ;;  %2331 = vrot.lane.b32.xlu0 %v11309_v18, %s13061_s28 }
 0x399   : > { %20582 = vst [vmem:[#allocation5_spill] sm:$0xff] %v15654_v33  ;;  %v3828_v37 = vand.u32 4294901760, %v15654_v33 }
 0x39a   : > { %v1804_v5 = vpop.permute.xlu1 %1803  ;;  %v2568_v53 = vpop.permute.xlu0 %2567 }
 0x39b   : > { %v3034_v41 = vsel %vm2982_vm8, %v2969_v52, %v2568_v53  ;;  %12228 = vmatprep.mubr.f32.mxu0 %v3828_v37  ;;  %v3829_v42 = vsub.f32 %v15654_v33, %v3828_v37  ;;  %v11246_v37 = vld [vmem:[%s13685_s16 + $0x201] sm:$0xff] }
 0x39c   : > { %v3216_v60 = vsel %vm3061_vm9, %v3034_v41, 0  ;;  %1821 = vrot.lane.b32.xlu1 %v11180_v0, %s13059_s6  ;;  %1567 = vrot.lane.b32.xlu0 %v11116_v57, %s13058_s18  ;;  %v11245_v0 = vld [vmem:[%s13685_s16 + $0x1f9] sm:$0xff]  ;;  %v10975_v53 = vld [vmem:[%s13685_s16 + $0x1a5] sm:$0xff] }
 0x39d   : > { %v15670_v61 = vand.u32 4294901760, %v3216_v60  ;;  %v3830_v18 = vand.u32 4294901760, %v3829_v42 }
 0x39e   : > { %v15674_v14 = vpop.permute.xlu1 %1293  ;;  %v2058_v25 = vpop.permute.xlu0 %2057 }
 0x39f   : > { %20583 = vst [vmem:[#allocation79_spill] sm:$0xff] %v15670_v61  ;;  %v15677_v45 = vsub.f32 %v3216_v60, %v15670_v61  ;;  %11898 = vmatprep.mubr.f32.mxu1 %v3830_v18  ;;  %v11311_v18 = vld [vmem:[%s13685_s16 + $0x202] sm:$0xff] }
 0x3a0   : > { %1823 = vrot.lane.b32.xlu1 %v11181_v49, %s13059_s6  ;;  %2587 = vrot.lane.b32.xlu0 %v11374_v46, %s13062_s7  ;;  %v11310_v49 = vld [vmem:[%s13685_s16 + $0x1fa] sm:$0xff]  ;;  %v2710_v46 = vsel %vm2657_vm3, %v10975_v53, %v15598_v34 }
 0x3a1   : > { %20584 = vst [vmem:[#allocation80_spill] sm:$0xff] %v15677_v45  ;;  %v3838_v41 = vand.u32 4294901760, %v15677_v45  ;;  %v2775_v29 = vsel %vm2722_vm4, %v2710_v46, %v15616_v63 }
 0x3a2   : > { %v2314_v57 = vpop.permute.xlu1 %2313  ;;  %v2060_v52 = vpop.permute.xlu0 %2059 }
 0x3a3   : > { %12229 = vmatmul.mubr.f32.gmra.mrb[50].mxu0 %v3838_v41  ;;  %v3839_v42 = vsub.f32 %v15677_v45, %v3838_v41  ;;  %v2840_v41 = vsel %vm2787_vm5, %v2775_v29, %v1802_v56  ;;  %v15712_v56 = vpack.c.bf16 %v15310_v21, %v15303_v59 }
 0x3a4   : > { %2079 = vrot.lane.b32.xlu1 %v11246_v37, %s13060_s11  ;;  %2077 = vrot.lane.b32.xlu0 %v11245_v0, %s13060_s11  ;;  %v2905_v37 = vsel %vm2852_vm6, %v2840_v41, %v2058_v25  ;;  %v11376_v0 = vld [vmem:[%s13685_s16 + $0x203] sm:$0xff]  ;;  %v2711_v25 = vsel %vm2657_vm3, %v10976_v26, %v15618_v20 }
 0x3a5   : > { %v3840_v60 = vand.u32 4294901760, %v3839_v42  ;;  %v11375_v42 = vld [vmem:[%s13685_s16 + $0x1fb] sm:$0xff]  ;;  %v2970_v45 = vsel %vm2917_vm7, %v2905_v37, %v2314_v57  ;;  %12494 = vmatprep.subr.bf16.mxu1 %v15712_v56 }
 0x3a6   : > { %v1550_v33 = vpop.permute.xlu1 %1549  ;;  %v15692_v61 = vpop.permute.xlu0 %1295 }
 0x3a7   : > { %11899 = vmatmul.mubr.f32.gmra.mrb[50].mxu1 %v3840_v60 }
 0x3a8   : > { %2335 = vrot.lane.b32.xlu1 %v11311_v18, %s13061_s28  ;;  %2333 = vrot.lane.b32.xlu0 %v11310_v49, %s13061_s28 }
 0x3aa   : > { %v2570_v34 = vpop.permute.xlu1 %2569  ;;  %v2316_v53 = vpop.permute.xlu0 %2315 }
 0x3ab   : > { %v3035_v11 = vsel %vm2982_vm8, %v2970_v45, %v2570_v34  ;;  %v2776_v45 = vsel %vm2722_vm4, %v2711_v25, %v15648_v22  ;;  %v10977_v25 = vld [vmem:[%s13685_s16 + $0x1b5] sm:$0xff] }
 0x3ac   : > { %v3219_v63 = vsel %vm3061_vm9, %v3035_v11, 0  ;;  %2591 = vrot.lane.b32.xlu1 %v11376_v0, %s13062_s7  ;;  %2589 = vrot.lane.b32.xlu0 %v11375_v42, %s13062_s7  ;;  %v2841_v18 = vsel %vm2787_vm5, %v2776_v45, %v1804_v5 }
 0x3ad   : > { %v15708_v29 = vand.u32 4294901760, %v3219_v63  ;;  %v2906_v49 = vsel %vm2852_vm6, %v2841_v18, %v2060_v52 }
 0x3ae   : > { %v1806_v57 = vpop.permute.xlu1 %1805  ;;  %v1552_v60 = vpop.permute.xlu0 %1551  ;;  %v2971_v21 = vsel %vm2917_vm7, %v2906_v49, %v2316_v53  ;;  %v2712_v49 = vsel %vm2657_vm3, %v10977_v25, %v15674_v14 }
 0x3af   : > { %20585 = vst [vmem:[#allocation81_spill] sm:$0xff] %v15708_v29  ;;  %v15719_v11 = vsub.f32 %v3219_v63, %v15708_v29 }
 0x3b1   : > { %20586 = vst [vmem:[#allocation82_spill] sm:$0xff] %v15719_v11  ;;  %v3848_v59 = vand.u32 4294901760, %v15719_v11 }
 0x3b2   : > { %v1808_v26 = vpop.permute.xlu1 %1807  ;;  %v2572_v20 = vpop.permute.xlu0 %2571 }
 0x3b3   : > { %v3036_v46 = vsel %vm2982_vm8, %v2971_v21, %v2572_v20  ;;  %12231 = vmatprep.mubr.f32.mxu0 %v3848_v59  ;;  %v3849_v22 = vsub.f32 %v15719_v11, %v3848_v59  ;;  %v2777_v20 = vsel %vm2722_vm4, %v2712_v49, %v1550_v33 }
 0x3b4   : > { %v3222_v41 = vsel %vm3061_vm9, %v3036_v46, 0  ;;  %v2842_v46 = vsel %vm2787_vm5, %v2777_v20, %v1806_v57 }
 0x3b5   : > { %v15729_v37 = vand.u32 4294901760, %v3222_v41  ;;  %v3850_v0 = vand.u32 4294901760, %v3849_v22 }
 0x3b6   : > { %v1298_v5 = vpop.permute.xlu1 %1297  ;;  %v2062_v42 = vpop.permute.xlu0 %2061 }
 0x3b7   : > { %20587 = vst [vmem:[#allocation83_spill] sm:$0xff] %v15729_v37  ;;  %v15732_v52 = vsub.f32 %v3222_v41, %v15729_v37  ;;  %11901 = vmatprep.mubr.f32.mxu1 %v3850_v0  ;;  %v2907_v22 = vsel %vm2852_vm6, %v2842_v46, %v2062_v42  ;;  %v10978_v37 = vld [vmem:[%s13685_s16 + $0x1bd] sm:$0xff] }
 0x3b8   : > { %v2713_v14 = vsel %vm2657_vm3, %v10978_v37, %v15692_v61 }
 0x3b9   : > { %20588 = vst [vmem:[#allocation84_spill] sm:$0xff] %v15732_v52  ;;  %v3858_v34 = vand.u32 4294901760, %v15732_v52  ;;  %v2778_v57 = vsel %vm2722_vm4, %v2713_v14, %v1552_v60 }
 0x3ba   : > { %v2318_v53 = vpop.permute.xlu1 %2317  ;;  %v2064_v63 = vpop.permute.xlu0 %2063 }
 0x3bb   : > { %12232 = vmatmul.mubr.f32.gmra.mrb[52].mxu0 %v3858_v34  ;;  %v3859_v45 = vsub.f32 %v15732_v52, %v3858_v34  ;;  %v2972_v41 = vsel %vm2917_vm7, %v2907_v22, %v2318_v53  ;;  %v2843_v53 = vsel %vm2787_vm5, %v2778_v57, %v1808_v26  ;;  %v10979_v57 = vld [vmem:[%s13685_s16 + $0x1c5] sm:$0xff] }
 0x3bd   : > { %v3860_v18 = vand.u32 4294901760, %v3859_v45 }
 0x3be   : > { %v1554_v59 = vpop.permute.xlu1 %1553  ;;  %v1300_v21 = vpop.permute.xlu0 %1299 }
 0x3bf   : > { %11902 = vmatmul.mubr.f32.gmra.mrb[52].mxu1 %v3860_v18  ;;  %v2908_v18 = vsel %vm2852_vm6, %v2843_v53, %v2064_v63 }
 0x3c2   : > { %v2574_v0 = vpop.permute.xlu1 %2573  ;;  %v2320_v11 = vpop.permute.xlu0 %2319 }
 0x3c3   : > { %v3037_v34 = vsel %vm2982_vm8, %v2972_v41, %v2574_v0  ;;  %v2973_v20 = vsel %vm2917_vm7, %v2908_v18, %v2320_v11 }
 0x3c4   : > { %v3225_v45 = vsel %vm3061_vm9, %v3037_v34, 0 }
 0x3c5   : > { %v15746_v52 = vand.u32 4294901760, %v3225_v45 }
 0x3c6   : > { %v1810_v33 = vpop.permute.xlu1 %1809  ;;  %v1556_v25 = vpop.permute.xlu0 %1555 }
 0x3c7   : > { %20589 = vst [vmem:[#allocation85_spill] sm:$0xff] %v15746_v52  ;;  %v15752_v42 = vsub.f32 %v3225_v45, %v15746_v52  ;;  %v10980_v52 = vld [vmem:[%s13685_s16 + $0x1cd] sm:$0xff] }
 0x3c9   : > { %20590 = vst [vmem:[#allocation86_spill] sm:$0xff] %v15752_v42  ;;  %v3868_v49 = vand.u32 4294901760, %v15752_v42 }
 0x3ca   : > { %v1812_v46 = vpop.permute.xlu1 %1811  ;;  %v2576_v22 = vpop.permute.xlu0 %2575 }
 0x3cb   : > { %v3038_v61 = vsel %vm2982_vm8, %v2973_v20, %v2576_v22  ;;  %12234 = vmatprep.mubr.f32.mxu0 %v3868_v49  ;;  %v3869_v37 = vsub.f32 %v15752_v42, %v3868_v49  ;;  %v2714_v49 = vsel %vm2657_vm3, %v10979_v57, %v1298_v5  ;;  %v2715_v5 = vsel %vm2657_vm3, %v10980_v52, %v1300_v21 }
 0x3cc   : > { %v3228_v60 = vsel %vm3061_vm9, %v3038_v61, 0  ;;  %v2779_v61 = vsel %vm2722_vm4, %v2714_v49, %v1554_v59 }
 0x3cd   : > { %v15761_v41 = vand.u32 4294901760, %v3228_v60  ;;  %v3870_v0 = vand.u32 4294901760, %v3869_v37  ;;  %v2844_v37 = vsel %vm2787_vm5, %v2779_v61, %v1810_v33 }
 0x3ce   : > { %v1302_v26 = vpop.permute.xlu1 %1301  ;;  %v2066_v34 = vpop.permute.xlu0 %2065 }
 0x3cf   : > { %20591 = vst [vmem:[#allocation87_spill] sm:$0xff] %v15761_v41  ;;  %v15764_v63 = vsub.f32 %v3228_v60, %v15761_v41  ;;  %11904 = vmatprep.mubr.f32.mxu1 %v3870_v0  ;;  %v2909_v60 = vsel %vm2852_vm6, %v2844_v37, %v2066_v34 }
 0x3d1   : > { %20592 = vst [vmem:[#allocation88_spill] sm:$0xff] %v15764_v63  ;;  %v3878_v11 = vand.u32 4294901760, %v15764_v63 }
 0x3d2   : > { %v2322_v45 = vpop.permute.xlu1 %2321  ;;  %v2068_v14 = vpop.permute.xlu0 %2067 }
 0x3d3   : > { %12235 = vmatmul.mubr.f32.gmra.mrb[54].mxu0 %v3878_v11  ;;  %v3879_v53 = vsub.f32 %v15764_v63, %v3878_v11  ;;  %v2974_v0 = vsel %vm2917_vm7, %v2909_v60, %v2322_v45 }
 0x3d5   : > { %v3880_v18 = vand.u32 4294901760, %v3879_v53 }
 0x3d6   : > { %v1558_v20 = vpop.permute.xlu1 %1557  ;;  %v1304_v22 = vpop.permute.xlu0 %1303 }
 0x3d7   : > { %11905 = vmatmul.mubr.f32.gmra.mrb[54].mxu1 %v3880_v18  ;;  %v2780_v18 = vsel %vm2722_vm4, %v2715_v5, %v1556_v25 }
 0x3d8   : > { %v2845_v34 = vsel %vm2787_vm5, %v2780_v18, %v1812_v46  ;;  %v10981_v18 = vld [vmem:[%s13685_s16 + $0x1d5] sm:$0xff] }
 0x3d9   : > { %v2910_v45 = vsel %vm2852_vm6, %v2845_v34, %v2068_v14 }
 0x3da   : > { %v2578_v42 = vpop.permute.xlu1 %2577  ;;  %v2324_v41 = vpop.permute.xlu0 %2323 }
 0x3db   : > { %v3039_v29 = vsel %vm2982_vm8, %v2974_v0, %v2578_v42  ;;  %v2975_v42 = vsel %vm2917_vm7, %v2910_v45, %v2324_v41 }
 0x3dc   : > { %v3231_v11 = vsel %vm3061_vm9, %v3039_v29, 0 }
 0x3dd   : > { %v15777_v53 = vand.u32 4294901760, %v3231_v11 }
 0x3de   : > { %v1814_v57 = vpop.permute.xlu1 %1813  ;;  %v1560_v59 = vpop.permute.xlu0 %1559 }
 0x3df   : > { %20593 = vst [vmem:[#allocation89_spill] sm:$0xff] %v15777_v53  ;;  %v15782_v33 = vsub.f32 %v3231_v11, %v15777_v53 }
 0x3e1   : > { %20594 = vst [vmem:[#allocation90_spill] sm:$0xff] %v15782_v33  ;;  %v3888_v49 = vand.u32 4294901760, %v15782_v33 }
 0x3e2   : > { %v1816_v29 = vpop.permute.xlu1 %1815  ;;  %v2580_v61 = vpop.permute.xlu0 %2579 }
 0x3e3   : > { %v3040_v52 = vsel %vm2982_vm8, %v2975_v42, %v2580_v61  ;;  %12237 = vmatprep.mubr.f32.mxu0 %v3888_v49  ;;  %v3889_v21 = vsub.f32 %v15782_v33, %v3888_v49  ;;  %v2716_v49 = vsel %vm2657_vm3, %v10981_v18, %v1302_v26 }
 0x3e4   : > { %v3234_v25 = vsel %vm3061_vm9, %v3040_v52, 0  ;;  %v2781_v52 = vsel %vm2722_vm4, %v2716_v49, %v1558_v20 }
 0x3e5   : > { %v15791_v37 = vand.u32 4294901760, %v3234_v25  ;;  %v3890_v60 = vand.u32 4294901760, %v3889_v21  ;;  %v2846_v21 = vsel %vm2787_vm5, %v2781_v52, %v1814_v57 }
 0x3e6   : > { %v1306_v46 = vpop.permute.xlu1 %1305  ;;  %v2070_v0 = vpop.permute.xlu0 %2069 }
 0x3e7   : > { %20595 = vst [vmem:[#allocation91_spill] sm:$0xff] %v15791_v37  ;;  %v15794_v14 = vsub.f32 %v3234_v25, %v15791_v37  ;;  %11907 = vmatprep.mubr.f32.mxu1 %v3890_v60  ;;  %v2911_v25 = vsel %vm2852_vm6, %v2846_v21, %v2070_v0  ;;  %v10982_v37 = vld [vmem:[%s13685_s16 + $0x1dd] sm:$0xff] }
 0x3e8   : > { %v2717_v26 = vsel %vm2657_vm3, %v10982_v37, %v1304_v22 }
 0x3e9   : > { %20596 = vst [vmem:[#allocation92_spill] sm:$0xff] %v15794_v14  ;;  %v3898_v41 = vand.u32 4294901760, %v15794_v14 }
 0x3ea   : > { %v2326_v11 = vpop.permute.xlu1 %2325  ;;  %v2072_v5 = vpop.permute.xlu0 %2071 }
 0x3eb   : > { %12238 = vmatmul.mubr.f32.gmra.mrb[56].mxu0 %v3898_v41  ;;  %v3899_v34 = vsub.f32 %v15794_v14, %v3898_v41  ;;  %v2976_v60 = vsel %vm2917_vm7, %v2911_v25, %v2326_v11 }
 0x3ed   : > { %v3900_v45 = vand.u32 4294901760, %v3899_v34 }
 0x3ee   : > { %v1562_v42 = vpop.permute.xlu1 %1561  ;;  %v1308_v61 = vpop.permute.xlu0 %1307 }
 0x3ef   : > { %11908 = vmatmul.mubr.f32.gmra.mrb[56].mxu1 %v3900_v45  ;;  %v2782_v45 = vsel %vm2722_vm4, %v2717_v26, %v1560_v59 }
 0x3f0   : > { %v2847_v0 = vsel %vm2787_vm5, %v2782_v45, %v1816_v29  ;;  %v10983_v45 = vld [vmem:[%s13685_s16 + $0x1e5] sm:$0xff] }
 0x3f1   : > { %v2912_v11 = vsel %vm2852_vm6, %v2847_v0, %v2072_v5 }
 0x3f2   : > { %v2582_v33 = vpop.permute.xlu1 %2581  ;;  %v2328_v63 = vpop.permute.xlu0 %2327 }
 0x3f3   : > { %v3041_v53 = vsel %vm2982_vm8, %v2976_v60, %v2582_v33  ;;  %v2977_v33 = vsel %vm2917_vm7, %v2912_v11, %v2328_v63 }
 0x3f4   : > { %v3237_v41 = vsel %vm3061_vm9, %v3041_v53, 0 }
 0x3f5   : > { %v15807_v34 = vand.u32 4294901760, %v3237_v41 }
 0x3f6   : > { %v1818_v18 = vpop.permute.xlu1 %1817  ;;  %v1564_v20 = vpop.permute.xlu0 %1563 }
 0x3f7   : > { %20597 = vst [vmem:[#allocation93_spill] sm:$0xff] %v15807_v34  ;;  %v15812_v57 = vsub.f32 %v3237_v41, %v15807_v34 }
 0x3f9   : > { %20598 = vst [vmem:[#allocation94_spill] sm:$0xff] %v15812_v57  ;;  %v3908_v49 = vand.u32 4294901760, %v15812_v57 }
 0x3fa   : > { %v1820_v53 = vpop.permute.xlu1 %1819  ;;  %v2584_v52 = vpop.permute.xlu0 %2583 }
 0x3fb   : > { %v3042_v22 = vsel %vm2982_vm8, %v2977_v33, %v2584_v52  ;;  %12240 = vmatprep.mubr.f32.mxu0 %v3908_v49  ;;  %v3909_v37 = vsub.f32 %v15812_v57, %v3908_v49  ;;  %v2718_v49 = vsel %vm2657_vm3, %v10983_v45, %v1306_v46 }
 0x3fc   : > { %v3240_v59 = vsel %vm3061_vm9, %v3042_v22, 0  ;;  %v2783_v22 = vsel %vm2722_vm4, %v2718_v49, %v1562_v42 }
 0x3fd   : > { %v15821_v21 = vand.u32 4294901760, %v3240_v59  ;;  %v3910_v25 = vand.u32 4294901760, %v3909_v37  ;;  %v2848_v37 = vsel %vm2787_vm5, %v2783_v22, %v1818_v18 }
 0x3fe   : > { %v1310_v29 = vpop.permute.xlu1 %1309  ;;  %v2074_v60 = vpop.permute.xlu0 %2073 }
 0x3ff   : > { %20599 = vst [vmem:[#allocation95_spill] sm:$0xff] %v15821_v21  ;;  %v15824_v5 = vsub.f32 %v3240_v59, %v15821_v21  ;;  %11910 = vmatprep.mubr.f32.mxu1 %v3910_v25  ;;  %v2913_v59 = vsel %vm2852_vm6, %v2848_v37, %v2074_v60  ;;  %v10984_v21 = vld [vmem:[%s13685_s16 + $0x1ed] sm:$0xff] }
 0x400   : > { %v2719_v46 = vsel %vm2657_vm3, %v10984_v21, %v1308_v61 }
 0x401   : > { %20600 = vst [vmem:[#allocation96_spill] sm:$0xff] %v15824_v5  ;;  %v3918_v63 = vand.u32 4294901760, %v15824_v5 }
 0x402   : > { %v2330_v41 = vpop.permute.xlu1 %2329  ;;  %v2076_v26 = vpop.permute.xlu0 %2075 }
 0x403   : > { %12241 = vmatmul.mubr.f32.gmra.mrb[58].mxu0 %v3918_v63  ;;  %v3919_v0 = vsub.f32 %v15824_v5, %v3918_v63  ;;  %v2978_v25 = vsel %vm2917_vm7, %v2913_v59, %v2330_v41 }
 0x405   : > { %v3920_v11 = vand.u32 4294901760, %v3919_v0 }
 0x406   : > { %v1566_v33 = vpop.permute.xlu1 %1565  ;;  %v1312_v52 = vpop.permute.xlu0 %1311  ;;  %v20638_v5 = vld [vmem:[#allocation95_spill] sm:$0xff] }
 0x407   : > { %11911 = vmatmul.mubr.f32.gmra.mrb[58].mxu1 %v3920_v11  ;;  %v2784_v11 = vsel %vm2722_vm4, %v2719_v46, %v1564_v20 }
 0x408   : > { %v2849_v60 = vsel %vm2787_vm5, %v2784_v11, %v1820_v53 }
 0x409   : > { %v2914_v41 = vsel %vm2852_vm6, %v2849_v60, %v2076_v26  ;;  %v10986_v26 = vld [vmem:[%s13685_s16 + $0x1fd] sm:$0xff] }
 0x40a   : > { %v2586_v57 = vpop.permute.xlu1 %2585  ;;  %v2332_v14 = vpop.permute.xlu0 %2331  ;;  %v2721_v60 = vsel %vm2657_vm3, %v10986_v26, %v1312_v52 }
 0x40b   : > { %v3043_v34 = vsel %vm2982_vm8, %v2978_v25, %v2586_v57 }
 0x40c   : > { %v3243_v63 = vsel %vm3061_vm9, %v3043_v34, 0  ;;  %v2979_v34 = vsel %vm2917_vm7, %v2914_v41, %v2332_v14 }
 0x40d   : > { %v15837_v0 = vand.u32 4294901760, %v3243_v63 }
 0x40e   : > { %v1822_v45 = vpop.permute.xlu1 %1821  ;;  %v1568_v42 = vpop.permute.xlu0 %1567 }
 0x40f   : > { %20601 = vst [vmem:[#allocation97_spill] sm:$0xff] %v15837_v0  ;;  %v15842_v18 = vsub.f32 %v3243_v63, %v15837_v0  ;;  %v10985_v63 = vld [vmem:[%s13685_s16 + $0x1f5] sm:$0xff] }
 0x410   : > { %v2720_v11 = vsel %vm2657_vm3, %v10985_v63, %v1310_v29 }
 0x411   : > { %20602 = vst [vmem:[#allocation98_spill] sm:$0xff] %v15842_v18  ;;  %v3928_v57 = vand.u32 4294901760, %v15842_v18 }
 0x412   : > { %v1824_v49 = vpop.permute.xlu1 %1823  ;;  %v2588_v22 = vpop.permute.xlu0 %2587 }
 0x413   : > { %v3044_v61 = vsel %vm2982_vm8, %v2979_v34, %v2588_v22  ;;  %12243 = vmatprep.mubr.f32.mxu0 %v3928_v57  ;;  %v3929_v20 = vsub.f32 %v15842_v18, %v3928_v57  ;;  %v2785_v34 = vsel %vm2722_vm4, %v2720_v11, %v1566_v33  ;;  %v2786_v22 = vsel %vm2722_vm4, %v2721_v60, %v1568_v42 }
 0x414   : > { %v3246_v21 = vsel %vm3061_vm9, %v3044_v61, 0 }
 0x415   : > { %v15851_v37 = vand.u32 4294901760, %v3246_v21  ;;  %v3930_v59 = vand.u32 4294901760, %v3929_v20  ;;  %v2850_v20 = vsel %vm2787_vm5, %v2785_v34, %v1822_v45 }
 0x416   : > { %v2080_v25 = vpop.permute.xlu1 %2079  ;;  %v2078_v53 = vpop.permute.xlu0 %2077 }
 0x417   : > { %20603 = vst [vmem:[#allocation99_spill] sm:$0xff] %v15851_v37  ;;  %v15856_v46 = vsub.f32 %v3246_v21, %v15851_v37  ;;  %11913 = vmatprep.mubr.f32.mxu1 %v3930_v59  ;;  %v2851_v21 = vsel %vm2787_vm5, %v2786_v22, %v1824_v49  ;;  %v2915_v18 = vsel %vm2852_vm6, %v2850_v20, %v2078_v53  ;;  %v20607_v22 = vld [vmem:[#allocation19_spill] sm:$0xff] }
 0x418   : > { %v2916_v59 = vsel %vm2852_vm6, %v2851_v21, %v2080_v25  ;;  %v20608_v21 = vld [vmem:[#allocation21_spill] sm:$0xff] }
 0x419   : > { %20604 = vst [vmem:[#allocation100_spill] sm:$0xff] %v15856_v46  ;;  %v3938_v14 = vand.u32 4294901760, %v15856_v46 }
 0x41a   : > { %v2336_v41 = vpop.permute.xlu1 %2335  ;;  %v2334_v57 = vpop.permute.xlu0 %2333 }
 0x41b   : > { %12244 = vmatmul.mubr.f32.gmra.mrb[60].mxu0 %v3938_v14  ;;  %v3939_v61 = vsub.f32 %v15856_v46, %v3938_v14  ;;  %v2981_v52 = vsel %vm2917_vm7, %v2916_v59, %v2336_v41  ;;  %v2980_v63 = vsel %vm2917_vm7, %v2915_v18, %v2334_v57  ;;  %v12497_v59 = vpack.c.bf16 %v15416_v55, %v15409_v38  ;;  %v20610_v38 = vld [vmem:[#allocation11_spill] sm:$0xff]  ;;  %v20611_v55 = vld [vmem:[#allocation53_spill] sm:$0xff] }
 0x41c   : > { %v20637_v46 = vld [vmem:[#allocation93_spill] sm:$0xff] }
 0x41d   : > { %v3940_v29 = vand.u32 4294901760, %v3939_v61 }
 0x41e   : > { %v2592_v26 = vpop.permute.xlu1 %2591  ;;  %v2590_v33 = vpop.permute.xlu0 %2589 }
 0x41f   : > { %v3046_v42 = vsel %vm2982_vm8, %v2981_v52, %v2592_v26  ;;  %v3045_v11 = vsel %vm2982_vm8, %v2980_v63, %v2590_v33  ;;  %11914 = vmatmul.mubr.f32.gmra.mrb[60].mxu1 %v3940_v29  ;;  %v20609_v29 = vld [vmem:[#allocation8_spill] sm:$0xff]  ;;  %v20617_v52 = vld [vmem:[#allocation65_spill] sm:$0xff]  ;;  %v20618_v63 = vld [vmem:[#allocation67_spill] sm:$0xff] }
 0x420   : > { %v3252_v45 = vsel %vm3061_vm9, %v3046_v42, 0  ;;  %v3249_v49 = vsel %vm3061_vm9, %v3045_v11, 0  ;;  %v20619_v26 = vld [vmem:[#allocation69_spill] sm:$0xff]  ;;  %v20620_v33 = vld [vmem:[#allocation71_spill] sm:$0xff]  ;;  %v20622_v11 = vld [vmem:[#allocation74_spill] sm:$0xff] }
 0x421   : > { %v15874_v14 = vand.u32 4294901760, %v3252_v45  ;;  %v15876_v25 = vand.u32 4294901760, %v3249_v49  ;;  %v20621_v42 = vld [vmem:[#allocation13_spill] sm:$0xff] }
 0x423   : > { %v15879_v53 = vsub.f32 %v3252_v45, %v15874_v14  ;;  %v15882_v18 = vsub.f32 %v3249_v49, %v15876_v25  ;;  %v20623_v45 = vld [vmem:[#allocation15_spill] sm:$0xff]  ;;  %v20624_v49 = vld [vmem:[#allocation6_spill] sm:$0xff] }
 0x425   : > { %20605 = vst [vmem:[#allocation101_spill] sm:$0xff] %v15879_v53  ;;  %20606 = vst [vmem:[#allocation102_spill] sm:$0xff] %v15882_v18  ;;  %v3948_v60 = vand.u32 4294901760, %v15882_v18  ;;  %v3958_v41 = vand.u32 4294901760, %v15879_v53 }
 0x427   : > { %12246 = vmatprep.mubr.f32.mxu0 %v3948_v60  ;;  %v3949_v57 = vsub.f32 %v15882_v18, %v3948_v60  ;;  %v3959_v34 = vsub.f32 %v15879_v53, %v3958_v41  ;;  %v20625_v60 = vld [vmem:[#allocation17_spill] sm:$0xff]  ;;  %v20636_v18 = vld [vmem:[#allocation91_spill] sm:$0xff] }
 0x428   : > { %12247 = vmatmul.mubr.f32.gmra.mrb[62].mxu0 %v3958_v41  ;;  %v20626_v41 = vld [vmem:[#allocation76_spill] sm:$0xff]  ;;  %v20635_v53 = vld [vmem:[#allocation89_spill] sm:$0xff] }
 0x429   : > { %12263 = vmatprep.mubr.f32.mxu0 %v20607_v22  ;;  %v3950_v61 = vand.u32 4294901760, %v3949_v57  ;;  %v3960_v20 = vand.u32 4294901760, %v3959_v34  ;;  %v20627_v57 = vld [vmem:[#allocation9_spill] sm:$0xff]  ;;  %v20628_v34 = vld [vmem:[#allocation18_spill] sm:$0xff] }
 0x42b   : > { %11916 = vmatprep.mubr.f32.mxu1 %v3950_v61  ;;  %v20629_v61 = vld [vmem:[#allocation12_spill] sm:$0xff] }
 0x42c   : > { %11917 = vmatmul.mubr.f32.gmra.mrb[62].mxu1 %v3960_v20  ;;  %12264 = vmatmul.mubr.f32.vlgmr.msra.gmra.mrb[0].mxu0 %v20608_v21  ;;  %v20630_v20 = vld [vmem:[#allocation79_spill] sm:$0xff] }
 0x42d   : > { %11933 = vmatprep.mubr.f32.mxu1 %v20607_v22  ;;  %12266 = vmatprep.mubr.f32.mxu0 %v14173_v19 }
 0x42e   : > { %12532 = vmatpush3.bf16.msra.mxu0 %v20581_v9  ;;  %v12501_v9 = vpack.c.bf16 %v15530_v2, %v15521_v30  ;;  %v20612_v30 = vld [vmem:[#allocation55_spill] sm:$0xff]  ;;  %v20613_v2 = vld [vmem:[#allocation57_spill] sm:$0xff] }
 0x42f   : > { %12534 = vmatprep.subr.bf16.mxu0 %v20609_v29 }
 0x430   : > { %11934 = vmatmul.mubr.f32.vlgmr.msra.gmra.mrb[0].mxu1 %v20608_v21  ;;  %12267 = vmatmul.mubr.f32.gmra.mrb[2].mxu0 %v14185_v8 }
 0x431   : > { %12496 = vmatpush3.bf16.msra.mxu1 %v15712_v56  ;;  %11936 = vmatprep.mubr.f32.mxu1 %v14173_v19  ;;  %v20616_v56 = vld [vmem:[#allocation63_spill] sm:$0xff] }
 0x432   : > { %12269 = vmatprep.mubr.f32.mxu0 %v14231_v6  ;;  %12498 = vmatprep.subr.bf16.mxu1 %v12497_v59 }
 0x433   : > { %12536 = vmatpush3.bf16.msra.mxu0 %v20609_v29  ;;  %v20632_v29 = vld [vmem:[#allocation83_spill] sm:$0xff] }
 0x434   : > { %11937 = vmatmul.mubr.f32.gmra.mrb[2].mxu1 %v14185_v8  ;;  %12270 = vmatmul.mubr.f32.gmra.mrb[4].mxu0 %v14243_v58 }
 0x435   : > { %11939 = vmatprep.mubr.f32.mxu1 %v14231_v6  ;;  %12272 = vmatprep.mubr.f32.mxu0 %v14289_v16 }
 0x436   : > { %12500 = vmatpush3.bf16.msra.mxu1 %v12497_v59  ;;  %12538 = vmatprep.subr.bf16.mxu0 %v20610_v38  ;;  %v20631_v59 = vld [vmem:[#allocation81_spill] sm:$0xff] }
 0x437   : > { %12502 = vmatprep.subr.bf16.mxu1 %v12501_v9  ;;  %12540 = vmatpush3.bf16.msra.mxu0 %v20610_v38  ;;  %v20634_v38 = vld [vmem:[#allocation87_spill] sm:$0xff] }
 0x438   : > { %11940 = vmatmul.mubr.f32.gmra.mrb[4].mxu1 %v14243_v58  ;;  %12273 = vmatmul.mubr.f32.gmra.mrb[6].mxu0 %v14301_v12 }
 0x439   : > { %11942 = vmatprep.mubr.f32.mxu1 %v14289_v16  ;;  %12275 = vmatprep.mubr.f32.mxu0 %v14347_v3 }
 0x43a   : > { %12504 = vmatpush3.bf16.msra.mxu1 %v12501_v9  ;;  %12371 = vmatprep.subr.mxu0 %v20579_v50  ;;  %v20633_v9 = vld [vmem:[#allocation85_spill] sm:$0xff] }
 0x43b   : > { %12041 = vmatprep.subr.mxu1 %v15626_v13  ;;  %12372 = vmatpush3.msra.mxu0 %v20579_v50  ;;  %v20614_v50 = vld [vmem:[#allocation59_spill] sm:$0xff] }
 0x43c   : > { %11943 = vmatmul.mubr.f32.gmra.mrb[6].mxu1 %v14301_v12  ;;  %12276 = vmatmul.mubr.f32.gmra.mrb[8].mxu0 %v14359_v7 }
 0x43d   : > { %11945 = vmatprep.mubr.f32.mxu1 %v14347_v3  ;;  %12278 = vmatprep.mubr.f32.mxu0 %v14405_v1 }
 0x43e   : > { %12042 = vmatpush3.msra.mxu1 %v15626_v13  ;;  %v20615_v13 = vld [vmem:[#allocation61_spill] sm:$0xff] }
 0x440   : > { %11946 = vmatmul.mubr.f32.gmra.mrb[8].mxu1 %v14359_v7  ;;  %12279 = vmatmul.mubr.f32.gmra.mrb[10].mxu0 %v14417_v23 }
 0x441   : > { %11948 = vmatprep.mubr.f32.mxu1 %v14405_v1  ;;  %12281 = vmatprep.mubr.f32.mxu0 %v14463_v15 }
 0x444   : > { %11949 = vmatmul.mubr.f32.gmra.mrb[10].mxu1 %v14417_v23  ;;  %12282 = vmatmul.mubr.f32.gmra.mrb[12].mxu0 %v14475_v27 }
 0x445   : > { %11951 = vmatprep.mubr.f32.mxu1 %v14463_v15  ;;  %12284 = vmatprep.mubr.f32.mxu0 %v14521_v24 }
 0x448   : > { %11952 = vmatmul.mubr.f32.gmra.mrb[12].mxu1 %v14475_v27  ;;  %12285 = vmatmul.mubr.f32.gmra.mrb[14].mxu0 %v14533_v31 }
 0x449   : > { %11954 = vmatprep.mubr.f32.mxu1 %v14521_v24  ;;  %12287 = vmatprep.mubr.f32.mxu0 %v14579_v28 }
 0x44c   : > { %11955 = vmatmul.mubr.f32.gmra.mrb[14].mxu1 %v14533_v31  ;;  %12288 = vmatmul.mubr.f32.gmra.mrb[16].mxu0 %v14591_v35 }
 0x44d   : > { %11957 = vmatprep.mubr.f32.mxu1 %v14579_v28  ;;  %12290 = vmatprep.mubr.f32.mxu0 %v14637_v32 }
 0x450   : > { %11958 = vmatmul.mubr.f32.gmra.mrb[16].mxu1 %v14591_v35  ;;  %12291 = vmatmul.mubr.f32.gmra.mrb[18].mxu0 %v14649_v39 }
 0x451   : > { %11960 = vmatprep.mubr.f32.mxu1 %v14637_v32  ;;  %12293 = vmatprep.mubr.f32.mxu0 %v14695_v36 }
 0x454   : > { %11961 = vmatmul.mubr.f32.gmra.mrb[18].mxu1 %v14649_v39  ;;  %12294 = vmatmul.mubr.f32.gmra.mrb[20].mxu0 %v14707_v43 }
 0x455   : > { %11963 = vmatprep.mubr.f32.mxu1 %v14695_v36  ;;  %12296 = vmatprep.mubr.f32.mxu0 %v14753_v40 }
 0x458   : > { %11964 = vmatmul.mubr.f32.gmra.mrb[20].mxu1 %v14707_v43  ;;  %12297 = vmatmul.mubr.f32.gmra.mrb[22].mxu0 %v14765_v47 }
 0x459   : > { %11966 = vmatprep.mubr.f32.mxu1 %v14753_v40  ;;  %12299 = vmatprep.mubr.f32.mxu0 %v14811_v44 }
 0x45c   : > { %11967 = vmatmul.mubr.f32.gmra.mrb[22].mxu1 %v14765_v47  ;;  %12300 = vmatmul.mubr.f32.gmra.mrb[24].mxu0 %v14823_v51 }
 0x45d   : > { %11969 = vmatprep.mubr.f32.mxu1 %v14811_v44  ;;  %12302 = vmatprep.mubr.f32.mxu0 %v14869_v48 }
 0x460   : > { %11970 = vmatmul.mubr.f32.gmra.mrb[24].mxu1 %v14823_v51  ;;  %12303 = vmatmul.mubr.f32.gmra.mrb[26].mxu0 %v14881_v62 }
 0x461   : > { %11972 = vmatprep.mubr.f32.mxu1 %v14869_v48  ;;  %12305 = vmatprep.mubr.f32.mxu0 %v14927_v54 }
 0x464   : > { %11973 = vmatmul.mubr.f32.gmra.mrb[26].mxu1 %v14881_v62  ;;  %12306 = vmatmul.mubr.f32.gmra.mrb[28].mxu0 %v14939_v10 }
 0x465   : > { %11975 = vmatprep.mubr.f32.mxu1 %v14927_v54  ;;  %12308 = vmatprep.mubr.f32.mxu0 %v14985_v4 }
 0x468   : > { %11976 = vmatmul.mubr.f32.gmra.mrb[28].mxu1 %v14939_v10  ;;  %12309 = vmatmul.mubr.f32.gmra.mrb[30].mxu0 %v14997_v17 }
 0x469   : > { %11978 = vmatprep.mubr.f32.mxu1 %v14985_v4  ;;  %12311 = vmatprep.mubr.f32.mxu0 %v20611_v55 }
 0x46c   : > { %11979 = vmatmul.mubr.f32.gmra.mrb[30].mxu1 %v14997_v17  ;;  %12312 = vmatmul.mubr.f32.gmra.mrb[32].mxu0 %v20612_v30 }
 0x46d   : > { %11981 = vmatprep.mubr.f32.mxu1 %v20611_v55  ;;  %12314 = vmatprep.mubr.f32.mxu0 %v20613_v2 }
 0x470   : > { %11982 = vmatmul.mubr.f32.gmra.mrb[32].mxu1 %v20612_v30  ;;  %12315 = vmatmul.mubr.f32.gmra.mrb[34].mxu0 %v20614_v50 }
 0x471   : > { %11984 = vmatprep.mubr.f32.mxu1 %v20613_v2  ;;  %12317 = vmatprep.mubr.f32.mxu0 %v20615_v13 }
 0x474   : > { %11985 = vmatmul.mubr.f32.gmra.mrb[34].mxu1 %v20614_v50  ;;  %12318 = vmatmul.mubr.f32.gmra.mrb[36].mxu0 %v20616_v56 }
 0x475   : > { %11987 = vmatprep.mubr.f32.mxu1 %v20615_v13  ;;  %12320 = vmatprep.mubr.f32.mxu0 %v20617_v52 }
 0x478   : > { %11988 = vmatmul.mubr.f32.gmra.mrb[36].mxu1 %v20616_v56  ;;  %12321 = vmatmul.mubr.f32.gmra.mrb[38].mxu0 %v20618_v63 }
 0x479   : > { %11990 = vmatprep.mubr.f32.mxu1 %v20617_v52  ;;  %12323 = vmatprep.mubr.f32.mxu0 %v20619_v26 }
 0x47c   : > { %11991 = vmatmul.mubr.f32.gmra.mrb[38].mxu1 %v20618_v63  ;;  %12324 = vmatmul.mubr.f32.gmra.mrb[40].mxu0 %v20620_v33 }
 0x47d   : > { %11993 = vmatprep.mubr.f32.mxu1 %v20619_v26  ;;  %12326 = vmatprep.mubr.f32.mxu0 %v20621_v42 }
 0x480   : > { %11994 = vmatmul.mubr.f32.gmra.mrb[40].mxu1 %v20620_v33  ;;  %12327 = vmatmul.mubr.f32.gmra.mrb[42].mxu0 %v20622_v11 }
 0x481   : > { %11996 = vmatprep.mubr.f32.mxu1 %v20621_v42  ;;  %12329 = vmatprep.mubr.f32.mxu0 %v20623_v45 }
 0x484   : > { %11997 = vmatmul.mubr.f32.gmra.mrb[42].mxu1 %v20622_v11  ;;  %12330 = vmatmul.mubr.f32.gmra.mrb[44].mxu0 %v20624_v49 }
 0x485   : > { %11999 = vmatprep.mubr.f32.mxu1 %v20623_v45  ;;  %12332 = vmatprep.mubr.f32.mxu0 %v20625_v60 }
 0x488   : > { %12000 = vmatmul.mubr.f32.gmra.mrb[44].mxu1 %v20624_v49  ;;  %12333 = vmatmul.mubr.f32.gmra.mrb[46].mxu0 %v20626_v41 }
 0x489   : > { %12002 = vmatprep.mubr.f32.mxu1 %v20625_v60  ;;  %12335 = vmatprep.mubr.f32.mxu0 %v20627_v57 }
 0x48c   : > { %12003 = vmatmul.mubr.f32.gmra.mrb[46].mxu1 %v20626_v41  ;;  %12336 = vmatmul.mubr.f32.gmra.mrb[48].mxu0 %v20628_v34 }
 0x48d   : > { %12005 = vmatprep.mubr.f32.mxu1 %v20627_v57  ;;  %12338 = vmatprep.mubr.f32.mxu0 %v20629_v61 }
 0x490   : > { %12006 = vmatmul.mubr.f32.gmra.mrb[48].mxu1 %v20628_v34  ;;  %12339 = vmatmul.mubr.f32.gmra.mrb[50].mxu0 %v20630_v20 }
 0x491   : > { %12008 = vmatprep.mubr.f32.mxu1 %v20629_v61  ;;  %12341 = vmatprep.mubr.f32.mxu0 %v20631_v59 }
 0x494   : > { %12009 = vmatmul.mubr.f32.gmra.mrb[50].mxu1 %v20630_v20  ;;  %12342 = vmatmul.mubr.f32.gmra.mrb[52].mxu0 %v20632_v29 }
 0x495   : > { %12011 = vmatprep.mubr.f32.mxu1 %v20631_v59  ;;  %12344 = vmatprep.mubr.f32.mxu0 %v20633_v9 }
 0x498   : > { %12012 = vmatmul.mubr.f32.gmra.mrb[52].mxu1 %v20632_v29  ;;  %12345 = vmatmul.mubr.f32.gmra.mrb[54].mxu0 %v20634_v38 }
 0x499   : > { %12014 = vmatprep.mubr.f32.mxu1 %v20633_v9  ;;  %12347 = vmatprep.mubr.f32.mxu0 %v20635_v53 }
 0x49c   : > { %12015 = vmatmul.mubr.f32.gmra.mrb[54].mxu1 %v20634_v38  ;;  %12348 = vmatmul.mubr.f32.gmra.mrb[56].mxu0 %v20636_v18 }
 0x49d   : > { %12017 = vmatprep.mubr.f32.mxu1 %v20635_v53  ;;  %12350 = vmatprep.mubr.f32.mxu0 %v20637_v46 }
 0x4a0   : > { %12018 = vmatmul.mubr.f32.gmra.mrb[56].mxu1 %v20636_v18  ;;  %12351 = vmatmul.mubr.f32.gmra.mrb[58].mxu0 %v20638_v5 }
 0x4a1   : > { %12020 = vmatprep.mubr.f32.mxu1 %v20637_v46  ;;  %12353 = vmatprep.mubr.f32.mxu0 %v15837_v0  ;;  %v20639_v46 = vld [vmem:[#allocation20_spill] sm:$0xff] }
 0x4a4   : > { %12021 = vmatmul.mubr.f32.gmra.mrb[58].mxu1 %v20638_v5  ;;  %12354 = vmatmul.mubr.f32.gmra.mrb[60].mxu0 %v15851_v37  ;;  %v20640_v5 = vld [vmem:[#allocation22_spill] sm:$0xff] }
 0x4a5   : > { %12023 = vmatprep.mubr.f32.mxu1 %v15837_v0  ;;  %12356 = vmatprep.mubr.f32.mxu0 %v15876_v25  ;;  %v20641_v0 = vld [vmem:[#allocation23_spill] sm:$0xff] }
 0x4a8   : > { %12024 = vmatmul.mubr.f32.gmra.mrb[60].mxu1 %v15851_v37  ;;  %12357 = vmatmul.mubr.f32.gmra.mrb[62].mxu0 %v15874_v14  ;;  %v20642_v37 = vld [vmem:[#allocation24_spill] sm:$0xff] }
 0x4a9   : > { %12026 = vmatprep.mubr.f32.mxu1 %v15876_v25  ;;  %12373 = vmatprep.mubr.f32.mxu0 %v20607_v22  ;;  %v20643_v22 = vld [vmem:[#allocation25_spill] sm:$0xff] }
 0x4ac   : > { %12027 = vmatmul.mubr.f32.gmra.mrb[62].mxu1 %v15874_v14  ;;  %12374 = vmatmul.mubr.f32.vlgmr.msra.gmra.mrb[0].mxu0 %v20608_v21  ;;  %v20644_v21 = vld [vmem:[#allocation26_spill] sm:$0xff] }
 0x4ad   : > { %12043 = vmatprep.mubr.f32.mxu1 %v20639_v46  ;;  %12376 = vmatprep.mubr.f32.mxu0 %v14173_v19  ;;  %v20645_v19 = vld [vmem:[#allocation27_spill] sm:$0xff]  ;;  %v20678_v46 = vld [vmem:[#allocation68_spill] sm:$0xff] }
 0x4b0   : > { %12044 = vmatmul.mubr.f32.vlgmr.msra.gmra.mrb[0].mxu1 %v20640_v5  ;;  %12377 = vmatmul.mubr.f32.gmra.mrb[2].mxu0 %v14185_v8  ;;  %v20646_v8 = vld [vmem:[#allocation28_spill] sm:$0xff]  ;;  %v20675_v5 = vld [vmem:[#allocation62_spill] sm:$0xff] }
 0x4b1   : > { %12046 = vmatprep.mubr.f32.mxu1 %v20641_v0  ;;  %12379 = vmatprep.mubr.f32.mxu0 %v14231_v6  ;;  %v20647_v6 = vld [vmem:[#allocation29_spill] sm:$0xff]  ;;  %v20676_v0 = vld [vmem:[#allocation64_spill] sm:$0xff] }
 0x4b4   : > { %12047 = vmatmul.mubr.f32.gmra.mrb[2].mxu1 %v20642_v37  ;;  %12380 = vmatmul.mubr.f32.gmra.mrb[4].mxu0 %v14243_v58  ;;  %v20648_v58 = vld [vmem:[#allocation30_spill] sm:$0xff] }
 0x4b5   : > { %12049 = vmatprep.mubr.f32.mxu1 %v20643_v22  ;;  %12382 = vmatprep.mubr.f32.mxu0 %v14289_v16  ;;  %v20649_v16 = vld [vmem:[#allocation31_spill] sm:$0xff]  ;;  %v20677_v37 = vld [vmem:[#allocation66_spill] sm:$0xff] }
 0x4b6   : > { %v20705_v22 = vld [vmem:[#allocation102_spill] sm:$0xff] }
 0x4b8   : > { %12050 = vmatmul.mubr.f32.gmra.mrb[4].mxu1 %v20644_v21  ;;  %12383 = vmatmul.mubr.f32.gmra.mrb[6].mxu0 %v14301_v12  ;;  %v20650_v12 = vld [vmem:[#allocation32_spill] sm:$0xff]  ;;  %v20706_v21 = vld [vmem:[#allocation101_spill] sm:$0xff] }
 0x4b9   : > { %12052 = vmatprep.mubr.f32.mxu1 %v20645_v19  ;;  %12385 = vmatprep.mubr.f32.mxu0 %v14347_v3  ;;  %v20651_v3 = vld [vmem:[#allocation33_spill] sm:$0xff] }
 0x4bc   : > { %12053 = vmatmul.mubr.f32.gmra.mrb[6].mxu1 %v20646_v8  ;;  %12386 = vmatmul.mubr.f32.gmra.mrb[8].mxu0 %v14359_v7  ;;  %v20652_v7 = vld [vmem:[#allocation34_spill] sm:$0xff] }
 0x4bd   : > { %12055 = vmatprep.mubr.f32.mxu1 %v20647_v6  ;;  %12388 = vmatprep.mubr.f32.mxu0 %v14405_v1  ;;  %v20653_v1 = vld [vmem:[#allocation35_spill] sm:$0xff]  ;;  %v16161_v6 = vld [vmem:[%s20091_s2] ss:$0 sm:$0xff] }
 0x4c0   : > { %12056 = vmatmul.mubr.f32.gmra.mrb[8].mxu1 %v20648_v58  ;;  %12389 = vmatmul.mubr.f32.gmra.mrb[10].mxu0 %v14417_v23  ;;  %v20654_v23 = vld [vmem:[#allocation36_spill] sm:$0xff] }
 0x4c1   : > { %12058 = vmatprep.mubr.f32.mxu1 %v20649_v16  ;;  %12391 = vmatprep.mubr.f32.mxu0 %v14463_v15  ;;  %v20655_v15 = vld [vmem:[#allocation37_spill] sm:$0xff] }
 0x4c4   : > { %12059 = vmatmul.mubr.f32.gmra.mrb[10].mxu1 %v20650_v12  ;;  %12392 = vmatmul.mubr.f32.gmra.mrb[12].mxu0 %v14475_v27  ;;  %v20656_v27 = vld [vmem:[#allocation38_spill] sm:$0xff] }
 0x4c5   : > { %12061 = vmatprep.mubr.f32.mxu1 %v20651_v3  ;;  %12394 = vmatprep.mubr.f32.mxu0 %v14521_v24  ;;  %v20657_v24 = vld [vmem:[#allocation39_spill] sm:$0xff] }
 0x4c8   : > { %12062 = vmatmul.mubr.f32.gmra.mrb[12].mxu1 %v20652_v7  ;;  %12395 = vmatmul.mubr.f32.gmra.mrb[14].mxu0 %v14533_v31  ;;  %v20658_v31 = vld [vmem:[#allocation40_spill] sm:$0xff] }
 0x4c9   : > { %12064 = vmatprep.mubr.f32.mxu1 %v20653_v1  ;;  %12397 = vmatprep.mubr.f32.mxu0 %v14579_v28  ;;  %v20659_v28 = vld [vmem:[#allocation41_spill] sm:$0xff] }
 0x4cc   : > { %12065 = vmatmul.mubr.f32.gmra.mrb[14].mxu1 %v20654_v23  ;;  %12398 = vmatmul.mubr.f32.gmra.mrb[16].mxu0 %v14591_v35  ;;  %v20660_v35 = vld [vmem:[#allocation42_spill] sm:$0xff] }
 0x4cd   : > { %12067 = vmatprep.mubr.f32.mxu1 %v20655_v15  ;;  %12400 = vmatprep.mubr.f32.mxu0 %v14637_v32  ;;  %v20661_v32 = vld [vmem:[#allocation43_spill] sm:$0xff] }
 0x4d0   : > { %12068 = vmatmul.mubr.f32.gmra.mrb[16].mxu1 %v20656_v27  ;;  %12401 = vmatmul.mubr.f32.gmra.mrb[18].mxu0 %v14649_v39  ;;  %v20662_v39 = vld [vmem:[#allocation44_spill] sm:$0xff] }
 0x4d1   : > { %12070 = vmatprep.mubr.f32.mxu1 %v20657_v24  ;;  %12403 = vmatprep.mubr.f32.mxu0 %v14695_v36  ;;  %v20663_v36 = vld [vmem:[#allocation45_spill] sm:$0xff] }
 0x4d4   : > { %12071 = vmatmul.mubr.f32.gmra.mrb[18].mxu1 %v20658_v31  ;;  %12404 = vmatmul.mubr.f32.gmra.mrb[20].mxu0 %v14707_v43  ;;  %v20664_v43 = vld [vmem:[#allocation46_spill] sm:$0xff] }
 0x4d5   : > { %12073 = vmatprep.mubr.f32.mxu1 %v20659_v28  ;;  %12406 = vmatprep.mubr.f32.mxu0 %v14753_v40  ;;  %v20665_v40 = vld [vmem:[#allocation47_spill] sm:$0xff] }
 0x4d8   : > { %12074 = vmatmul.mubr.f32.gmra.mrb[20].mxu1 %v20660_v35  ;;  %12407 = vmatmul.mubr.f32.gmra.mrb[22].mxu0 %v14765_v47  ;;  %v20666_v47 = vld [vmem:[#allocation48_spill] sm:$0xff] }
 0x4d9   : > { %12076 = vmatprep.mubr.f32.mxu1 %v20661_v32  ;;  %12409 = vmatprep.mubr.f32.mxu0 %v14811_v44  ;;  %v20667_v44 = vld [vmem:[#allocation49_spill] sm:$0xff] }
 0x4dc   : > { %12077 = vmatmul.mubr.f32.gmra.mrb[22].mxu1 %v20662_v39  ;;  %12410 = vmatmul.mubr.f32.gmra.mrb[24].mxu0 %v14823_v51  ;;  %v20668_v51 = vld [vmem:[#allocation50_spill] sm:$0xff] }
 0x4dd   : > { %12079 = vmatprep.mubr.f32.mxu1 %v20663_v36  ;;  %12412 = vmatprep.mubr.f32.mxu0 %v14869_v48  ;;  %v20669_v48 = vld [vmem:[#allocation51_spill] sm:$0xff] }
 0x4e0   : > { %12080 = vmatmul.mubr.f32.gmra.mrb[24].mxu1 %v20664_v43  ;;  %12413 = vmatmul.mubr.f32.gmra.mrb[26].mxu0 %v14881_v62  ;;  %v20670_v62 = vld [vmem:[#allocation52_spill] sm:$0xff] }
 0x4e1   : > { %12082 = vmatprep.mubr.f32.mxu1 %v20665_v40  ;;  %12415 = vmatprep.mubr.f32.mxu0 %v14927_v54  ;;  %v20671_v54 = vld [vmem:[#allocation54_spill] sm:$0xff] }
 0x4e4   : > { %12083 = vmatmul.mubr.f32.gmra.mrb[26].mxu1 %v20666_v47  ;;  %12416 = vmatmul.mubr.f32.gmra.mrb[28].mxu0 %v14939_v10  ;;  %v20672_v10 = vld [vmem:[#allocation56_spill] sm:$0xff] }
 0x4e5   : > { %12085 = vmatprep.mubr.f32.mxu1 %v20667_v44  ;;  %12418 = vmatprep.mubr.f32.mxu0 %v14985_v4  ;;  %v20673_v4 = vld [vmem:[#allocation58_spill] sm:$0xff] }
 0x4e8   : > { %12086 = vmatmul.mubr.f32.gmra.mrb[28].mxu1 %v20668_v51  ;;  %12419 = vmatmul.mubr.f32.gmra.mrb[30].mxu0 %v14997_v17  ;;  %v20674_v17 = vld [vmem:[#allocation60_spill] sm:$0xff] }
 0x4e9   : > { %12088 = vmatprep.mubr.f32.mxu1 %v20669_v48  ;;  %12421 = vmatprep.mubr.f32.mxu0 %v20611_v55  ;;  %v20679_v55 = vld [vmem:[#allocation70_spill] sm:$0xff] }
 0x4ec   : > { %12089 = vmatmul.mubr.f32.gmra.mrb[30].mxu1 %v20670_v62  ;;  %12422 = vmatmul.mubr.f32.gmra.mrb[32].mxu0 %v20612_v30  ;;  %v20680_v30 = vld [vmem:[#allocation72_spill] sm:$0xff] }
 0x4ed   : > { %12091 = vmatprep.mubr.f32.mxu1 %v20671_v54  ;;  %12424 = vmatprep.mubr.f32.mxu0 %v20613_v2  ;;  %v20681_v2 = vld [vmem:[#allocation73_spill] sm:$0xff] }
 0x4f0   : > { %12092 = vmatmul.mubr.f32.gmra.mrb[32].mxu1 %v20672_v10  ;;  %12425 = vmatmul.mubr.f32.gmra.mrb[34].mxu0 %v20614_v50  ;;  %v20682_v50 = vld [vmem:[#allocation75_spill] sm:$0xff] }
 0x4f1   : > { %12094 = vmatprep.mubr.f32.mxu1 %v20673_v4  ;;  %12427 = vmatprep.mubr.f32.mxu0 %v20615_v13  ;;  %v20683_v13 = vld [vmem:[#allocation14_spill] sm:$0xff] }
 0x4f4   : > { %12095 = vmatmul.mubr.f32.gmra.mrb[34].mxu1 %v20674_v17  ;;  %12428 = vmatmul.mubr.f32.gmra.mrb[36].mxu0 %v20616_v56  ;;  %v20684_v56 = vld [vmem:[#allocation7_spill] sm:$0xff] }
 0x4f5   : > { %12097 = vmatprep.mubr.f32.mxu1 %v20675_v5  ;;  %12430 = vmatprep.mubr.f32.mxu0 %v20617_v52  ;;  %v20685_v52 = vld [vmem:[#allocation16_spill] sm:$0xff] }
 0x4f8   : > { %12098 = vmatmul.mubr.f32.gmra.mrb[36].mxu1 %v20676_v0  ;;  %12431 = vmatmul.mubr.f32.gmra.mrb[38].mxu0 %v20618_v63  ;;  %v20686_v63 = vld [vmem:[#allocation77_spill] sm:$0xff] }
 0x4f9   : > { %12100 = vmatprep.mubr.f32.mxu1 %v20677_v37  ;;  %12433 = vmatprep.mubr.f32.mxu0 %v20619_v26  ;;  %v20687_v26 = vld [vmem:[#allocation10_spill] sm:$0xff] }
 0x4fc   : > { %12101 = vmatmul.mubr.f32.gmra.mrb[38].mxu1 %v20678_v46  ;;  %12434 = vmatmul.mubr.f32.gmra.mrb[40].mxu0 %v20620_v33  ;;  %v20688_v33 = vld [vmem:[#allocation78_spill] sm:$0xff] }
 0x4fd   : > { %12103 = vmatprep.mubr.f32.mxu1 %v20679_v55  ;;  %12436 = vmatprep.mubr.f32.mxu0 %v20621_v42  ;;  %v20689_v42 = vld [vmem:[#allocation5_spill] sm:$0xff] }
 0x500   : > { %12104 = vmatmul.mubr.f32.gmra.mrb[40].mxu1 %v20680_v30  ;;  %12437 = vmatmul.mubr.f32.gmra.mrb[42].mxu0 %v20622_v11  ;;  %v20690_v11 = vld [vmem:[#allocation80_spill] sm:$0xff] }
 0x501   : > { %12106 = vmatprep.mubr.f32.mxu1 %v20681_v2  ;;  %12439 = vmatprep.mubr.f32.mxu0 %v20623_v45  ;;  %v20691_v45 = vld [vmem:[#allocation82_spill] sm:$0xff] }
 0x504   : > { %12107 = vmatmul.mubr.f32.gmra.mrb[42].mxu1 %v20682_v50  ;;  %12440 = vmatmul.mubr.f32.gmra.mrb[44].mxu0 %v20624_v49  ;;  %v20692_v49 = vld [vmem:[#allocation84_spill] sm:$0xff] }
 0x505   : > { %12109 = vmatprep.mubr.f32.mxu1 %v20683_v13  ;;  %12442 = vmatprep.mubr.f32.mxu0 %v20625_v60  ;;  %v20693_v60 = vld [vmem:[#allocation86_spill] sm:$0xff] }
 0x508   : > { %12110 = vmatmul.mubr.f32.gmra.mrb[44].mxu1 %v20684_v56  ;;  %12443 = vmatmul.mubr.f32.gmra.mrb[46].mxu0 %v20626_v41  ;;  %v20694_v41 = vld [vmem:[#allocation88_spill] sm:$0xff] }
 0x509   : > { %12112 = vmatprep.mubr.f32.mxu1 %v20685_v52  ;;  %12445 = vmatprep.mubr.f32.mxu0 %v20627_v57  ;;  %v20695_v57 = vld [vmem:[#allocation90_spill] sm:$0xff] }
 0x50c   : > { %12113 = vmatmul.mubr.f32.gmra.mrb[46].mxu1 %v20686_v63  ;;  %12446 = vmatmul.mubr.f32.gmra.mrb[48].mxu0 %v20628_v34  ;;  %v20696_v34 = vld [vmem:[#allocation93_spill] sm:$0xff] }
 0x50d   : > { %12115 = vmatprep.mubr.f32.mxu1 %v20687_v26  ;;  %12448 = vmatprep.mubr.f32.mxu0 %v20629_v61  ;;  %v20697_v61 = vld [vmem:[#allocation92_spill] sm:$0xff] }
 0x510   : > { %12116 = vmatmul.mubr.f32.gmra.mrb[48].mxu1 %v20688_v33  ;;  %12449 = vmatmul.mubr.f32.gmra.mrb[50].mxu0 %v20630_v20  ;;  %v20698_v20 = vld [vmem:[#allocation95_spill] sm:$0xff] }
 0x511   : > { %12118 = vmatprep.mubr.f32.mxu1 %v20689_v42  ;;  %12451 = vmatprep.mubr.f32.mxu0 %v20631_v59  ;;  %v20699_v59 = vld [vmem:[#allocation94_spill] sm:$0xff] }
 0x514   : > { %12119 = vmatmul.mubr.f32.gmra.mrb[50].mxu1 %v20690_v11  ;;  %12452 = vmatmul.mubr.f32.gmra.mrb[52].mxu0 %v20632_v29  ;;  %v20700_v29 = vld [vmem:[#allocation97_spill] sm:$0xff] }
 0x515   : > { %12121 = vmatprep.mubr.f32.mxu1 %v20691_v45  ;;  %12454 = vmatprep.mubr.f32.mxu0 %v20633_v9  ;;  %v20701_v9 = vld [vmem:[#allocation96_spill] sm:$0xff] }
 0x518   : > { %12122 = vmatmul.mubr.f32.gmra.mrb[52].mxu1 %v20692_v49  ;;  %12455 = vmatmul.mubr.f32.gmra.mrb[54].mxu0 %v20634_v38  ;;  %v20702_v38 = vld [vmem:[#allocation99_spill] sm:$0xff] }
 0x519   : > { %12124 = vmatprep.mubr.f32.mxu1 %v20693_v60  ;;  %12457 = vmatprep.mubr.f32.mxu0 %v20635_v53  ;;  %v20703_v53 = vld [vmem:[#allocation98_spill] sm:$0xff] }
 0x51c   : > { %12125 = vmatmul.mubr.f32.gmra.mrb[54].mxu1 %v20694_v41  ;;  %12458 = vmatmul.mubr.f32.gmra.mrb[56].mxu0 %v20636_v18  ;;  %v20704_v18 = vld [vmem:[#allocation100_spill] sm:$0xff] }
 0x51d   : > { %12127 = vmatprep.mubr.f32.mxu1 %v20695_v57  ;;  %12460 = vmatprep.mubr.f32.mxu0 %v20696_v34 }
 0x520   : > { %12128 = vmatmul.mubr.f32.gmra.mrb[56].mxu1 %v20697_v61  ;;  %12461 = vmatmul.mubr.f32.gmra.mrb[58].mxu0 %v20698_v20 }
 0x521   : > { %12130 = vmatprep.mubr.f32.mxu1 %v20699_v59  ;;  %12463 = vmatprep.mubr.f32.mxu0 %v20700_v29 }
 0x524   : > { %12131 = vmatmul.mubr.f32.gmra.mrb[58].mxu1 %v20701_v9  ;;  %12464 = vmatmul.mubr.f32.gmra.mrb[60].mxu0 %v20702_v38 }
 0x525   : > { %12133 = vmatprep.mubr.f32.mxu1 %v20703_v53  ;;  %12466 = vmatprep.mubr.f32.mxu0 %v15876_v25 }
 0x528   : > { %12134 = vmatmul.mubr.f32.gmra.mrb[60].mxu1 %v20704_v18  ;;  %12467 = vmatmul.mubr.f32.gmra.mrb[62].mxu0 %v15874_v14 }
 0x529   : > { %12136 = vmatprep.mubr.f32.mxu1 %v20705_v22 }
 0x52c   : > { %12137 = vmatmul.mubr.f32.gmra.mrb[62].mxu1 %v20706_v21 }
 0x57f   : > { %v12375_v19 = vpop.f32.mrb[0].mxu0 }
 0x580   : > { %v6105_v8 = vpop.f32.mrb[1].mxu0 }
 0x583   : > { %v12045_v58 = vpop.f32.mrb[0].mxu1  ;;  %v12378_v16 = vpop.f32.mrb[2].mxu0 }
 0x584   : > { %v12541_v12 = vadd.f32 %v12045_v58, %v16161_v6  ;;  %v4532_v25 = vpop.f32.mrb[1].mxu1  ;;  %v6117_v3 = vpop.f32.mrb[3].mxu0 }
 0x585   : > { %v12543_v7 = vadd.f32 %v16161_v6, %v4532_v25 }
 0x586   : > { %v16165_v14 = vadd.f32 %v12541_v12, %v12375_v19 }
 0x587   : > { %v16167_v1 = vadd.f32 %v12543_v7, %v6105_v8  ;;  %v12048_v23 = vpop.f32.mrb[2].mxu1  ;;  %v12381_v15 = vpop.f32.mrb[4].mxu0 }
 0x588   : > { %20707 = vst [vmem:[#allocation19_spill] sm:$0xff] %v16165_v14  ;;  %v12545_v27 = vadd.f32 %v12048_v23, %v16161_v6  ;;  %v4546_v24 = vpop.f32.mrb[3].mxu1  ;;  %v6129_v31 = vpop.f32.mrb[5].mxu0 }
 0x589   : > { %v12547_v28 = vadd.f32 %v16161_v6, %v4546_v24 }
 0x58a   : > { %v16171_v35 = vadd.f32 %v12545_v27, %v12378_v16 }
 0x58b   : > { %v16173_v32 = vadd.f32 %v12547_v28, %v6117_v3  ;;  %v12051_v39 = vpop.f32.mrb[4].mxu1  ;;  %v12384_v36 = vpop.f32.mrb[6].mxu0 }
 0x58c   : > { %20708 = vst [vmem:[#allocation21_spill] sm:$0xff] %v16171_v35  ;;  %v12549_v43 = vadd.f32 %v12051_v39, %v16161_v6  ;;  %v4560_v40 = vpop.f32.mrb[5].mxu1  ;;  %v6141_v47 = vpop.f32.mrb[7].mxu0 }
 0x58d   : > { %20709 = vst [vmem:[#allocation8_spill] sm:$0xff] %v16173_v32  ;;  %v12551_v44 = vadd.f32 %v16161_v6, %v4560_v40 }
 0x58e   : > { %v16177_v51 = vadd.f32 %v12549_v43, %v12381_v15 }
 0x58f   : > { %v16179_v48 = vadd.f32 %v12551_v44, %v6129_v31  ;;  %v12054_v62 = vpop.f32.mrb[6].mxu1  ;;  %v12387_v54 = vpop.f32.mrb[8].mxu0 }
 0x590   : > { %v12553_v10 = vadd.f32 %v12054_v62, %v16161_v6  ;;  %v4574_v4 = vpop.f32.mrb[7].mxu1  ;;  %v6153_v17 = vpop.f32.mrb[9].mxu0 }
 0x591   : > { %20710 = vst [vmem:[#allocation11_spill] sm:$0xff] %v16179_v48  ;;  %v12555_v5 = vadd.f32 %v16161_v6, %v4574_v4 }
 0x592   : > { %v16183_v0 = vadd.f32 %v12553_v10, %v12384_v36 }
 0x593   : > { %v16185_v37 = vadd.f32 %v12555_v5, %v6141_v47  ;;  %v12057_v46 = vpop.f32.mrb[8].mxu1  ;;  %v12390_v55 = vpop.f32.mrb[10].mxu0 }
 0x594   : > { %v12557_v30 = vadd.f32 %v12057_v46, %v16161_v6  ;;  %v4588_v2 = vpop.f32.mrb[9].mxu1  ;;  %v6165_v50 = vpop.f32.mrb[11].mxu0 }
 0x595   : > { %v12559_v13 = vadd.f32 %v16161_v6, %v4588_v2 }
 0x596   : > { %v16189_v56 = vadd.f32 %v12557_v30, %v12387_v54 }
 0x597   : > { %v16191_v52 = vadd.f32 %v12559_v13, %v6153_v17  ;;  %v12060_v63 = vpop.f32.mrb[10].mxu1  ;;  %v12393_v26 = vpop.f32.mrb[12].mxu0 }
 0x598   : > { %v12561_v33 = vadd.f32 %v12060_v63, %v16161_v6  ;;  %v4602_v42 = vpop.f32.mrb[11].mxu1  ;;  %v6177_v11 = vpop.f32.mrb[13].mxu0 }
 0x599   : > { %v12563_v45 = vadd.f32 %v16161_v6, %v4602_v42 }
 0x59a   : > { %v16195_v49 = vadd.f32 %v12561_v33, %v12390_v55 }
 0x59b   : > { %v16197_v60 = vadd.f32 %v12563_v45, %v6165_v50  ;;  %v12063_v41 = vpop.f32.mrb[12].mxu1  ;;  %v12396_v57 = vpop.f32.mrb[14].mxu0 }
 0x59c   : > { %v12565_v34 = vadd.f32 %v12063_v41, %v16161_v6  ;;  %v4616_v61 = vpop.f32.mrb[13].mxu1  ;;  %v6189_v20 = vpop.f32.mrb[15].mxu0 }
 0x59d   : > { %v12567_v59 = vadd.f32 %v16161_v6, %v4616_v61 }
 0x59e   : > { %v16201_v29 = vadd.f32 %v12565_v34, %v12393_v26 }
 0x59f   : > { %v16203_v9 = vadd.f32 %v12567_v59, %v6177_v11  ;;  %v12066_v38 = vpop.f32.mrb[14].mxu1  ;;  %v12399_v53 = vpop.f32.mrb[16].mxu0 }
 0x5a0   : > { %v12569_v18 = vadd.f32 %v12066_v38, %v16161_v6  ;;  %v4630_v22 = vpop.f32.mrb[15].mxu1  ;;  %v6201_v21 = vpop.f32.mrb[17].mxu0 }
 0x5a1   : > { %v12571_v19 = vadd.f32 %v16161_v6, %v4630_v22 }
 0x5a2   : > { %v16207_v8 = vadd.f32 %v12569_v18, %v12396_v57 }
 0x5a3   : > { %v16209_v58 = vadd.f32 %v12571_v19, %v6189_v20  ;;  %v12069_v16 = vpop.f32.mrb[16].mxu1  ;;  %v12402_v12 = vpop.f32.mrb[18].mxu0 }
 0x5a4   : > { %v12573_v25 = vadd.f32 %v12069_v16, %v16161_v6  ;;  %v4644_v3 = vpop.f32.mrb[17].mxu1  ;;  %v6213_v7 = vpop.f32.mrb[19].mxu0 }
 0x5a5   : > { %v12575_v23 = vadd.f32 %v16161_v6, %v4644_v3 }
 0x5a6   : > { %v16213_v15 = vadd.f32 %v12573_v25, %v12399_v53 }
 0x5a7   : > { %v16215_v27 = vadd.f32 %v12575_v23, %v6201_v21  ;;  %v12072_v24 = vpop.f32.mrb[18].mxu1  ;;  %v12405_v31 = vpop.f32.mrb[20].mxu0 }
 0x5a8   : > { %v12577_v28 = vadd.f32 %v12072_v24, %v16161_v6  ;;  %v4658_v39 = vpop.f32.mrb[19].mxu1  ;;  %v6225_v36 = vpop.f32.mrb[21].mxu0 }
 0x5a9   : > { %v12579_v43 = vadd.f32 %v16161_v6, %v4658_v39 }
 0x5aa   : > { %v16219_v40 = vadd.f32 %v12577_v28, %v12402_v12 }
 0x5ab   : > { %v16221_v47 = vadd.f32 %v12579_v43, %v6213_v7  ;;  %v12075_v44 = vpop.f32.mrb[20].mxu1  ;;  %v12408_v62 = vpop.f32.mrb[22].mxu0 }
 0x5ac   : > { %v12581_v54 = vadd.f32 %v12075_v44, %v16161_v6  ;;  %v4672_v10 = vpop.f32.mrb[21].mxu1  ;;  %v6237_v4 = vpop.f32.mrb[23].mxu0 }
 0x5ad   : > { %v12583_v17 = vadd.f32 %v16161_v6, %v4672_v10 }
 0x5ae   : > { %v16225_v5 = vadd.f32 %v12581_v54, %v12405_v31 }
 0x5af   : > { %v16227_v46 = vadd.f32 %v12583_v17, %v6225_v36  ;;  %v12078_v55 = vpop.f32.mrb[22].mxu1  ;;  %v12411_v30 = vpop.f32.mrb[24].mxu0 }
 0x5b0   : > { %v12585_v2 = vadd.f32 %v12078_v55, %v16161_v6  ;;  %v4686_v50 = vpop.f32.mrb[23].mxu1  ;;  %v6249_v13 = vpop.f32.mrb[25].mxu0 }
 0x5b1   : > { %v12587_v63 = vadd.f32 %v16161_v6, %v4686_v50 }
 0x5b2   : > { %v16231_v26 = vadd.f32 %v12585_v2, %v12408_v62 }
 0x5b3   : > { %v16233_v33 = vadd.f32 %v12587_v63, %v6237_v4  ;;  %v12081_v42 = vpop.f32.mrb[24].mxu1  ;;  %v12414_v11 = vpop.f32.mrb[26].mxu0 }
 0x5b4   : > { %v12589_v45 = vadd.f32 %v12081_v42, %v16161_v6  ;;  %v4700_v41 = vpop.f32.mrb[25].mxu1  ;;  %v6261_v57 = vpop.f32.mrb[27].mxu0 }
 0x5b5   : > { %v12591_v34 = vadd.f32 %v16161_v6, %v4700_v41 }
 0x5b6   : > { %v16237_v61 = vadd.f32 %v12589_v45, %v12411_v30 }
 0x5b7   : > { %v16239_v20 = vadd.f32 %v12591_v34, %v6249_v13  ;;  %v12084_v59 = vpop.f32.mrb[26].mxu1  ;;  %v12417_v38 = vpop.f32.mrb[28].mxu0 }
 0x5b8   : > { %20711 = vst [vmem:[#allocation53_spill] sm:$0xff] %v16237_v61  ;;  %v12593_v53 = vadd.f32 %v12084_v59, %v16161_v6  ;;  %v4714_v18 = vpop.f32.mrb[27].mxu1  ;;  %v6273_v22 = vpop.f32.mrb[29].mxu0 }
 0x5b9   : > { %v12595_v21 = vadd.f32 %v16161_v6, %v4714_v18 }
 0x5ba   : > { %v16243_v19 = vadd.f32 %v12593_v53, %v12414_v11 }
 0x5bb   : > { %v16245_v16 = vadd.f32 %v12595_v21, %v6261_v57  ;;  %v12087_v12 = vpop.f32.mrb[28].mxu1  ;;  %v12420_v25 = vpop.f32.mrb[30].mxu0 }
 0x5bc   : > { %20712 = vst [vmem:[#allocation55_spill] sm:$0xff] %v16243_v19  ;;  %v12597_v3 = vadd.f32 %v12087_v12, %v16161_v6  ;;  %v4728_v7 = vpop.f32.mrb[29].mxu1  ;;  %v6285_v23 = vpop.f32.mrb[31].mxu0 }
 0x5bd   : > { %20713 = vst [vmem:[#allocation57_spill] sm:$0xff] %v16245_v16  ;;  %v12599_v24 = vadd.f32 %v16161_v6, %v4728_v7 }
 0x5be   : > { %v16249_v31 = vadd.f32 %v12597_v3, %v12417_v38 }
 0x5bf   : > { %v16251_v28 = vadd.f32 %v12599_v24, %v6273_v22  ;;  %v12090_v39 = vpop.f32.mrb[30].mxu1  ;;  %v12423_v36 = vpop.f32.mrb[32].mxu0 }
 0x5c0   : > { %20714 = vst [vmem:[#allocation59_spill] sm:$0xff] %v16249_v31  ;;  %v12601_v43 = vadd.f32 %v12090_v39, %v16161_v6  ;;  %v4742_v44 = vpop.f32.mrb[31].mxu1  ;;  %v6297_v62 = vpop.f32.mrb[33].mxu0 }
 0x5c1   : > { %20715 = vst [vmem:[#allocation61_spill] sm:$0xff] %v16251_v28  ;;  %v12603_v54 = vadd.f32 %v16161_v6, %v4742_v44 }
 0x5c2   : > { %v16255_v10 = vadd.f32 %v12601_v43, %v12420_v25 }
 0x5c3   : > { %v16257_v4 = vadd.f32 %v12603_v54, %v6285_v23  ;;  %v12093_v17 = vpop.f32.mrb[32].mxu1  ;;  %v12426_v55 = vpop.f32.mrb[34].mxu0 }
 0x5c4   : > { %20716 = vst [vmem:[#allocation63_spill] sm:$0xff] %v16255_v10  ;;  %v12605_v30 = vadd.f32 %v12093_v17, %v16161_v6  ;;  %v4756_v2 = vpop.f32.mrb[33].mxu1  ;;  %v6309_v50 = vpop.f32.mrb[35].mxu0 }
 0x5c5   : > { %20717 = vst [vmem:[#allocation65_spill] sm:$0xff] %v16257_v4  ;;  %v12607_v13 = vadd.f32 %v16161_v6, %v4756_v2 }
 0x5c6   : > { %v16261_v63 = vadd.f32 %v12605_v30, %v12423_v36 }
 0x5c7   : > { %v16263_v42 = vadd.f32 %v12607_v13, %v6297_v62  ;;  %v12096_v11 = vpop.f32.mrb[34].mxu1  ;;  %v12429_v45 = vpop.f32.mrb[36].mxu0 }
 0x5c8   : > { %20718 = vst [vmem:[#allocation67_spill] sm:$0xff] %v16261_v63  ;;  %v12609_v41 = vadd.f32 %v12096_v11, %v16161_v6  ;;  %v4770_v57 = vpop.f32.mrb[35].mxu1  ;;  %v6321_v34 = vpop.f32.mrb[37].mxu0 }
 0x5c9   : > { %20719 = vst [vmem:[#allocation69_spill] sm:$0xff] %v16263_v42  ;;  %v12611_v59 = vadd.f32 %v16161_v6, %v4770_v57 }
 0x5ca   : > { %v16267_v38 = vadd.f32 %v12609_v41, %v12426_v55 }
 0x5cb   : > { %v16269_v53 = vadd.f32 %v12611_v59, %v6309_v50  ;;  %v12099_v18 = vpop.f32.mrb[36].mxu1  ;;  %v12432_v22 = vpop.f32.mrb[38].mxu0 }
 0x5cc   : > { %20720 = vst [vmem:[#allocation71_spill] sm:$0xff] %v16267_v38  ;;  %v12613_v21 = vadd.f32 %v12099_v18, %v16161_v6  ;;  %v4784_v12 = vpop.f32.mrb[37].mxu1  ;;  %v6333_v25 = vpop.f32.mrb[39].mxu0 }
 0x5cd   : > { %20721 = vst [vmem:[#allocation13_spill] sm:$0xff] %v16269_v53  ;;  %v12615_v3 = vadd.f32 %v16161_v6, %v4784_v12 }
 0x5ce   : > { %v16273_v7 = vadd.f32 %v12613_v21, %v12429_v45 }
 0x5cf   : > { %v16275_v23 = vadd.f32 %v12615_v3, %v6321_v34  ;;  %v12102_v24 = vpop.f32.mrb[38].mxu1  ;;  %v12435_v39 = vpop.f32.mrb[40].mxu0 }
 0x5d0   : > { %20722 = vst [vmem:[#allocation74_spill] sm:$0xff] %v16273_v7  ;;  %v12617_v36 = vadd.f32 %v12102_v24, %v16161_v6  ;;  %v4798_v43 = vpop.f32.mrb[39].mxu1  ;;  %v6345_v44 = vpop.f32.mrb[41].mxu0 }
 0x5d1   : > { %20723 = vst [vmem:[#allocation15_spill] sm:$0xff] %v16275_v23  ;;  %v12619_v62 = vadd.f32 %v16161_v6, %v4798_v43 }
 0x5d2   : > { %v16279_v54 = vadd.f32 %v12617_v36, %v12432_v22 }
 0x5d3   : > { %v16281_v17 = vadd.f32 %v12619_v62, %v6333_v25  ;;  %v12105_v55 = vpop.f32.mrb[40].mxu1  ;;  %v12438_v30 = vpop.f32.mrb[42].mxu0 }
 0x5d4   : > { %v12621_v2 = vadd.f32 %v12105_v55, %v16161_v6  ;;  %v4812_v50 = vpop.f32.mrb[41].mxu1  ;;  %v6357_v13 = vpop.f32.mrb[43].mxu0 }
 0x5d5   : > { %20724 = vst [vmem:[#allocation6_spill] sm:$0xff] %v16281_v17  ;;  %v12623_v11 = vadd.f32 %v16161_v6, %v4812_v50 }
 0x5d6   : > { %v16285_v45 = vadd.f32 %v12621_v2, %v12435_v39 }
 0x5d7   : > { %v16287_v41 = vadd.f32 %v12623_v11, %v6345_v44  ;;  %v12108_v57 = vpop.f32.mrb[42].mxu1  ;;  %v12441_v34 = vpop.f32.mrb[44].mxu0 }
 0x5d8   : > { %v12625_v59 = vadd.f32 %v12108_v57, %v16161_v6  ;;  %v4826_v18 = vpop.f32.mrb[43].mxu1  ;;  %v6369_v22 = vpop.f32.mrb[45].mxu0 }
 0x5d9   : > { %v12627_v21 = vadd.f32 %v16161_v6, %v4826_v18 }
 0x5da   : > { %v16291_v12 = vadd.f32 %v12625_v59, %v12438_v30 }
 0x5db   : > { %v16293_v25 = vadd.f32 %v12627_v21, %v6357_v13  ;;  %v12111_v3 = vpop.f32.mrb[44].mxu1  ;;  %v12444_v24 = vpop.f32.mrb[46].mxu0 }
 0x5dc   : > { %v12629_v36 = vadd.f32 %v12111_v3, %v16161_v6  ;;  %v4840_v39 = vpop.f32.mrb[45].mxu1  ;;  %v6381_v43 = vpop.f32.mrb[47].mxu0 }
 0x5dd   : > { %v12631_v44 = vadd.f32 %v16161_v6, %v4840_v39 }
 0x5de   : > { %v16297_v62 = vadd.f32 %v12629_v36, %v12441_v34 }
 0x5df   : > { %v16299_v55 = vadd.f32 %v12631_v44, %v6369_v22  ;;  %v12114_v2 = vpop.f32.mrb[46].mxu1  ;;  %v12447_v50 = vpop.f32.mrb[48].mxu0 }
 0x5e0   : > { %20725 = vst [vmem:[#allocation17_spill] sm:$0xff] %v16297_v62  ;;  %v12633_v11 = vadd.f32 %v12114_v2, %v16161_v6  ;;  %v4854_v30 = vpop.f32.mrb[47].mxu1  ;;  %v6393_v57 = vpop.f32.mrb[49].mxu0 }
 0x5e1   : > { %20726 = vst [vmem:[#allocation76_spill] sm:$0xff] %v16299_v55  ;;  %v12635_v13 = vadd.f32 %v16161_v6, %v4854_v30 }
 0x5e2   : > { %v16303_v59 = vadd.f32 %v12633_v11, %v12444_v24 }
 0x5e3   : > { %v16305_v18 = vadd.f32 %v12635_v13, %v6381_v43  ;;  %v12117_v21 = vpop.f32.mrb[48].mxu1  ;;  %v12450_v3 = vpop.f32.mrb[50].mxu0 }
 0x5e4   : > { %20727 = vst [vmem:[#allocation9_spill] sm:$0xff] %v16303_v59  ;;  %v12637_v39 = vadd.f32 %v12117_v21, %v16161_v6  ;;  %v4868_v34 = vpop.f32.mrb[49].mxu1  ;;  %v6405_v36 = vpop.f32.mrb[51].mxu0 }
 0x5e5   : > { %20728 = vst [vmem:[#allocation18_spill] sm:$0xff] %v16305_v18  ;;  %v12639_v22 = vadd.f32 %v16161_v6, %v4868_v34 }
 0x5e6   : > { %v16309_v44 = vadd.f32 %v12637_v39, %v12447_v50 }
 0x5e7   : > { %v16311_v62 = vadd.f32 %v12639_v22, %v6393_v57  ;;  %v12120_v2 = vpop.f32.mrb[50].mxu1  ;;  %v12453_v55 = vpop.f32.mrb[52].mxu0 }
 0x5e8   : > { %20729 = vst [vmem:[#allocation12_spill] sm:$0xff] %v16309_v44  ;;  %v12641_v30 = vadd.f32 %v12120_v2, %v16161_v6  ;;  %v4882_v24 = vpop.f32.mrb[51].mxu1  ;;  %v6417_v11 = vpop.f32.mrb[53].mxu0 }
 0x5e9   : > { %20730 = vst [vmem:[#allocation79_spill] sm:$0xff] %v16311_v62  ;;  %v12643_v43 = vadd.f32 %v16161_v6, %v4882_v24 }
 0x5ea   : > { %v16315_v13 = vadd.f32 %v12641_v30, %v12450_v3 }
 0x5eb   : > { %v16317_v59 = vadd.f32 %v12643_v43, %v6405_v36  ;;  %v12123_v21 = vpop.f32.mrb[52].mxu1  ;;  %v12456_v18 = vpop.f32.mrb[54].mxu0 }
 0x5ec   : > { %20731 = vst [vmem:[#allocation81_spill] sm:$0xff] %v16315_v13  ;;  %v12645_v34 = vadd.f32 %v12123_v21, %v16161_v6  ;;  %v4896_v50 = vpop.f32.mrb[53].mxu1  ;;  %v6429_v39 = vpop.f32.mrb[55].mxu0 }
 0x5ed   : > { %20732 = vst [vmem:[#allocation83_spill] sm:$0xff] %v16317_v59  ;;  %v12647_v57 = vadd.f32 %v16161_v6, %v4896_v50 }
 0x5ee   : > { %v16321_v22 = vadd.f32 %v12645_v34, %v12453_v55 }
 0x5ef   : > { %v16323_v44 = vadd.f32 %v12647_v57, %v6417_v11  ;;  %v12126_v2 = vpop.f32.mrb[54].mxu1  ;;  %v12459_v62 = vpop.f32.mrb[56].mxu0 }
 0x5f0   : > { %20733 = vst [vmem:[#allocation85_spill] sm:$0xff] %v16321_v22  ;;  %v12649_v24 = vadd.f32 %v12126_v2, %v16161_v6  ;;  %v4910_v3 = vpop.f32.mrb[55].mxu1  ;;  %v6441_v30 = vpop.f32.mrb[57].mxu0 }
 0x5f1   : > { %20734 = vst [vmem:[#allocation87_spill] sm:$0xff] %v16323_v44  ;;  %v12651_v36 = vadd.f32 %v16161_v6, %v4910_v3 }
 0x5f2   : > { %v16327_v43 = vadd.f32 %v12649_v24, %v12456_v18 }
 0x5f3   : > { %v16329_v13 = vadd.f32 %v12651_v36, %v6429_v39  ;;  %v12129_v21 = vpop.f32.mrb[56].mxu1  ;;  %v12462_v59 = vpop.f32.mrb[58].mxu0 }
 0x5f4   : > { %20735 = vst [vmem:[#allocation89_spill] sm:$0xff] %v16327_v43  ;;  %v12653_v50 = vadd.f32 %v12129_v21, %v16161_v6  ;;  %v4924_v55 = vpop.f32.mrb[57].mxu1  ;;  %v6453_v34 = vpop.f32.mrb[59].mxu0 }
 0x5f5   : > { %20736 = vst [vmem:[#allocation91_spill] sm:$0xff] %v16329_v13  ;;  %v12655_v11 = vadd.f32 %v16161_v6, %v4924_v55 }
 0x5f6   : > { %v16333_v57 = vadd.f32 %v12653_v50, %v12459_v62 }
 0x5f7   : > { %v16335_v22 = vadd.f32 %v12655_v11, %v6441_v30  ;;  %v12132_v2 = vpop.f32.mrb[58].mxu1  ;;  %v12465_v44 = vpop.f32.mrb[60].mxu0 }
 0x5f8   : > { %20737 = vst [vmem:[#allocation20_spill] sm:$0xff] %v16333_v57  ;;  %v12657_v3 = vadd.f32 %v12132_v2, %v16161_v6  ;;  %v4938_v18 = vpop.f32.mrb[59].mxu1  ;;  %v6465_v24 = vpop.f32.mrb[61].mxu0 }
 0x5f9   : > { %20738 = vst [vmem:[#allocation22_spill] sm:$0xff] %v16335_v22  ;;  %v12659_v39 = vadd.f32 %v16161_v6, %v4938_v18 }
 0x5fa   : > { %v16339_v36 = vadd.f32 %v12657_v3, %v12462_v59 }
 0x5fb   : > { %v16341_v43 = vadd.f32 %v12659_v39, %v6453_v34  ;;  %v12135_v21 = vpop.f32.mrb[60].mxu1  ;;  %v12468_v13 = vpop.f32.mrb[62].mxu0  ;;  %v6491_v39 = vsel (!%p11378_p1), %vm2722_vm4, %v16167_v1, 0.0 }
 0x5fc   : > { %v12661_v55 = vadd.f32 %v12135_v21, %v16161_v6  ;;  %v4952_v62 = vpop.f32.mrb[61].mxu1  ;;  %v6477_v50 = vpop.f32.mrb[63].mxu0 }
 0x5fd   : > { %v12663_v30 = vadd.f32 %v16161_v6, %v4952_v62  ;;  %6489 = sbr.rel (%p11378_p1) target bundleno = 1711 (0x6af), region = 52  ;;  %v6500_v62 = vsel (!%p11378_p1), %vm2722_vm4, %v16177_v51, 0.0 }
 0x5fe   : > { %v16345_v11 = vadd.f32 %v12661_v55, %v12465_v44  ;;  %v6492_v44 = vsel (!%p11378_p1), %vm2722_vm4, %v16165_v14, 0.0 }
 0x5ff   : > { %v16347_v57 = vadd.f32 %v12663_v30, %v6465_v24  ;;  %v12138_v2 = vpop.f32.mrb[62].mxu1  ;;  %v6494_v24 = vsel (!%p11378_p1), %vm2722_vm4, %v16173_v32, 0.0  ;;  %v6493_v21 = vadd.f32 (!%p11378_p1), %v6492_v44, %v6491_v39  ;;  %v6502_v30 = vsel (!%p11378_p1), %vm2722_vm4, %v16185_v37, 0.0 }
 0x600   : > { %v12665_v22 = vadd.f32 %v12138_v2, %v16161_v6  ;;  %v4966_v18 = vpop.f32.mrb[63].mxu1  ;;  %v6506_v39 = vsel (!%p11378_p1), %vm2722_vm4, %v16191_v52, 0.0 }
 0x601   : > { %v12667_v59 = vadd.f32 %v16161_v6, %v4966_v18  ;;  %v6496_v6 = vsel (!%p11378_p1), %vm2722_vm4, %v16171_v35, 0.0  ;;  %v6504_v18 = vsel (!%p11378_p1), %vm2722_vm4, %v16183_v0, 0.0 }
 0x602   : > { %v16351_v34 = vadd.f32 %v12665_v22, %v12468_v13  ;;  %v6495_v13 = vadd.f32 (!%p11378_p1), %v6494_v24, %v6493_v21  ;;  %v6498_v22 = vsel (!%p11378_p1), %vm2722_vm4, %v16179_v48, 0.0  ;;  %v6508_v24 = vsel (!%p11378_p1), %vm2722_vm4, %v16189_v56, 0.0 }
 0x603   : > { %v16353_v3 = vadd.f32 %v12667_v59, %v6477_v50 }
 0x604   : > { %v6497_v55 = vadd.f32 %v6496_v6, %v6495_v13  ;;  %v6510_v6 = vsel %vm2722_vm4, %v16197_v60, 0.0 }
 0x606   : > { %v6499_v50 = vadd.f32 %v6498_v22, %v6497_v55  ;;  %v6512_v22 = vsel %vm2722_vm4, %v16195_v49, 0.0 }
 0x608   : > { %v6501_v2 = vadd.f32 %v6500_v62, %v6499_v50  ;;  %v6514_v62 = vsel %vm2722_vm4, %v16203_v9, 0.0 }
 0x60a   : > { %v6503_v59 = vadd.f32 %v6502_v30, %v6501_v2  ;;  %v6516_v30 = vsel %vm2722_vm4, %v16201_v29, 0.0 }
 0x60c   : > { %v6505_v44 = vadd.f32 %v6504_v18, %v6503_v59  ;;  %v6518_v18 = vsel %vm2722_vm4, %v16209_v58, 0.0 }
 0x60e   : > { %v6507_v21 = vadd.f32 %v6506_v39, %v6505_v44  ;;  %v6520_v39 = vsel %vm2722_vm4, %v16207_v8, 0.0 }
 0x610   : > { %v6509_v13 = vadd.f32 %v6508_v24, %v6507_v21  ;;  %v6522_v24 = vsel %vm2722_vm4, %v16215_v27, 0.0 }
 0x612   : > { %v6511_v55 = vadd.f32 %v6510_v6, %v6509_v13  ;;  %v6524_v6 = vsel %vm2722_vm4, %v16213_v15, 0.0 }
 0x614   : > { %v6513_v50 = vadd.f32 %v6512_v22, %v6511_v55  ;;  %v6526_v22 = vsel %vm2722_vm4, %v16221_v47, 0.0  ;;  %v6628_v55 = vmul.f32 %v16167_v1, %v16167_v1 }
 0x616   : > { %v6515_v2 = vadd.f32 %v6514_v62, %v6513_v50  ;;  %v6629_v50 = vmul.f32 %v16165_v14, %v16165_v14 }
 0x618   : > { %v6517_v59 = vadd.f32 %v6516_v30, %v6515_v2  ;;  %v6630_v30 = vmul.f32 %v16173_v32, %v16173_v32  ;;  %v6528_v2 = vsel %vm2722_vm4, %v16219_v40, 0.0  ;;  %v6532_v32 = vsel %vm2722_vm4, %v16225_v5, 0.0 }
 0x61a   : > { %v6519_v44 = vadd.f32 %v6518_v18, %v6517_v59  ;;  %v6631_v59 = vmul.f32 %v16171_v35, %v16171_v35  ;;  %v6633_v35 = vmul.f32 %v16177_v51, %v16177_v51 }
 0x61c   : > { %v6521_v21 = vadd.f32 %v6520_v39, %v6519_v44  ;;  %v6530_v39 = vsel %vm2722_vm4, %v16227_v46, 0.0  ;;  %v6692_v44 = vsel %vm2722_vm4, %v6628_v55, 0.0  ;;  %v6697_v14 = vsel %vm2722_vm4, %v6631_v59, 0.0 }
 0x61d   : > { %v6534_v55 = vsel %vm2722_vm4, %v16233_v33, 0.0  ;;  %v6701_v59 = vsel %vm2722_vm4, %v6633_v35, 0.0 }
 0x61e   : > { %v6523_v13 = vadd.f32 %v6522_v24, %v6521_v21  ;;  %v6632_v21 = vmul.f32 %v16179_v48, %v16179_v48  ;;  %v6536_v48 = vsel %vm2722_vm4, %v16231_v26, 0.0 }
 0x620   : > { %v6525_v62 = vadd.f32 %v6524_v6, %v6523_v13  ;;  %v6693_v6 = vsel %vm2722_vm4, %v6629_v50, 0.0  ;;  %v6695_v13 = vsel %vm2722_vm4, %v6630_v30, 0.0  ;;  %v6634_v50 = vmul.f32 %v16185_v37, %v16185_v37 }
 0x621   : > { %v6699_v30 = vsel %vm2722_vm4, %v6632_v21, 0.0 }
 0x622   : > { %v6527_v18 = vadd.f32 %v6526_v22, %v6525_v62  ;;  %v6694_v22 = vadd.f32 %v6693_v6, %v6692_v44  ;;  %v6538_v6 = vsel %vm2722_vm4, %v16239_v20, 0.0  ;;  %v6703_v21 = vsel %vm2722_vm4, %v6634_v50, 0.0 }
 0x624   : > { %v6529_v24 = vadd.f32 %v6528_v2, %v6527_v18  ;;  %v6696_v2 = vadd.f32 %v6695_v13, %v6694_v22  ;;  %v6636_v22 = vmul.f32 %v16191_v52, %v16191_v52 }
 0x626   : > { %v6531_v62 = vadd.f32 %v6530_v39, %v6529_v24  ;;  %v6698_v44 = vadd.f32 %v6697_v14, %v6696_v2  ;;  %v6635_v24 = vmul.f32 %v16183_v0, %v16183_v0  ;;  %v6637_v2 = vmul.f32 %v16189_v56, %v16189_v56 }
 0x627   : > { %v6707_v50 = vsel %vm2722_vm4, %v6636_v22, 0.0 }
 0x628   : > { %v6533_v18 = vadd.f32 %v6532_v32, %v6531_v62  ;;  %v6700_v13 = vadd.f32 %v6699_v30, %v6698_v44  ;;  %v6540_v62 = vsel %vm2722_vm4, %v16237_v61, 0.0  ;;  %v6705_v35 = vsel %vm2722_vm4, %v6635_v24, 0.0 }
 0x629   : > { %v6638_v44 = vmul.f32 %v16197_v60, %v16197_v60  ;;  %v6709_v24 = vsel %vm2722_vm4, %v6637_v2, 0.0 }
 0x62a   : > { %v6535_v39 = vadd.f32 %v6534_v55, %v6533_v18  ;;  %v6702_v14 = vadd.f32 %v6701_v59, %v6700_v13  ;;  %v6542_v18 = vsel %vm2722_vm4, %v16245_v16, 0.0  ;;  %v6639_v13 = vmul.f32 %v16195_v49, %v16195_v49 }
 0x62b   : > { %v6711_v22 = vsel %vm2722_vm4, %v6638_v44, 0.0 }
 0x62c   : > { %v6537_v32 = vadd.f32 %v6536_v48, %v6535_v39  ;;  %v6704_v30 = vadd.f32 %v6703_v21, %v6702_v14  ;;  %v6544_v39 = vsel %vm2722_vm4, %v16243_v19, 0.0  ;;  %v6640_v14 = vmul.f32 %v16203_v9, %v16203_v9 }
 0x62d   : > { %v6713_v2 = vsel %vm2722_vm4, %v6639_v13, 0.0 }
 0x62e   : > { %v6539_v55 = vadd.f32 %v6538_v6, %v6537_v32  ;;  %v6706_v59 = vadd.f32 %v6705_v35, %v6704_v30  ;;  %v6546_v32 = vsel %vm2722_vm4, %v16251_v28, 0.0  ;;  %v6641_v30 = vmul.f32 %v16201_v29, %v16201_v29 }
 0x62f   : > { %v6715_v44 = vsel %vm2722_vm4, %v6640_v14, 0.0 }
 0x630   : > { %v6541_v48 = vadd.f32 %v6540_v62, %v6539_v55  ;;  %v6708_v21 = vadd.f32 %v6707_v50, %v6706_v59  ;;  %v6548_v55 = vsel %vm2722_vm4, %v16249_v31, 0.0  ;;  %v6642_v59 = vmul.f32 %v16209_v58, %v16209_v58 }
 0x631   : > { %v6717_v13 = vsel %vm2722_vm4, %v6641_v30, 0.0 }
 0x632   : > { %v6543_v6 = vadd.f32 %v6542_v18, %v6541_v48  ;;  %v6710_v35 = vadd.f32 %v6709_v24, %v6708_v21  ;;  %v6550_v48 = vsel %vm2722_vm4, %v16257_v4, 0.0  ;;  %v6643_v21 = vmul.f32 %v16207_v8, %v16207_v8 }
 0x633   : > { %v6719_v14 = vsel %vm2722_vm4, %v6642_v59, 0.0 }
 0x634   : > { %v6545_v62 = vadd.f32 %v6544_v39, %v6543_v6  ;;  %v6712_v50 = vadd.f32 %v6711_v22, %v6710_v35  ;;  %v6552_v6 = vsel %vm2722_vm4, %v16255_v10, 0.0  ;;  %v6644_v35 = vmul.f32 %v16215_v27, %v16215_v27 }
 0x635   : > { %v6721_v30 = vsel %vm2722_vm4, %v6643_v21, 0.0 }
 0x636   : > { %v6547_v18 = vadd.f32 %v6546_v32, %v6545_v62  ;;  %v6714_v24 = vadd.f32 %v6713_v2, %v6712_v50  ;;  %v6554_v62 = vsel %vm2722_vm4, %v16263_v42, 0.0  ;;  %v6645_v50 = vmul.f32 %v16213_v15, %v16213_v15 }
 0x637   : > { %v6723_v59 = vsel %vm2722_vm4, %v6644_v35, 0.0 }
 0x638   : > { %v6549_v39 = vadd.f32 %v6548_v55, %v6547_v18  ;;  %v6716_v22 = vadd.f32 %v6715_v44, %v6714_v24  ;;  %v6556_v18 = vsel %vm2722_vm4, %v16261_v63, 0.0  ;;  %v6646_v24 = vmul.f32 %v16221_v47, %v16221_v47 }
 0x639   : > { %v6725_v21 = vsel %vm2722_vm4, %v6645_v50, 0.0 }
 0x63a   : > { %v6551_v32 = vadd.f32 %v6550_v48, %v6549_v39  ;;  %v6718_v2 = vadd.f32 %v6717_v13, %v6716_v22  ;;  %v6558_v39 = vsel %vm2722_vm4, %v16269_v53, 0.0  ;;  %v6647_v22 = vmul.f32 %v16219_v40, %v16219_v40 }
 0x63b   : > { %v6727_v35 = vsel %vm2722_vm4, %v6646_v24, 0.0 }
 0x63c   : > { %v6553_v55 = vadd.f32 %v6552_v6, %v6551_v32  ;;  %v6720_v44 = vadd.f32 %v6719_v14, %v6718_v2  ;;  %v6560_v32 = vsel %vm2722_vm4, %v16267_v38, 0.0  ;;  %v6648_v2 = vmul.f32 %v16227_v46, %v16227_v46 }
 0x63d   : > { %v6729_v50 = vsel %vm2722_vm4, %v6647_v22, 0.0 }
 0x63e   : > { %v6555_v48 = vadd.f32 %v6554_v62, %v6553_v55  ;;  %v6722_v13 = vadd.f32 %v6721_v30, %v6720_v44  ;;  %v6562_v55 = vsel %vm2722_vm4, %v16275_v23, 0.0  ;;  %v6649_v44 = vmul.f32 %v16225_v5, %v16225_v5 }
 0x63f   : > { %v6731_v24 = vsel %vm2722_vm4, %v6648_v2, 0.0 }
 0x640   : > { %v6557_v6 = vadd.f32 %v6556_v18, %v6555_v48  ;;  %v6724_v14 = vadd.f32 %v6723_v59, %v6722_v13  ;;  %v6564_v48 = vsel %vm2722_vm4, %v16273_v7, 0.0  ;;  %v6650_v13 = vmul.f32 %v16233_v33, %v16233_v33 }
 0x641   : > { %v6733_v22 = vsel %vm2722_vm4, %v6649_v44, 0.0 }
 0x642   : > { %v6559_v62 = vadd.f32 %v6558_v39, %v6557_v6  ;;  %v6726_v30 = vadd.f32 %v6725_v21, %v6724_v14  ;;  %v6566_v6 = vsel %vm2722_vm4, %v16281_v17, 0.0  ;;  %v6651_v14 = vmul.f32 %v16231_v26, %v16231_v26 }
 0x643   : > { %v6735_v2 = vsel %vm2722_vm4, %v6650_v13, 0.0 }
 0x644   : > { %v6561_v18 = vadd.f32 %v6560_v32, %v6559_v62  ;;  %v6728_v59 = vadd.f32 %v6727_v35, %v6726_v30  ;;  %v6568_v62 = vsel %vm2722_vm4, %v16279_v54, 0.0  ;;  %v6652_v30 = vmul.f32 %v16239_v20, %v16239_v20 }
 0x645   : > { %v6737_v44 = vsel %vm2722_vm4, %v6651_v14, 0.0 }
 0x646   : > { %v6563_v39 = vadd.f32 %v6562_v55, %v6561_v18  ;;  %v6730_v21 = vadd.f32 %v6729_v50, %v6728_v59  ;;  %v6570_v18 = vsel %vm2722_vm4, %v16287_v41, 0.0  ;;  %v6653_v59 = vmul.f32 %v16237_v61, %v16237_v61 }
 0x647   : > { %v6739_v13 = vsel %vm2722_vm4, %v6652_v30, 0.0 }
 0x648   : > { %v6565_v32 = vadd.f32 %v6564_v48, %v6563_v39  ;;  %v6732_v35 = vadd.f32 %v6731_v24, %v6730_v21  ;;  %v6572_v39 = vsel %vm2722_vm4, %v16285_v45, 0.0  ;;  %v6654_v21 = vmul.f32 %v16245_v16, %v16245_v16 }
 0x649   : > { %v6741_v14 = vsel %vm2722_vm4, %v6653_v59, 0.0 }
 0x64a   : > { %v6567_v55 = vadd.f32 %v6566_v6, %v6565_v32  ;;  %v6734_v50 = vadd.f32 %v6733_v22, %v6732_v35  ;;  %v6574_v32 = vsel %vm2722_vm4, %v16293_v25, 0.0  ;;  %v6655_v35 = vmul.f32 %v16243_v19, %v16243_v19 }
 0x64b   : > { %v6743_v30 = vsel %vm2722_vm4, %v6654_v21, 0.0 }
 0x64c   : > { %v6569_v48 = vadd.f32 %v6568_v62, %v6567_v55  ;;  %v6736_v24 = vadd.f32 %v6735_v2, %v6734_v50  ;;  %v6576_v55 = vsel %vm2722_vm4, %v16291_v12, 0.0  ;;  %v6656_v50 = vmul.f32 %v16251_v28, %v16251_v28 }
 0x64d   : > { %v6745_v59 = vsel %vm2722_vm4, %v6655_v35, 0.0 }
 0x64e   : > { %v6571_v6 = vadd.f32 %v6570_v18, %v6569_v48  ;;  %v6738_v22 = vadd.f32 %v6737_v44, %v6736_v24  ;;  %v20739_v48 = vld [vmem:[#allocation76_spill] sm:$0xff]  ;;  %v6657_v24 = vmul.f32 %v16249_v31, %v16249_v31  ;;  %v6747_v21 = vsel %vm2722_vm4, %v6656_v50, 0.0 }
 0x64f   : > { %v6578_v61 = vsel %vm2722_vm4, %v20739_v48, 0.0 }
 0x650   : > { %v6573_v62 = vadd.f32 %v6572_v39, %v6571_v6  ;;  %v6740_v2 = vadd.f32 %v6739_v13, %v6738_v22  ;;  %v20740_v6 = vld [vmem:[#allocation17_spill] sm:$0xff]  ;;  %v6658_v22 = vmul.f32 %v16257_v4, %v16257_v4  ;;  %v6749_v35 = vsel %vm2722_vm4, %v6657_v24, 0.0 }
 0x651   : > { %v6580_v16 = vsel %vm2722_vm4, %v20740_v6, 0.0 }
 0x652   : > { %v6575_v18 = vadd.f32 %v6574_v32, %v6573_v62  ;;  %v6742_v44 = vadd.f32 %v6741_v14, %v6740_v2  ;;  %v20741_v62 = vld [vmem:[#allocation18_spill] sm:$0xff]  ;;  %v6659_v2 = vmul.f32 %v16255_v10, %v16255_v10  ;;  %v6751_v50 = vsel %vm2722_vm4, %v6658_v22, 0.0 }
 0x653   : > { %v6582_v19 = vsel %vm2722_vm4, %v20741_v62, 0.0 }
 0x654   : > { %v6577_v39 = vadd.f32 %v6576_v55, %v6575_v18  ;;  %v6744_v13 = vadd.f32 %v6743_v30, %v6742_v44  ;;  %v20742_v18 = vld [vmem:[#allocation9_spill] sm:$0xff]  ;;  %v6660_v44 = vmul.f32 %v16263_v42, %v16263_v42  ;;  %v6753_v24 = vsel %vm2722_vm4, %v6659_v2, 0.0 }
 0x655   : > { %v6584_v28 = vsel %vm2722_vm4, %v20742_v18, 0.0 }
 0x656   : > { %v6579_v32 = vadd.f32 %v6578_v61, %v6577_v39  ;;  %v6746_v14 = vadd.f32 %v6745_v59, %v6744_v13  ;;  %v20743_v39 = vld [vmem:[#allocation79_spill] sm:$0xff]  ;;  %v6661_v13 = vmul.f32 %v16261_v63, %v16261_v63  ;;  %v6755_v22 = vsel %vm2722_vm4, %v6660_v44, 0.0 }
 0x657   : > { %v6586_v31 = vsel %vm2722_vm4, %v20743_v39, 0.0 }
 0x658   : > { %v6581_v55 = vadd.f32 %v6580_v16, %v6579_v32  ;;  %v6748_v30 = vadd.f32 %v6747_v21, %v6746_v14  ;;  %v20744_v32 = vld [vmem:[#allocation12_spill] sm:$0xff]  ;;  %v6662_v14 = vmul.f32 %v16269_v53, %v16269_v53  ;;  %v6757_v2 = vsel %vm2722_vm4, %v6661_v13, 0.0 }
 0x659   : > { %v6588_v4 = vsel %vm2722_vm4, %v20744_v32, 0.0 }
 0x65a   : > { %v6583_v61 = vadd.f32 %v6582_v19, %v6581_v55  ;;  %v6750_v59 = vadd.f32 %v6749_v35, %v6748_v30  ;;  %v20745_v55 = vld [vmem:[#allocation83_spill] sm:$0xff]  ;;  %v6663_v30 = vmul.f32 %v16267_v38, %v16267_v38  ;;  %v6759_v44 = vsel %vm2722_vm4, %v6662_v14, 0.0 }
 0x65b   : > { %v6590_v10 = vsel %vm2722_vm4, %v20745_v55, 0.0 }
 0x65c   : > { %v6585_v16 = vadd.f32 %v6584_v28, %v6583_v61  ;;  %v6752_v21 = vadd.f32 %v6751_v50, %v6750_v59  ;;  %v20746_v61 = vld [vmem:[#allocation81_spill] sm:$0xff]  ;;  %v6664_v59 = vmul.f32 %v16275_v23, %v16275_v23  ;;  %v6761_v13 = vsel %vm2722_vm4, %v6663_v30, 0.0 }
 0x65d   : > { %v6592_v42 = vsel %vm2722_vm4, %v20746_v61, 0.0 }
 0x65e   : > { %v6587_v19 = vadd.f32 %v6586_v31, %v6585_v16  ;;  %v6754_v35 = vadd.f32 %v6753_v24, %v6752_v21  ;;  %v20747_v16 = vld [vmem:[#allocation87_spill] sm:$0xff]  ;;  %v6665_v21 = vmul.f32 %v16273_v7, %v16273_v7  ;;  %v6763_v14 = vsel %vm2722_vm4, %v6664_v59, 0.0 }
 0x65f   : > { %v6594_v63 = vsel %vm2722_vm4, %v20747_v16, 0.0 }
 0x660   : > { %v6589_v28 = vadd.f32 %v6588_v4, %v6587_v19  ;;  %v6756_v50 = vadd.f32 %v6755_v22, %v6754_v35  ;;  %v20748_v19 = vld [vmem:[#allocation85_spill] sm:$0xff]  ;;  %v6666_v35 = vmul.f32 %v16281_v17, %v16281_v17  ;;  %v6765_v30 = vsel %vm2722_vm4, %v6665_v21, 0.0 }
 0x661   : > { %v6596_v53 = vsel %vm2722_vm4, %v20748_v19, 0.0 }
 0x662   : > { %v6591_v31 = vadd.f32 %v6590_v10, %v6589_v28  ;;  %v6758_v24 = vadd.f32 %v6757_v2, %v6756_v50  ;;  %v20749_v28 = vld [vmem:[#allocation91_spill] sm:$0xff]  ;;  %v6667_v50 = vmul.f32 %v16279_v54, %v16279_v54  ;;  %v6767_v59 = vsel %vm2722_vm4, %v6666_v35, 0.0 }
 0x663   : > { %v6598_v38 = vsel %vm2722_vm4, %v20749_v28, 0.0 }
 0x664   : > { %v6593_v4 = vadd.f32 %v6592_v42, %v6591_v31  ;;  %v6760_v22 = vadd.f32 %v6759_v44, %v6758_v24  ;;  %v20750_v31 = vld [vmem:[#allocation89_spill] sm:$0xff]  ;;  %v6668_v24 = vmul.f32 %v16287_v41, %v16287_v41  ;;  %v6769_v21 = vsel %vm2722_vm4, %v6667_v50, 0.0 }
 0x665   : > { %v6600_v23 = vsel %vm2722_vm4, %v20750_v31, 0.0 }
 0x666   : > { %v6595_v10 = vadd.f32 %v6594_v63, %v6593_v4  ;;  %v6762_v2 = vadd.f32 %v6761_v13, %v6760_v22  ;;  %v20751_v4 = vld [vmem:[#allocation22_spill] sm:$0xff]  ;;  %v6669_v22 = vmul.f32 %v16285_v45, %v16285_v45  ;;  %v6771_v35 = vsel %vm2722_vm4, %v6668_v24, 0.0 }
 0x667   : > { %v6602_v7 = vsel %vm2722_vm4, %v20751_v4, 0.0 }
 0x668   : > { %v6597_v42 = vadd.f32 %v6596_v53, %v6595_v10  ;;  %v6764_v44 = vadd.f32 %v6763_v14, %v6762_v2  ;;  %v20752_v10 = vld [vmem:[#allocation20_spill] sm:$0xff]  ;;  %v6670_v2 = vmul.f32 %v16293_v25, %v16293_v25  ;;  %v6773_v50 = vsel %vm2722_vm4, %v6669_v22, 0.0 }
 0x669   : > { %v6604_v17 = vsel %vm2722_vm4, %v20752_v10, 0.0 }
 0x66a   : > { %v6599_v63 = vadd.f32 %v6598_v38, %v6597_v42  ;;  %v6766_v13 = vadd.f32 %v6765_v30, %v6764_v44  ;;  %v6606_v42 = vsel %vm2722_vm4, %v16341_v43, 0.0  ;;  %v6671_v44 = vmul.f32 %v16291_v12, %v16291_v12 }
 0x66b   : > { %v6775_v24 = vsel %vm2722_vm4, %v6670_v2, 0.0 }
 0x66c   : > { %v6601_v53 = vadd.f32 %v6600_v23, %v6599_v63  ;;  %v6768_v14 = vadd.f32 %v6767_v59, %v6766_v13  ;;  %v6608_v63 = vsel %vm2722_vm4, %v16339_v36, 0.0  ;;  %v6672_v13 = vmul.f32 %v20739_v48, %v20739_v48 }
 0x66d   : > { %v6777_v22 = vsel %vm2722_vm4, %v6671_v44, 0.0  ;;  %v6674_v48 = vmul.f32 %v20741_v62, %v20741_v62 }
 0x66e   : > { %v6603_v38 = vadd.f32 %v6602_v7, %v6601_v53  ;;  %v6770_v30 = vadd.f32 %v6769_v21, %v6768_v14  ;;  %v6610_v53 = vsel %vm2722_vm4, %v16347_v57, 0.0  ;;  %v6673_v14 = vmul.f32 %v20740_v6, %v20740_v6 }
 0x66f   : > { %v6779_v2 = vsel %vm2722_vm4, %v6672_v13, 0.0  ;;  %v6675_v6 = vmul.f32 %v20742_v18, %v20742_v18  ;;  %v6677_v13 = vmul.f32 %v20744_v32, %v20744_v32  ;;  %v6678_v18 = vmul.f32 %v20745_v55, %v20745_v55 }
 0x670   : > { %v6605_v23 = vadd.f32 %v6604_v17, %v6603_v38  ;;  %v6772_v59 = vadd.f32 %v6771_v35, %v6770_v30  ;;  %v6612_v38 = vsel %vm2722_vm4, %v16345_v11, 0.0  ;;  %v6616_v30 = vsel %vm2722_vm4, %v16351_v34, 0.0 }
 0x671   : > { %v6781_v44 = vsel %vm2722_vm4, %v6673_v14, 0.0  ;;  %v6680_v32 = vmul.f32 %v20747_v16, %v20747_v16  ;;  %v6681_v55 = vmul.f32 %v20748_v19, %v20748_v19  ;;  %v6684_v19 = vmul.f32 %v20751_v4, %v20751_v4 }
 0x672   : > { %v6607_v7 = vadd.f32 %v6606_v42, %v6605_v23  ;;  %v6774_v21 = vadd.f32 %v6773_v50, %v6772_v59  ;;  %v6614_v23 = vsel %vm2722_vm4, %v16353_v3, 0.0 }
 0x674   : > { %v6609_v17 = vadd.f32 %v6608_v63, %v6607_v7  ;;  %v6776_v35 = vadd.f32 %v6775_v24, %v6774_v21  ;;  %v6783_v24 = vsel %vm2722_vm4, %v6674_v48, 0.0  ;;  %v6785_v21 = vsel %vm2722_vm4, %v6675_v6, 0.0 }
 0x676   : > { %v6611_v42 = vadd.f32 %v6610_v53, %v6609_v17  ;;  %v6778_v7 = vadd.f32 %v6777_v22, %v6776_v35  ;;  %v6676_v17 = vmul.f32 %v20743_v39, %v20743_v39  ;;  %v6679_v39 = vmul.f32 %v20746_v61, %v20746_v61 }
 0x677   : > { %v6682_v61 = vmul.f32 %v20749_v28, %v20749_v28  ;;  %v6685_v28 = vmul.f32 %v20752_v10, %v20752_v10 }
 0x678   : > { %v6613_v63 = vadd.f32 %v6612_v38, %v6611_v42  ;;  %v6780_v53 = vadd.f32 %v6779_v2, %v6778_v7  ;;  %v6787_v14 = vsel %vm2722_vm4, %v6676_v17, 0.0  ;;  %v6793_v6 = vsel %vm2722_vm4, %v6679_v39, 0.0 }
 0x679   : > { %v6795_v17 = vsel %vm2722_vm4, %v6680_v32, 0.0  ;;  %v6805_v4 = vsel %vm2722_vm4, %v6685_v28, 0.0 }
 0x67a   : > { %v6615_v50 = vadd.f32 %v6614_v23, %v6613_v63  ;;  %v6782_v62 = vadd.f32 %v6781_v44, %v6780_v53  ;;  %v6789_v63 = vsel %vm2722_vm4, %v6677_v13, 0.0  ;;  %v6490_v44 = vld [vmem:[#allocation3] sm:$0x1] }
 0x67c   : > { %v6617_v59 = vadd.f32 %v6616_v30, %v6615_v50  ;;  %v6784_v42 = vadd.f32 %v6783_v24, %v6782_v62  ;;  %v6791_v30 = vsel %vm2722_vm4, %v6678_v18, 0.0  ;;  %v6683_v62 = vmul.f32 %v20750_v31, %v20750_v31 }
 0x67d   : > { %v6686_v31 = vmul.f32 %v16341_v43, %v16341_v43 }
 0x67e   : > { %v6618_v38 = vrot.slane %v6617_v59, 4  ;;  %v6786_v23 = vadd.f32 %v6785_v21, %v6784_v42  ;;  %v6799_v21 = vsel %vm2722_vm4, %v6682_v61, 0.0 }
 0x67f   : > { %v6807_v10 = vsel %vm2722_vm4, %v6686_v31, 0.0 }
 0x680   : > { %v6619_v22 = vadd.f32 %v6618_v38, %v6617_v59  ;;  %v6788_v48 = vadd.f32 %v6787_v14, %v6786_v23  ;;  %v6797_v38 = vsel %vm2722_vm4, %v6681_v55, 0.0  ;;  %v6803_v14 = vsel %vm2722_vm4, %v6684_v19, 0.0 }
 0x682   : > { %v6620_v35 = vrot.slane %v6619_v22, 2  ;;  %v6790_v7 = vadd.f32 %v6789_v63, %v6788_v48  ;;  %v6688_v63 = vmul.f32 %v16347_v57, %v16347_v57 }
 0x684   : > { %v6621_v2 = vadd.f32 %v6620_v35, %v6619_v22  ;;  %v6792_v53 = vadd.f32 %v6791_v30, %v6790_v7  ;;  %v6801_v22 = vsel %vm2722_vm4, %v6683_v62, 0.0  ;;  %v6687_v35 = vmul.f32 %v16339_v36, %v16339_v36 }
 0x685   : > { %v6690_v7 = vmul.f32 %v16353_v3, %v16353_v3 }
 0x686   : > { %v6622_v50 = vrot.slane %v6621_v2, 1  ;;  %v6794_v24 = vadd.f32 %v6793_v6, %v6792_v53  ;;  %v6809_v32 = vsel %vm2722_vm4, %v6687_v35, 0.0  ;;  %v6691_v6 = vmul.f32 %v16351_v34, %v16351_v34 }
 0x688   : > { %v6623_v59 = vadd.f32 %v6622_v50, %v6621_v2  ;;  %v6796_v13 = vadd.f32 %v6795_v17, %v6794_v24  ;;  %v6689_v2 = vmul.f32 %v16345_v11, %v16345_v11  ;;  %v6811_v50 = vsel %vm2722_vm4, %v6688_v63, 0.0 }
 0x689   : > { %v6817_v17 = vsel %vm2722_vm4, %v6691_v6, 0.0 }
 0x68a   : > { %v6624_v16 = vadd.f32 %v6623_v59, %v6490_v44  ;;  %v6798_v42 = vadd.f32 %v6797_v38, %v6796_v13  ;;  %v6813_v44 = vsel %vm2722_vm4, %v6689_v2, 0.0  ;;  %v6815_v59 = vsel %vm2722_vm4, %v6690_v7, 0.0 }
 0x68c   : > { %6626 = vst.msk [vmem:[#allocation3] sm:$0x1] %vm6625_vm10, %v6624_v16  ;;  %v6800_v18 = vadd.f32 %v6799_v21, %v6798_v42  ;;  %v6627_v42 = vld [vmem:[#allocation4] sm:$0x1] }
 0x68e   : > { %v6802_v23 = vadd.f32 %v6801_v22, %v6800_v18 }
 0x690   : > { %v6804_v39 = vadd.f32 %v6803_v14, %v6802_v23 }
 0x692   : > { %v6806_v48 = vadd.f32 %v6805_v4, %v6804_v39 }
 0x694   : > { %v6808_v30 = vadd.f32 %v6807_v10, %v6806_v48 }
 0x696   : > { %v6810_v55 = vadd.f32 %v6809_v32, %v6808_v30 }
 0x698   : > { %v6812_v53 = vadd.f32 %v6811_v50, %v6810_v55 }
 0x69a   : > { %v6814_v61 = vadd.f32 %v6813_v44, %v6812_v53 }
 0x69c   : > { %v6816_v24 = vadd.f32 %v6815_v59, %v6814_v61 }
 0x69e   : > { %v6818_v16 = vadd.f32 %v6817_v17, %v6816_v24 }
 0x6a0   : > { %v6819_v62 = vrot.slane %v6818_v16, 4 }
 0x6a2   : > { %v6820_v38 = vadd.f32 %v6819_v62, %v6818_v16 }
 0x6a4   : > { %v6821_v13 = vrot.slane %v6820_v38, 2 }
 0x6a6   : > { %v6822_v19 = vadd.f32 %v6821_v13, %v6820_v38 }
 0x6a8   : > { %v6823_v21 = vrot.slane %v6822_v19, 1 }
 0x6aa   : > { %v6824_v28 = vadd.f32 %v6823_v21, %v6822_v19 }
 0x6ac   : > { %v6825_v22 = vadd.f32 %v6824_v28, %v6627_v42 }
 0x6ae   : > { %6826 = vst.msk [vmem:[#allocation4] sm:$0x1] %vm6625_vm10, %v6825_v22 }
 0x6af PF: > { %p11379_p2 = scmp.ne.s32.totalorder %s13037_s20, 1 }
 0x6b1   : > { %6830 = sbr.rel (%p11379_p2) target bundleno = 2411 (0x96b), region = 56 }
 0x6b8   : > { %v6831_v18 = vld [vmem:[#allocation3] sm:$0x1]  ;;  %v6833_v31 = vld [vmem:[#allocation4] sm:$0x1]  ;;  %v6845_v63 = vlaneseq  ;;  %v6837_v48 = vld [vmem:[%s20092_s3] sm:$0x1] }
 0x6b9   : > { %v6832_v14 = vmul.f32 0.00024414063, %v6831_v18  ;;  %v6834_v23 = vmul.f32 0.00024414063, %v6833_v31  ;;  %v13063_v2 = vmov 1983009808   ;;  %v6841_v53 = vld [vmem:[%s20093_s4] sm:$0x1] }
 0x6ba   : > { %v16679_v10 = vshrl.u32 %v6845_v63, 7  ;;  %v7114_v32 = vunpack.c.l.s4 %v13063_v2  ;;  %v20754_v24 = vld [vmem:[#allocation19_spill] sm:$0xff]  ;;  %v20755_v62 = vld [vmem:[#allocation8_spill] sm:$0xff]  ;;  %v20756_v13 = vld [vmem:[#allocation21_spill] sm:$0xff]  ;;  %vm8456_vm11 = vcmask 123904   ;;  %vm10505_vm12 = vcmask 1041409  }
 0x6bb   : > { %v6835_v35 = vmul.f32 %v6832_v14, %v6832_v14  ;;  %v20757_v21 = vld [vmem:[#allocation11_spill] sm:$0xff]  ;;  %v20763_v63 = vld [vmem:[#allocation65_spill] sm:$0xff]  ;;  %vm10507_vm13 = vcmask 1042434   ;;  %vm10509_vm14 = vcmask 1043459   ;;  %vm10511_vm15 = vcmask 1044484  }
 0x6bc   : > { %v20273_v30 = vsub.s32 0, %v16679_v10  ;;  %v7115_v55 = vunpack.c.0.s8 %v7114_v32  ;;  %v20764_v2 = vld [vmem:[#allocation63_spill] sm:$0xff]  ;;  %vm10513_vm0 = vcmask 1045509   ;;  %vm10515_vm1 = vcmask 1046534  }
 0x6bd   : > { %v6836_v4 = vsub.f32 %v6834_v23, %v6835_v35  ;;  %v20759_v23 = vld [vmem:[#allocation57_spill] sm:$0xff]  ;;  %v20760_v35 = vld [vmem:[#allocation55_spill] sm:$0xff]  ;;  %vm10517_vm2 = vcmask 1047559  }
 0x6be   : > { %v16695_v59 = vsub.s32 %v7115_v55, %v16679_v10  ;;  %v20766_v55 = vld [vmem:[#allocation67_spill] sm:$0xff] }
 0x6bf   : > { %v6838_v39 = vadd.f32 1e-05, %v6836_v4  ;;  %v20761_v4 = vld [vmem:[#allocation61_spill] sm:$0xff] }
 0x6c0   : > { %20753 = vst [vmem:[#allocation103_spill] sm:$0xff] %v16695_v59  ;;  %v20782_v59 = vld [vmem:[#allocation12_spill] sm:$0xff] }
 0x6c1   : > { %12997 = vrsqrt.f32 %v6838_v39  ;;  %v20762_v39 = vld [vmem:[#allocation59_spill] sm:$0xff] }
 0x6cb   : > { %v12998_v7 = vpop.eup %12997 }
 0x6cc   : > { %v6840_v50 = vmul.f32 %v12998_v7, %v6837_v48  ;;  %v20765_v7 = vld [vmem:[#allocation69_spill] sm:$0xff] }
 0x6ce   : > { %v16685_v6 = vmul.f32 %v6840_v50, %v6832_v14  ;;  %v16689_v44 = vrot.slane %v6840_v50, %v20273_v30  ;;  %v20758_v14 = vld [vmem:[#allocation53_spill] sm:$0xff]  ;;  %v20780_v30 = vld [vmem:[#allocation79_spill] sm:$0xff] }
 0x6d0   : > { %v6843_v61 = vsub.f32 %v6841_v53, %v16685_v6  ;;  %v16700_v17 = vmul.f32 %v16167_v1, %v16689_v44  ;;  %v16704_v16 = vmul.f32 %v20754_v24, %v16689_v44  ;;  %v16708_v38 = vmul.f32 %v20755_v62, %v16689_v44  ;;  %v20767_v53 = vld [vmem:[#allocation13_spill] sm:$0xff]  ;;  %v20768_v62 = vld [vmem:[#allocation71_spill] sm:$0xff] }
 0x6d1   : > { %v16712_v19 = vmul.f32 %v20756_v13, %v16689_v44  ;;  %v16716_v42 = vmul.f32 %v20757_v21, %v16689_v44  ;;  %v16720_v1 = vmul.f32 %v16177_v51, %v16689_v44  ;;  %v16724_v28 = vmul.f32 %v16185_v37, %v16689_v44  ;;  %v20769_v21 = vld [vmem:[#allocation15_spill] sm:$0xff] }
 0x6d2   : > { %v16728_v22 = vmul.f32 %v16183_v0, %v16689_v44  ;;  %v16732_v18 = vmul.f32 %v16191_v52, %v16689_v44  ;;  %v16736_v31 = vmul.f32 %v16189_v56, %v16689_v44  ;;  %v16740_v51 = vmul.f32 %v16197_v60, %v16689_v44 }
 0x6d3   : > { %v16744_v37 = vmul.f32 %v16195_v49, %v16689_v44  ;;  %v16748_v0 = vmul.f32 %v16203_v9, %v16689_v44  ;;  %v16752_v52 = vmul.f32 %v16201_v29, %v16689_v44  ;;  %v16756_v56 = vmul.f32 %v16209_v58, %v16689_v44 }
 0x6d4   : > { %v16760_v60 = vmul.f32 %v16207_v8, %v16689_v44  ;;  %v16764_v49 = vmul.f32 %v16215_v27, %v16689_v44  ;;  %v16768_v9 = vmul.f32 %v16213_v15, %v16689_v44  ;;  %v16772_v29 = vmul.f32 %v16221_v47, %v16689_v44 }
 0x6d5   : > { %v16776_v58 = vmul.f32 %v16219_v40, %v16689_v44  ;;  %v16780_v8 = vmul.f32 %v16227_v46, %v16689_v44  ;;  %v16784_v27 = vmul.f32 %v16225_v5, %v16689_v44  ;;  %v16788_v15 = vmul.f32 %v16233_v33, %v16689_v44 }
 0x6d6   : > { %v16792_v47 = vmul.f32 %v16231_v26, %v16689_v44  ;;  %v16796_v40 = vmul.f32 %v16239_v20, %v16689_v44  ;;  %v16800_v46 = vmul.f32 %v20758_v14, %v16689_v44  ;;  %v16804_v5 = vmul.f32 %v20759_v23, %v16689_v44  ;;  %v20770_v23 = vld [vmem:[#allocation74_spill] sm:$0xff] }
 0x6d7   : > { %v16808_v33 = vmul.f32 %v20760_v35, %v16689_v44  ;;  %v16812_v26 = vmul.f32 %v20761_v4, %v16689_v44  ;;  %v16816_v20 = vmul.f32 %v20762_v39, %v16689_v44  ;;  %v16820_v48 = vmul.f32 %v20763_v63, %v16689_v44  ;;  %v20771_v4 = vld [vmem:[#allocation6_spill] sm:$0xff] }
 0x6d8   : > { %v16824_v32 = vmul.f32 %v20764_v2, %v16689_v44  ;;  %v16828_v50 = vmul.f32 %v20765_v7, %v16689_v44  ;;  %v16832_v6 = vmul.f32 %v20766_v55, %v16689_v44  ;;  %v16836_v24 = vmul.f32 %v20767_v53, %v16689_v44 }
 0x6d9   : > { %v16840_v13 = vmul.f32 %v20768_v62, %v16689_v44  ;;  %v16844_v14 = vmul.f32 %v20769_v21, %v16689_v44  ;;  %v16848_v35 = vmul.f32 %v20770_v23, %v16689_v44  ;;  %v16852_v39 = vmul.f32 %v20771_v4, %v16689_v44  ;;  %v20772_v62 = vld [vmem:[#allocation76_spill] sm:$0xff]  ;;  %v20774_v21 = vld [vmem:[#allocation17_spill] sm:$0xff]  ;;  %v20776_v23 = vld [vmem:[#allocation18_spill] sm:$0xff] }
 0x6da   : > { %v16856_v63 = vmul.f32 %v16279_v54, %v16689_v44  ;;  %v16860_v2 = vmul.f32 %v16287_v41, %v16689_v44  ;;  %v16864_v7 = vmul.f32 %v16285_v45, %v16689_v44  ;;  %v16868_v55 = vmul.f32 %v16293_v25, %v16689_v44  ;;  %v20778_v4 = vld [vmem:[#allocation9_spill] sm:$0xff] }
 0x6db   : > { %v16872_v53 = vmul.f32 %v16291_v12, %v16689_v44  ;;  %v16876_v54 = vmul.f32 %v20772_v62, %v16689_v44  ;;  %v16880_v41 = vmul.f32 %v20774_v21, %v16689_v44  ;;  %v16884_v45 = vmul.f32 %v20776_v23, %v16689_v44 }
 0x6dc   : > { %v16888_v25 = vmul.f32 %v20778_v4, %v16689_v44  ;;  %v16892_v12 = vmul.f32 %v20780_v30, %v16689_v44  ;;  %v16896_v62 = vmul.f32 %v20782_v59, %v16689_v44 }
 0x6dd   : > { %20773 = vst [vmem:[#allocation104_spill] sm:$0xff] %v16876_v54  ;;  %20775 = vst [vmem:[#allocation105_spill] sm:$0xff] %v16880_v41  ;;  %v20784_v54 = vld [vmem:[#allocation83_spill] sm:$0xff]  ;;  %v20786_v41 = vld [vmem:[#allocation81_spill] sm:$0xff] }
 0x6de   : > { %20777 = vst [vmem:[#allocation106_spill] sm:$0xff] %v16884_v45  ;;  %20779 = vst [vmem:[#allocation107_spill] sm:$0xff] %v16888_v25  ;;  %v16900_v21 = vmul.f32 %v20784_v54, %v16689_v44  ;;  %v16904_v23 = vmul.f32 %v20786_v41, %v16689_v44  ;;  %v20788_v45 = vld [vmem:[#allocation87_spill] sm:$0xff]  ;;  %v20790_v25 = vld [vmem:[#allocation85_spill] sm:$0xff] }
 0x6df   : > { %20781 = vst [vmem:[#allocation108_spill] sm:$0xff] %v16892_v12  ;;  %20783 = vst [vmem:[#allocation109_spill] sm:$0xff] %v16896_v62  ;;  %v16908_v4 = vmul.f32 %v20788_v45, %v16689_v44  ;;  %v16912_v30 = vmul.f32 %v20790_v25, %v16689_v44  ;;  %v20791_v12 = vld [vmem:[#allocation91_spill] sm:$0xff]  ;;  %v20792_v62 = vld [vmem:[#allocation89_spill] sm:$0xff] }
 0x6e0   : > { %20785 = vst [vmem:[#allocation110_spill] sm:$0xff] %v16900_v21  ;;  %20787 = vst [vmem:[#allocation111_spill] sm:$0xff] %v16904_v23  ;;  %v16916_v59 = vmul.f32 %v20791_v12, %v16689_v44  ;;  %v16920_v54 = vmul.f32 %v20792_v62, %v16689_v44  ;;  %v20793_v21 = vld [vmem:[#allocation22_spill] sm:$0xff]  ;;  %v20794_v23 = vld [vmem:[#allocation20_spill] sm:$0xff]  ;;  %v16936_v12 = vmul.f32 %v16341_v43, %v16689_v44 }
 0x6e1   : > { %20789 = vst [vmem:[#allocation112_spill] sm:$0xff] %v16908_v4  ;;  %v16924_v41 = vmul.f32 %v20793_v21, %v16689_v44  ;;  %v16928_v45 = vmul.f32 %v20794_v23, %v16689_v44  ;;  %v20795_v4 = vsub.s32 0, %v16679_v10  ;;  %v16940_v62 = vmul.f32 %v16339_v36, %v16689_v44 }
 0x6e2   : > { %v16944_v21 = vmul.f32 %v16347_v57, %v16689_v44  ;;  %v16948_v23 = vmul.f32 %v16345_v11, %v16689_v44  ;;  %v16952_v10 = vmul.f32 %v16353_v3, %v16689_v44  ;;  %v16956_v43 = vmul.f32 %v16351_v34, %v16689_v44 }
 0x6e3   : > { %v16932_v25 = vrot.slane %v6843_v61, %v20795_v4 }
 0x6e5   : > { %v16960_v36 = vadd.f32 %v16932_v25, %v16700_v17  ;;  %v16964_v57 = vadd.f32 %v16932_v25, %v16704_v16  ;;  %v16968_v11 = vadd.f32 %v16932_v25, %v16708_v38  ;;  %v16972_v3 = vadd.f32 %v16932_v25, %v16712_v19  ;;  %v20803_v4 = vld [vmem:[#allocation106_spill] sm:$0xff] }
 0x6e6   : > { %v16976_v34 = vadd.f32 %v16932_v25, %v16716_v42  ;;  %v16980_v44 = vadd.f32 %v16932_v25, %v16720_v1  ;;  %v16984_v61 = vadd.f32 %v16932_v25, %v16724_v28  ;;  %v16988_v17 = vadd.f32 %v16932_v25, %v16728_v22 }
 0x6e7   : > { %v16992_v16 = vadd.f32 %v16932_v25, %v16732_v18  ;;  %v16996_v38 = vadd.f32 %v16932_v25, %v16736_v31  ;;  %v17000_v19 = vadd.f32 %v16932_v25, %v16740_v51  ;;  %v17004_v42 = vadd.f32 %v16932_v25, %v16744_v37 }
 0x6e8   : > { %v17008_v1 = vadd.f32 %v16932_v25, %v16748_v0  ;;  %v17012_v28 = vadd.f32 %v16932_v25, %v16752_v52  ;;  %v17016_v22 = vadd.f32 %v16932_v25, %v16756_v56  ;;  %v17020_v18 = vadd.f32 %v16932_v25, %v16760_v60 }
 0x6e9   : > { %v17024_v31 = vadd.f32 %v16932_v25, %v16764_v49  ;;  %v17028_v51 = vadd.f32 %v16932_v25, %v16768_v9  ;;  %v17032_v37 = vadd.f32 %v16932_v25, %v16772_v29  ;;  %v17036_v0 = vadd.f32 %v16932_v25, %v16776_v58 }
 0x6ea   : > { %v17040_v52 = vadd.f32 %v16932_v25, %v16780_v8  ;;  %v17044_v56 = vadd.f32 %v16932_v25, %v16784_v27  ;;  %v17048_v60 = vadd.f32 %v16932_v25, %v16788_v15  ;;  %v17052_v49 = vadd.f32 %v16932_v25, %v16792_v47 }
 0x6eb   : > { %v17056_v9 = vadd.f32 %v16932_v25, %v16796_v40  ;;  %v17060_v29 = vadd.f32 %v16932_v25, %v16800_v46  ;;  %v17064_v58 = vadd.f32 %v16932_v25, %v16804_v5  ;;  %v17068_v8 = vadd.f32 %v16932_v25, %v16808_v33 }
 0x6ec   : > { %v17072_v27 = vadd.f32 %v16932_v25, %v16812_v26  ;;  %v17076_v15 = vadd.f32 %v16932_v25, %v16816_v20  ;;  %v17080_v47 = vadd.f32 %v16932_v25, %v16820_v48  ;;  %v17084_v40 = vadd.f32 %v16932_v25, %v16824_v32 }
 0x6ed   : > { %v17088_v46 = vadd.f32 %v16932_v25, %v16828_v50  ;;  %v17092_v5 = vadd.f32 %v16932_v25, %v16832_v6  ;;  %v17096_v33 = vadd.f32 %v16932_v25, %v16836_v24  ;;  %v17100_v26 = vadd.f32 %v16932_v25, %v16840_v13 }
 0x6ee   : > { %v17104_v20 = vadd.f32 %v16932_v25, %v16844_v14  ;;  %v17108_v48 = vadd.f32 %v16932_v25, %v16848_v35  ;;  %v17112_v32 = vadd.f32 %v16932_v25, %v16852_v39  ;;  %v17116_v50 = vadd.f32 %v16932_v25, %v16856_v63  ;;  %v20799_v35 = vld [vmem:[#allocation104_spill] sm:$0xff]  ;;  %v20801_v63 = vld [vmem:[#allocation105_spill] sm:$0xff] }
 0x6ef   : > { %v17120_v6 = vadd.f32 %v16932_v25, %v16860_v2  ;;  %v17124_v24 = vadd.f32 %v16932_v25, %v16864_v7  ;;  %v17128_v13 = vadd.f32 %v16932_v25, %v16868_v55  ;;  %v17132_v14 = vadd.f32 %v16932_v25, %v16872_v53 }
 0x6f0   : > { %v17136_v39 = vadd.f32 %v16932_v25, %v20799_v35  ;;  %v17140_v2 = vadd.f32 %v16932_v25, %v20801_v63  ;;  %v17144_v7 = vadd.f32 %v16932_v25, %v20803_v4 }
 0x6f1   : > { %20796 = vst [vmem:[#allocation113_spill] sm:$0xff] %v17124_v24  ;;  %20797 = vst [vmem:[#allocation114_spill] sm:$0xff] %v17128_v13  ;;  %v20805_v24 = vld [vmem:[#allocation107_spill] sm:$0xff]  ;;  %v20806_v13 = vld [vmem:[#allocation108_spill] sm:$0xff] }
 0x6f2   : > { %20798 = vst [vmem:[#allocation115_spill] sm:$0xff] %v17132_v14  ;;  %20800 = vst [vmem:[#allocation104_spill] sm:$0xff] %v17136_v39  ;;  %v17148_v55 = vadd.f32 %v16932_v25, %v20805_v24  ;;  %v17152_v53 = vadd.f32 %v16932_v25, %v20806_v13  ;;  %v20807_v14 = vld [vmem:[#allocation109_spill] sm:$0xff]  ;;  %v20808_v39 = vld [vmem:[#allocation110_spill] sm:$0xff]  ;;  %v17172_v13 = vadd.f32 %v16932_v25, %v16912_v30 }
 0x6f3   : > { %20802 = vst [vmem:[#allocation105_spill] sm:$0xff] %v17140_v2  ;;  %20804 = vst [vmem:[#allocation106_spill] sm:$0xff] %v17144_v7  ;;  %v17156_v35 = vadd.f32 %v16932_v25, %v20807_v14  ;;  %v17160_v63 = vadd.f32 %v16932_v25, %v20808_v39  ;;  %v20809_v2 = vld [vmem:[#allocation111_spill] sm:$0xff]  ;;  %v20810_v7 = vld [vmem:[#allocation112_spill] sm:$0xff]  ;;  %v17176_v14 = vadd.f32 %v16932_v25, %v16916_v59 }
 0x6f4   : > { %v17164_v4 = vadd.f32 %v16932_v25, %v20809_v2  ;;  %v17168_v24 = vadd.f32 %v16932_v25, %v20810_v7  ;;  %v17180_v39 = vadd.f32 %v16932_v25, %v16920_v54  ;;  %v17184_v2 = vadd.f32 %v16932_v25, %v16924_v41 }
 0x6f5   : > { %v17188_v7 = vadd.f32 %v16932_v25, %v16928_v45  ;;  %v17192_v30 = vadd.f32 %v16932_v25, %v16936_v12  ;;  %v17196_v59 = vadd.f32 %v16932_v25, %v16940_v62  ;;  %v17200_v54 = vadd.f32 %v16932_v25, %v16944_v21 }
 0x6f6   : > { %v17204_v41 = vadd.f32 %v16932_v25, %v16948_v23  ;;  %v17208_v45 = vadd.f32 %v16932_v25, %v16952_v10  ;;  %v17212_v12 = vadd.f32 %v16932_v25, %v16956_v43  ;;  %v17218_v62 = vmax.f32 %v16964_v57, 0.0 }
 0x6f7   : > { %20811 = vst [vmem:[#allocation107_spill] sm:$0xff] %v17192_v30  ;;  %v17215_v30 = vmax.f32 %v16960_v36, 0.0  ;;  %v17221_v21 = vmax.f32 %v16968_v11, 0.0  ;;  %v17224_v23 = vmax.f32 %v16972_v3, 0.0  ;;  %v17230_v10 = vmax.f32 %v16980_v44, 0.0 }
 0x6f8   : > { %20812 = vst [vmem:[#allocation108_spill] sm:$0xff] %v17204_v41  ;;  %v17227_v41 = vmax.f32 %v16976_v34, 0.0  ;;  %v17233_v25 = vmax.f32 %v16984_v61, 0.0  ;;  %v17236_v43 = vmax.f32 %v16988_v17, 0.0  ;;  %v17239_v36 = vmax.f32 %v16992_v16, 0.0 }
 0x6f9   : > { %v17242_v57 = vmax.f32 %v16996_v38, 0.0  ;;  %v17245_v11 = vmax.f32 %v17000_v19, 0.0  ;;  %v17248_v3 = vmax.f32 %v17004_v42, 0.0  ;;  %v17251_v34 = vmax.f32 %v17008_v1, 0.0 }
 0x6fa   : > { %v17254_v44 = vmax.f32 %v17012_v28, 0.0  ;;  %v17257_v61 = vmax.f32 %v17016_v22, 0.0  ;;  %v17260_v17 = vmax.f32 %v17020_v18, 0.0  ;;  %v17263_v16 = vmax.f32 %v17024_v31, 0.0 }
 0x6fb   : > { %v17266_v38 = vmax.f32 %v17028_v51, 0.0  ;;  %v17269_v19 = vmax.f32 %v17032_v37, 0.0  ;;  %v17272_v42 = vmax.f32 %v17036_v0, 0.0  ;;  %v17275_v1 = vmax.f32 %v17040_v52, 0.0 }
 0x6fc   : > { %v17278_v28 = vmax.f32 %v17044_v56, 0.0  ;;  %v17281_v22 = vmax.f32 %v17048_v60, 0.0  ;;  %v17284_v18 = vmax.f32 %v17052_v49, 0.0  ;;  %v17287_v31 = vmax.f32 %v17056_v9, 0.0 }
 0x6fd   : > { %v17290_v51 = vmax.f32 %v17060_v29, 0.0  ;;  %v17293_v37 = vmax.f32 %v17064_v58, 0.0  ;;  %v17296_v0 = vmax.f32 %v17068_v8, 0.0  ;;  %v17299_v52 = vmax.f32 %v17072_v27, 0.0 }
 0x6fe   : > { %v17302_v56 = vmax.f32 %v17076_v15, 0.0  ;;  %v17305_v60 = vmax.f32 %v17080_v47, 0.0  ;;  %v17308_v49 = vmax.f32 %v17084_v40, 0.0  ;;  %v17311_v9 = vmax.f32 %v17088_v46, 0.0 }
 0x6ff   : > { %v17314_v29 = vmax.f32 %v17092_v5, 0.0  ;;  %v17317_v58 = vmax.f32 %v17096_v33, 0.0  ;;  %v17320_v8 = vmax.f32 %v17100_v26, 0.0  ;;  %v17323_v27 = vmax.f32 %v17104_v20, 0.0  ;;  %v20818_v5 = vld [vmem:[#allocation113_spill] sm:$0xff]  ;;  %v20819_v26 = vld [vmem:[#allocation114_spill] sm:$0xff] }
 0x700   : > { %v17326_v15 = vmax.f32 %v17108_v48, 0.0  ;;  %v17329_v47 = vmax.f32 %v17112_v32, 0.0  ;;  %v17332_v40 = vmax.f32 %v17116_v50, 0.0  ;;  %v17335_v46 = vmax.f32 %v17120_v6, 0.0  ;;  %v20820_v20 = vld [vmem:[#allocation115_spill] sm:$0xff]  ;;  %v20821_v48 = vld [vmem:[#allocation104_spill] sm:$0xff] }
 0x701   : > { %20813 = vst [vmem:[#allocation109_spill] sm:$0xff] %v17320_v8  ;;  %20814 = vst [vmem:[#allocation110_spill] sm:$0xff] %v17323_v27  ;;  %v17338_v33 = vmax.f32 %v20818_v5, 0.0  ;;  %v17341_v8 = vmax.f32 %v20819_v26, 0.0  ;;  %v17344_v27 = vmax.f32 %v20820_v20, 0.0  ;;  %v20822_v32 = vld [vmem:[#allocation105_spill] sm:$0xff] }
 0x702   : > { %20815 = vst [vmem:[#allocation111_spill] sm:$0xff] %v17326_v15  ;;  %20816 = vst [vmem:[#allocation112_spill] sm:$0xff] %v17329_v47  ;;  %v17347_v15 = vmax.f32 %v20821_v48, 0.0  ;;  %v17350_v47 = vmax.f32 %v20822_v32, 0.0  ;;  %v20823_v50 = vld [vmem:[#allocation106_spill] sm:$0xff]  ;;  %v17356_v6 = vmax.f32 %v17148_v55, 0.0 }
 0x703   : > { %20817 = vst [vmem:[#allocation116_spill] sm:$0xff] %v17332_v40  ;;  %v17353_v40 = vmax.f32 %v20823_v50, 0.0  ;;  %v17359_v5 = vmax.f32 %v17152_v53, 0.0  ;;  %v17362_v26 = vmax.f32 %v17156_v35, 0.0  ;;  %v17365_v20 = vmax.f32 %v17160_v63, 0.0 }
 0x704   : > { %v17368_v48 = vmax.f32 %v17164_v4, 0.0  ;;  %v17371_v32 = vmax.f32 %v17168_v24, 0.0  ;;  %v17374_v50 = vmax.f32 %v17172_v13, 0.0  ;;  %v17377_v55 = vmax.f32 %v17176_v14, 0.0  ;;  %v20827_v4 = vld [vmem:[#allocation107_spill] sm:$0xff]  ;;  %v20831_v14 = vld [vmem:[#allocation108_spill] sm:$0xff] }
 0x705   : > { %v17380_v53 = vmax.f32 %v17180_v39, 0.0  ;;  %v17383_v35 = vmax.f32 %v17184_v2, 0.0  ;;  %v17386_v63 = vmax.f32 %v17188_v7, 0.0  ;;  %v17392_v24 = vmax.f32 %v17196_v59, 0.0  ;;  %v20833_v2 = vld [vmem:[#allocation103_spill] sm:$0xff] }
 0x706   : > { %20824 = vst [vmem:[#allocation113_spill] sm:$0xff] %v17368_v48  ;;  %20825 = vst [vmem:[#allocation114_spill] sm:$0xff] %v17377_v55  ;;  %v17389_v48 = vmax.f32 %v20827_v4, 0.0  ;;  %v17395_v13 = vmax.f32 %v17200_v54, 0.0  ;;  %v17398_v55 = vmax.f32 %v20831_v14, 0.0  ;;  %v7112_v39 = vcombine.high %v17215_v30, %v17215_v30 }
 0x707   : > { %20826 = vst [vmem:[#allocation115_spill] sm:$0xff] %v17383_v35  ;;  %20829 = vst [vmem:[#allocation105_spill] sm:$0xff] %v17392_v24  ;;  %v17404_v35 = vrot.slane %v17215_v30, %v20833_v2  ;;  %v7129_v7 = vcombine.high %v17218_v62, %v17218_v62  ;;  %v17410_v59 = vrot.slane %v17218_v62, %v20833_v2  ;;  %v17428_v62 = vmax.f32 %v17212_v12, 0.0 }
 0x708   : > { %20828 = vst [vmem:[#allocation104_spill] sm:$0xff] %v17389_v48  ;;  %20830 = vst [vmem:[#allocation106_spill] sm:$0xff] %v17395_v13  ;;  %v7146_v54 = vcombine.high %v17221_v21, %v17221_v21  ;;  %v17416_v4 = vrot.slane %v17221_v21, %v20833_v2  ;;  %v7163_v14 = vcombine.high %v17224_v23, %v17224_v23 }
 0x709   : > { %20832 = vst [vmem:[#allocation107_spill] sm:$0xff] %v17398_v55  ;;  %v17422_v30 = vrot.slane %v17224_v23, %v20833_v2  ;;  %v17425_v55 = vmax.f32 %v17208_v45, 0.0  ;;  %v17431_v13 = vrot.slane %v7112_v39, %v20833_v2  ;;  %v17434_v24 = vrot.slane %v7129_v7, %v20833_v2 }
 0x70a   : > { %20834 = vst [vmem:[#allocation108_spill] sm:$0xff] %v17416_v4  ;;  %v17441_v23 = vrot.slane %v7146_v54, %v20833_v2  ;;  %v17444_v45 = vrot.slane %v7163_v14, %v20833_v2  ;;  %v7180_v7 = vcombine.high %v17227_v41, %v17227_v41  ;;  %v17454_v21 = vrot.slane %v17227_v41, %v20833_v2 }
 0x70b   : > { %20835 = vst [vmem:[#allocation103_spill] sm:$0xff] %v17422_v30  ;;  %v7197_v48 = vcombine.high %v17230_v10, %v17230_v10  ;;  %v17464_v12 = vrot.slane %v17230_v10, %v20833_v2  ;;  %v7214_v41 = vcombine.high %v17233_v25, %v17233_v25  ;;  %v17475_v54 = vrot.slane %v17233_v25, %v20833_v2 }
 0x70c   : > { %20836 = vst [vmem:[#allocation117_spill] sm:$0xff] %v17441_v23  ;;  %20837 = vst [vmem:[#allocation118_spill] sm:$0xff] %v17444_v45  ;;  %v17469_v30 = vrot.slane %v7180_v7, %v20833_v2  ;;  %v7231_v10 = vcombine.high %v17236_v43, %v17236_v43  ;;  %v17486_v7 = vrot.slane %v17236_v43, %v20833_v2 }
 0x70d   : > { %20838 = vst [vmem:[#allocation119_spill] sm:$0xff] %v17464_v12  ;;  %20839 = vst [vmem:[#allocation120_spill] sm:$0xff] %v17475_v54  ;;  %v17480_v4 = vrot.slane %v7197_v48, %v20833_v2  ;;  %v17493_v23 = vrot.slane %v7214_v41, %v20833_v2  ;;  %v7248_v48 = vcombine.high %v17239_v36, %v17239_v36 }
 0x70e   : > { %20840 = vst [vmem:[#allocation121_spill] sm:$0xff] %v17486_v7  ;;  %v17502_v43 = vrot.slane %v7231_v10, %v20833_v2  ;;  %v17506_v39 = vrot.slane %v17239_v36, %v20833_v2  ;;  %v7265_v12 = vcombine.high %v17242_v57, %v17242_v57  ;;  %v17517_v14 = vrot.slane %v17242_v57, %v20833_v2 }
 0x70f   : > { %v17511_v25 = vrot.slane %v7248_v48, %v20833_v2  ;;  %v7282_v45 = vcombine.high %v17245_v11, %v17245_v11  ;;  %v17527_v48 = vrot.slane %v17245_v11, %v20833_v2  ;;  %v7299_v10 = vcombine.high %v17248_v3, %v17248_v3 }
 0x710   : > { %20841 = vst [vmem:[#allocation122_spill] sm:$0xff] %v17506_v39  ;;  %20843 = vst [vmem:[#allocation124_spill] sm:$0xff] %v17517_v14  ;;  %v17534_v54 = vrot.slane %v7265_v12, %v20833_v2  ;;  %v17545_v11 = vrot.slane %v17248_v3, %v20833_v2  ;;  %v7316_v41 = vcombine.high %v17251_v34, %v17251_v34 }
 0x711   : > { %20842 = vst [vmem:[#allocation123_spill] sm:$0xff] %v17511_v25  ;;  %v17541_v7 = vrot.slane %v7282_v45, %v20833_v2  ;;  %v17552_v57 = vrot.slane %v7299_v10, %v20833_v2  ;;  %v17556_v39 = vrot.slane %v17251_v34, %v20833_v2  ;;  %v7333_v45 = vcombine.high %v17254_v44, %v17254_v44 }
 0x712   : > { %20844 = vst [vmem:[#allocation125_spill] sm:$0xff] %v17545_v11  ;;  %v17565_v25 = vrot.slane %v7316_v41, %v20833_v2  ;;  %v17569_v10 = vrot.slane %v17254_v44, %v20833_v2  ;;  %v7350_v3 = vcombine.high %v17257_v61, %v17257_v61  ;;  %v17586_v44 = vrot.slane %v17257_v61, %v20833_v2 }
 0x713   : > { %20845 = vst [vmem:[#allocation126_spill] sm:$0xff] %v17556_v39  ;;  %v17576_v14 = vrot.slane %v7333_v45, %v20833_v2  ;;  %v7367_v34 = vcombine.high %v17260_v17, %v17260_v17  ;;  %v17597_v11 = vrot.slane %v17260_v17, %v20833_v2  ;;  %v7384_v36 = vcombine.high %v17263_v16, %v17263_v16 }
 0x714   : > { %20846 = vst [vmem:[#allocation127_spill] sm:$0xff] %v17565_v25  ;;  %20847 = vst [vmem:[#allocation128_spill] sm:$0xff] %v17569_v10  ;;  %v17593_v12 = vrot.slane %v7350_v3, %v20833_v2  ;;  %v17608_v39 = vrot.slane %v17263_v16, %v20833_v2  ;;  %v7401_v3 = vcombine.high %v17266_v38, %v17266_v38 }
 0x715   : > { %20848 = vst [vmem:[#allocation129_spill] sm:$0xff] %v17597_v11  ;;  %v17604_v41 = vrot.slane %v7367_v34, %v20833_v2  ;;  %v17617_v25 = vrot.slane %v7384_v36, %v20833_v2  ;;  %v17621_v34 = vrot.slane %v17266_v38, %v20833_v2  ;;  %v7418_v17 = vcombine.high %v17269_v19, %v17269_v19 }
 0x716   : > { %20849 = vst [vmem:[#allocation130_spill] sm:$0xff] %v17608_v39  ;;  %v17628_v10 = vrot.slane %v7401_v3, %v20833_v2  ;;  %v17638_v38 = vrot.slane %v17269_v19, %v20833_v2  ;;  %v7435_v16 = vcombine.high %v17272_v42, %v17272_v42  ;;  %v17649_v11 = vrot.slane %v17272_v42, %v20833_v2 }
 0x717   : > { %20850 = vst [vmem:[#allocation131_spill] sm:$0xff] %v17617_v25  ;;  %20851 = vst [vmem:[#allocation132_spill] sm:$0xff] %v17621_v34  ;;  %v17645_v61 = vrot.slane %v7418_v17, %v20833_v2  ;;  %v7452_v45 = vcombine.high %v17275_v1, %v17275_v1  ;;  %v17660_v39 = vrot.slane %v17275_v1, %v20833_v2 }
 0x718   : > { %20852 = vst [vmem:[#allocation133_spill] sm:$0xff] %v17649_v11  ;;  %v17656_v36 = vrot.slane %v7435_v16, %v20833_v2  ;;  %v7469_v17 = vcombine.high %v17278_v28, %v17278_v28  ;;  %v17673_v16 = vrot.slane %v17278_v28, %v20833_v2  ;;  %v7486_v42 = vcombine.high %v17281_v22, %v17281_v22 }
 0x719   : > { %20853 = vst [vmem:[#allocation134_spill] sm:$0xff] %v17660_v39  ;;  %v17669_v25 = vrot.slane %v7452_v45, %v20833_v2  ;;  %v17690_v28 = vrot.slane %v17281_v22, %v20833_v2  ;;  %v7503_v1 = vcombine.high %v17284_v18, %v17284_v18  ;;  %v17701_v11 = vrot.slane %v17284_v18, %v20833_v2 }
 0x71a   : > { %20855 = vst [vmem:[#allocation136_spill] sm:$0xff] %v17673_v16  ;;  %v17680_v34 = vrot.slane %v7469_v17, %v20833_v2  ;;  %v17697_v19 = vrot.slane %v7486_v42, %v20833_v2  ;;  %v7520_v3 = vcombine.high %v17287_v31, %v17287_v31  ;;  %v17712_v39 = vrot.slane %v17287_v31, %v20833_v2 }
 0x71b   : > { %20854 = vst [vmem:[#allocation135_spill] sm:$0xff] %v17669_v25  ;;  %20856 = vst [vmem:[#allocation137_spill] sm:$0xff] %v17701_v11  ;;  %v17708_v45 = vrot.slane %v7503_v1, %v20833_v2  ;;  %v7537_v42 = vcombine.high %v17290_v51, %v17290_v51  ;;  %v17725_v1 = vrot.slane %v17290_v51, %v20833_v2 }
 0x71c   : > { %20857 = vst [vmem:[#allocation138_spill] sm:$0xff] %v17712_v39  ;;  %v17721_v25 = vrot.slane %v7520_v3, %v20833_v2  ;;  %v7554_v18 = vcombine.high %v17293_v37, %v17293_v37  ;;  %v17742_v51 = vrot.slane %v17293_v37, %v20833_v2  ;;  %v7571_v31 = vcombine.high %v17296_v0, %v17296_v0 }
 0x71d   : > { %20859 = vst [vmem:[#allocation140_spill] sm:$0xff] %v17725_v1  ;;  %v17732_v16 = vrot.slane %v7537_v42, %v20833_v2  ;;  %v17753_v11 = vrot.slane %v17296_v0, %v20833_v2  ;;  %v7588_v17 = vcombine.high %v17299_v52, %v17299_v52  ;;  %v17764_v39 = vrot.slane %v17299_v52, %v20833_v2 }
 0x71e   : > { %20858 = vst [vmem:[#allocation139_spill] sm:$0xff] %v17721_v25  ;;  %v17749_v22 = vrot.slane %v7554_v18, %v20833_v2  ;;  %v17760_v3 = vrot.slane %v7571_v31, %v20833_v2  ;;  %v7605_v18 = vcombine.high %v17302_v56, %v17302_v56  ;;  %v17777_v31 = vrot.slane %v17302_v56, %v20833_v2 }
 0x71f   : > { %20860 = vst [vmem:[#allocation141_spill] sm:$0xff] %v17753_v11  ;;  %20861 = vst [vmem:[#allocation142_spill] sm:$0xff] %v17764_v39  ;;  %v17773_v25 = vrot.slane %v7588_v17, %v20833_v2  ;;  %v7622_v0 = vcombine.high %v17305_v60, %v17305_v60  ;;  %v17794_v56 = vrot.slane %v17305_v60, %v20833_v2 }
 0x720   : > { %20863 = vst [vmem:[#allocation144_spill] sm:$0xff] %v17777_v31  ;;  %v17784_v1 = vrot.slane %v7605_v18, %v20833_v2  ;;  %v7639_v52 = vcombine.high %v17308_v49, %v17308_v49  ;;  %v17805_v11 = vrot.slane %v17308_v49, %v20833_v2  ;;  %v7656_v42 = vcombine.high %v17311_v9, %v17311_v9 }
 0x721   : > { %20862 = vst [vmem:[#allocation143_spill] sm:$0xff] %v17773_v25  ;;  %20864 = vst [vmem:[#allocation145_spill] sm:$0xff] %v17794_v56  ;;  %v17801_v37 = vrot.slane %v7622_v0, %v20833_v2  ;;  %v17816_v39 = vrot.slane %v17311_v9, %v20833_v2  ;;  %v7673_v0 = vcombine.high %v17314_v29, %v17314_v29  ;;  %v20872_v9 = vld [vmem:[#allocation109_spill] sm:$0xff] }
 0x722   : > { %20866 = vst [vmem:[#allocation147_spill] sm:$0xff] %v17805_v11  ;;  %v17812_v17 = vrot.slane %v7639_v52, %v20833_v2  ;;  %v17825_v25 = vrot.slane %v7656_v42, %v20833_v2  ;;  %v17829_v52 = vrot.slane %v17314_v29, %v20833_v2  ;;  %v7690_v49 = vcombine.high %v17317_v58, %v17317_v58  ;;  %v20875_v42 = vld [vmem:[#allocation110_spill] sm:$0xff] }
 0x723   : > { %20865 = vst [vmem:[#allocation146_spill] sm:$0xff] %v17801_v37  ;;  %20868 = vst [vmem:[#allocation149_spill] sm:$0xff] %v17816_v39  ;;  %v17836_v31 = vrot.slane %v7673_v0, %v20833_v2  ;;  %v17846_v29 = vrot.slane %v17317_v58, %v20833_v2  ;;  %v7707_v37 = vcombine.high %v20872_v9, %v20872_v9  ;;  %v20877_v0 = vld [vmem:[#allocation111_spill] sm:$0xff] }
 0x724   : > { %20867 = vst [vmem:[#allocation148_spill] sm:$0xff] %v17812_v17  ;;  %20869 = vst [vmem:[#allocation150_spill] sm:$0xff] %v17825_v25  ;;  %v17853_v60 = vrot.slane %v7690_v49, %v20833_v2  ;;  %v17857_v11 = vrot.slane %v20872_v9, %v20833_v2  ;;  %v7724_v18 = vcombine.high %v20875_v42, %v20875_v42  ;;  %v20881_v9 = vld [vmem:[#allocation112_spill] sm:$0xff] }
 0x725   : > { %20870 = vst [vmem:[#allocation151_spill] sm:$0xff] %v17829_v52  ;;  %20871 = vst [vmem:[#allocation152_spill] sm:$0xff] %v17836_v31  ;;  %v17864_v39 = vrot.slane %v7707_v37, %v20833_v2  ;;  %v17868_v17 = vrot.slane %v20875_v42, %v20833_v2  ;;  %v7741_v49 = vcombine.high %v20877_v0, %v20877_v0  ;;  %v20883_v42 = vld [vmem:[#allocation116_spill] sm:$0xff] }
 0x726   : > { %20873 = vst [vmem:[#allocation109_spill] sm:$0xff] %v17853_v60  ;;  %20874 = vst [vmem:[#allocation153_spill] sm:$0xff] %v17857_v11  ;;  %v17877_v56 = vrot.slane %v7724_v18, %v20833_v2  ;;  %v17881_v37 = vrot.slane %v20877_v0, %v20833_v2  ;;  %v7758_v31 = vcombine.high %v20881_v9, %v20881_v9 }
 0x727   : > { %20876 = vst [vmem:[#allocation110_spill] sm:$0xff] %v17868_v17  ;;  %v17888_v52 = vrot.slane %v7741_v49, %v20833_v2  ;;  %v17898_v0 = vrot.slane %v20881_v9, %v20833_v2  ;;  %v7775_v60 = vcombine.high %v20883_v42, %v20883_v42  ;;  %v17909_v11 = vrot.slane %v20883_v42, %v20833_v2 }
 0x728   : > { %20878 = vst [vmem:[#allocation111_spill] sm:$0xff] %v17877_v56  ;;  %20879 = vst [vmem:[#allocation154_spill] sm:$0xff] %v17881_v37  ;;  %v17905_v58 = vrot.slane %v7758_v31, %v20833_v2  ;;  %v7792_v25 = vcombine.high %v17335_v46, %v17335_v46  ;;  %v17920_v17 = vrot.slane %v17335_v46, %v20833_v2 }
 0x729   : > { %20880 = vst [vmem:[#allocation155_spill] sm:$0xff] %v17888_v52  ;;  %20882 = vst [vmem:[#allocation112_spill] sm:$0xff] %v17898_v0  ;;  %v17916_v18 = vrot.slane %v7775_v60, %v20833_v2  ;;  %v7809_v31 = vcombine.high %v17338_v33, %v17338_v33  ;;  %v17933_v60 = vrot.slane %v17338_v33, %v20833_v2 }
 0x72a   : > { %20884 = vst [vmem:[#allocation116_spill] sm:$0xff] %v17905_v58  ;;  %20885 = vst [vmem:[#allocation156_spill] sm:$0xff] %v17909_v11  ;;  %v17929_v56 = vrot.slane %v7792_v25, %v20833_v2  ;;  %v7826_v42 = vcombine.high %v17341_v8, %v17341_v8  ;;  %v17950_v33 = vrot.slane %v17341_v8, %v20833_v2 }
 0x72b   : > { %20886 = vst [vmem:[#allocation157_spill] sm:$0xff] %v17916_v18  ;;  %20887 = vst [vmem:[#allocation158_spill] sm:$0xff] %v17920_v17  ;;  %v17940_v37 = vrot.slane %v7809_v31, %v20833_v2  ;;  %v7843_v46 = vcombine.high %v17344_v27, %v17344_v27  ;;  %v17961_v11 = vrot.slane %v17344_v27, %v20833_v2 }
 0x72c   : > { %20888 = vst [vmem:[#allocation159_spill] sm:$0xff] %v17929_v56  ;;  %20889 = vst [vmem:[#allocation160_spill] sm:$0xff] %v17933_v60  ;;  %v17957_v9 = vrot.slane %v7826_v42, %v20833_v2  ;;  %v7860_v49 = vcombine.high %v17347_v15, %v17347_v15  ;;  %v17972_v17 = vrot.slane %v17347_v15, %v20833_v2 }
 0x72d   : > { %20890 = vst [vmem:[#allocation161_spill] sm:$0xff] %v17940_v37  ;;  %20891 = vst [vmem:[#allocation162_spill] sm:$0xff] %v17950_v33  ;;  %v17968_v25 = vrot.slane %v7843_v46, %v20833_v2  ;;  %v7877_v42 = vcombine.high %v17350_v47, %v17350_v47  ;;  %v17985_v46 = vrot.slane %v17350_v47, %v20833_v2 }
 0x72e   : > { %20892 = vst [vmem:[#allocation163_spill] sm:$0xff] %v17957_v9  ;;  %20893 = vst [vmem:[#allocation164_spill] sm:$0xff] %v17961_v11  ;;  %v17981_v56 = vrot.slane %v7860_v49, %v20833_v2  ;;  %v7894_v27 = vcombine.high %v17353_v40, %v17353_v40  ;;  %v18002_v47 = vrot.slane %v17353_v40, %v20833_v2 }
 0x72f   : > { %20894 = vst [vmem:[#allocation165_spill] sm:$0xff] %v17968_v25  ;;  %20895 = vst [vmem:[#allocation166_spill] sm:$0xff] %v17972_v17  ;;  %v17992_v60 = vrot.slane %v7877_v42, %v20833_v2  ;;  %v7911_v15 = vcombine.high %v17356_v6, %v17356_v6  ;;  %v18013_v11 = vrot.slane %v17356_v6, %v20833_v2 }
 0x730   : > { %20896 = vst [vmem:[#allocation167_spill] sm:$0xff] %v17981_v56  ;;  %20897 = vst [vmem:[#allocation168_spill] sm:$0xff] %v17985_v46  ;;  %v18009_v8 = vrot.slane %v7894_v27, %v20833_v2  ;;  %v7928_v31 = vcombine.high %v17359_v5, %v17359_v5  ;;  %v18024_v17 = vrot.slane %v17359_v5, %v20833_v2  ;;  %v20908_v5 = vld [vmem:[#allocation113_spill] sm:$0xff] }
 0x731   : > { %20898 = vst [vmem:[#allocation169_spill] sm:$0xff] %v17992_v60  ;;  %20899 = vst [vmem:[#allocation170_spill] sm:$0xff] %v18002_v47  ;;  %v18020_v49 = vrot.slane %v7911_v15, %v20833_v2  ;;  %v7945_v27 = vcombine.high %v17362_v26, %v17362_v26  ;;  %v18037_v15 = vrot.slane %v17362_v26, %v20833_v2 }
 0x732   : > { %20900 = vst [vmem:[#allocation171_spill] sm:$0xff] %v18009_v8  ;;  %20901 = vst [vmem:[#allocation172_spill] sm:$0xff] %v18013_v11  ;;  %v18033_v56 = vrot.slane %v7928_v31, %v20833_v2  ;;  %v7962_v6 = vcombine.high %v17365_v20, %v17365_v20  ;;  %v18054_v26 = vrot.slane %v17365_v20, %v20833_v2 }
 0x733   : > { %20902 = vst [vmem:[#allocation173_spill] sm:$0xff] %v18020_v49  ;;  %20903 = vst [vmem:[#allocation174_spill] sm:$0xff] %v18024_v17  ;;  %v18044_v46 = vrot.slane %v7945_v27, %v20833_v2  ;;  %v7979_v8 = vcombine.high %v20908_v5, %v20908_v5  ;;  %v18065_v11 = vrot.slane %v20908_v5, %v20833_v2  ;;  %v20916_v5 = vld [vmem:[#allocation114_spill] sm:$0xff] }
 0x734   : > { %20904 = vst [vmem:[#allocation175_spill] sm:$0xff] %v18033_v56  ;;  %20905 = vst [vmem:[#allocation176_spill] sm:$0xff] %v18037_v15  ;;  %v18061_v40 = vrot.slane %v7962_v6, %v20833_v2  ;;  %v7996_v42 = vcombine.high %v17371_v32, %v17371_v32  ;;  %v18076_v17 = vrot.slane %v17371_v32, %v20833_v2 }
 0x735   : > { %20906 = vst [vmem:[#allocation177_spill] sm:$0xff] %v18044_v46  ;;  %20907 = vst [vmem:[#allocation178_spill] sm:$0xff] %v18054_v26  ;;  %v18072_v31 = vrot.slane %v7979_v8, %v20833_v2  ;;  %v8013_v6 = vcombine.high %v17374_v50, %v17374_v50  ;;  %v18089_v8 = vrot.slane %v17374_v50, %v20833_v2 }
 0x736   : > { %20909 = vst [vmem:[#allocation113_spill] sm:$0xff] %v18061_v40  ;;  %20910 = vst [vmem:[#allocation179_spill] sm:$0xff] %v18065_v11  ;;  %v18085_v56 = vrot.slane %v7996_v42, %v20833_v2  ;;  %v8030_v46 = vcombine.high %v20916_v5, %v20916_v5  ;;  %v18106_v50 = vrot.slane %v20916_v5, %v20833_v2 }
 0x737   : > { %20911 = vst [vmem:[#allocation180_spill] sm:$0xff] %v18072_v31  ;;  %20912 = vst [vmem:[#allocation181_spill] sm:$0xff] %v18076_v17  ;;  %v18096_v15 = vrot.slane %v8013_v6, %v20833_v2  ;;  %v8047_v32 = vcombine.high %v17380_v53, %v17380_v53  ;;  %v18117_v42 = vrot.slane %v17380_v53, %v20833_v2  ;;  %v20920_v31 = vld [vmem:[#allocation115_spill] sm:$0xff]  ;;  %v20926_v53 = vld [vmem:[#allocation104_spill] sm:$0xff] }
 0x738   : > { %20913 = vst [vmem:[#allocation182_spill] sm:$0xff] %v18085_v56  ;;  %20914 = vst [vmem:[#allocation183_spill] sm:$0xff] %v18089_v8  ;;  %v18113_v20 = vrot.slane %v8030_v46, %v20833_v2  ;;  %v8064_v27 = vcombine.high %v20920_v31, %v20920_v31  ;;  %v18128_v11 = vrot.slane %v20920_v31, %v20833_v2  ;;  %v20928_v31 = vld [vmem:[#allocation105_spill] sm:$0xff] }
 0x739   : > { %20915 = vst [vmem:[#allocation184_spill] sm:$0xff] %v18096_v15  ;;  %20917 = vst [vmem:[#allocation114_spill] sm:$0xff] %v18106_v50  ;;  %v18124_v17 = vrot.slane %v8047_v32, %v20833_v2  ;;  %v8081_v46 = vcombine.high %v17386_v63, %v17386_v63  ;;  %v18141_v32 = vrot.slane %v17386_v63, %v20833_v2 }
 0x73a   : > { %20918 = vst [vmem:[#allocation185_spill] sm:$0xff] %v18113_v20  ;;  %20919 = vst [vmem:[#allocation186_spill] sm:$0xff] %v18117_v42  ;;  %v18137_v56 = vrot.slane %v8064_v27, %v20833_v2  ;;  %v8098_v15 = vcombine.high %v20926_v53, %v20926_v53  ;;  %v18158_v63 = vrot.slane %v20926_v53, %v20833_v2  ;;  %v20931_v27 = vld [vmem:[#allocation106_spill] sm:$0xff] }
 0x73b   : > { %20921 = vst [vmem:[#allocation115_spill] sm:$0xff] %v18124_v17  ;;  %20922 = vst [vmem:[#allocation187_spill] sm:$0xff] %v18128_v11  ;;  %v18148_v8 = vrot.slane %v8081_v46, %v20833_v2  ;;  %v8115_v20 = vcombine.high %v20928_v31, %v20928_v31  ;;  %v18169_v42 = vrot.slane %v20928_v31, %v20833_v2  ;;  %v20934_v46 = vld [vmem:[#allocation107_spill] sm:$0xff] }
 0x73c   : > { %20923 = vst [vmem:[#allocation188_spill] sm:$0xff] %v18137_v56  ;;  %20924 = vst [vmem:[#allocation189_spill] sm:$0xff] %v18141_v32  ;;  %v18165_v5 = vrot.slane %v8098_v15, %v20833_v2  ;;  %v8132_v6 = vcombine.high %v20931_v27, %v20931_v27  ;;  %v18180_v17 = vrot.slane %v20931_v27, %v20833_v2  ;;  %v8471_v56 = vsel %vm8456_vm11, %v17431_v13, -inf }
 0x73d   : > { %20925 = vst [vmem:[#allocation190_spill] sm:$0xff] %v18148_v8  ;;  %20927 = vst [vmem:[#allocation104_spill] sm:$0xff] %v18158_v63  ;;  %v18176_v11 = vrot.slane %v8115_v20, %v20833_v2  ;;  %v8149_v15 = vcombine.high %v20934_v46, %v20934_v46  ;;  %v18193_v20 = vrot.slane %v20934_v46, %v20833_v2 }
 0x73e   : > { %20929 = vst [vmem:[#allocation105_spill] sm:$0xff] %v18165_v5  ;;  %20930 = vst [vmem:[#allocation191_spill] sm:$0xff] %v18169_v42  ;;  %v18189_v50 = vrot.slane %v8132_v6, %v20833_v2  ;;  %v8166_v31 = vcombine.high %v17425_v55, %v17425_v55  ;;  %v18210_v46 = vrot.slane %v17425_v55, %v20833_v2  ;;  %v8457_v6 = vsel %vm8456_vm11, %v17404_v35, -inf }
 0x73f   : > { %20932 = vst [vmem:[#allocation106_spill] sm:$0xff] %v18176_v11  ;;  %20933 = vst [vmem:[#allocation192_spill] sm:$0xff] %v18180_v17  ;;  %v18200_v32 = vrot.slane %v8149_v15, %v20833_v2  ;;  %v8183_v27 = vcombine.high %v17428_v62, %v17428_v62  ;;  %v18227_v55 = vrot.slane %v17428_v62, %v20833_v2  ;;  %v8458_v17 = vrot.slane %v8457_v6, 4 }
 0x740   : > { %20935 = vst [vmem:[#allocation107_spill] sm:$0xff] %v18189_v50  ;;  %20936 = vst [vmem:[#allocation193_spill] sm:$0xff] %v18193_v20  ;;  %v18219_v42 = vrot.slane %v8166_v31, %v20833_v2  ;;  %v20941_v15 = vcombine.high %v17404_v35, %v17404_v35  ;;  %v8472_v11 = vrot.slane %v8471_v56, 4  ;;  %v20943_v35 = vcombine.high %v17431_v13, %v17431_v13 }
 0x741   : > { %20937 = vst [vmem:[#allocation194_spill] sm:$0xff] %v18200_v32  ;;  %20938 = vst [vmem:[#allocation195_spill] sm:$0xff] %v18210_v46  ;;  %v18236_v53 = vrot.slane %v8183_v27, %v20833_v2  ;;  %v8459_v32 = vmax.f32 %v8457_v6, %v8458_v17  ;;  %v8485_v2 = vsel %vm8456_vm11, %v17410_v59, -inf  ;;  %v20944_v27 = vcombine.high %v17410_v59, %v17410_v59 }
 0x742   : > { %20939 = vst [vmem:[#allocation196_spill] sm:$0xff] %v18219_v42  ;;  %20940 = vst [vmem:[#allocation197_spill] sm:$0xff] %v18227_v55  ;;  %v8464_v50 = vsel %vm8456_vm11, %v20941_v15, -inf  ;;  %v8478_v15 = vsel %vm8456_vm11, %v20943_v35, -inf  ;;  %v8473_v8 = vmax.f32 %v8471_v56, %v8472_v11  ;;  %v8486_v62 = vrot.slane %v8485_v2, 4 }
 0x743   : > { %20942 = vst [vmem:[#allocation198_spill] sm:$0xff] %v18236_v53  ;;  %v8465_v20 = vrot.slane %v8464_v50, 4  ;;  %v8479_v63 = vrot.slane %v8478_v15, 4  ;;  %v8492_v31 = vsel %vm8456_vm11, %v20944_v27, -inf  ;;  %v8460_v46 = vrot.slane %v8459_v32, 2 }
 0x744   : > { %v8493_v17 = vrot.slane %v8492_v31, 4  ;;  %v8499_v13 = vsel %vm8456_vm11, %v17434_v24, -inf  ;;  %v8474_v40 = vrot.slane %v8473_v8, 2  ;;  %v8487_v26 = vmax.f32 %v8485_v2, %v8486_v62 }
 0x745   : > { %v8466_v5 = vmax.f32 %v8464_v50, %v8465_v20  ;;  %v8480_v42 = vmax.f32 %v8478_v15, %v8479_v63  ;;  %v20945_v50 = vcombine.high %v17434_v24, %v17434_v24  ;;  %v8461_v35 = vmax.f32 %v8459_v32, %v8460_v46  ;;  %v20958_v24 = vld [vmem:[#allocation118_spill] sm:$0xff] }
 0x746   : > { %v8494_v59 = vmax.f32 %v8492_v31, %v8493_v17  ;;  %v8500_v47 = vrot.slane %v8499_v13, 4  ;;  %v8475_v60 = vmax.f32 %v8473_v8, %v8474_v40  ;;  %v8488_v25 = vrot.slane %v8487_v26, 2 }
 0x747   : > { %v8467_v6 = vrot.slane %v8466_v5, 2  ;;  %v8506_v20 = vsel %vm8456_vm11, %v20945_v50, -inf  ;;  %v8481_v27 = vrot.slane %v8480_v42, 2  ;;  %v8462_v56 = vrot.slane %v8461_v35, 1 }
 0x748   : > { %v8507_v11 = vrot.slane %v8506_v20, 4  ;;  %v8495_v63 = vrot.slane %v8494_v59, 2  ;;  %v8501_v33 = vmax.f32 %v8499_v13, %v8500_v47  ;;  %v8476_v50 = vrot.slane %v8475_v60, 1 }
 0x749   : > { %v8468_v49 = vmax.f32 %v8466_v5, %v8467_v6  ;;  %v8482_v9 = vmax.f32 %v8480_v42, %v8481_v27  ;;  %v8489_v32 = vmax.f32 %v8487_v26, %v8488_v25  ;;  %v18262_v17 = vmax.f32 %v8461_v35, %v8462_v56  ;;  %v20947_v6 = vld [vmem:[#allocation108_spill] sm:$0xff] }
 0x74a   : > { %v8508_v37 = vmax.f32 %v8506_v20, %v8507_v11  ;;  %v8496_v46 = vmax.f32 %v8494_v59, %v8495_v63  ;;  %v8502_v62 = vrot.slane %v8501_v33, 2  ;;  %v8513_v47 = vsel %vm8456_vm11, %v20947_v6, -inf  ;;  %v20952_v11 = vld [vmem:[#allocation117_spill] sm:$0xff] }
 0x74b   : > { %v8469_v15 = vrot.slane %v8468_v49, 1  ;;  %v8483_v31 = vrot.slane %v8482_v9, 1  ;;  %20946 = vst [vmem:[#allocation199_spill] sm:$0xff] %v18262_v17  ;;  %v8490_v40 = vrot.slane %v8489_v32, 1  ;;  %v8514_v27 = vrot.slane %v8513_v47, 4 }
 0x74c   : > { %v8509_v2 = vrot.slane %v8508_v37, 2  ;;  %v8497_v8 = vrot.slane %v8496_v46, 1  ;;  %v8503_v13 = vmax.f32 %v8501_v33, %v8502_v62  ;;  %v18268_v25 = vmax.f32 %v8475_v60, %v8476_v50 }
 0x74d   : > { %v18266_v42 = vmax.f32 %v8468_v49, %v8469_v15  ;;  %v18270_v26 = vmax.f32 %v8482_v9, %v8483_v31  ;;  %v20951_v59 = vcombine.high %v20947_v6, %v20947_v6  ;;  %v8527_v56 = vsel %vm8456_vm11, %v20952_v11, -inf  ;;  %v20956_v15 = vld [vmem:[#allocation103_spill] sm:$0xff] }
 0x74e   : > { %v8510_v20 = vmax.f32 %v8508_v37, %v8509_v2  ;;  %20949 = vst [vmem:[#allocation200_spill] sm:$0xff] %v18268_v25  ;;  %v18278_v63 = vmax.f32 %v8489_v32, %v8490_v40  ;;  %v18280_v5 = vmax.f32 %v8496_v46, %v8497_v8  ;;  %v8515_v49 = vmax.f32 %v8513_v47, %v8514_v27 }
 0x74f   : > { %20948 = vst [vmem:[#allocation108_spill] sm:$0xff] %v18266_v42  ;;  %20950 = vst [vmem:[#allocation201_spill] sm:$0xff] %v18270_v26  ;;  %v8520_v35 = vsel %vm8456_vm11, %v20951_v59, -inf  ;;  %v8528_v37 = vrot.slane %v8527_v56, 4  ;;  %v20955_v60 = vcombine.high %v20952_v11, %v20952_v11  ;;  %v8541_v50 = vsel %vm8456_vm11, %v20956_v15, -inf }
 0x750   : > { %20953 = vst [vmem:[#allocation117_spill] sm:$0xff] %v18278_v63  ;;  %20954 = vst [vmem:[#allocation202_spill] sm:$0xff] %v18280_v5  ;;  %v8521_v33 = vrot.slane %v8520_v35, 4  ;;  %v20957_v31 = vcombine.high %v20956_v15, %v20956_v15  ;;  %v8504_v32 = vrot.slane %v8503_v13, 1  ;;  %v8511_v2 = vrot.slane %v8510_v20, 1 }
 0x751   : > { %v8534_v9 = vsel %vm8456_vm11, %v20955_v60, -inf  ;;  %v8516_v46 = vrot.slane %v8515_v49, 2  ;;  %v8529_v8 = vmax.f32 %v8527_v56, %v8528_v37  ;;  %v8542_v47 = vrot.slane %v8541_v50, 4 }
 0x752   : > { %v8548_v62 = vsel %vm8456_vm11, %v20957_v31, -inf  ;;  %v8522_v40 = vmax.f32 %v8520_v35, %v8521_v33  ;;  %v8535_v6 = vrot.slane %v8534_v9, 4  ;;  %v8555_v60 = vsel %vm8456_vm11, %v20958_v24, -inf }
 0x753   : > { %v8549_v27 = vrot.slane %v8548_v62, 4  ;;  %v8517_v59 = vmax.f32 %v8515_v49, %v8516_v46  ;;  %v20959_v5 = vcombine.high %v20958_v24, %v20958_v24  ;;  %v8530_v63 = vrot.slane %v8529_v8, 2 }
 0x754   : > { %v8523_v11 = vrot.slane %v8522_v40, 2  ;;  %v8536_v31 = vmax.f32 %v8534_v9, %v8535_v6  ;;  %v8543_v26 = vmax.f32 %v8541_v50, %v8542_v47  ;;  %v8556_v56 = vrot.slane %v8555_v60, 4 }
 0x755   : > { %v8562_v15 = vsel %vm8456_vm11, %v20959_v5, -inf  ;;  %v8550_v25 = vmax.f32 %v8548_v62, %v8549_v27  ;;  %v8518_v42 = vrot.slane %v8517_v59, 1  ;;  %v8531_v37 = vmax.f32 %v8529_v8, %v8530_v63 }
 0x756   : > { %v8524_v35 = vmax.f32 %v8522_v40, %v8523_v11  ;;  %v8563_v33 = vrot.slane %v8562_v15, 4  ;;  %v8537_v17 = vrot.slane %v8536_v31, 2  ;;  %v8544_v49 = vrot.slane %v8543_v26, 2 }
 0x757   : > { %v8551_v46 = vrot.slane %v8550_v25, 2  ;;  %v18298_v53 = vmax.f32 %v8503_v13, %v8504_v32  ;;  %v8557_v18 = vmax.f32 %v8555_v60, %v8556_v56  ;;  %v8532_v24 = vrot.slane %v8531_v37, 1 }
 0x758   : > { %v8525_v55 = vrot.slane %v8524_v35, 1  ;;  %v8564_v58 = vmax.f32 %v8562_v15, %v8563_v33  ;;  %v8538_v0 = vmax.f32 %v8536_v31, %v8537_v17  ;;  %v8545_v5 = vmax.f32 %v8543_v26, %v8544_v49  ;;  %v20964_v31 = vld [vmem:[#allocation119_spill] sm:$0xff] }
 0x759   : > { %v8552_v52 = vmax.f32 %v8550_v25, %v8551_v46  ;;  %v18300_v9 = vmax.f32 %v8510_v20, %v8511_v2  ;;  %v8558_v50 = vrot.slane %v8557_v18, 2  ;;  %v8569_v40 = vsel %vm8456_vm11, %v17454_v21, -inf }
 0x75a   : > { %v8565_v62 = vrot.slane %v8564_v58, 2  ;;  %v18304_v63 = vmax.f32 %v8517_v59, %v8518_v42  ;;  %v8539_v8 = vrot.slane %v8538_v0, 1  ;;  %v8546_v6 = vrot.slane %v8545_v5, 1 }
 0x75b   : > { %v8553_v13 = vrot.slane %v8552_v52, 1  ;;  %v8559_v32 = vmax.f32 %v8557_v18, %v8558_v50  ;;  %v8570_v27 = vrot.slane %v8569_v40, 4  ;;  %v20960_v17 = vcombine.high %v17454_v21, %v17454_v21 }
 0x75c   : > { %v8566_v47 = vmax.f32 %v8564_v58, %v8565_v62  ;;  %v18310_v20 = vmax.f32 %v8524_v35, %v8525_v55  ;;  %v18312_v26 = vmax.f32 %v8531_v37, %v8532_v24  ;;  %v18314_v2 = vmax.f32 %v8538_v0, %v8539_v8 }
 0x75d   : > { %v8576_v25 = vsel %vm8456_vm11, %v20960_v17, -inf  ;;  %v18316_v42 = vmax.f32 %v8545_v5, %v8546_v6  ;;  %v18318_v59 = vmax.f32 %v8552_v52, %v8553_v13  ;;  %v8571_v60 = vmax.f32 %v8569_v40, %v8570_v27 }
 0x75e   : > { %v8577_v11 = vrot.slane %v8576_v25, 4  ;;  %v8583_v58 = vsel %vm8456_vm11, %v17469_v30, -inf  ;;  %v20963_v21 = vcombine.high %v17469_v30, %v17469_v30  ;;  %v8597_v0 = vsel %vm8456_vm11, %v20964_v31, -inf }
 0x75f   : > { %20961 = vst [vmem:[#allocation103_spill] sm:$0xff] %v18316_v42  ;;  %20962 = vst [vmem:[#allocation118_spill] sm:$0xff] %v18318_v59  ;;  %v8584_v15 = vrot.slane %v8583_v58, 4  ;;  %v8560_v35 = vrot.slane %v8559_v32, 1  ;;  %v8567_v56 = vrot.slane %v8566_v47, 1  ;;  %v8572_v33 = vrot.slane %v8571_v60, 2 }
 0x760   : > { %v8578_v18 = vmax.f32 %v8576_v25, %v8577_v11  ;;  %v8590_v55 = vsel %vm8456_vm11, %v20963_v21, -inf  ;;  %v8598_v46 = vrot.slane %v8597_v0, 4  ;;  %v20965_v24 = vcombine.high %v20964_v31, %v20964_v31 }
 0x761   : > { %v8591_v37 = vrot.slane %v8590_v55, 4  ;;  %v8585_v49 = vmax.f32 %v8583_v58, %v8584_v15  ;;  %v8573_v50 = vmax.f32 %v8571_v60, %v8572_v33  ;;  %v8611_v40 = vsel %vm8456_vm11, %v17480_v4, -inf }
 0x762   : > { %v8579_v52 = vrot.slane %v8578_v18, 2  ;;  %v8604_v5 = vsel %vm8456_vm11, %v20965_v24, -inf  ;;  %v8599_v13 = vmax.f32 %v8597_v0, %v8598_v46  ;;  %v8612_v27 = vrot.slane %v8611_v40, 4 }
 0x763   : > { %v8592_v62 = vmax.f32 %v8590_v55, %v8591_v37  ;;  %v8605_v30 = vrot.slane %v8604_v5, 4  ;;  %v8586_v6 = vrot.slane %v8585_v49, 2  ;;  %v18334_v17 = vmax.f32 %v8559_v32, %v8560_v35 }
 0x764   : > { %v8580_v8 = vmax.f32 %v8578_v18, %v8579_v52  ;;  %v20967_v58 = vcombine.high %v17480_v4, %v17480_v4  ;;  %v8574_v21 = vrot.slane %v8573_v50, 1  ;;  %v8600_v55 = vrot.slane %v8599_v13, 2 }
 0x765   : > { %20966 = vst [vmem:[#allocation119_spill] sm:$0xff] %v18334_v17  ;;  %v8593_v25 = vrot.slane %v8592_v62, 2  ;;  %v8606_v11 = vmax.f32 %v8604_v5, %v8605_v30  ;;  %v8587_v60 = vmax.f32 %v8585_v49, %v8586_v6  ;;  %v8613_v31 = vmax.f32 %v8611_v40, %v8612_v27  ;;  %v20969_v17 = vld [vmem:[#allocation120_spill] sm:$0xff] }
 0x766   : > { %v8618_v15 = vsel %vm8456_vm11, %v20967_v58, -inf  ;;  %v8581_v33 = vrot.slane %v8580_v8, 1  ;;  %v18340_v52 = vmax.f32 %v8566_v47, %v8567_v56  ;;  %v8601_v32 = vmax.f32 %v8599_v13, %v8600_v55 }
 0x767   : > { %v8594_v37 = vmax.f32 %v8592_v62, %v8593_v25  ;;  %v8607_v24 = vrot.slane %v8606_v11, 2  ;;  %v8619_v18 = vrot.slane %v8618_v15, 4  ;;  %v8588_v0 = vrot.slane %v8587_v60, 1 }
 0x768   : > { %20968 = vst [vmem:[#allocation203_spill] sm:$0xff] %v18340_v52  ;;  %v8614_v35 = vrot.slane %v8613_v31, 2  ;;  %v8625_v4 = vsel %vm8456_vm11, %v20969_v17, -inf  ;;  %v18344_v58 = vmax.f32 %v8573_v50, %v8574_v21  ;;  %v8602_v49 = vrot.slane %v8601_v32, 1 }
 0x769   : > { %v8595_v46 = vrot.slane %v8594_v37, 1  ;;  %v8608_v5 = vmax.f32 %v8606_v11, %v8607_v24  ;;  %v8620_v30 = vmax.f32 %v8618_v15, %v8619_v18  ;;  %v8626_v40 = vrot.slane %v8625_v4, 4 }
 0x76a   : > { %v8615_v6 = vmax.f32 %v8613_v31, %v8614_v35  ;;  %v18346_v27 = vmax.f32 %v8580_v8, %v8581_v33  ;;  %v20970_v47 = vcombine.high %v20969_v17, %v20969_v17  ;;  %v18352_v13 = vmax.f32 %v8587_v60, %v8588_v0  ;;  %v20975_v35 = vld [vmem:[#allocation121_spill] sm:$0xff] }
 0x76b   : > { %v8609_v62 = vrot.slane %v8608_v5, 1  ;;  %v8621_v25 = vrot.slane %v8620_v30, 2  ;;  %v18354_v11 = vmax.f32 %v8594_v37, %v8595_v46  ;;  %v8627_v15 = vmax.f32 %v8625_v4, %v8626_v40 }
 0x76c   : > { %v8632_v56 = vsel %vm8456_vm11, %v20970_v47, -inf  ;;  %v18356_v50 = vmax.f32 %v8601_v32, %v8602_v49  ;;  %v8616_v21 = vrot.slane %v8615_v6, 1  ;;  %v8639_v8 = vsel %vm8456_vm11, %v17493_v23, -inf }
 0x76d   : > { %20971 = vst [vmem:[#allocation120_spill] sm:$0xff] %v18354_v11  ;;  %v8633_v55 = vrot.slane %v8632_v56, 4  ;;  %v20973_v31 = vcombine.high %v17493_v23, %v17493_v23  ;;  %v8622_v17 = vmax.f32 %v8620_v30, %v8621_v25  ;;  %v8628_v24 = vrot.slane %v8627_v15, 2 }
 0x76e   : > { %20972 = vst [vmem:[#allocation204_spill] sm:$0xff] %v18356_v50  ;;  %v8640_v60 = vrot.slane %v8639_v8, 4  ;;  %v18364_v0 = vmax.f32 %v8608_v5, %v8609_v62  ;;  %v8653_v32 = vsel %vm8456_vm11, %v20975_v35, -inf  ;;  %v20976_v46 = vcombine.high %v20975_v35, %v20975_v35 }
 0x76f   : > { %v8646_v33 = vsel %vm8456_vm11, %v20973_v31, -inf  ;;  %v8634_v18 = vmax.f32 %v8632_v56, %v8633_v55  ;;  %v8629_v49 = vmax.f32 %v8627_v15, %v8628_v24  ;;  %v8654_v47 = vrot.slane %v8653_v32, 4 }
 0x770   : > { %20974 = vst [vmem:[#allocation205_spill] sm:$0xff] %v18364_v0  ;;  %v8647_v37 = vrot.slane %v8646_v33, 4  ;;  %v8660_v4 = vsel %vm8456_vm11, %v20976_v46, -inf  ;;  %v8641_v23 = vmax.f32 %v8639_v8, %v8640_v60  ;;  %v18372_v31 = vmax.f32 %v8615_v6, %v8616_v21 }
 0x771   : > { %v8635_v40 = vrot.slane %v8634_v18, 2  ;;  %v8661_v25 = vrot.slane %v8660_v4, 4  ;;  %v8667_v5 = vsel %vm8456_vm11, %v17502_v43, -inf  ;;  %v8623_v62 = vrot.slane %v8622_v17, 1 }
 0x772   : > { %20977 = vst [vmem:[#allocation121_spill] sm:$0xff] %v18372_v31  ;;  %v8648_v30 = vmax.f32 %v8646_v33, %v8647_v37  ;;  %v8642_v55 = vrot.slane %v8641_v23, 2  ;;  %v8655_v52 = vmax.f32 %v8653_v32, %v8654_v47  ;;  %v8668_v35 = vrot.slane %v8667_v5, 4 }
 0x773   : > { %v8636_v56 = vmax.f32 %v8634_v18, %v8635_v40  ;;  %v8662_v50 = vmax.f32 %v8660_v4, %v8661_v25  ;;  %v20978_v15 = vcombine.high %v17502_v43, %v17502_v43  ;;  %v8630_v24 = vrot.slane %v8629_v49, 1  ;;  %v20980_v40 = vld [vmem:[#allocation122_spill] sm:$0xff] }
 0x774   : > { %v8649_v0 = vrot.slane %v8648_v30, 2  ;;  %v8643_v21 = vmax.f32 %v8641_v23, %v8642_v55  ;;  %v8656_v33 = vrot.slane %v8655_v52, 2  ;;  %v8669_v46 = vmax.f32 %v8667_v5, %v8668_v35 }
 0x775   : > { %v8674_v8 = vsel %vm8456_vm11, %v20978_v15, -inf  ;;  %v8637_v6 = vrot.slane %v8636_v56, 1  ;;  %v8663_v37 = vrot.slane %v8662_v50, 2  ;;  %v18380_v59 = vmax.f32 %v8622_v17, %v8623_v62 }
 0x776   : > { %v8650_v60 = vmax.f32 %v8648_v30, %v8649_v0  ;;  %v8675_v31 = vrot.slane %v8674_v8, 4  ;;  %v8644_v18 = vrot.slane %v8643_v21, 1  ;;  %v8657_v32 = vmax.f32 %v8655_v52, %v8656_v33  ;;  %v20982_v33 = vld [vmem:[#allocation123_spill] sm:$0xff] }
 0x777   : > { %20979 = vst [vmem:[#allocation206_spill] sm:$0xff] %v18380_v59  ;;  %v8681_v4 = vsel %vm8456_vm11, %v20980_v40, -inf  ;;  %v8664_v25 = vmax.f32 %v8662_v50, %v8663_v37  ;;  %v8670_v43 = vrot.slane %v8669_v46, 2  ;;  %v18384_v15 = vmax.f32 %v8629_v49, %v8630_v24 }
 0x778   : > { %v8651_v47 = vrot.slane %v8650_v60, 1  ;;  %v8676_v11 = vmax.f32 %v8674_v8, %v8675_v31  ;;  %v8658_v42 = vrot.slane %v8657_v32, 1  ;;  %v8682_v23 = vrot.slane %v8681_v4, 4 }
 0x779   : > { %v20981_v0 = vcombine.high %v20980_v40, %v20980_v40  ;;  %v18390_v17 = vmax.f32 %v8636_v56, %v8637_v6  ;;  %v8665_v5 = vrot.slane %v8664_v25, 1  ;;  %v8671_v52 = vmax.f32 %v8669_v46, %v8670_v43 }
 0x77a   : > { %v8677_v62 = vrot.slane %v8676_v11, 2  ;;  %v18392_v55 = vmax.f32 %v8643_v21, %v8644_v18  ;;  %v8683_v35 = vmax.f32 %v8681_v4, %v8682_v23  ;;  %v8695_v49 = vsel %vm8456_vm11, %v20982_v33, -inf  ;;  %v20986_v21 = vld [vmem:[#allocation124_spill] sm:$0xff] }
 0x77b   : > { %v8688_v30 = vsel %vm8456_vm11, %v20981_v0, -inf  ;;  %v18396_v31 = vmax.f32 %v8650_v60, %v8651_v47  ;;  %v18398_v8 = vmax.f32 %v8657_v32, %v8658_v42  ;;  %v8696_v37 = vrot.slane %v8695_v49, 4 }
 0x77c   : > { %v8689_v50 = vrot.slane %v8688_v30, 4  ;;  %v8678_v24 = vmax.f32 %v8676_v11, %v8677_v62  ;;  %v8684_v40 = vrot.slane %v8683_v35, 2  ;;  %v20985_v56 = vcombine.high %v20982_v33, %v20982_v33 }
 0x77d   : > { %20983 = vst [vmem:[#allocation122_spill] sm:$0xff] %v18396_v31  ;;  %20984 = vst [vmem:[#allocation123_spill] sm:$0xff] %v18398_v8  ;;  %v8709_v46 = vsel %vm8456_vm11, %v20986_v21, -inf  ;;  %v18406_v18 = vmax.f32 %v8664_v25, %v8665_v5  ;;  %v8672_v4 = vrot.slane %v8671_v52, 1  ;;  %v8697_v43 = vmax.f32 %v8695_v49, %v8696_v37 }
 0x77e   : > { %v8690_v0 = vmax.f32 %v8688_v30, %v8689_v50  ;;  %v8702_v6 = vsel %vm8456_vm11, %v20985_v56, -inf  ;;  %v8685_v47 = vmax.f32 %v8683_v35, %v8684_v40  ;;  %v8710_v32 = vrot.slane %v8709_v46, 4 }
 0x77f   : > { %20987 = vst [vmem:[#allocation124_spill] sm:$0xff] %v18406_v18  ;;  %v8703_v60 = vrot.slane %v8702_v6, 4  ;;  %v20988_v11 = vcombine.high %v20986_v21, %v20986_v21  ;;  %v8679_v30 = vrot.slane %v8678_v24, 1  ;;  %v8698_v62 = vrot.slane %v8697_v43, 2 }
 0x780   : > { %v8691_v42 = vrot.slane %v8690_v0, 2  ;;  %v8686_v56 = vrot.slane %v8685_v47, 1  ;;  %v8711_v8 = vmax.f32 %v8709_v46, %v8710_v32  ;;  %v8723_v25 = vsel %vm8456_vm11, %v17534_v54, -inf }
 0x781   : > { %v8716_v23 = vsel %vm8456_vm11, %v20988_v11, -inf  ;;  %v8704_v50 = vmax.f32 %v8702_v6, %v8703_v60  ;;  %v8699_v5 = vmax.f32 %v8697_v43, %v8698_v62  ;;  %v8724_v37 = vrot.slane %v8723_v25, 4 }
 0x782   : > { %v8717_v33 = vrot.slane %v8716_v23, 4  ;;  %v8692_v59 = vmax.f32 %v8690_v0, %v8691_v42  ;;  %v18414_v40 = vmax.f32 %v8671_v52, %v8672_v4  ;;  %v8712_v21 = vrot.slane %v8711_v8, 2 }
 0x783   : > { %v8705_v49 = vrot.slane %v8704_v50, 2  ;;  %v20990_v11 = vcombine.high %v17534_v54, %v17534_v54  ;;  %v8700_v60 = vrot.slane %v8699_v5, 1  ;;  %v8725_v46 = vmax.f32 %v8723_v25, %v8724_v37 }
 0x784   : > { %v8718_v35 = vmax.f32 %v8716_v23, %v8717_v33  ;;  %20989 = vst [vmem:[#allocation207_spill] sm:$0xff] %v18414_v40  ;;  %v8693_v18 = vrot.slane %v8692_v59, 1  ;;  %v18420_v42 = vmax.f32 %v8678_v24, %v8679_v30  ;;  %v8713_v32 = vmax.f32 %v8711_v8, %v8712_v21 }
 0x785   : > { %v8730_v6 = vsel %vm8456_vm11, %v20990_v11, -inf  ;;  %v8706_v31 = vmax.f32 %v8704_v50, %v8705_v49  ;;  %v8737_v23 = vsel %vm8456_vm11, %v17527_v48, -inf  ;;  %v18424_v52 = vmax.f32 %v8685_v47, %v8686_v56 }
 0x786   : > { %v8719_v0 = vrot.slane %v8718_v35, 2  ;;  %20991 = vst [vmem:[#allocation208_spill] sm:$0xff] %v18420_v42  ;;  %v8731_v43 = vrot.slane %v8730_v6, 4  ;;  %v8726_v33 = vrot.slane %v8725_v46, 2  ;;  %v18426_v40 = vmax.f32 %v8692_v59, %v8693_v18 }
 0x787   : > { %v8707_v4 = vrot.slane %v8706_v31, 1  ;;  %v8738_v11 = vrot.slane %v8737_v23, 4  ;;  %v20993_v50 = vcombine.high %v17527_v48, %v17527_v48  ;;  %v18432_v30 = vmax.f32 %v8699_v5, %v8700_v60 }
 0x788   : > { %v8720_v62 = vmax.f32 %v8718_v35, %v8719_v0  ;;  %20992 = vst [vmem:[#allocation209_spill] sm:$0xff] %v18426_v40  ;;  %v8732_v54 = vmax.f32 %v8730_v6, %v8731_v43  ;;  %v8714_v8 = vrot.slane %v8713_v32, 1  ;;  %v8727_v25 = vmax.f32 %v8725_v46, %v8726_v33  ;;  %v20997_v46 = vld [vmem:[#allocation125_spill] sm:$0xff] }
 0x789   : > { %v8744_v24 = vsel %vm8456_vm11, %v20993_v50, -inf  ;;  %20994 = vst [vmem:[#allocation210_spill] sm:$0xff] %v18432_v30  ;;  %v18434_v37 = vmax.f32 %v8706_v31, %v8707_v4  ;;  %v8739_v56 = vmax.f32 %v8737_v23, %v8738_v11  ;;  %v8751_v59 = vsel %vm8456_vm11, %v17541_v7, -inf }
 0x78a   : > { %v8745_v49 = vrot.slane %v8744_v24, 4  ;;  %v8733_v47 = vrot.slane %v8732_v54, 2  ;;  %v8721_v18 = vrot.slane %v8720_v62, 1  ;;  %v8728_v35 = vrot.slane %v8727_v25, 1 }
 0x78b   : > { %20995 = vst [vmem:[#allocation211_spill] sm:$0xff] %v18434_v37  ;;  %v8752_v6 = vrot.slane %v8751_v59, 4  ;;  %v8740_v48 = vrot.slane %v8739_v56, 2  ;;  %v20996_v5 = vcombine.high %v17541_v7, %v17541_v7  ;;  %v8765_v31 = vsel %vm8456_vm11, %v20997_v46, -inf }
 0x78c   : > { %v8746_v21 = vmax.f32 %v8744_v24, %v8745_v49  ;;  %v8734_v0 = vmax.f32 %v8732_v54, %v8733_v47  ;;  %v18444_v43 = vmax.f32 %v8713_v32, %v8714_v8  ;;  %v8766_v42 = vrot.slane %v8765_v31, 4 }
 0x78d   : > { %v8758_v60 = vsel %vm8456_vm11, %v20996_v5, -inf  ;;  %v8753_v4 = vmax.f32 %v8751_v59, %v8752_v6  ;;  %v8741_v50 = vmax.f32 %v8739_v56, %v8740_v48  ;;  %v20999_v54 = vcombine.high %v20997_v46, %v20997_v46 }
 0x78e   : > { %20998 = vst [vmem:[#allocation125_spill] sm:$0xff] %v18444_v43  ;;  %v8747_v23 = vrot.slane %v8746_v21, 2  ;;  %v8759_v33 = vrot.slane %v8758_v60, 4  ;;  %v8735_v11 = vrot.slane %v8734_v0, 1  ;;  %v18450_v37 = vmax.f32 %v8720_v62, %v8721_v18 }
 0x78f   : > { %v8772_v24 = vsel %vm8456_vm11, %v20999_v54, -inf  ;;  %v8754_v7 = vrot.slane %v8753_v4, 2  ;;  %v18452_v30 = vmax.f32 %v8727_v25, %v8728_v35  ;;  %v8767_v32 = vmax.f32 %v8765_v31, %v8766_v42 }
 0x790   : > { %v8748_v49 = vmax.f32 %v8746_v21, %v8747_v23  ;;  %v8760_v47 = vmax.f32 %v8758_v60, %v8759_v33  ;;  %v8773_v5 = vrot.slane %v8772_v24, 4  ;;  %v8779_v8 = vsel %vm8456_vm11, %v17552_v57, -inf  ;;  %v21003_v33 = vld [vmem:[#allocation126_spill] sm:$0xff] }
 0x791   : > { %21000 = vst [vmem:[#allocation212_spill] sm:$0xff] %v18452_v30  ;;  %v8742_v59 = vrot.slane %v8741_v50, 1  ;;  %v8755_v56 = vmax.f32 %v8753_v4, %v8754_v7  ;;  %v8768_v46 = vrot.slane %v8767_v32, 2  ;;  %v8780_v40 = vrot.slane %v8779_v8, 4 }
 0x792   : > { %v8761_v6 = vrot.slane %v8760_v47, 2  ;;  %v8774_v48 = vmax.f32 %v8772_v24, %v8773_v5  ;;  %v8749_v43 = vrot.slane %v8748_v49, 1  ;;  %v21001_v21 = vcombine.high %v17552_v57, %v17552_v57 }
 0x793   : > { %v18460_v62 = vmax.f32 %v8734_v0, %v8735_v11  ;;  %v8756_v25 = vrot.slane %v8755_v56, 1  ;;  %v8769_v35 = vmax.f32 %v8767_v32, %v8768_v46  ;;  %v8781_v31 = vmax.f32 %v8779_v8, %v8780_v40  ;;  %v21006_v46 = vld [vmem:[#allocation127_spill] sm:$0xff] }
 0x794   : > { %v8786_v60 = vsel %vm8456_vm11, %v21001_v21, -inf  ;;  %v8762_v18 = vmax.f32 %v8760_v47, %v8761_v6  ;;  %v8775_v42 = vrot.slane %v8774_v48, 2  ;;  %v8793_v4 = vsel %vm8456_vm11, %v21003_v33, -inf }
 0x795   : > { %21002 = vst [vmem:[#allocation213_spill] sm:$0xff] %v18460_v62  ;;  %v8787_v23 = vrot.slane %v8786_v60, 4  ;;  %v18464_v54 = vmax.f32 %v8741_v50, %v8742_v59  ;;  %v8794_v5 = vrot.slane %v8793_v4, 4  ;;  %v18466_v30 = vmax.f32 %v8748_v49, %v8749_v43 }
 0x796   : > { %v8763_v24 = vrot.slane %v8762_v18, 1  ;;  %v8776_v7 = vmax.f32 %v8774_v48, %v8775_v42  ;;  %v8782_v57 = vrot.slane %v8781_v31, 2  ;;  %v21004_v0 = vcombine.high %v21003_v33, %v21003_v33 }
 0x797   : > { %v8788_v21 = vmax.f32 %v8786_v60, %v8787_v23  ;;  %v18472_v47 = vmax.f32 %v8755_v56, %v8756_v25  ;;  %v8770_v40 = vrot.slane %v8769_v35, 1  ;;  %v8795_v32 = vmax.f32 %v8793_v4, %v8794_v5  ;;  %v21009_v4 = vld [vmem:[#allocation128_spill] sm:$0xff] }
 0x798   : > { %v8800_v11 = vsel %vm8456_vm11, %v21004_v0, -inf  ;;  %v8777_v6 = vrot.slane %v8776_v7, 1  ;;  %v8783_v50 = vmax.f32 %v8781_v31, %v8782_v57  ;;  %v8807_v48 = vsel %vm8456_vm11, %v21006_v46, -inf }
 0x799   : > { %21005 = vst [vmem:[#allocation126_spill] sm:$0xff] %v18472_v47  ;;  %v8801_v8 = vrot.slane %v8800_v11, 4  ;;  %v8789_v59 = vrot.slane %v8788_v21, 2  ;;  %v18476_v43 = vmax.f32 %v8762_v18, %v8763_v24  ;;  %v8796_v49 = vrot.slane %v8795_v32, 2 }
 0x79a   : > { %v8808_v42 = vrot.slane %v8807_v48, 4  ;;  %v8784_v23 = vrot.slane %v8783_v50, 1  ;;  %v21008_v56 = vcombine.high %v21006_v46, %v21006_v46  ;;  %v8821_v5 = vsel %vm8456_vm11, %v21009_v4, -inf }
 0x79b   : > { %21007 = vst [vmem:[#allocation127_spill] sm:$0xff] %v18476_v43  ;;  %v8802_v60 = vmax.f32 %v8800_v11, %v8801_v8  ;;  %v8790_v33 = vmax.f32 %v8788_v21, %v8789_v59  ;;  %v8797_v31 = vmax.f32 %v8795_v32, %v8796_v49  ;;  %v18484_v47 = vmax.f32 %v8769_v35, %v8770_v40 }
 0x79c   : > { %v8814_v25 = vsel %vm8456_vm11, %v21008_v56, -inf  ;;  %v8809_v0 = vmax.f32 %v8807_v48, %v8808_v42  ;;  %v18486_v18 = vmax.f32 %v8776_v7, %v8777_v6  ;;  %v8822_v24 = vrot.slane %v8821_v5, 4 }
 0x79d   : > { %v8803_v57 = vrot.slane %v8802_v60, 2  ;;  %v8815_v62 = vrot.slane %v8814_v25, 4  ;;  %21010 = vst [vmem:[#allocation128_spill] sm:$0xff] %v18484_v47  ;;  %v21012_v21 = vcombine.high %v21009_v4, %v21009_v4  ;;  %v8791_v8 = vrot.slane %v8790_v33, 1 }
 0x79e   : > { %21011 = vst [vmem:[#allocation214_spill] sm:$0xff] %v18486_v18  ;;  %v8810_v46 = vrot.slane %v8809_v0, 2  ;;  %v18492_v43 = vmax.f32 %v8783_v50, %v8784_v23  ;;  %v8823_v32 = vmax.f32 %v8821_v5, %v8822_v24  ;;  %v8835_v35 = vsel %vm8456_vm11, %v17576_v14, -inf }
 0x79f   : > { %v8828_v11 = vsel %vm8456_vm11, %v21012_v21, -inf  ;;  %v8804_v59 = vmax.f32 %v8802_v60, %v8803_v57  ;;  %v8816_v56 = vmax.f32 %v8814_v25, %v8815_v62  ;;  %v8798_v40 = vrot.slane %v8797_v31, 1 }
 0x7a0   : > { %21013 = vst [vmem:[#allocation215_spill] sm:$0xff] %v18492_v43  ;;  %v8829_v49 = vrot.slane %v8828_v11, 4  ;;  %v8811_v6 = vmax.f32 %v8809_v0, %v8810_v46  ;;  %v8824_v42 = vrot.slane %v8823_v32, 2  ;;  %v8836_v4 = vrot.slane %v8835_v35, 4 }
 0x7a1   : > { %v8805_v7 = vrot.slane %v8804_v59, 1  ;;  %v8817_v48 = vrot.slane %v8816_v56, 2  ;;  %v21014_v21 = vcombine.high %v17576_v14, %v17576_v14  ;;  %v18500_v62 = vmax.f32 %v8790_v33, %v8791_v8 }
 0x7a2   : > { %v8830_v18 = vmax.f32 %v8828_v11, %v8829_v49  ;;  %v8812_v50 = vrot.slane %v8811_v6, 1  ;;  %v8825_v5 = vmax.f32 %v8823_v32, %v8824_v42  ;;  %v8837_v24 = vmax.f32 %v8835_v35, %v8836_v4 }
 0x7a3   : > { %v8842_v60 = vsel %vm8456_vm11, %v21014_v21, -inf  ;;  %21015 = vst [vmem:[#allocation216_spill] sm:$0xff] %v18500_v62  ;;  %v8818_v23 = vmax.f32 %v8816_v56, %v8817_v48  ;;  %v8849_v0 = vsel %vm8456_vm11, %v17586_v44, -inf  ;;  %v18504_v46 = vmax.f32 %v8797_v31, %v8798_v40 }
 0x7a4   : > { %v8843_v25 = vrot.slane %v8842_v60, 4  ;;  %v8831_v57 = vrot.slane %v8830_v18, 2  ;;  %v18506_v11 = vmax.f32 %v8804_v59, %v8805_v7  ;;  %v8850_v43 = vrot.slane %v8849_v0, 4 }
 0x7a5   : > { %v8819_v14 = vrot.slane %v8818_v23, 1  ;;  %v8838_v21 = vrot.slane %v8837_v24, 2  ;;  %v21016_v33 = vcombine.high %v17586_v44, %v17586_v44  ;;  %v18512_v56 = vmax.f32 %v8811_v6, %v8812_v50 }
 0x7a6   : > { %v8844_v49 = vmax.f32 %v8842_v60, %v8843_v25  ;;  %v8832_v47 = vmax.f32 %v8830_v18, %v8831_v57  ;;  %v8851_v35 = vmax.f32 %v8849_v0, %v8850_v43  ;;  %v8826_v42 = vrot.slane %v8825_v5, 1  ;;  %v21020_v43 = vld [vmem:[#allocation129_spill] sm:$0xff] }
 0x7a7   : > { %v8856_v8 = vsel %vm8456_vm11, %v21016_v33, -inf  ;;  %21017 = vst [vmem:[#allocation217_spill] sm:$0xff] %v18512_v56  ;;  %v8839_v40 = vmax.f32 %v8837_v24, %v8838_v21  ;;  %v8863_v59 = vsel %vm8456_vm11, %v17593_v12, -inf  ;;  %v18516_v25 = vmax.f32 %v8818_v23, %v8819_v14 }
 0x7a8   : > { %v8845_v32 = vrot.slane %v8844_v49, 2  ;;  %v8857_v48 = vrot.slane %v8856_v8, 4  ;;  %v8833_v31 = vrot.slane %v8832_v47, 1  ;;  %v8852_v4 = vrot.slane %v8851_v35, 2 }
 0x7a9   : > { %v8864_v60 = vrot.slane %v8863_v59, 4  ;;  %21018 = vst [vmem:[#allocation218_spill] sm:$0xff] %v18516_v25  ;;  %v8840_v44 = vrot.slane %v8839_v40, 1  ;;  %v21019_v6 = vcombine.high %v17593_v12, %v17593_v12  ;;  %v8877_v57 = vsel %vm8456_vm11, %v21020_v43, -inf }
 0x7aa   : > { %v8846_v7 = vmax.f32 %v8844_v49, %v8845_v32  ;;  %v8858_v18 = vmax.f32 %v8856_v8, %v8857_v48  ;;  %v8853_v24 = vmax.f32 %v8851_v35, %v8852_v4  ;;  %v18524_v62 = vmax.f32 %v8825_v5, %v8826_v42 }
 0x7ab   : > { %v8870_v50 = vsel %vm8456_vm11, %v21019_v6, -inf  ;;  %v8865_v33 = vmax.f32 %v8863_v59, %v8864_v60  ;;  %v8878_v8 = vrot.slane %v8877_v57, 4  ;;  %v21022_v23 = vcombine.high %v21020_v43, %v21020_v43 }
 0x7ac   : > { %v8847_v0 = vrot.slane %v8846_v7, 1  ;;  %v8859_v21 = vrot.slane %v8858_v18, 2  ;;  %21021 = vst [vmem:[#allocation129_spill] sm:$0xff] %v18524_v62  ;;  %v8871_v49 = vrot.slane %v8870_v50, 4  ;;  %v18530_v32 = vmax.f32 %v8832_v47, %v8833_v31 }
 0x7ad   : > { %v8884_v14 = vsel %vm8456_vm11, %v21022_v23, -inf  ;;  %v18532_v12 = vmax.f32 %v8839_v40, %v8840_v44  ;;  %v8866_v6 = vrot.slane %v8865_v33, 2  ;;  %v8879_v56 = vmax.f32 %v8877_v57, %v8878_v8 }
 0x7ae   : > { %21023 = vst [vmem:[#allocation219_spill] sm:$0xff] %v18530_v32  ;;  %v8860_v48 = vmax.f32 %v8858_v18, %v8859_v21  ;;  %v8872_v25 = vmax.f32 %v8870_v50, %v8871_v49  ;;  %v8885_v35 = vrot.slane %v8884_v14, 4  ;;  %v8891_v5 = vsel %vm8456_vm11, %v17604_v41, -inf }
 0x7af   : > { %21024 = vst [vmem:[#allocation220_spill] sm:$0xff] %v18532_v12  ;;  %v18536_v42 = vmax.f32 %v8846_v7, %v8847_v0  ;;  %v8854_v59 = vrot.slane %v8853_v24, 1  ;;  %v8867_v4 = vmax.f32 %v8865_v33, %v8866_v6  ;;  %v8892_v60 = vrot.slane %v8891_v5, 4  ;;  %v21027_v7 = vld [vmem:[#allocation130_spill] sm:$0xff] }
 0x7b0   : > { %v8873_v43 = vrot.slane %v8872_v25, 2  ;;  %v8880_v62 = vrot.slane %v8879_v56, 2  ;;  %v8886_v23 = vmax.f32 %v8884_v14, %v8885_v35  ;;  %v21026_v47 = vcombine.high %v17604_v41, %v17604_v41 }
 0x7b1   : > { %21025 = vst [vmem:[#allocation221_spill] sm:$0xff] %v18536_v42  ;;  %v8861_v40 = vrot.slane %v8860_v48, 1  ;;  %v8868_v18 = vrot.slane %v8867_v4, 1  ;;  %v8893_v44 = vmax.f32 %v8891_v5, %v8892_v60  ;;  %v8905_v0 = vsel %vm8456_vm11, %v21027_v7, -inf }
 0x7b2   : > { %v8898_v31 = vsel %vm8456_vm11, %v21026_v47, -inf  ;;  %v8874_v57 = vmax.f32 %v8872_v25, %v8873_v43  ;;  %v8881_v21 = vmax.f32 %v8879_v56, %v8880_v62  ;;  %v8887_v49 = vrot.slane %v8886_v23, 2 }
 0x7b3   : > { %v8899_v50 = vrot.slane %v8898_v31, 4  ;;  %v18544_v33 = vmax.f32 %v8853_v24, %v8854_v59  ;;  %v8894_v8 = vrot.slane %v8893_v44, 2  ;;  %v8906_v14 = vrot.slane %v8905_v0, 4  ;;  %v21031_v59 = vld [vmem:[#allocation131_spill] sm:$0xff] }
 0x7b4   : > { %v8875_v35 = vrot.slane %v8874_v57, 1  ;;  %v8882_v42 = vrot.slane %v8881_v21, 1  ;;  %v8888_v41 = vmax.f32 %v8886_v23, %v8887_v49  ;;  %v21029_v47 = vcombine.high %v21027_v7, %v21027_v7 }
 0x7b5   : > { %21028 = vst [vmem:[#allocation130_spill] sm:$0xff] %v18544_v33  ;;  %v8900_v6 = vmax.f32 %v8898_v31, %v8899_v50  ;;  %v8895_v60 = vmax.f32 %v8893_v44, %v8894_v8  ;;  %v8907_v62 = vmax.f32 %v8905_v0, %v8906_v14  ;;  %v18550_v43 = vmax.f32 %v8860_v48, %v8861_v40  ;;  %v21034_v48 = vld [vmem:[#allocation132_spill] sm:$0xff] }
 0x7b6   : > { %v8912_v5 = vsel %vm8456_vm11, %v21029_v47, -inf  ;;  %v18552_v12 = vmax.f32 %v8867_v4, %v8868_v18  ;;  %v8889_v24 = vrot.slane %v8888_v41, 1  ;;  %v8919_v31 = vsel %vm8456_vm11, %v21031_v59, -inf }
 0x7b7   : > { %v8901_v25 = vrot.slane %v8900_v6, 2  ;;  %v8913_v56 = vrot.slane %v8912_v5, 4  ;;  %v8896_v50 = vrot.slane %v8895_v60, 1  ;;  %v8908_v23 = vrot.slane %v8907_v62, 2 }
 0x7b8   : > { %21030 = vst [vmem:[#allocation222_spill] sm:$0xff] %v18552_v12  ;;  %v18556_v33 = vmax.f32 %v8874_v57, %v8875_v35  ;;  %v8920_v7 = vrot.slane %v8919_v31, 4  ;;  %v21033_v44 = vcombine.high %v21031_v59, %v21031_v59  ;;  %v8933_v4 = vsel %vm8456_vm11, %v21034_v48, -inf }
 0x7b9   : > { %v8902_v32 = vmax.f32 %v8900_v6, %v8901_v25  ;;  %v8914_v49 = vmax.f32 %v8912_v5, %v8913_v56  ;;  %v18564_v40 = vmax.f32 %v8881_v21, %v8882_v42  ;;  %v8909_v8 = vmax.f32 %v8907_v62, %v8908_v23 }
 0x7ba   : > { %21032 = vst [vmem:[#allocation131_spill] sm:$0xff] %v18556_v33  ;;  %v8926_v0 = vsel %vm8456_vm11, %v21033_v44, -inf  ;;  %v8921_v47 = vmax.f32 %v8919_v31, %v8920_v7  ;;  %v8934_v25 = vrot.slane %v8933_v4, 4  ;;  %v21036_v57 = vcombine.high %v21034_v48, %v21034_v48 }
 0x7bb   : > { %21035 = vst [vmem:[#allocation132_spill] sm:$0xff] %v18564_v40  ;;  %v8903_v18 = vrot.slane %v8902_v32, 1  ;;  %v8915_v14 = vrot.slane %v8914_v49, 2  ;;  %v8927_v6 = vrot.slane %v8926_v0, 4  ;;  %v18570_v5 = vmax.f32 %v8888_v41, %v8889_v24 }
 0x7bc   : > { %v8940_v35 = vsel %vm8456_vm11, %v21036_v57, -inf  ;;  %v18572_v56 = vmax.f32 %v8895_v60, %v8896_v50  ;;  %v8922_v33 = vrot.slane %v8921_v47, 2  ;;  %v8935_v21 = vmax.f32 %v8933_v4, %v8934_v25 }
 0x7bd   : > { %21037 = vst [vmem:[#allocation223_spill] sm:$0xff] %v18570_v5  ;;  %v8916_v59 = vmax.f32 %v8914_v49, %v8915_v14  ;;  %v8941_v44 = vrot.slane %v8940_v35, 4  ;;  %v8928_v42 = vmax.f32 %v8926_v0, %v8927_v6  ;;  %v8947_v62 = vsel %vm8456_vm11, %v17628_v10, -inf }
 0x7be   : > { %21038 = vst [vmem:[#allocation224_spill] sm:$0xff] %v18572_v56  ;;  %v18576_v31 = vmax.f32 %v8902_v32, %v8903_v18  ;;  %v8910_v23 = vrot.slane %v8909_v8, 1  ;;  %v8948_v40 = vrot.slane %v8947_v62, 4  ;;  %v8923_v48 = vmax.f32 %v8921_v47, %v8922_v33 }
 0x7bf   : > { %v8942_v7 = vmax.f32 %v8940_v35, %v8941_v44  ;;  %v8929_v12 = vrot.slane %v8928_v42, 2  ;;  %v8936_v57 = vrot.slane %v8935_v21, 2  ;;  %v21040_v41 = vcombine.high %v17628_v10, %v17628_v10 }
 0x7c0   : > { %21039 = vst [vmem:[#allocation225_spill] sm:$0xff] %v18576_v31  ;;  %v8917_v24 = vrot.slane %v8916_v59, 1  ;;  %v8949_v49 = vmax.f32 %v8947_v62, %v8948_v40  ;;  %v8924_v4 = vrot.slane %v8923_v48, 1  ;;  %v8961_v32 = vsel %vm8456_vm11, %v17638_v38, -inf }
 0x7c1   : > { %v8954_v60 = vsel %vm8456_vm11, %v21040_v41, -inf  ;;  %v8943_v50 = vrot.slane %v8942_v7, 2  ;;  %v8930_v14 = vmax.f32 %v8928_v42, %v8929_v12  ;;  %v8937_v6 = vmax.f32 %v8935_v21, %v8936_v57 }
 0x7c2   : > { %v8955_v0 = vrot.slane %v8954_v60, 4  ;;  %v8950_v25 = vrot.slane %v8949_v49, 2  ;;  %v8962_v47 = vrot.slane %v8961_v32, 4  ;;  %v18584_v35 = vmax.f32 %v8909_v8, %v8910_v23 }
 0x7c3   : > { %v8944_v18 = vmax.f32 %v8942_v7, %v8943_v50  ;;  %v8931_v44 = vrot.slane %v8930_v14, 1  ;;  %v8938_v10 = vrot.slane %v8937_v6, 1  ;;  %v21041_v41 = vcombine.high %v17638_v38, %v17638_v38 }
 0x7c4   : > { %v8956_v33 = vmax.f32 %v8954_v60, %v8955_v0  ;;  %v8951_v31 = vmax.f32 %v8949_v49, %v8950_v25  ;;  %v8963_v42 = vmax.f32 %v8961_v32, %v8962_v47  ;;  %v18590_v21 = vmax.f32 %v8916_v59, %v8917_v24  ;;  %v21045_v59 = vld [vmem:[#allocation133_spill] sm:$0xff] }
 0x7c5   : > { %v8968_v40 = vsel %vm8456_vm11, %v21041_v41, -inf  ;;  %v8945_v62 = vrot.slane %v8944_v18, 1  ;;  %v18592_v57 = vmax.f32 %v8923_v48, %v8924_v4  ;;  %v8975_v8 = vsel %vm8456_vm11, %v17645_v61, -inf }
 0x7c6   : > { %v8957_v12 = vrot.slane %v8956_v33, 2  ;;  %v8969_v7 = vrot.slane %v8968_v40, 4  ;;  %v18596_v23 = vmax.f32 %v8930_v14, %v8931_v44  ;;  %v8952_v60 = vrot.slane %v8951_v31, 1 }
 0x7c7   : > { %21042 = vst [vmem:[#allocation226_spill] sm:$0xff] %v18592_v57  ;;  %v8964_v0 = vrot.slane %v8963_v42, 2  ;;  %v8976_v56 = vrot.slane %v8975_v8, 4  ;;  %v21044_v49 = vcombine.high %v17645_v61, %v17645_v61  ;;  %v8989_v48 = vsel %vm8456_vm11, %v21045_v59, -inf }
 0x7c8   : > { %21043 = vst [vmem:[#allocation227_spill] sm:$0xff] %v18596_v23  ;;  %v8958_v50 = vmax.f32 %v8956_v33, %v8957_v12  ;;  %v8970_v38 = vmax.f32 %v8968_v40, %v8969_v7  ;;  %v18604_v24 = vmax.f32 %v8937_v6, %v8938_v10  ;;  %v18606_v4 = vmax.f32 %v8944_v18, %v8945_v62 }
 0x7c9   : > { %v8982_v32 = vsel %vm8456_vm11, %v21044_v49, -inf  ;;  %v8965_v25 = vmax.f32 %v8963_v42, %v8964_v0  ;;  %v8977_v44 = vmax.f32 %v8975_v8, %v8976_v56  ;;  %v8990_v33 = vrot.slane %v8989_v48, 4 }
 0x7ca   : > { %21046 = vst [vmem:[#allocation133_spill] sm:$0xff] %v18604_v24  ;;  %21047 = vst [vmem:[#allocation228_spill] sm:$0xff] %v18606_v4  ;;  %v8983_v14 = vrot.slane %v8982_v32, 4  ;;  %v8971_v47 = vrot.slane %v8970_v38, 2  ;;  %v21048_v41 = vcombine.high %v21045_v59, %v21045_v59  ;;  %v18612_v61 = vmax.f32 %v8951_v31, %v8952_v60 }
 0x7cb   : > { %v8959_v12 = vrot.slane %v8958_v50, 1  ;;  %v8978_v6 = vrot.slane %v8977_v44, 2  ;;  %v8991_v10 = vmax.f32 %v8989_v48, %v8990_v33  ;;  %v9003_v18 = vsel %vm8456_vm11, %v17656_v36, -inf }
 0x7cc   : > { %v8996_v40 = vsel %vm8456_vm11, %v21048_v41, -inf  ;;  %21049 = vst [vmem:[#allocation229_spill] sm:$0xff] %v18612_v61  ;;  %v8984_v7 = vmax.f32 %v8982_v32, %v8983_v14  ;;  %v8972_v5 = vmax.f32 %v8970_v38, %v8971_v47  ;;  %v8966_v62 = vrot.slane %v8965_v25, 1  ;;  %v21052_v61 = vld [vmem:[#allocation134_spill] sm:$0xff] }
 0x7cd   : > { %v8997_v49 = vrot.slane %v8996_v40, 4  ;;  %v9004_v8 = vrot.slane %v9003_v18, 4  ;;  %v8979_v4 = vmax.f32 %v8977_v44, %v8978_v6  ;;  %v8992_v59 = vrot.slane %v8991_v10, 2 }
 0x7ce   : > { %v8985_v42 = vrot.slane %v8984_v7, 2  ;;  %v8973_v0 = vrot.slane %v8972_v5, 1  ;;  %v21050_v31 = vcombine.high %v17656_v36, %v17656_v36  ;;  %v18620_v48 = vmax.f32 %v8958_v50, %v8959_v12 }
 0x7cf   : > { %v8998_v56 = vmax.f32 %v8996_v40, %v8997_v49  ;;  %v9005_v38 = vmax.f32 %v9003_v18, %v9004_v8  ;;  %v8980_v33 = vrot.slane %v8979_v4, 1  ;;  %v8993_v41 = vmax.f32 %v8991_v10, %v8992_v59 }
 0x7d0   : > { %v9010_v60 = vsel %vm8456_vm11, %v21050_v31, -inf  ;;  %v8986_v32 = vmax.f32 %v8984_v7, %v8985_v42  ;;  %21051 = vst [vmem:[#allocation230_spill] sm:$0xff] %v18620_v48  ;;  %v9017_v40 = vsel %vm8456_vm11, %v21052_v61, -inf  ;;  %v18624_v23 = vmax.f32 %v8965_v25, %v8966_v62  ;;  %v21054_v31 = vld [vmem:[#allocation135_spill] sm:$0xff] }
 0x7d1   : > { %v8999_v14 = vrot.slane %v8998_v56, 2  ;;  %v9011_v47 = vrot.slane %v9010_v60, 4  ;;  %v9006_v44 = vrot.slane %v9005_v38, 2  ;;  %v8994_v36 = vrot.slane %v8993_v41, 1 }
 0x7d2   : > { %v8987_v49 = vrot.slane %v8986_v32, 1  ;;  %v9018_v57 = vrot.slane %v9017_v40, 4  ;;  %v21053_v7 = vcombine.high %v21052_v61, %v21052_v61  ;;  %v18630_v50 = vmax.f32 %v8972_v5, %v8973_v0 }
 0x7d3   : > { %v9000_v24 = vmax.f32 %v8998_v56, %v8999_v14  ;;  %v9012_v6 = vmax.f32 %v9010_v60, %v9011_v47  ;;  %v9007_v10 = vmax.f32 %v9005_v38, %v9006_v44  ;;  %v18632_v8 = vmax.f32 %v8979_v4, %v8980_v33  ;;  %v21058_v4 = vld [vmem:[#allocation136_spill] sm:$0xff] }
 0x7d4   : > { %v9024_v18 = vsel %vm8456_vm11, %v21053_v7, -inf  ;;  %v9019_v59 = vmax.f32 %v9017_v40, %v9018_v57  ;;  %v9031_v25 = vsel %vm8456_vm11, %v21054_v31, -inf  ;;  %v18636_v62 = vmax.f32 %v8986_v32, %v8987_v49 }
 0x7d5   : > { %v9001_v12 = vrot.slane %v9000_v24, 1  ;;  %v9013_v42 = vrot.slane %v9012_v6, 2  ;;  %v9025_v56 = vrot.slane %v9024_v18, 4  ;;  %v18638_v60 = vmax.f32 %v8993_v41, %v8994_v36 }
 0x7d6   : > { %21055 = vst [vmem:[#allocation134_spill] sm:$0xff] %v18636_v62  ;;  %v9032_v61 = vrot.slane %v9031_v25, 4  ;;  %v9020_v47 = vrot.slane %v9019_v59, 2  ;;  %v21057_v5 = vcombine.high %v21054_v31, %v21054_v31  ;;  %v9045_v57 = vsel %vm8456_vm11, %v21058_v4, -inf }
 0x7d7   : > { %21056 = vst [vmem:[#allocation135_spill] sm:$0xff] %v18638_v60  ;;  %v9014_v14 = vmax.f32 %v9012_v6, %v9013_v42  ;;  %v9026_v7 = vmax.f32 %v9024_v18, %v9025_v56  ;;  %v18646_v38 = vmax.f32 %v9000_v24, %v9001_v12  ;;  %v9008_v33 = vrot.slane %v9007_v10, 1 }
 0x7d8   : > { %v9038_v0 = vsel %vm8456_vm11, %v21057_v5, -inf  ;;  %v9033_v40 = vmax.f32 %v9031_v25, %v9032_v61  ;;  %v9021_v49 = vmax.f32 %v9019_v59, %v9020_v47  ;;  %v9046_v44 = vrot.slane %v9045_v57, 4 }
 0x7d9   : > { %21059 = vst [vmem:[#allocation136_spill] sm:$0xff] %v18646_v38  ;;  %v9039_v32 = vrot.slane %v9038_v0, 4  ;;  %v9027_v41 = vrot.slane %v9026_v7, 2  ;;  %v21060_v6 = vcombine.high %v21058_v4, %v21058_v4  ;;  %v9015_v18 = vrot.slane %v9014_v14, 1 }
 0x7da   : > { %v9034_v42 = vrot.slane %v9033_v40, 2  ;;  %v9022_v5 = vrot.slane %v9021_v49, 1  ;;  %v9047_v62 = vmax.f32 %v9045_v57, %v9046_v44  ;;  %v9059_v24 = vsel %vm8456_vm11, %v17680_v34, -inf }
 0x7db   : > { %v9052_v36 = vsel %vm8456_vm11, %v21060_v6, -inf  ;;  %v9040_v56 = vmax.f32 %v9038_v0, %v9039_v32  ;;  %v9028_v60 = vmax.f32 %v9026_v7, %v9027_v41  ;;  %v9060_v61 = vrot.slane %v9059_v24, 4 }
 0x7dc   : > { %v9053_v31 = vrot.slane %v9052_v36, 4  ;;  %v9035_v12 = vmax.f32 %v9033_v40, %v9034_v42  ;;  %v18654_v47 = vmax.f32 %v9007_v10, %v9008_v33  ;;  %v9048_v4 = vrot.slane %v9047_v62, 2 }
 0x7dd   : > { %v9041_v25 = vrot.slane %v9040_v56, 2  ;;  %v9029_v38 = vrot.slane %v9028_v60, 1  ;;  %v21062_v6 = vcombine.high %v17680_v34, %v17680_v34  ;;  %v9061_v57 = vmax.f32 %v9059_v24, %v9060_v61 }
 0x7de   : > { %v9054_v59 = vmax.f32 %v9052_v36, %v9053_v31  ;;  %21061 = vst [vmem:[#allocation231_spill] sm:$0xff] %v18654_v47  ;;  %v9036_v32 = vrot.slane %v9035_v12, 1  ;;  %v18660_v41 = vmax.f32 %v9014_v14, %v9015_v18  ;;  %v9049_v44 = vmax.f32 %v9047_v62, %v9048_v4 }
 0x7df   : > { %v9066_v0 = vsel %vm8456_vm11, %v21062_v6, -inf  ;;  %v9042_v48 = vmax.f32 %v9040_v56, %v9041_v25  ;;  %v9073_v36 = vsel %vm8456_vm11, %v17690_v28, -inf  ;;  %v18664_v10 = vmax.f32 %v9021_v49, %v9022_v5 }
 0x7e0   : > { %v9055_v7 = vrot.slane %v9054_v59, 2  ;;  %21063 = vst [vmem:[#allocation232_spill] sm:$0xff] %v18660_v41  ;;  %v9067_v40 = vrot.slane %v9066_v0, 4  ;;  %v9062_v31 = vrot.slane %v9061_v57, 2  ;;  %v18666_v47 = vmax.f32 %v9028_v60, %v9029_v38 }
 0x7e1   : > { %v9043_v33 = vrot.slane %v9042_v48, 1  ;;  %v9074_v6 = vrot.slane %v9073_v36, 4  ;;  %v21065_v56 = vcombine.high %v17690_v28, %v17690_v28  ;;  %v18672_v18 = vmax.f32 %v9035_v12, %v9036_v32 }
 0x7e2   : > { %v9056_v42 = vmax.f32 %v9054_v59, %v9055_v7  ;;  %21064 = vst [vmem:[#allocation233_spill] sm:$0xff] %v18666_v47  ;;  %v9068_v34 = vmax.f32 %v9066_v0, %v9067_v40  ;;  %v9050_v62 = vrot.slane %v9049_v44, 1  ;;  %v9063_v24 = vmax.f32 %v9061_v57, %v9062_v31  ;;  %v21069_v57 = vld [vmem:[#allocation137_spill] sm:$0xff] }
 0x7e3   : > { %v9080_v14 = vsel %vm8456_vm11, %v21065_v56, -inf  ;;  %21066 = vst [vmem:[#allocation234_spill] sm:$0xff] %v18672_v18  ;;  %v18674_v61 = vmax.f32 %v9042_v48, %v9043_v33  ;;  %v9075_v5 = vmax.f32 %v9073_v36, %v9074_v6  ;;  %v9087_v60 = vsel %vm8456_vm11, %v17697_v19, -inf }
 0x7e4   : > { %v9081_v25 = vrot.slane %v9080_v14, 4  ;;  %v9069_v49 = vrot.slane %v9068_v34, 2  ;;  %v9057_v38 = vrot.slane %v9056_v42, 1  ;;  %v9064_v59 = vrot.slane %v9063_v24, 1 }
 0x7e5   : > { %21067 = vst [vmem:[#allocation235_spill] sm:$0xff] %v18674_v61  ;;  %v9088_v0 = vrot.slane %v9087_v60, 4  ;;  %v9076_v28 = vrot.slane %v9075_v5, 2  ;;  %v21068_v12 = vcombine.high %v17697_v19, %v17697_v19  ;;  %v9101_v48 = vsel %vm8456_vm11, %v21069_v57, -inf }
 0x7e6   : > { %v9082_v4 = vmax.f32 %v9080_v14, %v9081_v25  ;;  %v9070_v7 = vmax.f32 %v9068_v34, %v9069_v49  ;;  %v18684_v40 = vmax.f32 %v9049_v44, %v9050_v62  ;;  %v9102_v41 = vrot.slane %v9101_v48, 4 }
 0x7e7   : > { %v9094_v32 = vsel %vm8456_vm11, %v21068_v12, -inf  ;;  %v9089_v33 = vmax.f32 %v9087_v60, %v9088_v0  ;;  %v9077_v56 = vmax.f32 %v9075_v5, %v9076_v28  ;;  %v21071_v34 = vcombine.high %v21069_v57, %v21069_v57 }
 0x7e8   : > { %21070 = vst [vmem:[#allocation137_spill] sm:$0xff] %v18684_v40  ;;  %v9083_v36 = vrot.slane %v9082_v4, 2  ;;  %v9095_v31 = vrot.slane %v9094_v32, 4  ;;  %v9071_v6 = vrot.slane %v9070_v7, 1  ;;  %v18690_v61 = vmax.f32 %v9056_v42, %v9057_v38 }
 0x7e9   : > { %v9108_v14 = vsel %vm8456_vm11, %v21071_v34, -inf  ;;  %v9090_v19 = vrot.slane %v9089_v33, 2  ;;  %v18692_v18 = vmax.f32 %v9063_v24, %v9064_v59  ;;  %v9103_v44 = vmax.f32 %v9101_v48, %v9102_v41 }
 0x7ea   : > { %v9084_v25 = vmax.f32 %v9082_v4, %v9083_v36  ;;  %v9096_v49 = vmax.f32 %v9094_v32, %v9095_v31  ;;  %v9109_v12 = vrot.slane %v9108_v14, 4  ;;  %21072 = vst [vmem:[#allocation236_spill] sm:$0xff] %v18690_v61  ;;  %v9115_v62 = vsel %vm8456_vm11, %v17708_v45, -inf  ;;  %v21076_v31 = vld [vmem:[#allocation138_spill] sm:$0xff] }
 0x7eb   : > { %21073 = vst [vmem:[#allocation237_spill] sm:$0xff] %v18692_v18  ;;  %v9078_v60 = vrot.slane %v9077_v56, 1  ;;  %v9091_v5 = vmax.f32 %v9089_v33, %v9090_v19  ;;  %v9104_v57 = vrot.slane %v9103_v44, 2  ;;  %v9116_v47 = vrot.slane %v9115_v62, 4 }
 0x7ec   : > { %v9097_v0 = vrot.slane %v9096_v49, 2  ;;  %v9110_v28 = vmax.f32 %v9108_v14, %v9109_v12  ;;  %v9085_v40 = vrot.slane %v9084_v25, 1  ;;  %v21074_v4 = vcombine.high %v17708_v45, %v17708_v45 }
 0x7ed   : > { %v18700_v42 = vmax.f32 %v9070_v7, %v9071_v6  ;;  %v9092_v24 = vrot.slane %v9091_v5, 1  ;;  %v9105_v59 = vmax.f32 %v9103_v44, %v9104_v57  ;;  %v9117_v48 = vmax.f32 %v9115_v62, %v9116_v47  ;;  %v21078_v57 = vld [vmem:[#allocation139_spill] sm:$0xff] }
 0x7ee   : > { %v9122_v32 = vsel %vm8456_vm11, %v21074_v4, -inf  ;;  %v9098_v38 = vmax.f32 %v9096_v49, %v9097_v0  ;;  %v9111_v41 = vrot.slane %v9110_v28, 2  ;;  %v9129_v33 = vsel %vm8456_vm11, %v21076_v31, -inf }
 0x7ef   : > { %21075 = vst [vmem:[#allocation238_spill] sm:$0xff] %v18700_v42  ;;  %v9123_v36 = vrot.slane %v9122_v32, 4  ;;  %v18704_v34 = vmax.f32 %v9077_v56, %v9078_v60  ;;  %v9130_v12 = vrot.slane %v9129_v33, 4  ;;  %v18706_v18 = vmax.f32 %v9084_v25, %v9085_v40 }
 0x7f0   : > { %v9099_v14 = vrot.slane %v9098_v38, 1  ;;  %v9112_v19 = vmax.f32 %v9110_v28, %v9111_v41  ;;  %v9118_v45 = vrot.slane %v9117_v48, 2  ;;  %v21077_v7 = vcombine.high %v21076_v31, %v21076_v31 }
 0x7f1   : > { %v9124_v4 = vmax.f32 %v9122_v32, %v9123_v36  ;;  %v18712_v49 = vmax.f32 %v9091_v5, %v9092_v24  ;;  %v9106_v47 = vrot.slane %v9105_v59, 1  ;;  %v9131_v44 = vmax.f32 %v9129_v33, %v9130_v12  ;;  %v21081_v33 = vld [vmem:[#allocation140_spill] sm:$0xff] }
 0x7f2   : > { %v9136_v6 = vsel %vm8456_vm11, %v21077_v7, -inf  ;;  %v9113_v0 = vrot.slane %v9112_v19, 1  ;;  %v9119_v56 = vmax.f32 %v9117_v48, %v9118_v45  ;;  %v9143_v28 = vsel %vm8456_vm11, %v21078_v57, -inf }
 0x7f3   : > { %v9137_v62 = vrot.slane %v9136_v6, 4  ;;  %v9125_v60 = vrot.slane %v9124_v4, 2  ;;  %v18716_v40 = vmax.f32 %v9098_v38, %v9099_v14  ;;  %v9132_v25 = vrot.slane %v9131_v44, 2 }
 0x7f4   : > { %v9144_v41 = vrot.slane %v9143_v28, 4  ;;  %v9120_v36 = vrot.slane %v9119_v56, 1  ;;  %v21080_v5 = vcombine.high %v21078_v57, %v21078_v57  ;;  %v9157_v12 = vsel %vm8456_vm11, %v21081_v33, -inf }
 0x7f5   : > { %21079 = vst [vmem:[#allocation138_spill] sm:$0xff] %v18716_v40  ;;  %v9138_v32 = vmax.f32 %v9136_v6, %v9137_v62  ;;  %v9126_v31 = vmax.f32 %v9124_v4, %v9125_v60  ;;  %v9133_v48 = vmax.f32 %v9131_v44, %v9132_v25  ;;  %v18724_v61 = vmax.f32 %v9105_v59, %v9106_v47 }
 0x7f6   : > { %v9150_v24 = vsel %vm8456_vm11, %v21080_v5, -inf  ;;  %v9145_v7 = vmax.f32 %v9143_v28, %v9144_v41  ;;  %v18726_v38 = vmax.f32 %v9112_v19, %v9113_v0  ;;  %v9158_v14 = vrot.slane %v9157_v12, 4 }
 0x7f7   : > { %v9139_v45 = vrot.slane %v9138_v32, 2  ;;  %v9151_v42 = vrot.slane %v9150_v24, 4  ;;  %21082 = vst [vmem:[#allocation139_spill] sm:$0xff] %v18724_v61  ;;  %v21084_v4 = vcombine.high %v21081_v33, %v21081_v33  ;;  %v9127_v62 = vrot.slane %v9126_v31, 1 }
 0x7f8   : > { %21083 = vst [vmem:[#allocation140_spill] sm:$0xff] %v18726_v38  ;;  %v9146_v57 = vrot.slane %v9145_v7, 2  ;;  %v18732_v40 = vmax.f32 %v9119_v56, %v9120_v36  ;;  %v9159_v44 = vmax.f32 %v9157_v12, %v9158_v14  ;;  %v9171_v59 = vsel %vm8456_vm11, %v17732_v16, -inf }
 0x7f9   : > { %v9164_v6 = vsel %vm8456_vm11, %v21084_v4, -inf  ;;  %v9140_v60 = vmax.f32 %v9138_v32, %v9139_v45  ;;  %v9152_v5 = vmax.f32 %v9150_v24, %v9151_v42  ;;  %v9134_v47 = vrot.slane %v9133_v48, 1 }
 0x7fa   : > { %21085 = vst [vmem:[#allocation239_spill] sm:$0xff] %v18732_v40  ;;  %v9165_v25 = vrot.slane %v9164_v6, 4  ;;  %v9147_v0 = vmax.f32 %v9145_v7, %v9146_v57  ;;  %v9160_v41 = vrot.slane %v9159_v44, 2  ;;  %v9172_v33 = vrot.slane %v9171_v59, 4 }
 0x7fb   : > { %v9141_v19 = vrot.slane %v9140_v60, 1  ;;  %v9153_v28 = vrot.slane %v9152_v5, 2  ;;  %v21086_v4 = vcombine.high %v17732_v16, %v17732_v16  ;;  %v18740_v42 = vmax.f32 %v9126_v31, %v9127_v62 }
 0x7fc   : > { %v9166_v38 = vmax.f32 %v9164_v6, %v9165_v25  ;;  %v9148_v56 = vrot.slane %v9147_v0, 1  ;;  %v9161_v12 = vmax.f32 %v9159_v44, %v9160_v41  ;;  %v9173_v14 = vmax.f32 %v9171_v59, %v9172_v33 }
 0x7fd   : > { %v9178_v32 = vsel %vm8456_vm11, %v21086_v4, -inf  ;;  %21087 = vst [vmem:[#allocation240_spill] sm:$0xff] %v18740_v42  ;;  %v9154_v36 = vmax.f32 %v9152_v5, %v9153_v28  ;;  %v9185_v7 = vsel %vm8456_vm11, %v17742_v51, -inf  ;;  %v18744_v57 = vmax.f32 %v9133_v48, %v9134_v47 }
 0x7fe   : > { %v9179_v24 = vrot.slane %v9178_v32, 4  ;;  %v9167_v45 = vrot.slane %v9166_v38, 2  ;;  %v18746_v6 = vmax.f32 %v9140_v60, %v9141_v19  ;;  %v9186_v40 = vrot.slane %v9185_v7, 4 }
 0x7ff   : > { %v9155_v16 = vrot.slane %v9154_v36, 1  ;;  %v9174_v4 = vrot.slane %v9173_v14, 2  ;;  %v21088_v31 = vcombine.high %v17742_v51, %v17742_v51  ;;  %v18752_v5 = vmax.f32 %v9147_v0, %v9148_v56 }
 0x800   : > { %v9180_v25 = vmax.f32 %v9178_v32, %v9179_v24  ;;  %v9168_v61 = vmax.f32 %v9166_v38, %v9167_v45  ;;  %v9187_v59 = vmax.f32 %v9185_v7, %v9186_v40  ;;  %v9162_v41 = vrot.slane %v9161_v12, 1  ;;  %v21092_v40 = vld [vmem:[#allocation141_spill] sm:$0xff] }
 0x801   : > { %v9192_v62 = vsel %vm8456_vm11, %v21088_v31, -inf  ;;  %21089 = vst [vmem:[#allocation241_spill] sm:$0xff] %v18752_v5  ;;  %v9175_v47 = vmax.f32 %v9173_v14, %v9174_v4  ;;  %v9199_v60 = vsel %vm8456_vm11, %v17749_v22, -inf  ;;  %v18756_v24 = vmax.f32 %v9154_v36, %v9155_v16 }
 0x802   : > { %v9181_v44 = vrot.slane %v9180_v25, 2  ;;  %v9193_v28 = vrot.slane %v9192_v62, 4  ;;  %v9169_v48 = vrot.slane %v9168_v61, 1  ;;  %v9188_v33 = vrot.slane %v9187_v59, 2 }
 0x803   : > { %v9200_v32 = vrot.slane %v9199_v60, 4  ;;  %21090 = vst [vmem:[#allocation242_spill] sm:$0xff] %v18756_v24  ;;  %v9176_v51 = vrot.slane %v9175_v47, 1  ;;  %v21091_v0 = vcombine.high %v17749_v22, %v17749_v22  ;;  %v9213_v45 = vsel %vm8456_vm11, %v21092_v40, -inf }
 0x804   : > { %v9182_v19 = vmax.f32 %v9180_v25, %v9181_v44  ;;  %v9194_v38 = vmax.f32 %v9192_v62, %v9193_v28  ;;  %v9189_v14 = vmax.f32 %v9187_v59, %v9188_v33  ;;  %v18764_v42 = vmax.f32 %v9161_v12, %v9162_v41 }
 0x805   : > { %v9206_v56 = vsel %vm8456_vm11, %v21091_v0, -inf  ;;  %v9201_v31 = vmax.f32 %v9199_v60, %v9200_v32  ;;  %v9214_v62 = vrot.slane %v9213_v45, 4  ;;  %v21094_v36 = vcombine.high %v21092_v40, %v21092_v40 }
 0x806   : > { %v9183_v7 = vrot.slane %v9182_v19, 1  ;;  %v9195_v4 = vrot.slane %v9194_v38, 2  ;;  %21093 = vst [vmem:[#allocation141_spill] sm:$0xff] %v18764_v42  ;;  %v9207_v25 = vrot.slane %v9206_v56, 4  ;;  %v18770_v44 = vmax.f32 %v9168_v61, %v9169_v48 }
 0x807   : > { %v9220_v16 = vsel %vm8456_vm11, %v21094_v36, -inf  ;;  %v18772_v22 = vmax.f32 %v9175_v47, %v9176_v51  ;;  %v9202_v0 = vrot.slane %v9201_v31, 2  ;;  %v9215_v5 = vmax.f32 %v9213_v45, %v9214_v62 }
 0x808   : > { %21095 = vst [vmem:[#allocation243_spill] sm:$0xff] %v18770_v44  ;;  %v9196_v28 = vmax.f32 %v9194_v38, %v9195_v4  ;;  %v9208_v24 = vmax.f32 %v9206_v56, %v9207_v25  ;;  %v9221_v59 = vrot.slane %v9220_v16, 4  ;;  %v9227_v12 = vsel %vm8456_vm11, %v17760_v3, -inf }
 0x809   : > { %21096 = vst [vmem:[#allocation244_spill] sm:$0xff] %v18772_v22  ;;  %v18776_v41 = vmax.f32 %v9182_v19, %v9183_v7  ;;  %v9190_v60 = vrot.slane %v9189_v14, 1  ;;  %v9203_v33 = vmax.f32 %v9201_v31, %v9202_v0  ;;  %v9228_v32 = vrot.slane %v9227_v12, 4  ;;  %v21099_v19 = vld [vmem:[#allocation142_spill] sm:$0xff] }
 0x80a   : > { %v9209_v40 = vrot.slane %v9208_v24, 2  ;;  %v9216_v42 = vrot.slane %v9215_v5, 2  ;;  %v9222_v36 = vmax.f32 %v9220_v16, %v9221_v59  ;;  %v21098_v61 = vcombine.high %v17760_v3, %v17760_v3 }
 0x80b   : > { %21097 = vst [vmem:[#allocation245_spill] sm:$0xff] %v18776_v41  ;;  %v9197_v47 = vrot.slane %v9196_v28, 1  ;;  %v9204_v38 = vrot.slane %v9203_v33, 1  ;;  %v9229_v51 = vmax.f32 %v9227_v12, %v9228_v32  ;;  %v9241_v7 = vsel %vm8456_vm11, %v21099_v19, -inf }
 0x80c   : > { %v9234_v48 = vsel %vm8456_vm11, %v21098_v61, -inf  ;;  %v9210_v45 = vmax.f32 %v9208_v24, %v9209_v40  ;;  %v9217_v4 = vmax.f32 %v9215_v5, %v9216_v42  ;;  %v9223_v25 = vrot.slane %v9222_v36, 2 }
 0x80d   : > { %v9235_v56 = vrot.slane %v9234_v48, 4  ;;  %v18784_v31 = vmax.f32 %v9189_v14, %v9190_v60  ;;  %v9230_v62 = vrot.slane %v9229_v51, 2  ;;  %v9242_v16 = vrot.slane %v9241_v7, 4  ;;  %v21104_v60 = vld [vmem:[#allocation143_spill] sm:$0xff] }
 0x80e   : > { %v9211_v59 = vrot.slane %v9210_v45, 1  ;;  %v9218_v41 = vrot.slane %v9217_v4, 1  ;;  %v9224_v3 = vmax.f32 %v9222_v36, %v9223_v25  ;;  %v21101_v61 = vcombine.high %v21099_v19, %v21099_v19 }
 0x80f   : > { %21100 = vst [vmem:[#allocation142_spill] sm:$0xff] %v18784_v31  ;;  %v9236_v0 = vmax.f32 %v9234_v48, %v9235_v56  ;;  %v9231_v32 = vmax.f32 %v9229_v51, %v9230_v62  ;;  %v9243_v42 = vmax.f32 %v9241_v7, %v9242_v16  ;;  %v18790_v40 = vmax.f32 %v9196_v28, %v9197_v47  ;;  %v21107_v28 = vld [vmem:[#allocation144_spill] sm:$0xff] }
 0x810   : > { %v9248_v12 = vsel %vm8456_vm11, %v21101_v61, -inf  ;;  %v18792_v22 = vmax.f32 %v9203_v33, %v9204_v38  ;;  %v9225_v14 = vrot.slane %v9224_v3, 1  ;;  %v9255_v48 = vsel %vm8456_vm11, %v21104_v60, -inf }
 0x811   : > { %v9237_v24 = vrot.slane %v9236_v0, 2  ;;  %v9249_v5 = vrot.slane %v9248_v12, 4  ;;  %21102 = vst [vmem:[#allocation246_spill] sm:$0xff] %v18790_v40  ;;  %v9232_v56 = vrot.slane %v9231_v32, 1  ;;  %v9244_v36 = vrot.slane %v9243_v42, 2 }
 0x812   : > { %21103 = vst [vmem:[#allocation247_spill] sm:$0xff] %v18792_v22  ;;  %v18796_v44 = vmax.f32 %v9210_v45, %v9211_v59  ;;  %v9256_v19 = vrot.slane %v9255_v48, 4  ;;  %v21106_v51 = vcombine.high %v21104_v60, %v21104_v60  ;;  %v9269_v33 = vsel %vm8456_vm11, %v21107_v28, -inf }
 0x813   : > { %v9238_v31 = vmax.f32 %v9236_v0, %v9237_v24  ;;  %v9250_v25 = vmax.f32 %v9248_v12, %v9249_v5  ;;  %v18804_v47 = vmax.f32 %v9217_v4, %v9218_v41  ;;  %v9245_v62 = vmax.f32 %v9243_v42, %v9244_v36 }
 0x814   : > { %21105 = vst [vmem:[#allocation143_spill] sm:$0xff] %v18796_v44  ;;  %v9262_v7 = vsel %vm8456_vm11, %v21106_v51, -inf  ;;  %v9257_v61 = vmax.f32 %v9255_v48, %v9256_v19  ;;  %v9270_v24 = vrot.slane %v9269_v33, 4  ;;  %v21109_v45 = vcombine.high %v21107_v28, %v21107_v28 }
 0x815   : > { %21108 = vst [vmem:[#allocation144_spill] sm:$0xff] %v18804_v47  ;;  %v9239_v38 = vrot.slane %v9238_v31, 1  ;;  %v9251_v16 = vrot.slane %v9250_v25, 2  ;;  %v9263_v0 = vrot.slane %v9262_v7, 4  ;;  %v18810_v12 = vmax.f32 %v9224_v3, %v9225_v14 }
 0x816   : > { %v9276_v59 = vsel %vm8456_vm11, %v21109_v45, -inf  ;;  %v18812_v5 = vmax.f32 %v9231_v32, %v9232_v56  ;;  %v9258_v44 = vrot.slane %v9257_v61, 2  ;;  %v9271_v4 = vmax.f32 %v9269_v33, %v9270_v24 }
 0x817   : > { %21110 = vst [vmem:[#allocation248_spill] sm:$0xff] %v18810_v12  ;;  %v9252_v60 = vmax.f32 %v9250_v25, %v9251_v16  ;;  %v9277_v51 = vrot.slane %v9276_v59, 4  ;;  %v9264_v41 = vmax.f32 %v9262_v7, %v9263_v0  ;;  %v9283_v42 = vsel %vm8456_vm11, %v17784_v1, -inf }
 0x818   : > { %21111 = vst [vmem:[#allocation249_spill] sm:$0xff] %v18812_v5  ;;  %v18816_v48 = vmax.f32 %v9238_v31, %v9239_v38  ;;  %v9246_v36 = vrot.slane %v9245_v62, 1  ;;  %v9284_v47 = vrot.slane %v9283_v42, 4  ;;  %v9259_v28 = vmax.f32 %v9257_v61, %v9258_v44  ;;  %v21114_v31 = vld [vmem:[#allocation145_spill] sm:$0xff] }
 0x819   : > { %v9278_v19 = vmax.f32 %v9276_v59, %v9277_v51  ;;  %v9265_v22 = vrot.slane %v9264_v41, 2  ;;  %v9272_v45 = vrot.slane %v9271_v4, 2  ;;  %v21113_v3 = vcombine.high %v17784_v1, %v17784_v1 }
 0x81a   : > { %21112 = vst [vmem:[#allocation250_spill] sm:$0xff] %v18816_v48  ;;  %v9253_v14 = vrot.slane %v9252_v60, 1  ;;  %v9285_v25 = vmax.f32 %v9283_v42, %v9284_v47  ;;  %v9260_v33 = vrot.slane %v9259_v28, 1  ;;  %v9297_v38 = vsel %vm8456_vm11, %v21114_v31, -inf }
 0x81b   : > { %v9290_v32 = vsel %vm8456_vm11, %v21113_v3, -inf  ;;  %v9279_v56 = vrot.slane %v9278_v19, 2  ;;  %v9266_v16 = vmax.f32 %v9264_v41, %v9265_v22  ;;  %v9273_v0 = vmax.f32 %v9271_v4, %v9272_v45 }
 0x81c   : > { %v9291_v7 = vrot.slane %v9290_v32, 4  ;;  %v9286_v59 = vrot.slane %v9285_v25, 2  ;;  %v9298_v61 = vrot.slane %v9297_v38, 4  ;;  %v18824_v51 = vmax.f32 %v9245_v62, %v9246_v36 }
 0x81d   : > { %v9280_v24 = vmax.f32 %v9278_v19, %v9279_v56  ;;  %v9267_v48 = vrot.slane %v9266_v16, 1  ;;  %v9274_v1 = vrot.slane %v9273_v0, 1  ;;  %v21116_v3 = vcombine.high %v21114_v31, %v21114_v31 }
 0x81e   : > { %v9292_v44 = vmax.f32 %v9290_v32, %v9291_v7  ;;  %21115 = vst [vmem:[#allocation145_spill] sm:$0xff] %v18824_v51  ;;  %v9287_v5 = vmax.f32 %v9285_v25, %v9286_v59  ;;  %v9299_v41 = vmax.f32 %v9297_v38, %v9298_v61  ;;  %v18830_v4 = vmax.f32 %v9252_v60, %v9253_v14  ;;  %v21119_v32 = vld [vmem:[#allocation146_spill] sm:$0xff]  ;;  %v21122_v60 = vld [vmem:[#allocation147_spill] sm:$0xff] }
 0x81f   : > { %v9304_v47 = vsel %vm8456_vm11, %v21116_v3, -inf  ;;  %v9281_v42 = vrot.slane %v9280_v24, 1  ;;  %v18832_v45 = vmax.f32 %v9259_v28, %v9260_v33  ;;  %v9311_v62 = vsel %vm8456_vm11, %v21119_v32, -inf }
 0x820   : > { %v9293_v22 = vrot.slane %v9292_v44, 2  ;;  %21117 = vst [vmem:[#allocation251_spill] sm:$0xff] %v18830_v4  ;;  %v9305_v19 = vrot.slane %v9304_v47, 4  ;;  %v18836_v36 = vmax.f32 %v9266_v16, %v9267_v48  ;;  %v9288_v56 = vrot.slane %v9287_v5, 1 }
 0x821   : > { %21118 = vst [vmem:[#allocation252_spill] sm:$0xff] %v18832_v45  ;;  %v9300_v12 = vrot.slane %v9299_v41, 2  ;;  %v9312_v51 = vrot.slane %v9311_v62, 4  ;;  %v21121_v25 = vcombine.high %v21119_v32, %v21119_v32  ;;  %v9325_v28 = vsel %vm8456_vm11, %v21122_v60, -inf }
 0x822   : > { %21120 = vst [vmem:[#allocation146_spill] sm:$0xff] %v18836_v36  ;;  %v9294_v7 = vmax.f32 %v9292_v44, %v9293_v22  ;;  %v9306_v31 = vmax.f32 %v9304_v47, %v9305_v19  ;;  %v18844_v14 = vmax.f32 %v9273_v0, %v9274_v1  ;;  %v18846_v33 = vmax.f32 %v9280_v24, %v9281_v42  ;;  %v21127_v24 = vld [vmem:[#allocation148_spill] sm:$0xff] }
 0x823   : > { %v9318_v38 = vsel %vm8456_vm11, %v21121_v25, -inf  ;;  %v9301_v59 = vmax.f32 %v9299_v41, %v9300_v12  ;;  %v9313_v61 = vmax.f32 %v9311_v62, %v9312_v51  ;;  %v9326_v44 = vrot.slane %v9325_v28, 4 }
 0x824   : > { %21123 = vst [vmem:[#allocation147_spill] sm:$0xff] %v18844_v14  ;;  %21124 = vst [vmem:[#allocation253_spill] sm:$0xff] %v18846_v33  ;;  %v9319_v48 = vrot.slane %v9318_v38, 4  ;;  %v9307_v16 = vrot.slane %v9306_v31, 2  ;;  %v21125_v3 = vcombine.high %v21122_v60, %v21122_v60  ;;  %v18852_v22 = vmax.f32 %v9287_v5, %v9288_v56 }
 0x825   : > { %v9295_v19 = vrot.slane %v9294_v7, 1  ;;  %v9314_v0 = vrot.slane %v9313_v61, 2  ;;  %v9327_v1 = vmax.f32 %v9325_v28, %v9326_v44  ;;  %v9339_v12 = vsel %vm8456_vm11, %v21127_v24, -inf }
 0x826   : > { %v9332_v47 = vsel %vm8456_vm11, %v21125_v3, -inf  ;;  %21126 = vst [vmem:[#allocation254_spill] sm:$0xff] %v18852_v22  ;;  %v9320_v32 = vmax.f32 %v9318_v38, %v9319_v48  ;;  %v9308_v36 = vmax.f32 %v9306_v31, %v9307_v16  ;;  %v9302_v42 = vrot.slane %v9301_v59, 1  ;;  %v21130_v22 = vld [vmem:[#allocation149_spill] sm:$0xff] }
 0x827   : > { %v9333_v25 = vrot.slane %v9332_v47, 4  ;;  %v9340_v62 = vrot.slane %v9339_v12, 4  ;;  %v9315_v14 = vmax.f32 %v9313_v61, %v9314_v0  ;;  %v9328_v60 = vrot.slane %v9327_v1, 2 }
 0x828   : > { %v9321_v41 = vrot.slane %v9320_v32, 2  ;;  %v9309_v33 = vrot.slane %v9308_v36, 1  ;;  %v21128_v5 = vcombine.high %v21127_v24, %v21127_v24  ;;  %v18860_v28 = vmax.f32 %v9294_v7, %v9295_v19 }
 0x829   : > { %v9334_v51 = vmax.f32 %v9332_v47, %v9333_v25  ;;  %v9341_v31 = vmax.f32 %v9339_v12, %v9340_v62  ;;  %v9316_v44 = vrot.slane %v9315_v14, 1  ;;  %v9329_v3 = vmax.f32 %v9327_v1, %v9328_v60 }
 0x82a   : > { %v9346_v56 = vsel %vm8456_vm11, %v21128_v5, -inf  ;;  %v9322_v38 = vmax.f32 %v9320_v32, %v9321_v41  ;;  %21129 = vst [vmem:[#allocation148_spill] sm:$0xff] %v18860_v28  ;;  %v9353_v47 = vsel %vm8456_vm11, %v21130_v22, -inf  ;;  %v18864_v4 = vmax.f32 %v9301_v59, %v9302_v42  ;;  %v21133_v5 = vld [vmem:[#allocation150_spill] sm:$0xff] }
 0x82b   : > { %v9335_v48 = vrot.slane %v9334_v51, 2  ;;  %v9347_v16 = vrot.slane %v9346_v56, 4  ;;  %v9342_v61 = vrot.slane %v9341_v31, 2  ;;  %v9330_v24 = vrot.slane %v9329_v3, 1 }
 0x82c   : > { %v9323_v25 = vrot.slane %v9322_v38, 1  ;;  %v9354_v40 = vrot.slane %v9353_v47, 4  ;;  %v21131_v32 = vcombine.high %v21130_v22, %v21130_v22  ;;  %v18870_v7 = vmax.f32 %v9308_v36, %v9309_v33 }
 0x82d   : > { %v9336_v45 = vmax.f32 %v9334_v51, %v9335_v48  ;;  %v9348_v0 = vmax.f32 %v9346_v56, %v9347_v16  ;;  %v9343_v1 = vmax.f32 %v9341_v31, %v9342_v61  ;;  %v18872_v62 = vmax.f32 %v9315_v14, %v9316_v44  ;;  %v21137_v14 = vld [vmem:[#allocation151_spill] sm:$0xff] }
 0x82e   : > { %v9360_v12 = vsel %vm8456_vm11, %v21131_v32, -inf  ;;  %v9355_v60 = vmax.f32 %v9353_v47, %v9354_v40  ;;  %v9367_v59 = vsel %vm8456_vm11, %v21133_v5, -inf  ;;  %v18876_v42 = vmax.f32 %v9322_v38, %v9323_v25 }
 0x82f   : > { %v9337_v19 = vrot.slane %v9336_v45, 1  ;;  %v9349_v41 = vrot.slane %v9348_v0, 2  ;;  %21132 = vst [vmem:[#allocation149_spill] sm:$0xff] %v18872_v62  ;;  %v9361_v51 = vrot.slane %v9360_v12, 4  ;;  %v18878_v56 = vmax.f32 %v9329_v3, %v9330_v24 }
 0x830   : > { %21134 = vst [vmem:[#allocation150_spill] sm:$0xff] %v18876_v42  ;;  %v9368_v22 = vrot.slane %v9367_v59, 4  ;;  %v9356_v16 = vrot.slane %v9355_v60, 2  ;;  %v21136_v36 = vcombine.high %v21133_v5, %v21133_v5  ;;  %v9381_v40 = vsel %vm8456_vm11, %v21137_v14, -inf }
 0x831   : > { %21135 = vst [vmem:[#allocation255_spill] sm:$0xff] %v18878_v56  ;;  %v9350_v48 = vmax.f32 %v9348_v0, %v9349_v41  ;;  %v9362_v32 = vmax.f32 %v9360_v12, %v9361_v51  ;;  %v18886_v31 = vmax.f32 %v9336_v45, %v9337_v19  ;;  %v9344_v44 = vrot.slane %v9343_v1, 1  ;;  %v21140_v45 = vld [vmem:[#allocation152_spill] sm:$0xff] }
 0x832   : > { %v9374_v33 = vsel %vm8456_vm11, %v21136_v36, -inf  ;;  %v9369_v47 = vmax.f32 %v9367_v59, %v9368_v22  ;;  %v9357_v25 = vmax.f32 %v9355_v60, %v9356_v16  ;;  %v9382_v61 = vrot.slane %v9381_v40, 4 }
 0x833   : > { %21138 = vst [vmem:[#allocation151_spill] sm:$0xff] %v18886_v31  ;;  %v9375_v38 = vrot.slane %v9374_v33, 4  ;;  %v9363_v3 = vrot.slane %v9362_v32, 2  ;;  %v21139_v0 = vcombine.high %v21137_v14, %v21137_v14  ;;  %v9351_v12 = vrot.slane %v9350_v48, 1 }
 0x834   : > { %v9370_v41 = vrot.slane %v9369_v47, 2  ;;  %v9358_v36 = vrot.slane %v9357_v25, 1  ;;  %v9383_v56 = vmax.f32 %v9381_v40, %v9382_v61  ;;  %v9395_v19 = vsel %vm8456_vm11, %v21140_v45, -inf }
 0x835   : > { %v9388_v24 = vsel %vm8456_vm11, %v21139_v0, -inf  ;;  %v9376_v51 = vmax.f32 %v9374_v33, %v9375_v38  ;;  %v9364_v28 = vmax.f32 %v9362_v32, %v9363_v3  ;;  %v9396_v16 = vrot.slane %v9395_v19, 4 }
 0x836   : > { %v9389_v5 = vrot.slane %v9388_v24, 4  ;;  %v9371_v59 = vmax.f32 %v9369_v47, %v9370_v41  ;;  %v18894_v31 = vmax.f32 %v9343_v1, %v9344_v44  ;;  %v9384_v14 = vrot.slane %v9383_v56, 2 }
 0x837   : > { %v9377_v22 = vrot.slane %v9376_v51, 2  ;;  %v9365_v42 = vrot.slane %v9364_v28, 1  ;;  %v21142_v0 = vcombine.high %v21140_v45, %v21140_v45  ;;  %v9397_v40 = vmax.f32 %v9395_v19, %v9396_v16 }
 0x838   : > { %v9390_v60 = vmax.f32 %v9388_v24, %v9389_v5  ;;  %21141 = vst [vmem:[#allocation152_spill] sm:$0xff] %v18894_v31  ;;  %v9372_v38 = vrot.slane %v9371_v59, 1  ;;  %v18900_v3 = vmax.f32 %v9350_v48, %v9351_v12  ;;  %v9385_v61 = vmax.f32 %v9383_v56, %v9384_v14 }
 0x839   : > { %v9402_v33 = vsel %vm8456_vm11, %v21142_v0, -inf  ;;  %v9378_v62 = vmax.f32 %v9376_v51, %v9377_v22  ;;  %v9409_v24 = vsel %vm8456_vm11, %v17846_v29, -inf  ;;  %v18904_v1 = vmax.f32 %v9357_v25, %v9358_v36 }
 0x83a   : > { %v9391_v32 = vrot.slane %v9390_v60, 2  ;;  %21143 = vst [vmem:[#allocation256_spill] sm:$0xff] %v18900_v3  ;;  %v9403_v47 = vrot.slane %v9402_v33, 4  ;;  %v9398_v5 = vrot.slane %v9397_v40, 2  ;;  %v18906_v31 = vmax.f32 %v9364_v28, %v9365_v42 }
 0x83b   : > { %21144 = vst [vmem:[#allocation257_spill] sm:$0xff] %v18904_v1  ;;  %v9379_v44 = vrot.slane %v9378_v62, 1  ;;  %v9410_v0 = vrot.slane %v9409_v24, 4  ;;  %v21146_v51 = vcombine.high %v17846_v29, %v17846_v29  ;;  %v18912_v12 = vmax.f32 %v9371_v59, %v9372_v38 }
 0x83c   : > { %v9392_v41 = vmax.f32 %v9390_v60, %v9391_v32  ;;  %21145 = vst [vmem:[#allocation258_spill] sm:$0xff] %v18906_v31  ;;  %v9404_v45 = vmax.f32 %v9402_v33, %v9403_v47  ;;  %v9386_v56 = vrot.slane %v9385_v61, 1  ;;  %v9399_v19 = vmax.f32 %v9397_v40, %v9398_v5  ;;  %v21149_v60 = vld [vmem:[#allocation109_spill] sm:$0xff] }
 0x83d   : > { %v9416_v48 = vsel %vm8456_vm11, %v21146_v51, -inf  ;;  %21147 = vst [vmem:[#allocation259_spill] sm:$0xff] %v18912_v12  ;;  %v18914_v16 = vmax.f32 %v9378_v62, %v9379_v44  ;;  %v9411_v36 = vmax.f32 %v9409_v24, %v9410_v0  ;;  %v9423_v28 = vsel %vm8456_vm11, %v21149_v60, -inf  ;;  %v21151_v40 = vld [vmem:[#allocation153_spill] sm:$0xff] }
 0x83e   : > { %v9417_v22 = vrot.slane %v9416_v48, 4  ;;  %v9405_v25 = vrot.slane %v9404_v45, 2  ;;  %v9393_v42 = vrot.slane %v9392_v41, 1  ;;  %v9400_v14 = vrot.slane %v9399_v19, 1 }
 0x83f   : > { %21148 = vst [vmem:[#allocation260_spill] sm:$0xff] %v18914_v16  ;;  %v9424_v32 = vrot.slane %v9423_v28, 4  ;;  %v9412_v29 = vrot.slane %v9411_v36, 2  ;;  %v21150_v59 = vcombine.high %v21149_v60, %v21149_v60  ;;  %v9437_v62 = vsel %vm8456_vm11, %v21151_v40, -inf }
 0x840   : > { %v9418_v33 = vmax.f32 %v9416_v48, %v9417_v22  ;;  %v9406_v47 = vmax.f32 %v9404_v45, %v9405_v25  ;;  %v18924_v44 = vmax.f32 %v9385_v61, %v9386_v56  ;;  %v9438_v16 = vrot.slane %v9437_v62, 4 }
 0x841   : > { %v9430_v38 = vsel %vm8456_vm11, %v21150_v59, -inf  ;;  %v9425_v5 = vmax.f32 %v9423_v28, %v9424_v32  ;;  %v9413_v3 = vmax.f32 %v9411_v36, %v9412_v29  ;;  %v21153_v45 = vcombine.high %v21151_v40, %v21151_v40 }
 0x842   : > { %21152 = vst [vmem:[#allocation109_spill] sm:$0xff] %v18924_v44  ;;  %v9419_v24 = vrot.slane %v9418_v33, 2  ;;  %v9431_v0 = vrot.slane %v9430_v38, 4  ;;  %v9407_v51 = vrot.slane %v9406_v47, 1  ;;  %v18930_v12 = vmax.f32 %v9392_v41, %v9393_v42 }
 0x843   : > { %v9444_v48 = vsel %vm8456_vm11, %v21153_v45, -inf  ;;  %v9426_v25 = vrot.slane %v9425_v5, 2  ;;  %v18932_v31 = vmax.f32 %v9399_v19, %v9400_v14  ;;  %v9439_v61 = vmax.f32 %v9437_v62, %v9438_v16 }
 0x844   : > { %v9420_v22 = vmax.f32 %v9418_v33, %v9419_v24  ;;  %v9432_v60 = vmax.f32 %v9430_v38, %v9431_v0  ;;  %v9445_v59 = vrot.slane %v9444_v48, 4  ;;  %21154 = vst [vmem:[#allocation153_spill] sm:$0xff] %v18930_v12  ;;  %v9451_v56 = vsel %vm8456_vm11, %v17864_v39, -inf  ;;  %v21158_v0 = vld [vmem:[#allocation110_spill] sm:$0xff] }
 0x845   : > { %21155 = vst [vmem:[#allocation261_spill] sm:$0xff] %v18932_v31  ;;  %v9414_v28 = vrot.slane %v9413_v3, 1  ;;  %v9427_v36 = vmax.f32 %v9425_v5, %v9426_v25  ;;  %v9440_v40 = vrot.slane %v9439_v61, 2  ;;  %v9452_v1 = vrot.slane %v9451_v56, 4 }
 0x846   : > { %v9433_v32 = vrot.slane %v9432_v60, 2  ;;  %v9446_v29 = vmax.f32 %v9444_v48, %v9445_v59  ;;  %v9421_v44 = vrot.slane %v9420_v22, 1  ;;  %v21156_v33 = vcombine.high %v17864_v39, %v17864_v39 }
 0x847   : > { %v18940_v41 = vmax.f32 %v9406_v47, %v9407_v51  ;;  %v9428_v19 = vrot.slane %v9427_v36, 1  ;;  %v9441_v14 = vmax.f32 %v9439_v61, %v9440_v40  ;;  %v9453_v62 = vmax.f32 %v9451_v56, %v9452_v1  ;;  %v21163_v40 = vld [vmem:[#allocation111_spill] sm:$0xff] }
 0x848   : > { %v9458_v38 = vsel %vm8456_vm11, %v21156_v33, -inf  ;;  %v9434_v42 = vmax.f32 %v9432_v60, %v9433_v32  ;;  %v9447_v16 = vrot.slane %v9446_v29, 2  ;;  %v9465_v5 = vsel %vm8456_vm11, %v21158_v0, -inf }
 0x849   : > { %21157 = vst [vmem:[#allocation262_spill] sm:$0xff] %v18940_v41  ;;  %v9459_v24 = vrot.slane %v9458_v38, 4  ;;  %v18944_v45 = vmax.f32 %v9413_v3, %v9414_v28  ;;  %v9466_v59 = vrot.slane %v9465_v5, 4  ;;  %v18946_v31 = vmax.f32 %v9420_v22, %v9421_v44 }
 0x84a   : > { %v9435_v48 = vrot.slane %v9434_v42, 1  ;;  %v9448_v25 = vmax.f32 %v9446_v29, %v9447_v16  ;;  %v9454_v39 = vrot.slane %v9453_v62, 2  ;;  %v21161_v47 = vcombine.high %v21158_v0, %v21158_v0 }
 0x84b   : > { %21159 = vst [vmem:[#allocation110_spill] sm:$0xff] %v18944_v45  ;;  %21160 = vst [vmem:[#allocation263_spill] sm:$0xff] %v18946_v31  ;;  %v9460_v33 = vmax.f32 %v9458_v38, %v9459_v24  ;;  %v18952_v60 = vmax.f32 %v9427_v36, %v9428_v19  ;;  %v9442_v1 = vrot.slane %v9441_v14, 1  ;;  %v9467_v61 = vmax.f32 %v9465_v5, %v9466_v59  ;;  %v21166_v5 = vld [vmem:[#allocation154_spill] sm:$0xff] }
 0x84c   : > { %v9472_v51 = vsel %vm8456_vm11, %v21161_v47, -inf  ;;  %v9449_v32 = vrot.slane %v9448_v25, 1  ;;  %v9455_v3 = vmax.f32 %v9453_v62, %v9454_v39  ;;  %v9479_v29 = vsel %vm8456_vm11, %v21163_v40, -inf }
 0x84d   : > { %21162 = vst [vmem:[#allocation264_spill] sm:$0xff] %v18952_v60  ;;  %v9473_v56 = vrot.slane %v9472_v51, 4  ;;  %v9461_v28 = vrot.slane %v9460_v33, 2  ;;  %v18956_v44 = vmax.f32 %v9434_v42, %v9435_v48  ;;  %v9468_v22 = vrot.slane %v9467_v61, 2 }
 0x84e   : > { %v9480_v16 = vrot.slane %v9479_v29, 4  ;;  %v9456_v24 = vrot.slane %v9455_v3, 1  ;;  %v21165_v36 = vcombine.high %v21163_v40, %v21163_v40  ;;  %v9493_v59 = vsel %vm8456_vm11, %v21166_v5, -inf }
 0x84f   : > { %21164 = vst [vmem:[#allocation111_spill] sm:$0xff] %v18956_v44  ;;  %v9474_v38 = vmax.f32 %v9472_v51, %v9473_v56  ;;  %v9462_v0 = vmax.f32 %v9460_v33, %v9461_v28  ;;  %v9469_v62 = vmax.f32 %v9467_v61, %v9468_v22  ;;  %v18964_v60 = vmax.f32 %v9441_v14, %v9442_v1 }
 0x850   : > { %v9486_v19 = vsel %vm8456_vm11, %v21165_v36, -inf  ;;  %v9481_v47 = vmax.f32 %v9479_v29, %v9480_v16  ;;  %v18966_v42 = vmax.f32 %v9448_v25, %v9449_v32  ;;  %v9494_v48 = vrot.slane %v9493_v59, 4  ;;  %v21171_v29 = vld [vmem:[#allocation155_spill] sm:$0xff] }
 0x851   : > { %v9475_v39 = vrot.slane %v9474_v38, 2  ;;  %v9487_v41 = vrot.slane %v9486_v19, 4  ;;  %21167 = vst [vmem:[#allocation154_spill] sm:$0xff] %v18964_v60  ;;  %v21169_v33 = vcombine.high %v21166_v5, %v21166_v5  ;;  %v9463_v56 = vrot.slane %v9462_v0, 1 }
 0x852   : > { %21168 = vst [vmem:[#allocation265_spill] sm:$0xff] %v18966_v42  ;;  %v9482_v40 = vrot.slane %v9481_v47, 2  ;;  %v18972_v44 = vmax.f32 %v9455_v3, %v9456_v24  ;;  %v9495_v61 = vmax.f32 %v9493_v59, %v9494_v48  ;;  %v9507_v14 = vsel %vm8456_vm11, %v21171_v29, -inf }
 0x853   : > { %v9500_v51 = vsel %vm8456_vm11, %v21169_v33, -inf  ;;  %v9476_v28 = vmax.f32 %v9474_v38, %v9475_v39  ;;  %v9488_v36 = vmax.f32 %v9486_v19, %v9487_v41  ;;  %v9470_v1 = vrot.slane %v9469_v62, 1 }
 0x854   : > { %21170 = vst [vmem:[#allocation266_spill] sm:$0xff] %v18972_v44  ;;  %v9501_v22 = vrot.slane %v9500_v51, 4  ;;  %v9483_v32 = vmax.f32 %v9481_v47, %v9482_v40  ;;  %v9496_v42 = vrot.slane %v9495_v61, 2  ;;  %v9508_v5 = vrot.slane %v9507_v14, 4  ;;  %v21174_v44 = vld [vmem:[#allocation112_spill] sm:$0xff] }
 0x855   : > { %v9477_v25 = vrot.slane %v9476_v28, 1  ;;  %v9489_v16 = vrot.slane %v9488_v36, 2  ;;  %v21172_v33 = vcombine.high %v21171_v29, %v21171_v29  ;;  %v18980_v41 = vmax.f32 %v9462_v0, %v9463_v56 }
 0x856   : > { %v9502_v60 = vmax.f32 %v9500_v51, %v9501_v22  ;;  %v9484_v3 = vrot.slane %v9483_v32, 1  ;;  %v9497_v59 = vmax.f32 %v9495_v61, %v9496_v42  ;;  %v9509_v48 = vmax.f32 %v9507_v14, %v9508_v5 }
 0x857   : > { %v9514_v38 = vsel %vm8456_vm11, %v21172_v33, -inf  ;;  %21173 = vst [vmem:[#allocation155_spill] sm:$0xff] %v18980_v41  ;;  %v9490_v24 = vmax.f32 %v9488_v36, %v9489_v16  ;;  %v9521_v47 = vsel %vm8456_vm11, %v21174_v44, -inf  ;;  %v18984_v40 = vmax.f32 %v9469_v62, %v9470_v1 }
 0x858   : > { %v9515_v19 = vrot.slane %v9514_v38, 4  ;;  %v9503_v39 = vrot.slane %v9502_v60, 2  ;;  %v18986_v51 = vmax.f32 %v9476_v28, %v9477_v25  ;;  %v9522_v31 = vrot.slane %v9521_v47, 4  ;;  %v21179_v28 = vld [vmem:[#allocation116_spill] sm:$0xff] }
 0x859   : > { %21175 = vst [vmem:[#allocation112_spill] sm:$0xff] %v18984_v40  ;;  %v9491_v29 = vrot.slane %v9490_v24, 1  ;;  %v9510_v33 = vrot.slane %v9509_v48, 2  ;;  %v21177_v0 = vcombine.high %v21174_v44, %v21174_v44  ;;  %v18992_v42 = vmax.f32 %v9483_v32, %v9484_v3 }
 0x85a   : > { %21176 = vst [vmem:[#allocation267_spill] sm:$0xff] %v18986_v51  ;;  %v9516_v22 = vmax.f32 %v9514_v38, %v9515_v19  ;;  %v9504_v45 = vmax.f32 %v9502_v60, %v9503_v39  ;;  %v9523_v61 = vmax.f32 %v9521_v47, %v9522_v31  ;;  %v9498_v16 = vrot.slane %v9497_v59, 1  ;;  %v21182_v31 = vld [vmem:[#allocation156_spill] sm:$0xff] }
 0x85b   : > { %v9528_v56 = vsel %vm8456_vm11, %v21177_v0, -inf  ;;  %21178 = vst [vmem:[#allocation268_spill] sm:$0xff] %v18992_v42  ;;  %v9511_v1 = vmax.f32 %v9509_v48, %v9510_v33  ;;  %v9535_v25 = vsel %vm8456_vm11, %v21179_v28, -inf  ;;  %v18996_v39 = vmax.f32 %v9490_v24, %v9491_v29 }
 0x85c   : > { %v9517_v36 = vrot.slane %v9516_v22, 2  ;;  %v9529_v14 = vrot.slane %v9528_v56, 4  ;;  %v9505_v62 = vrot.slane %v9504_v45, 1  ;;  %v9524_v38 = vrot.slane %v9523_v61, 2 }
 0x85d   : > { %v9536_v19 = vrot.slane %v9535_v25, 4  ;;  %21180 = vst [vmem:[#allocation116_spill] sm:$0xff] %v18996_v39  ;;  %v9512_v44 = vrot.slane %v9511_v1, 1  ;;  %v21181_v32 = vcombine.high %v21179_v28, %v21179_v28  ;;  %v9549_v47 = vsel %vm8456_vm11, %v21182_v31, -inf }
 0x85e   : > { %v9518_v5 = vmax.f32 %v9516_v22, %v9517_v36  ;;  %v9530_v60 = vmax.f32 %v9528_v56, %v9529_v14  ;;  %v9525_v48 = vmax.f32 %v9523_v61, %v9524_v38  ;;  %v19004_v42 = vmax.f32 %v9497_v59, %v9498_v16  ;;  %v21187_v38 = vld [vmem:[#allocation157_spill] sm:$0xff] }
 0x85f   : > { %v9542_v3 = vsel %vm8456_vm11, %v21181_v32, -inf  ;;  %v9537_v41 = vmax.f32 %v9535_v25, %v9536_v19  ;;  %v9550_v56 = vrot.slane %v9549_v47, 4  ;;  %v21184_v24 = vcombine.high %v21182_v31, %v21182_v31 }
 0x860   : > { %v9519_v0 = vrot.slane %v9518_v5, 1  ;;  %v9531_v33 = vrot.slane %v9530_v60, 2  ;;  %21183 = vst [vmem:[#allocation156_spill] sm:$0xff] %v19004_v42  ;;  %v9543_v22 = vrot.slane %v9542_v3, 4  ;;  %v19010_v36 = vmax.f32 %v9504_v45, %v9505_v62 }
 0x861   : > { %v9556_v29 = vsel %vm8456_vm11, %v21184_v24, -inf  ;;  %v19012_v14 = vmax.f32 %v9511_v1, %v9512_v44  ;;  %v9538_v32 = vrot.slane %v9537_v41, 2  ;;  %v9551_v51 = vmax.f32 %v9549_v47, %v9550_v56 }
 0x862   : > { %21185 = vst [vmem:[#allocation269_spill] sm:$0xff] %v19010_v36  ;;  %v9532_v28 = vmax.f32 %v9530_v60, %v9531_v33  ;;  %v9544_v39 = vmax.f32 %v9542_v3, %v9543_v22  ;;  %v9557_v61 = vrot.slane %v9556_v29, 4  ;;  %v9563_v59 = vsel %vm8456_vm11, %v21187_v38, -inf }
 0x863   : > { %21186 = vst [vmem:[#allocation270_spill] sm:$0xff] %v19012_v14  ;;  %v19016_v16 = vmax.f32 %v9518_v5, %v9519_v0  ;;  %v9526_v25 = vrot.slane %v9525_v48, 1  ;;  %v9539_v19 = vmax.f32 %v9537_v41, %v9538_v32  ;;  %v9564_v42 = vrot.slane %v9563_v59, 4  ;;  %v21190_v5 = vld [vmem:[#allocation158_spill] sm:$0xff] }
 0x864   : > { %v9545_v31 = vrot.slane %v9544_v39, 2  ;;  %v9552_v40 = vrot.slane %v9551_v51, 2  ;;  %v9558_v24 = vmax.f32 %v9556_v29, %v9557_v61  ;;  %v21189_v45 = vcombine.high %v21187_v38, %v21187_v38 }
 0x865   : > { %21188 = vst [vmem:[#allocation157_spill] sm:$0xff] %v19016_v16  ;;  %v9533_v1 = vrot.slane %v9532_v28, 1  ;;  %v9540_v60 = vrot.slane %v9539_v19, 1  ;;  %v9565_v44 = vmax.f32 %v9563_v59, %v9564_v42  ;;  %v9577_v0 = vsel %vm8456_vm11, %v21190_v5, -inf }
 0x866   : > { %v9570_v62 = vsel %vm8456_vm11, %v21189_v45, -inf  ;;  %v9546_v47 = vmax.f32 %v9544_v39, %v9545_v31  ;;  %v9553_v33 = vmax.f32 %v9551_v51, %v9552_v40  ;;  %v9559_v22 = vrot.slane %v9558_v24, 2 }
 0x867   : > { %v9571_v3 = vrot.slane %v9570_v62, 4  ;;  %v19024_v41 = vmax.f32 %v9525_v48, %v9526_v25  ;;  %v9566_v56 = vrot.slane %v9565_v44, 2  ;;  %v9578_v29 = vrot.slane %v9577_v0, 4  ;;  %v21195_v25 = vld [vmem:[#allocation159_spill] sm:$0xff] }
 0x868   : > { %v9547_v61 = vrot.slane %v9546_v47, 1  ;;  %v9554_v16 = vrot.slane %v9553_v33, 1  ;;  %v9560_v38 = vmax.f32 %v9558_v24, %v9559_v22  ;;  %v21192_v45 = vcombine.high %v21190_v5, %v21190_v5 }
 0x869   : > { %21191 = vst [vmem:[#allocation158_spill] sm:$0xff] %v19024_v41  ;;  %v9572_v32 = vmax.f32 %v9570_v62, %v9571_v3  ;;  %v9567_v59 = vmax.f32 %v9565_v44, %v9566_v56  ;;  %v9579_v40 = vmax.f32 %v9577_v0, %v9578_v29  ;;  %v19030_v31 = vmax.f32 %v9532_v28, %v9533_v1  ;;  %v21198_v28 = vld [vmem:[#allocation160_spill] sm:$0xff] }
 0x86a   : > { %v9584_v42 = vsel %vm8456_vm11, %v21192_v45, -inf  ;;  %v19032_v14 = vmax.f32 %v9539_v19, %v9540_v60  ;;  %v9561_v48 = vrot.slane %v9560_v38, 1  ;;  %v9591_v62 = vsel %vm8456_vm11, %v21195_v25, -inf }
 0x86b   : > { %v9573_v39 = vrot.slane %v9572_v32, 2  ;;  %v9585_v51 = vrot.slane %v9584_v42, 4  ;;  %21193 = vst [vmem:[#allocation271_spill] sm:$0xff] %v19030_v31  ;;  %v9568_v3 = vrot.slane %v9567_v59, 1  ;;  %v9580_v24 = vrot.slane %v9579_v40, 2 }
 0x86c   : > { %21194 = vst [vmem:[#allocation272_spill] sm:$0xff] %v19032_v14  ;;  %v19036_v41 = vmax.f32 %v9546_v47, %v9547_v61  ;;  %v9592_v5 = vrot.slane %v9591_v62, 4  ;;  %v21197_v44 = vcombine.high %v21195_v25, %v21195_v25  ;;  %v9605_v19 = vsel %vm8456_vm11, %v21198_v28, -inf }
 0x86d   : > { %v9574_v36 = vmax.f32 %v9572_v32, %v9573_v39  ;;  %v9586_v22 = vmax.f32 %v9584_v42, %v9585_v51  ;;  %v19044_v1 = vmax.f32 %v9553_v33, %v9554_v16  ;;  %v9581_v56 = vmax.f32 %v9579_v40, %v9580_v24 }
 0x86e   : > { %21196 = vst [vmem:[#allocation159_spill] sm:$0xff] %v19036_v41  ;;  %v9598_v0 = vsel %vm8456_vm11, %v21197_v44, -inf  ;;  %v9593_v45 = vmax.f32 %v9591_v62, %v9592_v5  ;;  %v9606_v39 = vrot.slane %v9605_v19, 4  ;;  %v21200_v47 = vcombine.high %v21198_v28, %v21198_v28 }
 0x86f   : > { %21199 = vst [vmem:[#allocation160_spill] sm:$0xff] %v19044_v1  ;;  %v9575_v60 = vrot.slane %v9574_v36, 1  ;;  %v9587_v29 = vrot.slane %v9586_v22, 2  ;;  %v9599_v32 = vrot.slane %v9598_v0, 4  ;;  %v19050_v42 = vmax.f32 %v9560_v38, %v9561_v48  ;;  %v21203_v1 = vld [vmem:[#allocation161_spill] sm:$0xff] }
 0x870   : > { %v9612_v61 = vsel %vm8456_vm11, %v21200_v47, -inf  ;;  %v19052_v51 = vmax.f32 %v9567_v59, %v9568_v3  ;;  %v9594_v41 = vrot.slane %v9593_v45, 2  ;;  %v9607_v33 = vmax.f32 %v9605_v19, %v9606_v39 }
 0x871   : > { %21201 = vst [vmem:[#allocation273_spill] sm:$0xff] %v19050_v42  ;;  %v9588_v25 = vmax.f32 %v9586_v22, %v9587_v29  ;;  %v9613_v44 = vrot.slane %v9612_v61, 4  ;;  %v9600_v16 = vmax.f32 %v9598_v0, %v9599_v32  ;;  %v9619_v40 = vsel %vm8456_vm11, %v21203_v1, -inf }
 0x872   : > { %21202 = vst [vmem:[#allocation274_spill] sm:$0xff] %v19052_v51  ;;  %v19056_v62 = vmax.f32 %v9574_v36, %v9575_v60  ;;  %v9582_v24 = vrot.slane %v9581_v56, 1  ;;  %v9620_v14 = vrot.slane %v9619_v40, 4  ;;  %v9595_v28 = vmax.f32 %v9593_v45, %v9594_v41  ;;  %v21206_v36 = vld [vmem:[#allocation162_spill] sm:$0xff] }
 0x873   : > { %v9614_v5 = vmax.f32 %v9612_v61, %v9613_v44  ;;  %v9601_v31 = vrot.slane %v9600_v16, 2  ;;  %v9608_v47 = vrot.slane %v9607_v33, 2  ;;  %v21205_v38 = vcombine.high %v21203_v1, %v21203_v1 }
 0x874   : > { %21204 = vst [vmem:[#allocation161_spill] sm:$0xff] %v19056_v62  ;;  %v9589_v48 = vrot.slane %v9588_v25, 1  ;;  %v9621_v22 = vmax.f32 %v9619_v40, %v9620_v14  ;;  %v9596_v19 = vrot.slane %v9595_v28, 1  ;;  %v9633_v60 = vsel %vm8456_vm11, %v21206_v36, -inf }
 0x875   : > { %v9626_v59 = vsel %vm8456_vm11, %v21205_v38, -inf  ;;  %v9615_v3 = vrot.slane %v9614_v5, 2  ;;  %v9602_v29 = vmax.f32 %v9600_v16, %v9601_v31  ;;  %v9609_v32 = vmax.f32 %v9607_v33, %v9608_v47 }
 0x876   : > { %v9627_v0 = vrot.slane %v9626_v59, 4  ;;  %v9622_v61 = vrot.slane %v9621_v22, 2  ;;  %v9634_v45 = vrot.slane %v9633_v60, 4  ;;  %v19064_v44 = vmax.f32 %v9581_v56, %v9582_v24 }
 0x877   : > { %v9616_v39 = vmax.f32 %v9614_v5, %v9615_v3  ;;  %v9603_v62 = vrot.slane %v9602_v29, 1  ;;  %v9610_v1 = vrot.slane %v9609_v32, 1  ;;  %v21208_v38 = vcombine.high %v21206_v36, %v21206_v36 }
 0x878   : > { %v9628_v41 = vmax.f32 %v9626_v59, %v9627_v0  ;;  %21207 = vst [vmem:[#allocation162_spill] sm:$0xff] %v19064_v44  ;;  %v9623_v51 = vmax.f32 %v9621_v22, %v9622_v61  ;;  %v9635_v16 = vmax.f32 %v9633_v60, %v9634_v45  ;;  %v19070_v33 = vmax.f32 %v9588_v25, %v9589_v48  ;;  %v21211_v59 = vld [vmem:[#allocation163_spill] sm:$0xff]  ;;  %v21214_v25 = vld [vmem:[#allocation164_spill] sm:$0xff] }
 0x879   : > { %v9640_v14 = vsel %vm8456_vm11, %v21208_v38, -inf  ;;  %v9617_v40 = vrot.slane %v9616_v39, 1  ;;  %v19072_v47 = vmax.f32 %v9595_v28, %v9596_v19  ;;  %v9647_v56 = vsel %vm8456_vm11, %v21211_v59, -inf }
 0x87a   : > { %v9629_v31 = vrot.slane %v9628_v41, 2  ;;  %21209 = vst [vmem:[#allocation275_spill] sm:$0xff] %v19070_v33  ;;  %v9641_v5 = vrot.slane %v9640_v14, 4  ;;  %v19076_v24 = vmax.f32 %v9602_v29, %v9603_v62  ;;  %v9624_v3 = vrot.slane %v9623_v51, 1 }
 0x87b   : > { %21210 = vst [vmem:[#allocation276_spill] sm:$0xff] %v19072_v47  ;;  %v9636_v42 = vrot.slane %v9635_v16, 2  ;;  %v9648_v44 = vrot.slane %v9647_v56, 4  ;;  %v21213_v22 = vcombine.high %v21211_v59, %v21211_v59  ;;  %v9661_v28 = vsel %vm8456_vm11, %v21214_v25, -inf }
 0x87c   : > { %21212 = vst [vmem:[#allocation163_spill] sm:$0xff] %v19076_v24  ;;  %v9630_v0 = vmax.f32 %v9628_v41, %v9629_v31  ;;  %v9642_v36 = vmax.f32 %v9640_v14, %v9641_v5  ;;  %v19084_v48 = vmax.f32 %v9609_v32, %v9610_v1  ;;  %v19086_v19 = vmax.f32 %v9616_v39, %v9617_v40  ;;  %v21219_v39 = vld [vmem:[#allocation165_spill] sm:$0xff] }
 0x87d   : > { %v9654_v60 = vsel %vm8456_vm11, %v21213_v22, -inf  ;;  %v9637_v61 = vmax.f32 %v9635_v16, %v9636_v42  ;;  %v9649_v45 = vmax.f32 %v9647_v56, %v9648_v44  ;;  %v9662_v41 = vrot.slane %v9661_v28, 4 }
 0x87e   : > { %21215 = vst [vmem:[#allocation164_spill] sm:$0xff] %v19084_v48  ;;  %21216 = vst [vmem:[#allocation277_spill] sm:$0xff] %v19086_v19  ;;  %v9655_v62 = vrot.slane %v9654_v60, 4  ;;  %v9643_v29 = vrot.slane %v9642_v36, 2  ;;  %v21217_v38 = vcombine.high %v21214_v25, %v21214_v25  ;;  %v19092_v31 = vmax.f32 %v9623_v51, %v9624_v3 }
 0x87f   : > { %v9631_v5 = vrot.slane %v9630_v0, 1  ;;  %v9650_v32 = vrot.slane %v9649_v45, 2  ;;  %v9663_v1 = vmax.f32 %v9661_v28, %v9662_v41  ;;  %v9675_v42 = vsel %vm8456_vm11, %v21219_v39, -inf }
 0x880   : > { %v9668_v14 = vsel %vm8456_vm11, %v21217_v38, -inf  ;;  %21218 = vst [vmem:[#allocation278_spill] sm:$0xff] %v19092_v31  ;;  %v9656_v59 = vmax.f32 %v9654_v60, %v9655_v62  ;;  %v9644_v24 = vmax.f32 %v9642_v36, %v9643_v29  ;;  %v9638_v40 = vrot.slane %v9637_v61, 1  ;;  %v21222_v31 = vld [vmem:[#allocation166_spill] sm:$0xff] }
 0x881   : > { %v9669_v22 = vrot.slane %v9668_v14, 4  ;;  %v9676_v56 = vrot.slane %v9675_v42, 4  ;;  %v9651_v48 = vmax.f32 %v9649_v45, %v9650_v32  ;;  %v9664_v25 = vrot.slane %v9663_v1, 2 }
 0x882   : > { %v9657_v16 = vrot.slane %v9656_v59, 2  ;;  %v9645_v19 = vrot.slane %v9644_v24, 1  ;;  %v21220_v51 = vcombine.high %v21219_v39, %v21219_v39  ;;  %v19100_v28 = vmax.f32 %v9630_v0, %v9631_v5 }
 0x883   : > { %v9670_v44 = vmax.f32 %v9668_v14, %v9669_v22  ;;  %v9677_v36 = vmax.f32 %v9675_v42, %v9676_v56  ;;  %v9652_v41 = vrot.slane %v9651_v48, 1  ;;  %v9665_v38 = vmax.f32 %v9663_v1, %v9664_v25 }
 0x884   : > { %v9682_v3 = vsel %vm8456_vm11, %v21220_v51, -inf  ;;  %v9658_v60 = vmax.f32 %v9656_v59, %v9657_v16  ;;  %21221 = vst [vmem:[#allocation165_spill] sm:$0xff] %v19100_v28  ;;  %v9689_v14 = vsel %vm8456_vm11, %v21222_v31, -inf  ;;  %v19104_v33 = vmax.f32 %v9637_v61, %v9638_v40  ;;  %v21227_v51 = vld [vmem:[#allocation167_spill] sm:$0xff] }
 0x885   : > { %v9671_v62 = vrot.slane %v9670_v44, 2  ;;  %v9683_v29 = vrot.slane %v9682_v3, 4  ;;  %v9678_v45 = vrot.slane %v9677_v36, 2  ;;  %v9666_v39 = vrot.slane %v9665_v38, 1 }
 0x886   : > { %v9659_v22 = vrot.slane %v9658_v60, 1  ;;  %21223 = vst [vmem:[#allocation166_spill] sm:$0xff] %v19104_v33  ;;  %v9690_v12 = vrot.slane %v9689_v14, 4  ;;  %v21224_v59 = vcombine.high %v21222_v31, %v21222_v31  ;;  %v19110_v0 = vmax.f32 %v9644_v24, %v9645_v19 }
 0x887   : > { %v9672_v47 = vmax.f32 %v9670_v44, %v9671_v62  ;;  %v9684_v32 = vmax.f32 %v9682_v3, %v9683_v29  ;;  %v9679_v1 = vmax.f32 %v9677_v36, %v9678_v45  ;;  %v19112_v56 = vmax.f32 %v9651_v48, %v9652_v41  ;;  %v21231_v48 = vld [vmem:[#allocation168_spill] sm:$0xff] }
 0x888   : > { %v9696_v42 = vsel %vm8456_vm11, %v21224_v59, -inf  ;;  %21225 = vst [vmem:[#allocation279_spill] sm:$0xff] %v19110_v0  ;;  %v9691_v25 = vmax.f32 %v9689_v14, %v9690_v12  ;;  %v9703_v61 = vsel %vm8456_vm11, %v21227_v51, -inf  ;;  %v19116_v40 = vmax.f32 %v9658_v60, %v9659_v22 }
 0x889   : > { %v9673_v5 = vrot.slane %v9672_v47, 1  ;;  %v9685_v16 = vrot.slane %v9684_v32, 2  ;;  %21226 = vst [vmem:[#allocation280_spill] sm:$0xff] %v19112_v56  ;;  %v9697_v44 = vrot.slane %v9696_v42, 4  ;;  %v19118_v3 = vmax.f32 %v9665_v38, %v9666_v39 }
 0x88a   : > { %21228 = vst [vmem:[#allocation167_spill] sm:$0xff] %v19116_v40  ;;  %v9704_v31 = vrot.slane %v9703_v61, 4  ;;  %v9692_v29 = vrot.slane %v9691_v25, 2  ;;  %v21230_v24 = vcombine.high %v21227_v51, %v21227_v51  ;;  %v9717_v12 = vsel %vm8456_vm11, %v21231_v48, -inf }
 0x88b   : > { %21229 = vst [vmem:[#allocation281_spill] sm:$0xff] %v19118_v3  ;;  %v9686_v62 = vmax.f32 %v9684_v32, %v9685_v16  ;;  %v9698_v59 = vmax.f32 %v9696_v42, %v9697_v44  ;;  %v19126_v36 = vmax.f32 %v9672_v47, %v9673_v5  ;;  %v9680_v41 = vrot.slane %v9679_v1, 1  ;;  %v21234_v47 = vld [vmem:[#allocation169_spill] sm:$0xff] }
 0x88c   : > { %v9710_v19 = vsel %vm8456_vm11, %v21230_v24, -inf  ;;  %v9705_v14 = vmax.f32 %v9703_v61, %v9704_v31  ;;  %v9693_v22 = vmax.f32 %v9691_v25, %v9692_v29  ;;  %v9718_v45 = vrot.slane %v9717_v12, 4 }
 0x88d   : > { %21232 = vst [vmem:[#allocation168_spill] sm:$0xff] %v19126_v36  ;;  %v9711_v60 = vrot.slane %v9710_v19, 4  ;;  %v9699_v38 = vrot.slane %v9698_v59, 2  ;;  %v21233_v32 = vcombine.high %v21231_v48, %v21231_v48  ;;  %v9687_v42 = vrot.slane %v9686_v62, 1 }
 0x88e   : > { %v9706_v16 = vrot.slane %v9705_v14, 2  ;;  %v9694_v24 = vrot.slane %v9693_v22, 1  ;;  %v9719_v40 = vmax.f32 %v9717_v12, %v9718_v45  ;;  %v9731_v5 = vsel %vm8456_vm11, %v21234_v47, -inf }
 0x88f   : > { %v9724_v39 = vsel %vm8456_vm11, %v21233_v32, -inf  ;;  %v9712_v44 = vmax.f32 %v9710_v19, %v9711_v60  ;;  %v9700_v3 = vmax.f32 %v9698_v59, %v9699_v38  ;;  %v9732_v29 = vrot.slane %v9731_v5, 4 }
 0x890   : > { %v9725_v51 = vrot.slane %v9724_v39, 4  ;;  %v9707_v61 = vmax.f32 %v9705_v14, %v9706_v16  ;;  %v19134_v36 = vmax.f32 %v9679_v1, %v9680_v41  ;;  %v9720_v48 = vrot.slane %v9719_v40, 2  ;;  %v21238_v16 = vld [vmem:[#allocation170_spill] sm:$0xff] }
 0x891   : > { %v9713_v31 = vrot.slane %v9712_v44, 2  ;;  %v9701_v28 = vrot.slane %v9700_v3, 1  ;;  %v21236_v32 = vcombine.high %v21234_v47, %v21234_v47  ;;  %v9733_v12 = vmax.f32 %v9731_v5, %v9732_v29 }
 0x892   : > { %v9726_v25 = vmax.f32 %v9724_v39, %v9725_v51  ;;  %21235 = vst [vmem:[#allocation169_spill] sm:$0xff] %v19134_v36  ;;  %v9708_v60 = vrot.slane %v9707_v61, 1  ;;  %v19140_v38 = vmax.f32 %v9686_v62, %v9687_v42  ;;  %v9721_v45 = vmax.f32 %v9719_v40, %v9720_v48 }
 0x893   : > { %v9738_v19 = vsel %vm8456_vm11, %v21236_v32, -inf  ;;  %v9714_v56 = vmax.f32 %v9712_v44, %v9713_v31  ;;  %v9745_v39 = vsel %vm8456_vm11, %v21238_v16, -inf  ;;  %v19144_v1 = vmax.f32 %v9693_v22, %v9694_v24 }
 0x894   : > { %v9727_v59 = vrot.slane %v9726_v25, 2  ;;  %21237 = vst [vmem:[#allocation282_spill] sm:$0xff] %v19140_v38  ;;  %v9739_v14 = vrot.slane %v9738_v19, 4  ;;  %v9734_v36 = vrot.slane %v9733_v12, 2  ;;  %v19146_v0 = vmax.f32 %v9700_v3, %v9701_v28 }
 0x895   : > { %21239 = vst [vmem:[#allocation170_spill] sm:$0xff] %v19144_v1  ;;  %v9715_v41 = vrot.slane %v9714_v56, 1  ;;  %v9746_v32 = vrot.slane %v9745_v39, 4  ;;  %v21241_v44 = vcombine.high %v21238_v16, %v21238_v16  ;;  %v19152_v42 = vmax.f32 %v9707_v61, %v9708_v60 }
 0x896   : > { %v9728_v51 = vmax.f32 %v9726_v25, %v9727_v59  ;;  %21240 = vst [vmem:[#allocation283_spill] sm:$0xff] %v19146_v0  ;;  %v9740_v47 = vmax.f32 %v9738_v19, %v9739_v14  ;;  %v9722_v40 = vrot.slane %v9721_v45, 1  ;;  %v9735_v5 = vmax.f32 %v9733_v12, %v9734_v36  ;;  %v21244_v25 = vld [vmem:[#allocation171_spill] sm:$0xff]  ;;  %v21246_v36 = vld [vmem:[#allocation172_spill] sm:$0xff] }
 0x897   : > { %v9752_v62 = vsel %vm8456_vm11, %v21241_v44, -inf  ;;  %21242 = vst [vmem:[#allocation284_spill] sm:$0xff] %v19152_v42  ;;  %v19154_v29 = vmax.f32 %v9714_v56, %v9715_v41  ;;  %v9747_v24 = vmax.f32 %v9745_v39, %v9746_v32  ;;  %v9759_v28 = vsel %vm8456_vm11, %v21244_v25, -inf }
 0x898   : > { %v9753_v31 = vrot.slane %v9752_v62, 4  ;;  %v9741_v22 = vrot.slane %v9740_v47, 2  ;;  %v9729_v3 = vrot.slane %v9728_v51, 1  ;;  %v9736_v48 = vrot.slane %v9735_v5, 1 }
 0x899   : > { %21243 = vst [vmem:[#allocation285_spill] sm:$0xff] %v19154_v29  ;;  %v9760_v59 = vrot.slane %v9759_v28, 4  ;;  %v9748_v16 = vrot.slane %v9747_v24, 2  ;;  %v21245_v61 = vcombine.high %v21244_v25, %v21244_v25  ;;  %v9773_v56 = vsel %vm8456_vm11, %v21246_v36, -inf }
 0x89a   : > { %v9754_v19 = vmax.f32 %v9752_v62, %v9753_v31  ;;  %v9742_v14 = vmax.f32 %v9740_v47, %v9741_v22  ;;  %v19164_v12 = vmax.f32 %v9721_v45, %v9722_v40  ;;  %v9774_v29 = vrot.slane %v9773_v56, 4  ;;  %v21251_v40 = vld [vmem:[#allocation173_spill] sm:$0xff] }
 0x89b   : > { %v9766_v60 = vsel %vm8456_vm11, %v21245_v61, -inf  ;;  %v9761_v41 = vmax.f32 %v9759_v28, %v9760_v59  ;;  %v9749_v38 = vmax.f32 %v9747_v24, %v9748_v16  ;;  %v21248_v47 = vcombine.high %v21246_v36, %v21246_v36 }
 0x89c   : > { %21247 = vst [vmem:[#allocation171_spill] sm:$0xff] %v19164_v12  ;;  %v9755_v39 = vrot.slane %v9754_v19, 2  ;;  %v9767_v32 = vrot.slane %v9766_v60, 4  ;;  %v9743_v44 = vrot.slane %v9742_v14, 1  ;;  %v19170_v42 = vmax.f32 %v9728_v51, %v9729_v3 }
 0x89d   : > { %v9780_v62 = vsel %vm8456_vm11, %v21248_v47, -inf  ;;  %v9762_v22 = vrot.slane %v9761_v41, 2  ;;  %v19172_v0 = vmax.f32 %v9735_v5, %v9736_v48  ;;  %v9775_v45 = vmax.f32 %v9773_v56, %v9774_v29 }
 0x89e   : > { %v9756_v31 = vmax.f32 %v9754_v19, %v9755_v39  ;;  %v9768_v25 = vmax.f32 %v9766_v60, %v9767_v32  ;;  %v9781_v61 = vrot.slane %v9780_v62, 4  ;;  %21249 = vst [vmem:[#allocation172_spill] sm:$0xff] %v19170_v42  ;;  %v9787_v28 = vsel %vm8456_vm11, %v21251_v40, -inf  ;;  %v21254_v32 = vld [vmem:[#allocation174_spill] sm:$0xff] }
 0x89f   : > { %21250 = vst [vmem:[#allocation286_spill] sm:$0xff] %v19172_v0  ;;  %v9750_v59 = vrot.slane %v9749_v38, 1  ;;  %v9763_v24 = vmax.f32 %v9761_v41, %v9762_v22  ;;  %v9776_v36 = vrot.slane %v9775_v45, 2  ;;  %v9788_v33 = vrot.slane %v9787_v28, 4 }
 0x8a0   : > { %v9769_v16 = vrot.slane %v9768_v25, 2  ;;  %v9782_v12 = vmax.f32 %v9780_v62, %v9781_v61  ;;  %v9757_v1 = vrot.slane %v9756_v31, 1  ;;  %v21252_v19 = vcombine.high %v21251_v40, %v21251_v40 }
 0x8a1   : > { %v19180_v51 = vmax.f32 %v9742_v14, %v9743_v44  ;;  %v9764_v5 = vrot.slane %v9763_v24, 1  ;;  %v9777_v48 = vmax.f32 %v9775_v45, %v9776_v36  ;;  %v9789_v56 = vmax.f32 %v9787_v28, %v9788_v33  ;;  %v21259_v36 = vld [vmem:[#allocation175_spill] sm:$0xff] }
 0x8a2   : > { %v9794_v60 = vsel %vm8456_vm11, %v21252_v19, -inf  ;;  %v9770_v3 = vmax.f32 %v9768_v25, %v9769_v16  ;;  %v9783_v29 = vrot.slane %v9782_v12, 2  ;;  %v9801_v41 = vsel %vm8456_vm11, %v21254_v32, -inf }
 0x8a3   : > { %21253 = vst [vmem:[#allocation173_spill] sm:$0xff] %v19180_v51  ;;  %v9795_v39 = vrot.slane %v9794_v60, 4  ;;  %v19184_v47 = vmax.f32 %v9749_v38, %v9750_v59  ;;  %v9802_v61 = vrot.slane %v9801_v41, 4  ;;  %v19186_v0 = vmax.f32 %v9756_v31, %v9757_v1 }
 0x8a4   : > { %v9771_v62 = vrot.slane %v9770_v3, 1  ;;  %v9784_v22 = vmax.f32 %v9782_v12, %v9783_v29  ;;  %v9790_v40 = vrot.slane %v9789_v56, 2  ;;  %v21257_v14 = vcombine.high %v21254_v32, %v21254_v32 }
 0x8a5   : > { %21255 = vst [vmem:[#allocation174_spill] sm:$0xff] %v19184_v47  ;;  %21256 = vst [vmem:[#allocation287_spill] sm:$0xff] %v19186_v0  ;;  %v9796_v19 = vmax.f32 %v9794_v60, %v9795_v39  ;;  %v19192_v25 = vmax.f32 %v9763_v24, %v9764_v5  ;;  %v9778_v33 = vrot.slane %v9777_v48, 1  ;;  %v9803_v45 = vmax.f32 %v9801_v41, %v9802_v61  ;;  %v21262_v41 = vld [vmem:[#allocation176_spill] sm:$0xff] }
 0x8a6   : > { %v9808_v44 = vsel %vm8456_vm11, %v21257_v14, -inf  ;;  %v9785_v16 = vrot.slane %v9784_v22, 1  ;;  %v9791_v38 = vmax.f32 %v9789_v56, %v9790_v40  ;;  %v9815_v12 = vsel %vm8456_vm11, %v21259_v36, -inf }
 0x8a7   : > { %21258 = vst [vmem:[#allocation288_spill] sm:$0xff] %v19192_v25  ;;  %v9809_v28 = vrot.slane %v9808_v44, 4  ;;  %v9797_v59 = vrot.slane %v9796_v19, 2  ;;  %v19196_v1 = vmax.f32 %v9770_v3, %v9771_v62  ;;  %v9804_v31 = vrot.slane %v9803_v45, 2 }
 0x8a8   : > { %v9816_v29 = vrot.slane %v9815_v12, 4  ;;  %v9792_v39 = vrot.slane %v9791_v38, 1  ;;  %v21261_v24 = vcombine.high %v21259_v36, %v21259_v36  ;;  %v9829_v61 = vsel %vm8456_vm11, %v21262_v41, -inf }
 0x8a9   : > { %21260 = vst [vmem:[#allocation175_spill] sm:$0xff] %v19196_v1  ;;  %v9810_v60 = vmax.f32 %v9808_v44, %v9809_v28  ;;  %v9798_v32 = vmax.f32 %v9796_v19, %v9797_v59  ;;  %v9805_v56 = vmax.f32 %v9803_v45, %v9804_v31  ;;  %v19204_v42 = vmax.f32 %v9777_v48, %v9778_v33 }
 0x8aa   : > { %v9822_v5 = vsel %vm8456_vm11, %v21261_v24, -inf  ;;  %v9817_v14 = vmax.f32 %v9815_v12, %v9816_v29  ;;  %v19206_v3 = vmax.f32 %v9784_v22, %v9785_v16  ;;  %v9830_v62 = vrot.slane %v9829_v61, 4  ;;  %v21267_v12 = vld [vmem:[#allocation177_spill] sm:$0xff] }
 0x8ab   : > { %v9811_v40 = vrot.slane %v9810_v60, 2  ;;  %v9823_v51 = vrot.slane %v9822_v5, 4  ;;  %21263 = vst [vmem:[#allocation176_spill] sm:$0xff] %v19204_v42  ;;  %v21265_v19 = vcombine.high %v21262_v41, %v21262_v41  ;;  %v9799_v28 = vrot.slane %v9798_v32, 1 }
 0x8ac   : > { %21264 = vst [vmem:[#allocation289_spill] sm:$0xff] %v19206_v3  ;;  %v9818_v36 = vrot.slane %v9817_v14, 2  ;;  %v19212_v1 = vmax.f32 %v9791_v38, %v9792_v39  ;;  %v9831_v45 = vmax.f32 %v9829_v61, %v9830_v62  ;;  %v9843_v48 = vsel %vm8456_vm11, %v21267_v12, -inf }
 0x8ad   : > { %v9836_v44 = vsel %vm8456_vm11, %v21265_v19, -inf  ;;  %v9812_v59 = vmax.f32 %v9810_v60, %v9811_v40  ;;  %v9824_v24 = vmax.f32 %v9822_v5, %v9823_v51  ;;  %v9806_v33 = vrot.slane %v9805_v56, 1 }
 0x8ae   : > { %21266 = vst [vmem:[#allocation290_spill] sm:$0xff] %v19212_v1  ;;  %v9837_v31 = vrot.slane %v9836_v44, 4  ;;  %v9819_v16 = vmax.f32 %v9817_v14, %v9818_v36  ;;  %v9832_v3 = vrot.slane %v9831_v45, 2  ;;  %v9844_v41 = vrot.slane %v9843_v48, 4  ;;  %v21270_v1 = vld [vmem:[#allocation178_spill] sm:$0xff] }
 0x8af   : > { %v9813_v22 = vrot.slane %v9812_v59, 1  ;;  %v9825_v29 = vrot.slane %v9824_v24, 2  ;;  %v21268_v19 = vcombine.high %v21267_v12, %v21267_v12  ;;  %v19220_v51 = vmax.f32 %v9798_v32, %v9799_v28 }
 0x8b0   : > { %v9838_v42 = vmax.f32 %v9836_v44, %v9837_v31  ;;  %v9820_v38 = vrot.slane %v9819_v16, 1  ;;  %v9833_v61 = vmax.f32 %v9831_v45, %v9832_v3  ;;  %v9845_v62 = vmax.f32 %v9843_v48, %v9844_v41 }
 0x8b1   : > { %v9850_v60 = vsel %vm8456_vm11, %v21268_v19, -inf  ;;  %21269 = vst [vmem:[#allocation177_spill] sm:$0xff] %v19220_v51  ;;  %v9826_v39 = vmax.f32 %v9824_v24, %v9825_v29  ;;  %v9857_v14 = vsel %vm8456_vm11, %v21270_v1, -inf  ;;  %v19224_v36 = vmax.f32 %v9805_v56, %v9806_v33 }
 0x8b2   : > { %v9851_v5 = vrot.slane %v9850_v60, 4  ;;  %v9839_v40 = vrot.slane %v9838_v42, 2  ;;  %v19226_v44 = vmax.f32 %v9812_v59, %v9813_v22  ;;  %v9858_v25 = vrot.slane %v9857_v14, 4  ;;  %v21275_v59 = vld [vmem:[#allocation113_spill] sm:$0xff] }
 0x8b3   : > { %21271 = vst [vmem:[#allocation178_spill] sm:$0xff] %v19224_v36  ;;  %v9827_v12 = vrot.slane %v9826_v39, 1  ;;  %v9846_v19 = vrot.slane %v9845_v62, 2  ;;  %v21273_v32 = vcombine.high %v21270_v1, %v21270_v1  ;;  %v19232_v3 = vmax.f32 %v9819_v16, %v9820_v38 }
 0x8b4   : > { %21272 = vst [vmem:[#allocation291_spill] sm:$0xff] %v19226_v44  ;;  %v9852_v31 = vmax.f32 %v9850_v60, %v9851_v5  ;;  %v9840_v0 = vmax.f32 %v9838_v42, %v9839_v40  ;;  %v9859_v45 = vmax.f32 %v9857_v14, %v9858_v25  ;;  %v9834_v29 = vrot.slane %v9833_v61, 1  ;;  %v21278_v25 = vld [vmem:[#allocation179_spill] sm:$0xff] }
 0x8b5   : > { %v9864_v28 = vsel %vm8456_vm11, %v21273_v32, -inf  ;;  %21274 = vst [vmem:[#allocation292_spill] sm:$0xff] %v19232_v3  ;;  %v9847_v33 = vmax.f32 %v9845_v62, %v9846_v19  ;;  %v9871_v22 = vsel %vm8456_vm11, %v21275_v59, -inf  ;;  %v19236_v40 = vmax.f32 %v9826_v39, %v9827_v12 }
 0x8b6   : > { %v9853_v24 = vrot.slane %v9852_v31, 2  ;;  %v9865_v48 = vrot.slane %v9864_v28, 4  ;;  %v9841_v56 = vrot.slane %v9840_v0, 1  ;;  %v9860_v60 = vrot.slane %v9859_v45, 2 }
 0x8b7   : > { %v9872_v5 = vrot.slane %v9871_v22, 4  ;;  %21276 = vst [vmem:[#allocation113_spill] sm:$0xff] %v19236_v40  ;;  %v9848_v1 = vrot.slane %v9847_v33, 1  ;;  %v21277_v16 = vcombine.high %v21275_v59, %v21275_v59  ;;  %v9885_v14 = vsel %vm8456_vm11, %v21278_v25, -inf }
 0x8b8   : > { %v9854_v41 = vmax.f32 %v9852_v31, %v9853_v24  ;;  %v9866_v42 = vmax.f32 %v9864_v28, %v9865_v48  ;;  %v9861_v62 = vmax.f32 %v9859_v45, %v9860_v60  ;;  %v19244_v3 = vmax.f32 %v9833_v61, %v9834_v29  ;;  %v21283_v60 = vld [vmem:[#allocation180_spill] sm:$0xff] }
 0x8b9   : > { %v9878_v38 = vsel %vm8456_vm11, %v21277_v16, -inf  ;;  %v9873_v51 = vmax.f32 %v9871_v22, %v9872_v5  ;;  %v9886_v28 = vrot.slane %v9885_v14, 4  ;;  %v21280_v39 = vcombine.high %v21278_v25, %v21278_v25 }
 0x8ba   : > { %v9855_v32 = vrot.slane %v9854_v41, 1  ;;  %v9867_v19 = vrot.slane %v9866_v42, 2  ;;  %21279 = vst [vmem:[#allocation179_spill] sm:$0xff] %v19244_v3  ;;  %v9879_v31 = vrot.slane %v9878_v38, 4  ;;  %v19250_v24 = vmax.f32 %v9840_v0, %v9841_v56 }
 0x8bb   : > { %v9892_v12 = vsel %vm8456_vm11, %v21280_v39, -inf  ;;  %v19252_v48 = vmax.f32 %v9847_v33, %v9848_v1  ;;  %v9874_v16 = vrot.slane %v9873_v51, 2  ;;  %v9887_v44 = vmax.f32 %v9885_v14, %v9886_v28 }
 0x8bc   : > { %21281 = vst [vmem:[#allocation293_spill] sm:$0xff] %v19250_v24  ;;  %v9868_v59 = vmax.f32 %v9866_v42, %v9867_v19  ;;  %v9880_v40 = vmax.f32 %v9878_v38, %v9879_v31  ;;  %v9893_v45 = vrot.slane %v9892_v12, 4  ;;  %v9899_v61 = vsel %vm8456_vm11, %v21283_v60, -inf }
 0x8bd   : > { %21282 = vst [vmem:[#allocation294_spill] sm:$0xff] %v19252_v48  ;;  %v19256_v29 = vmax.f32 %v9854_v41, %v9855_v32  ;;  %v9862_v22 = vrot.slane %v9861_v62, 1  ;;  %v9875_v5 = vmax.f32 %v9873_v51, %v9874_v16  ;;  %v9900_v3 = vrot.slane %v9899_v61, 4  ;;  %v21286_v41 = vld [vmem:[#allocation181_spill] sm:$0xff] }
 0x8be   : > { %v9881_v25 = vrot.slane %v9880_v40, 2  ;;  %v9888_v36 = vrot.slane %v9887_v44, 2  ;;  %v9894_v39 = vmax.f32 %v9892_v12, %v9893_v45  ;;  %v21285_v0 = vcombine.high %v21283_v60, %v21283_v60 }
 0x8bf   : > { %21284 = vst [vmem:[#allocation180_spill] sm:$0xff] %v19256_v29  ;;  %v9869_v33 = vrot.slane %v9868_v59, 1  ;;  %v9876_v42 = vrot.slane %v9875_v5, 1  ;;  %v9901_v1 = vmax.f32 %v9899_v61, %v9900_v3  ;;  %v9913_v32 = vsel %vm8456_vm11, %v21286_v41, -inf }
 0x8c0   : > { %v9906_v56 = vsel %vm8456_vm11, %v21285_v0, -inf  ;;  %v9882_v14 = vmax.f32 %v9880_v40, %v9881_v25  ;;  %v9889_v19 = vmax.f32 %v9887_v44, %v9888_v36  ;;  %v9895_v31 = vrot.slane %v9894_v39, 2 }
 0x8c1   : > { %v9907_v38 = vrot.slane %v9906_v56, 4  ;;  %v19264_v51 = vmax.f32 %v9861_v62, %v9862_v22  ;;  %v9902_v28 = vrot.slane %v9901_v1, 2  ;;  %v9914_v12 = vrot.slane %v9913_v32, 4  ;;  %v21291_v22 = vld [vmem:[#allocation182_spill] sm:$0xff] }
 0x8c2   : > { %v9883_v45 = vrot.slane %v9882_v14, 1  ;;  %v9890_v29 = vrot.slane %v9889_v19, 1  ;;  %v9896_v60 = vmax.f32 %v9894_v39, %v9895_v31  ;;  %v21288_v0 = vcombine.high %v21286_v41, %v21286_v41 }
 0x8c3   : > { %21287 = vst [vmem:[#allocation181_spill] sm:$0xff] %v19264_v51  ;;  %v9908_v16 = vmax.f32 %v9906_v56, %v9907_v38  ;;  %v9903_v61 = vmax.f32 %v9901_v1, %v9902_v28  ;;  %v9915_v36 = vmax.f32 %v9913_v32, %v9914_v12  ;;  %v19270_v25 = vmax.f32 %v9868_v59, %v9869_v33  ;;  %v21294_v59 = vld [vmem:[#allocation183_spill] sm:$0xff] }
 0x8c4   : > { %v9920_v3 = vsel %vm8456_vm11, %v21288_v0, -inf  ;;  %v19272_v48 = vmax.f32 %v9875_v5, %v9876_v42  ;;  %v9897_v62 = vrot.slane %v9896_v60, 1  ;;  %v9927_v56 = vsel %vm8456_vm11, %v21291_v22, -inf }
 0x8c5   : > { %v9909_v40 = vrot.slane %v9908_v16, 2  ;;  %v9921_v44 = vrot.slane %v9920_v3, 4  ;;  %21289 = vst [vmem:[#allocation295_spill] sm:$0xff] %v19270_v25  ;;  %v9904_v38 = vrot.slane %v9903_v61, 1  ;;  %v9916_v39 = vrot.slane %v9915_v36, 2 }
 0x8c6   : > { %21290 = vst [vmem:[#allocation296_spill] sm:$0xff] %v19272_v48  ;;  %v19276_v24 = vmax.f32 %v9882_v14, %v9883_v45  ;;  %v9928_v41 = vrot.slane %v9927_v56, 4  ;;  %v21293_v1 = vcombine.high %v21291_v22, %v21291_v22  ;;  %v9941_v5 = vsel %vm8456_vm11, %v21294_v59, -inf }
 0x8c7   : > { %v9910_v51 = vmax.f32 %v9908_v16, %v9909_v40  ;;  %v9922_v31 = vmax.f32 %v9920_v3, %v9921_v44  ;;  %v19284_v33 = vmax.f32 %v9889_v19, %v9890_v29  ;;  %v9917_v28 = vmax.f32 %v9915_v36, %v9916_v39 }
 0x8c8   : > { %21292 = vst [vmem:[#allocation182_spill] sm:$0xff] %v19276_v24  ;;  %v9934_v32 = vsel %vm8456_vm11, %v21293_v1, -inf  ;;  %v9929_v0 = vmax.f32 %v9927_v56, %v9928_v41  ;;  %v9942_v40 = vrot.slane %v9941_v5, 4  ;;  %v21296_v14 = vcombine.high %v21294_v59, %v21294_v59 }
 0x8c9   : > { %21295 = vst [vmem:[#allocation183_spill] sm:$0xff] %v19284_v33  ;;  %v9911_v42 = vrot.slane %v9910_v51, 1  ;;  %v9923_v12 = vrot.slane %v9922_v31, 2  ;;  %v9935_v16 = vrot.slane %v9934_v32, 4  ;;  %v19290_v3 = vmax.f32 %v9896_v60, %v9897_v62  ;;  %v21299_v33 = vld [vmem:[#allocation184_spill] sm:$0xff] }
 0x8ca   : > { %v9948_v45 = vsel %vm8456_vm11, %v21296_v14, -inf  ;;  %v19292_v44 = vmax.f32 %v9903_v61, %v9904_v38  ;;  %v9930_v24 = vrot.slane %v9929_v0, 2  ;;  %v9943_v19 = vmax.f32 %v9941_v5, %v9942_v40 }
 0x8cb   : > { %21297 = vst [vmem:[#allocation297_spill] sm:$0xff] %v19290_v3  ;;  %v9924_v22 = vmax.f32 %v9922_v31, %v9923_v12  ;;  %v9949_v1 = vrot.slane %v9948_v45, 4  ;;  %v9936_v29 = vmax.f32 %v9934_v32, %v9935_v16  ;;  %v9955_v36 = vsel %vm8456_vm11, %v21299_v33, -inf }
 0x8cc   : > { %21298 = vst [vmem:[#allocation298_spill] sm:$0xff] %v19292_v44  ;;  %v19296_v56 = vmax.f32 %v9910_v51, %v9911_v42  ;;  %v9918_v39 = vrot.slane %v9917_v28, 1  ;;  %v9956_v48 = vrot.slane %v9955_v36, 4  ;;  %v9931_v59 = vmax.f32 %v9929_v0, %v9930_v24  ;;  %v21302_v51 = vld [vmem:[#allocation114_spill] sm:$0xff] }
 0x8cd   : > { %v9950_v41 = vmax.f32 %v9948_v45, %v9949_v1  ;;  %v9937_v25 = vrot.slane %v9936_v29, 2  ;;  %v9944_v14 = vrot.slane %v9943_v19, 2  ;;  %v21301_v60 = vcombine.high %v21299_v33, %v21299_v33 }
 0x8ce   : > { %21300 = vst [vmem:[#allocation184_spill] sm:$0xff] %v19296_v56  ;;  %v9925_v62 = vrot.slane %v9924_v22, 1  ;;  %v9957_v31 = vmax.f32 %v9955_v36, %v9956_v48  ;;  %v9932_v5 = vrot.slane %v9931_v59, 1  ;;  %v9969_v42 = vsel %vm8456_vm11, %v21302_v51, -inf }
 0x8cf   : > { %v9962_v61 = vsel %vm8456_vm11, %v21301_v60, -inf  ;;  %v9951_v38 = vrot.slane %v9950_v41, 2  ;;  %v9938_v12 = vmax.f32 %v9936_v29, %v9937_v25  ;;  %v9945_v16 = vmax.f32 %v9943_v19, %v9944_v14 }
 0x8d0   : > { %v9963_v32 = vrot.slane %v9962_v61, 4  ;;  %v9958_v45 = vrot.slane %v9957_v31, 2  ;;  %v9970_v0 = vrot.slane %v9969_v42, 4  ;;  %v19304_v1 = vmax.f32 %v9917_v28, %v9918_v39 }
 0x8d1   : > { %v9952_v40 = vmax.f32 %v9950_v41, %v9951_v38  ;;  %v9939_v56 = vrot.slane %v9938_v12, 1  ;;  %v9946_v33 = vrot.slane %v9945_v16, 1  ;;  %v21304_v60 = vcombine.high %v21302_v51, %v21302_v51 }
 0x8d2   : > { %v9964_v24 = vmax.f32 %v9962_v61, %v9963_v32  ;;  %21303 = vst [vmem:[#allocation114_spill] sm:$0xff] %v19304_v1  ;;  %v9959_v44 = vmax.f32 %v9957_v31, %v9958_v45  ;;  %v9971_v29 = vmax.f32 %v9969_v42, %v9970_v0  ;;  %v19310_v19 = vmax.f32 %v9924_v22, %v9925_v62  ;;  %v21307_v61 = vld [vmem:[#allocation185_spill] sm:$0xff]  ;;  %v21310_v22 = vld [vmem:[#allocation186_spill] sm:$0xff] }
 0x8d3   : > { %v9976_v48 = vsel %vm8456_vm11, %v21304_v60, -inf  ;;  %v9953_v36 = vrot.slane %v9952_v40, 1  ;;  %v19312_v14 = vmax.f32 %v9931_v59, %v9932_v5  ;;  %v9983_v28 = vsel %vm8456_vm11, %v21307_v61, -inf }
 0x8d4   : > { %v9965_v25 = vrot.slane %v9964_v24, 2  ;;  %21305 = vst [vmem:[#allocation299_spill] sm:$0xff] %v19310_v19  ;;  %v9977_v41 = vrot.slane %v9976_v48, 4  ;;  %v19316_v39 = vmax.f32 %v9938_v12, %v9939_v56  ;;  %v9960_v38 = vrot.slane %v9959_v44, 1 }
 0x8d5   : > { %21306 = vst [vmem:[#allocation300_spill] sm:$0xff] %v19312_v14  ;;  %v9972_v3 = vrot.slane %v9971_v29, 2  ;;  %v9984_v1 = vrot.slane %v9983_v28, 4  ;;  %v21309_v31 = vcombine.high %v21307_v61, %v21307_v61  ;;  %v9997_v59 = vsel %vm8456_vm11, %v21310_v22, -inf }
 0x8d6   : > { %21308 = vst [vmem:[#allocation185_spill] sm:$0xff] %v19316_v39  ;;  %v9966_v32 = vmax.f32 %v9964_v24, %v9965_v25  ;;  %v9978_v51 = vmax.f32 %v9976_v48, %v9977_v41  ;;  %v19324_v62 = vmax.f32 %v9945_v16, %v9946_v33  ;;  %v19326_v5 = vmax.f32 %v9952_v40, %v9953_v36  ;;  %v21315_v40 = vld [vmem:[#allocation115_spill] sm:$0xff] }
 0x8d7   : > { %v9990_v42 = vsel %vm8456_vm11, %v21309_v31, -inf  ;;  %v9973_v45 = vmax.f32 %v9971_v29, %v9972_v3  ;;  %v9985_v0 = vmax.f32 %v9983_v28, %v9984_v1  ;;  %v9998_v24 = vrot.slane %v9997_v59, 4 }
 0x8d8   : > { %21311 = vst [vmem:[#allocation186_spill] sm:$0xff] %v19324_v62  ;;  %21312 = vst [vmem:[#allocation301_spill] sm:$0xff] %v19326_v5  ;;  %v9991_v56 = vrot.slane %v9990_v42, 4  ;;  %v9979_v12 = vrot.slane %v9978_v51, 2  ;;  %v21313_v60 = vcombine.high %v21310_v22, %v21310_v22  ;;  %v19332_v25 = vmax.f32 %v9959_v44, %v9960_v38 }
 0x8d9   : > { %v9967_v41 = vrot.slane %v9966_v32, 1  ;;  %v9986_v16 = vrot.slane %v9985_v0, 2  ;;  %v9999_v33 = vmax.f32 %v9997_v59, %v9998_v24  ;;  %v10011_v3 = vsel %vm8456_vm11, %v21315_v40, -inf }
 0x8da   : > { %v10004_v48 = vsel %vm8456_vm11, %v21313_v60, -inf  ;;  %21314 = vst [vmem:[#allocation302_spill] sm:$0xff] %v19332_v25  ;;  %v9992_v61 = vmax.f32 %v9990_v42, %v9991_v56  ;;  %v9980_v39 = vmax.f32 %v9978_v51, %v9979_v12  ;;  %v9974_v36 = vrot.slane %v9973_v45, 1  ;;  %v21318_v25 = vld [vmem:[#allocation187_spill] sm:$0xff] }
 0x8db   : > { %v10005_v31 = vrot.slane %v10004_v48, 4  ;;  %v10012_v28 = vrot.slane %v10011_v3, 4  ;;  %v9987_v62 = vmax.f32 %v9985_v0, %v9986_v16  ;;  %v10000_v22 = vrot.slane %v9999_v33, 2 }
 0x8dc   : > { %v9993_v29 = vrot.slane %v9992_v61, 2  ;;  %v9981_v5 = vrot.slane %v9980_v39, 1  ;;  %v21316_v44 = vcombine.high %v21315_v40, %v21315_v40  ;;  %v19340_v59 = vmax.f32 %v9966_v32, %v9967_v41 }
 0x8dd   : > { %v10006_v1 = vmax.f32 %v10004_v48, %v10005_v31  ;;  %v10013_v51 = vmax.f32 %v10011_v3, %v10012_v28  ;;  %v9988_v24 = vrot.slane %v9987_v62, 1  ;;  %v10001_v60 = vmax.f32 %v9999_v33, %v10000_v22 }
 0x8de   : > { %v10018_v38 = vsel %vm8456_vm11, %v21316_v44, -inf  ;;  %v9994_v42 = vmax.f32 %v9992_v61, %v9993_v29  ;;  %21317 = vst [vmem:[#allocation115_spill] sm:$0xff] %v19340_v59  ;;  %v10025_v48 = vsel %vm8456_vm11, %v21318_v25, -inf  ;;  %v19344_v19 = vmax.f32 %v9973_v45, %v9974_v36  ;;  %v21323_v44 = vld [vmem:[#allocation188_spill] sm:$0xff] }
 0x8df   : > { %v10007_v56 = vrot.slane %v10006_v1, 2  ;;  %v10019_v12 = vrot.slane %v10018_v38, 4  ;;  %v10014_v0 = vrot.slane %v10013_v51, 2  ;;  %v10002_v40 = vrot.slane %v10001_v60, 1 }
 0x8e0   : > { %v9995_v31 = vrot.slane %v9994_v42, 1  ;;  %21319 = vst [vmem:[#allocation187_spill] sm:$0xff] %v19344_v19  ;;  %v10026_v47 = vrot.slane %v10025_v48, 4  ;;  %v21320_v61 = vcombine.high %v21318_v25, %v21318_v25  ;;  %v19350_v32 = vmax.f32 %v9980_v39, %v9981_v5 }
 0x8e1   : > { %v10008_v14 = vmax.f32 %v10006_v1, %v10007_v56  ;;  %v10020_v16 = vmax.f32 %v10018_v38, %v10019_v12  ;;  %v10015_v33 = vmax.f32 %v10013_v51, %v10014_v0  ;;  %v19352_v28 = vmax.f32 %v9987_v62, %v9988_v24  ;;  %v21327_v62 = vld [vmem:[#allocation189_spill] sm:$0xff] }
 0x8e2   : > { %v10032_v3 = vsel %vm8456_vm11, %v21320_v61, -inf  ;;  %21321 = vst [vmem:[#allocation303_spill] sm:$0xff] %v19350_v32  ;;  %v10027_v22 = vmax.f32 %v10025_v48, %v10026_v47  ;;  %v10039_v45 = vsel %vm8456_vm11, %v21323_v44, -inf  ;;  %v19356_v36 = vmax.f32 %v9994_v42, %v9995_v31 }
 0x8e3   : > { %v10009_v41 = vrot.slane %v10008_v14, 1  ;;  %v10021_v29 = vrot.slane %v10020_v16, 2  ;;  %21322 = vst [vmem:[#allocation304_spill] sm:$0xff] %v19352_v28  ;;  %v10033_v1 = vrot.slane %v10032_v3, 4  ;;  %v19358_v38 = vmax.f32 %v10001_v60, %v10002_v40 }
 0x8e4   : > { %21324 = vst [vmem:[#allocation188_spill] sm:$0xff] %v19356_v36  ;;  %v10040_v25 = vrot.slane %v10039_v45, 4  ;;  %v10028_v12 = vrot.slane %v10027_v22, 2  ;;  %v21326_v39 = vcombine.high %v21323_v44, %v21323_v44  ;;  %v10053_v47 = vsel %vm8456_vm11, %v21327_v62, -inf }
 0x8e5   : > { %21325 = vst [vmem:[#allocation305_spill] sm:$0xff] %v19358_v38  ;;  %v10022_v56 = vmax.f32 %v10020_v16, %v10021_v29  ;;  %v10034_v61 = vmax.f32 %v10032_v3, %v10033_v1  ;;  %v19366_v51 = vmax.f32 %v10008_v14, %v10009_v41  ;;  %v10016_v24 = vrot.slane %v10015_v33, 1  ;;  %v21330_v14 = vld [vmem:[#allocation190_spill] sm:$0xff] }
 0x8e6   : > { %v10046_v5 = vsel %vm8456_vm11, %v21326_v39, -inf  ;;  %v10041_v48 = vmax.f32 %v10039_v45, %v10040_v25  ;;  %v10029_v31 = vmax.f32 %v10027_v22, %v10028_v12  ;;  %v10054_v0 = vrot.slane %v10053_v47, 4 }
 0x8e7   : > { %21328 = vst [vmem:[#allocation189_spill] sm:$0xff] %v19366_v51  ;;  %v10047_v42 = vrot.slane %v10046_v5, 4  ;;  %v10035_v60 = vrot.slane %v10034_v61, 2  ;;  %v21329_v16 = vcombine.high %v21327_v62, %v21327_v62  ;;  %v10023_v3 = vrot.slane %v10022_v56, 1 }
 0x8e8   : > { %v10042_v29 = vrot.slane %v10041_v48, 2  ;;  %v10030_v39 = vrot.slane %v10029_v31, 1  ;;  %v10055_v38 = vmax.f32 %v10053_v47, %v10054_v0  ;;  %v10067_v41 = vsel %vm8456_vm11, %v21330_v14, -inf }
 0x8e9   : > { %v10060_v40 = vsel %vm8456_vm11, %v21329_v16, -inf  ;;  %v10048_v1 = vmax.f32 %v10046_v5, %v10047_v42  ;;  %v10036_v59 = vmax.f32 %v10034_v61, %v10035_v60  ;;  %v10068_v12 = vrot.slane %v10067_v41, 4 }
 0x8ea   : > { %v10061_v44 = vrot.slane %v10060_v40, 4  ;;  %v10043_v45 = vmax.f32 %v10041_v48, %v10042_v29  ;;  %v19374_v51 = vmax.f32 %v10015_v33, %v10016_v24  ;;  %v10056_v62 = vrot.slane %v10055_v38, 2  ;;  %v21334_v29 = vld [vmem:[#allocation104_spill] sm:$0xff] }
 0x8eb   : > { %v10049_v25 = vrot.slane %v10048_v1, 2  ;;  %v10037_v36 = vrot.slane %v10036_v59, 1  ;;  %v21332_v16 = vcombine.high %v21330_v14, %v21330_v14  ;;  %v10069_v47 = vmax.f32 %v10067_v41, %v10068_v12 }
 0x8ec   : > { %v10062_v22 = vmax.f32 %v10060_v40, %v10061_v44  ;;  %21331 = vst [vmem:[#allocation190_spill] sm:$0xff] %v19374_v51  ;;  %v10044_v42 = vrot.slane %v10043_v45, 1  ;;  %v19380_v60 = vmax.f32 %v10022_v56, %v10023_v3  ;;  %v10057_v0 = vmax.f32 %v10055_v38, %v10056_v62 }
 0x8ed   : > { %v10074_v5 = vsel %vm8456_vm11, %v21332_v16, -inf  ;;  %v10050_v28 = vmax.f32 %v10048_v1, %v10049_v25  ;;  %v10081_v40 = vsel %vm8456_vm11, %v21334_v29, -inf  ;;  %v19384_v33 = vmax.f32 %v10029_v31, %v10030_v39 }
 0x8ee   : > { %v10063_v61 = vrot.slane %v10062_v22, 2  ;;  %21333 = vst [vmem:[#allocation306_spill] sm:$0xff] %v19380_v60  ;;  %v10075_v48 = vrot.slane %v10074_v5, 4  ;;  %v10070_v51 = vrot.slane %v10069_v47, 2  ;;  %v19386_v32 = vmax.f32 %v10036_v59, %v10037_v36 }
 0x8ef   : > { %21335 = vst [vmem:[#allocation104_spill] sm:$0xff] %v19384_v33  ;;  %v10051_v24 = vrot.slane %v10050_v28, 1  ;;  %v10082_v16 = vrot.slane %v10081_v40, 4  ;;  %v21337_v1 = vcombine.high %v21334_v29, %v21334_v29  ;;  %v19392_v3 = vmax.f32 %v10043_v45, %v10044_v42 }
 0x8f0   : > { %v10064_v44 = vmax.f32 %v10062_v22, %v10063_v61  ;;  %21336 = vst [vmem:[#allocation307_spill] sm:$0xff] %v19386_v32  ;;  %v10076_v14 = vmax.f32 %v10074_v5, %v10075_v48  ;;  %v10058_v38 = vrot.slane %v10057_v0, 1  ;;  %v10071_v41 = vmax.f32 %v10069_v47, %v10070_v51  ;;  %v21340_v22 = vld [vmem:[#allocation105_spill] sm:$0xff]  ;;  %v21342_v51 = vld [vmem:[#allocation191_spill] sm:$0xff] }
 0x8f1   : > { %v10088_v56 = vsel %vm8456_vm11, %v21337_v1, -inf  ;;  %21338 = vst [vmem:[#allocation308_spill] sm:$0xff] %v19392_v3  ;;  %v19394_v12 = vmax.f32 %v10050_v28, %v10051_v24  ;;  %v10083_v39 = vmax.f32 %v10081_v40, %v10082_v16  ;;  %v10095_v59 = vsel %vm8456_vm11, %v21340_v22, -inf }
 0x8f2   : > { %v10089_v25 = vrot.slane %v10088_v56, 4  ;;  %v10077_v31 = vrot.slane %v10076_v14, 2  ;;  %v10065_v36 = vrot.slane %v10064_v44, 1  ;;  %v10072_v62 = vrot.slane %v10071_v41, 1 }
 0x8f3   : > { %21339 = vst [vmem:[#allocation309_spill] sm:$0xff] %v19394_v12  ;;  %v10096_v61 = vrot.slane %v10095_v59, 4  ;;  %v10084_v29 = vrot.slane %v10083_v39, 2  ;;  %v21341_v45 = vcombine.high %v21340_v22, %v21340_v22  ;;  %v10109_v28 = vsel %vm8456_vm11, %v21342_v51, -inf }
 0x8f4   : > { %v10090_v5 = vmax.f32 %v10088_v56, %v10089_v25  ;;  %v10078_v48 = vmax.f32 %v10076_v14, %v10077_v31  ;;  %v19404_v47 = vmax.f32 %v10057_v0, %v10058_v38  ;;  %v10110_v12 = vrot.slane %v10109_v28, 4  ;;  %v21346_v38 = vld [vmem:[#allocation106_spill] sm:$0xff] }
 0x8f5   : > { %v10102_v42 = vsel %vm8456_vm11, %v21341_v45, -inf  ;;  %v10097_v24 = vmax.f32 %v10095_v59, %v10096_v61  ;;  %v10085_v60 = vmax.f32 %v10083_v39, %v10084_v29  ;;  %v21344_v14 = vcombine.high %v21342_v51, %v21342_v51 }
 0x8f6   : > { %21343 = vst [vmem:[#allocation105_spill] sm:$0xff] %v19404_v47  ;;  %v10091_v40 = vrot.slane %v10090_v5, 2  ;;  %v10103_v16 = vrot.slane %v10102_v42, 4  ;;  %v10079_v1 = vrot.slane %v10078_v48, 1  ;;  %v19410_v3 = vmax.f32 %v10064_v44, %v10065_v36 }
 0x8f7   : > { %v10116_v56 = vsel %vm8456_vm11, %v21344_v14, -inf  ;;  %v10098_v31 = vrot.slane %v10097_v24, 2  ;;  %v19412_v32 = vmax.f32 %v10071_v41, %v10072_v62  ;;  %v10111_v0 = vmax.f32 %v10109_v28, %v10110_v12 }
 0x8f8   : > { %v10092_v25 = vmax.f32 %v10090_v5, %v10091_v40  ;;  %v10104_v22 = vmax.f32 %v10102_v42, %v10103_v16  ;;  %v10117_v45 = vrot.slane %v10116_v56, 4  ;;  %v10123_v59 = vsel %vm8456_vm11, %v21346_v38, -inf  ;;  %v21349_v16 = vld [vmem:[#allocation192_spill] sm:$0xff] }
 0x8f9   : > { %21345 = vst [vmem:[#allocation191_spill] sm:$0xff] %v19412_v32  ;;  %v10086_v61 = vrot.slane %v10085_v60, 1  ;;  %v10099_v39 = vmax.f32 %v10097_v24, %v10098_v31  ;;  %v10112_v51 = vrot.slane %v10111_v0, 2  ;;  %v10124_v19 = vrot.slane %v10123_v59, 4 }
 0x8fa   : > { %v10105_v29 = vrot.slane %v10104_v22, 2  ;;  %v10118_v47 = vmax.f32 %v10116_v56, %v10117_v45  ;;  %v10093_v33 = vrot.slane %v10092_v25, 1  ;;  %v21347_v5 = vcombine.high %v21346_v38, %v21346_v38 }
 0x8fb   : > { %v19420_v44 = vmax.f32 %v10078_v48, %v10079_v1  ;;  %v10100_v41 = vrot.slane %v10099_v39, 1  ;;  %v10113_v62 = vmax.f32 %v10111_v0, %v10112_v51  ;;  %v10125_v28 = vmax.f32 %v10123_v59, %v10124_v19  ;;  %v21354_v51 = vld [vmem:[#allocation107_spill] sm:$0xff] }
 0x8fc   : > { %v10130_v42 = vsel %vm8456_vm11, %v21347_v5, -inf  ;;  %v10106_v36 = vmax.f32 %v10104_v22, %v10105_v29  ;;  %v10119_v12 = vrot.slane %v10118_v47, 2  ;;  %v10137_v24 = vsel %vm8456_vm11, %v21349_v16, -inf }
 0x8fd   : > { %21348 = vst [vmem:[#allocation106_spill] sm:$0xff] %v19420_v44  ;;  %v10131_v40 = vrot.slane %v10130_v42, 4  ;;  %v19424_v14 = vmax.f32 %v10085_v60, %v10086_v61  ;;  %v10138_v45 = vrot.slane %v10137_v24, 4  ;;  %v19426_v32 = vmax.f32 %v10092_v25, %v10093_v33 }
 0x8fe   : > { %v10107_v56 = vrot.slane %v10106_v36, 1  ;;  %v10120_v31 = vmax.f32 %v10118_v47, %v10119_v12  ;;  %v10126_v38 = vrot.slane %v10125_v28, 2  ;;  %v21352_v48 = vcombine.high %v21349_v16, %v21349_v16 }
 0x8ff   : > { %21350 = vst [vmem:[#allocation192_spill] sm:$0xff] %v19424_v14  ;;  %21351 = vst [vmem:[#allocation310_spill] sm:$0xff] %v19426_v32  ;;  %v10132_v5 = vmax.f32 %v10130_v42, %v10131_v40  ;;  %v19432_v22 = vmax.f32 %v10099_v39, %v10100_v41  ;;  %v10114_v19 = vrot.slane %v10113_v62, 1  ;;  %v10139_v0 = vmax.f32 %v10137_v24, %v10138_v45  ;;  %v21357_v24 = vld [vmem:[#allocation193_spill] sm:$0xff] }
 0x900   : > { %v10144_v1 = vsel %vm8456_vm11, %v21352_v48, -inf  ;;  %v10121_v29 = vrot.slane %v10120_v31, 1  ;;  %v10127_v60 = vmax.f32 %v10125_v28, %v10126_v38  ;;  %v10151_v47 = vsel %vm8456_vm11, %v21354_v51, -inf }
 0x901   : > { %21353 = vst [vmem:[#allocation311_spill] sm:$0xff] %v19432_v22  ;;  %v10145_v59 = vrot.slane %v10144_v1, 4  ;;  %v10133_v61 = vrot.slane %v10132_v5, 2  ;;  %v19436_v33 = vmax.f32 %v10106_v36, %v10107_v56  ;;  %v10140_v25 = vrot.slane %v10139_v0, 2 }
 0x902   : > { %v10152_v12 = vrot.slane %v10151_v47, 4  ;;  %v10128_v40 = vrot.slane %v10127_v60, 1  ;;  %v21356_v39 = vcombine.high %v21354_v51, %v21354_v51  ;;  %v10165_v45 = vsel %vm8456_vm11, %v21357_v24, -inf }
 0x903   : > { %21355 = vst [vmem:[#allocation107_spill] sm:$0xff] %v19436_v33  ;;  %v10146_v42 = vmax.f32 %v10144_v1, %v10145_v59  ;;  %v10134_v16 = vmax.f32 %v10132_v5, %v10133_v61  ;;  %v10141_v28 = vmax.f32 %v10139_v0, %v10140_v25  ;;  %v19444_v22 = vmax.f32 %v10113_v62, %v10114_v19 }
 0x904   : > { %v10158_v41 = vsel %vm8456_vm11, %v21356_v39, -inf  ;;  %v10153_v48 = vmax.f32 %v10151_v47, %v10152_v12  ;;  %v19446_v36 = vmax.f32 %v10120_v31, %v10121_v29  ;;  %v10166_v56 = vrot.slane %v10165_v45, 4  ;;  %v21362_v47 = vld [vmem:[#allocation194_spill] sm:$0xff] }
 0x905   : > { %v10147_v38 = vrot.slane %v10146_v42, 2  ;;  %v10159_v44 = vrot.slane %v10158_v41, 4  ;;  %21358 = vst [vmem:[#allocation193_spill] sm:$0xff] %v19444_v22  ;;  %v21360_v5 = vcombine.high %v21357_v24, %v21357_v24  ;;  %v10135_v59 = vrot.slane %v10134_v16, 1 }
 0x906   : > { %21359 = vst [vmem:[#allocation312_spill] sm:$0xff] %v19446_v36  ;;  %v10154_v51 = vrot.slane %v10153_v48, 2  ;;  %v19452_v33 = vmax.f32 %v10127_v60, %v10128_v40  ;;  %v10167_v0 = vmax.f32 %v10165_v45, %v10166_v56  ;;  %v10179_v62 = vsel %vm8456_vm11, %v21362_v47, -inf }
 0x907   : > { %v10172_v1 = vsel %vm8456_vm11, %v21360_v5, -inf  ;;  %v10148_v61 = vmax.f32 %v10146_v42, %v10147_v38  ;;  %v10160_v39 = vmax.f32 %v10158_v41, %v10159_v44  ;;  %v10142_v19 = vrot.slane %v10141_v28, 1 }
 0x908   : > { %21361 = vst [vmem:[#allocation313_spill] sm:$0xff] %v19452_v33  ;;  %v10173_v25 = vrot.slane %v10172_v1, 4  ;;  %v10155_v29 = vmax.f32 %v10153_v48, %v10154_v51  ;;  %v10168_v36 = vrot.slane %v10167_v0, 2  ;;  %v10180_v24 = vrot.slane %v10179_v62, 4  ;;  %v21365_v33 = vld [vmem:[#allocation195_spill] sm:$0xff] }
 0x909   : > { %v10149_v31 = vrot.slane %v10148_v61, 1  ;;  %v10161_v12 = vrot.slane %v10160_v39, 2  ;;  %v21363_v5 = vcombine.high %v21362_v47, %v21362_v47  ;;  %v19460_v44 = vmax.f32 %v10134_v16, %v10135_v59 }
 0x90a   : > { %v10174_v22 = vmax.f32 %v10172_v1, %v10173_v25  ;;  %v10156_v60 = vrot.slane %v10155_v29, 1  ;;  %v10169_v45 = vmax.f32 %v10167_v0, %v10168_v36  ;;  %v10181_v56 = vmax.f32 %v10179_v62, %v10180_v24 }
 0x90b   : > { %v10186_v42 = vsel %vm8456_vm11, %v21363_v5, -inf  ;;  %21364 = vst [vmem:[#allocation194_spill] sm:$0xff] %v19460_v44  ;;  %v10162_v40 = vmax.f32 %v10160_v39, %v10161_v12  ;;  %v10193_v48 = vsel %vm8456_vm11, %v21365_v33, -inf  ;;  %v19464_v51 = vmax.f32 %v10141_v28, %v10142_v19 }
 0x90c   : > { %v10187_v41 = vrot.slane %v10186_v42, 4  ;;  %v10175_v38 = vrot.slane %v10174_v22, 2  ;;  %v19466_v1 = vmax.f32 %v10148_v61, %v10149_v31  ;;  %v10194_v32 = vrot.slane %v10193_v48, 4  ;;  %v21370_v61 = vld [vmem:[#allocation196_spill] sm:$0xff] }
 0x90d   : > { %21366 = vst [vmem:[#allocation195_spill] sm:$0xff] %v19464_v51  ;;  %v10163_v47 = vrot.slane %v10162_v40, 1  ;;  %v10182_v5 = vrot.slane %v10181_v56, 2  ;;  %v21368_v16 = vcombine.high %v21365_v33, %v21365_v33  ;;  %v19472_v36 = vmax.f32 %v10155_v29, %v10156_v60 }
 0x90e   : > { %21367 = vst [vmem:[#allocation314_spill] sm:$0xff] %v19466_v1  ;;  %v10188_v25 = vmax.f32 %v10186_v42, %v10187_v41  ;;  %v10176_v14 = vmax.f32 %v10174_v22, %v10175_v38  ;;  %v10195_v0 = vmax.f32 %v10193_v48, %v10194_v32  ;;  %v10170_v12 = vrot.slane %v10169_v45, 1  ;;  %v21373_v32 = vld [vmem:[#allocation197_spill] sm:$0xff] }
 0x90f   : > { %v10200_v59 = vsel %vm8456_vm11, %v21368_v16, -inf  ;;  %21369 = vst [vmem:[#allocation315_spill] sm:$0xff] %v19472_v36  ;;  %v10183_v19 = vmax.f32 %v10181_v56, %v10182_v5  ;;  %v10207_v31 = vsel %vm8456_vm11, %v21370_v61, -inf  ;;  %v19476_v38 = vmax.f32 %v10162_v40, %v10163_v47 }
 0x910   : > { %v10189_v39 = vrot.slane %v10188_v25, 2  ;;  %v10201_v62 = vrot.slane %v10200_v59, 4  ;;  %v10177_v28 = vrot.slane %v10176_v14, 1  ;;  %v10196_v42 = vrot.slane %v10195_v0, 2 }
 0x911   : > { %v10208_v41 = vrot.slane %v10207_v31, 4  ;;  %21371 = vst [vmem:[#allocation196_spill] sm:$0xff] %v19476_v38  ;;  %v10184_v33 = vrot.slane %v10183_v19, 1  ;;  %v21372_v29 = vcombine.high %v21370_v61, %v21370_v61  ;;  %v10221_v48 = vsel %vm8456_vm11, %v21373_v32, -inf }
 0x912   : > { %v10190_v24 = vmax.f32 %v10188_v25, %v10189_v39  ;;  %v10202_v22 = vmax.f32 %v10200_v59, %v10201_v62  ;;  %v10197_v56 = vmax.f32 %v10195_v0, %v10196_v42  ;;  %v19484_v36 = vmax.f32 %v10169_v45, %v10170_v12  ;;  %v21376_v42 = vld [vmem:[#allocation198_spill] sm:$0xff] }
 0x913   : > { %v10214_v60 = vsel %vm8456_vm11, %v21372_v29, -inf  ;;  %v10209_v44 = vmax.f32 %v10207_v31, %v10208_v41  ;;  %v10222_v59 = vrot.slane %v10221_v48, 4  ;;  %v21375_v40 = vcombine.high %v21373_v32, %v21373_v32 }
 0x914   : > { %v10191_v16 = vrot.slane %v10190_v24, 1  ;;  %v10203_v5 = vrot.slane %v10202_v22, 2  ;;  %21374 = vst [vmem:[#allocation197_spill] sm:$0xff] %v19484_v36  ;;  %v10215_v25 = vrot.slane %v10214_v60, 4  ;;  %v19490_v39 = vmax.f32 %v10176_v14, %v10177_v28 }
 0x915   : > { %v10228_v47 = vsel %vm8456_vm11, %v21375_v40, -inf  ;;  %v19492_v62 = vmax.f32 %v10183_v19, %v10184_v33  ;;  %v10210_v29 = vrot.slane %v10209_v44, 2  ;;  %v10223_v1 = vmax.f32 %v10221_v48, %v10222_v59  ;;  %v21379_v59 = vld [vmem:[#allocation199_spill] sm:$0xff] }
 0x916   : > { %v10204_v61 = vmax.f32 %v10202_v22, %v10203_v5  ;;  %v10216_v38 = vmax.f32 %v10214_v60, %v10215_v25  ;;  %v10229_v0 = vrot.slane %v10228_v47, 4  ;;  %v10235_v45 = vsel %vm8456_vm11, %v21376_v42, -inf }
 0x917   : > { %v19496_v12 = vmax.f32 %v10190_v24, %v10191_v16  ;;  %v10198_v31 = vrot.slane %v10197_v56, 1  ;;  %v10211_v41 = vmax.f32 %v10209_v44, %v10210_v29  ;;  %v10236_v36 = vrot.slane %v10235_v45, 4  ;;  %v21380_v29 = vld [vmem:[#allocation108_spill] sm:$0xff] }
 0x918   : > { %v10217_v32 = vrot.slane %v10216_v38, 2  ;;  %v10224_v51 = vrot.slane %v10223_v1, 2  ;;  %v10230_v40 = vmax.f32 %v10228_v47, %v10229_v0  ;;  %v21378_v14 = vcombine.high %v21376_v42, %v21376_v42 }
 0x919   : > { %21377 = vst [vmem:[#allocation198_spill] sm:$0xff] %v19496_v12  ;;  %v10205_v19 = vrot.slane %v10204_v61, 1  ;;  %v10212_v22 = vrot.slane %v10211_v41, 1  ;;  %v10237_v33 = vmax.f32 %v10235_v45, %v10236_v36  ;;  %v19502_v24 = vmax.f32 %v10197_v56, %v10198_v31  ;;  %v21381_v45 = vld [vmem:[#allocation200_spill] sm:$0xff]  ;;  %v21382_v31 = vld [vmem:[#allocation201_spill] sm:$0xff] }
 0x91a   : > { %v10242_v28 = vsel %vm8456_vm11, %v21378_v14, -inf  ;;  %v10218_v48 = vmax.f32 %v10216_v38, %v10217_v32  ;;  %v10225_v5 = vmax.f32 %v10223_v1, %v10224_v51  ;;  %v10231_v25 = vrot.slane %v10230_v40, 2 }
 0x91b   : > { %v10243_v60 = vrot.slane %v10242_v28, 4  ;;  %v10238_v44 = vrot.slane %v10237_v33, 2  ;;  %v10506_v47 = vsel %vm10505_vm12, %v21380_v29, %v21379_v59  ;;  %v19511_v1 = vmax.f32 %v10204_v61, %v10205_v19  ;;  %v21384_v19 = vld [vmem:[#allocation202_spill] sm:$0xff] }
 0x91c   : > { %v10219_v0 = vrot.slane %v10218_v48, 1  ;;  %v10226_v42 = vrot.slane %v10225_v5, 1  ;;  %v10232_v12 = vmax.f32 %v10230_v40, %v10231_v25  ;;  %v10508_v51 = vsel %vm10507_vm13, %v21381_v45, %v10506_v47  ;;  %v21386_v47 = vld [vmem:[#allocation120_spill] sm:$0xff]  ;;  %v21391_v45 = vld [vmem:[#allocation210_spill] sm:$0xff] }
 0x91d   : > { %v10244_v16 = vmax.f32 %v10242_v28, %v10243_v60  ;;  %v19507_v14 = vmax.f32 %v10237_v33, %v10238_v44  ;;  %v19513_v38 = vmax.f32 %v10211_v41, %v10212_v22  ;;  %v10510_v32 = vsel %vm10509_vm14, %v21382_v31, %v10508_v51  ;;  %v21383_v33 = vld [vmem:[#allocation117_spill] sm:$0xff] }
 0x91e   : > { %v10233_v56 = vrot.slane %v10232_v12, 1  ;;  %v19517_v28 = vmax.f32 %v10218_v48, %v10219_v0  ;;  %v19521_v40 = vmax.f32 %v10225_v5, %v10226_v42  ;;  %v10512_v25 = vsel %vm10511_vm15, %v21383_v33, %v10510_v32  ;;  %v21389_v0 = vld [vmem:[#allocation204_spill] sm:$0xff]  ;;  %v21390_v42 = vld [vmem:[#allocation122_spill] sm:$0xff]  ;;  %v21393_v31 = vld [vmem:[#allocation205_spill] sm:$0xff] }
 0x91f   : > { %v10245_v36 = vrot.slane %v10244_v16, 2  ;;  %v10240_v41 = vrot.slane %v19507_v14, 1  ;;  %v10514_v22 = vsel %vm10513_vm0, %v21384_v19, %v10512_v25  ;;  %v10519_v48 = vsel %vm10505_vm12, %v18310_v20, %v18304_v63  ;;  %v21385_v20 = vld [vmem:[#allocation103_spill] sm:$0xff] }
 0x920   : > { %v19525_v61 = vmax.f32 %v10232_v12, %v10233_v56  ;;  %v10516_v5 = vsel %vm10515_vm1, %v18298_v53, %v10514_v22  ;;  %v10520_v44 = vsel %vm10507_vm13, %v18312_v26, %v10519_v48  ;;  %v10526_v12 = vsel %vm10505_vm12, %v18346_v27, %v18344_v58  ;;  %v21394_v32 = vld [vmem:[#allocation123_spill] sm:$0xff] }
 0x921   : > { %v19519_v60 = vmax.f32 %v10244_v16, %v10245_v36  ;;  %v10533_v16 = vsel %vm10505_vm12, %v18390_v17, %v18384_v15  ;;  %v10518_v29 = vsel %vm10517_vm2, %v18300_v9, %v10516_v5  ;;  %v10521_v63 = vsel %vm10509_vm14, %v18314_v2, %v10520_v44  ;;  %v21387_v15 = vld [vmem:[#allocation209_spill] sm:$0xff]  ;;  %v21388_v9 = vld [vmem:[#allocation118_spill] sm:$0xff]  ;;  %v21395_v25 = vld [vmem:[#allocation211_spill] sm:$0xff] }
 0x922   : > { %v10527_v53 = vsel %vm10507_vm13, %v18352_v13, %v10526_v12  ;;  %v10522_v26 = vsel %vm10511_vm15, %v21385_v20, %v10521_v63  ;;  %v10534_v27 = vsel %vm10507_vm13, %v18392_v55, %v10533_v16  ;;  %v10540_v17 = vsel %vm10505_vm12, %v21387_v15, %v18424_v52  ;;  %10768 = vst.msk [vmem:[%s13155_s14] sm:$0xff] %vm2722_vm4, %v10518_v29  ;;  %v21392_v55 = vld [vmem:[#allocation119_spill] sm:$0xff]  ;;  %v21397_v5 = vld [vmem:[#allocation121_spill] sm:$0xff]  ;;  %v21398_v12 = vld [vmem:[#allocation124_spill] sm:$0xff] }
 0x923   : > { %v10247_v59 = vrot.slane %v19519_v60, 1  ;;  %v10528_v58 = vsel %vm10509_vm14, %v21386_v47, %v10527_v53  ;;  %v10523_v2 = vsel %vm10513_vm0, %v21388_v9, %v10522_v26  ;;  %v10535_v36 = vsel %vm10509_vm14, %v21390_v42, %v10534_v27  ;;  %v21396_v22 = vld [vmem:[#allocation203_spill] sm:$0xff]  ;;  %v21399_v29 = vld [vmem:[#allocation125_spill] sm:$0xff]  ;;  %v21400_v53 = vld [vmem:[#allocation206_spill] sm:$0xff] }
 0x924   : > { %v10529_v13 = vsel %vm10511_vm15, %v21389_v0, %v10528_v58  ;;  %v10541_v51 = vsel %vm10507_vm13, %v21391_v45, %v10540_v17  ;;  %v10524_v56 = vsel %vm10515_vm1, %v21392_v55, %v10523_v2  ;;  %v10536_v33 = vsel %vm10511_vm15, %v21394_v32, %v10535_v36  ;;  %v21401_v26 = vld [vmem:[#allocation207_spill] sm:$0xff]  ;;  %v21402_v15 = vld [vmem:[#allocation208_spill] sm:$0xff]  ;;  %v21404_v0 = vld [vmem:[#allocation126_spill] sm:$0xff] }
 0x925   : > { %v10530_v52 = vsel %vm10513_vm0, %v21393_v31, %v10529_v13  ;;  %v10542_v19 = vsel %vm10509_vm14, %v21395_v25, %v10541_v51  ;;  %v10525_v48 = vsel %vm10517_vm2, %v21396_v22, %v10524_v56  ;;  %v10537_v16 = vsel %vm10513_vm0, %v21398_v12, %v10536_v33  ;;  %v21403_v9 = vld [vmem:[#allocation212_spill] sm:$0xff]  ;;  %v21405_v42 = vld [vmem:[#allocation213_spill] sm:$0xff]  ;;  %v21408_v55 = vld [vmem:[#allocation130_spill] sm:$0xff] }
 0x926   : > { %v10531_v44 = vsel %vm10515_vm1, %v21397_v5, %v10530_v52  ;;  %v10543_v63 = vsel %vm10511_vm15, %v21399_v29, %v10542_v19  ;;  %v10538_v47 = vsel %vm10515_vm1, %v21401_v26, %v10537_v16  ;;  %v10547_v27 = vsel %vm10505_vm12, %v18466_v30, %v18464_v54  ;;  %10769 = vst.msk [vmem:[%s13155_s14 + $0x8] sm:$0xff] %vm2722_vm4, %v10525_v48  ;;  %v21406_v54 = vld [vmem:[#allocation127_spill] sm:$0xff]  ;;  %v21407_v45 = vld [vmem:[#allocation217_spill] sm:$0xff]  ;;  %v21409_v31 = vld [vmem:[#allocation128_spill] sm:$0xff] }
 0x927   : > { %v10532_v20 = vsel %vm10517_vm2, %v21400_v53, %v10531_v44  ;;  %v10544_v58 = vsel %vm10513_vm0, %v18450_v37, %v10543_v63  ;;  %v10539_v17 = vsel %vm10517_vm2, %v21402_v15, %v10538_v47  ;;  %v10548_v13 = vsel %vm10507_vm13, %v21404_v0, %v10547_v27  ;;  %v21411_v32 = vld [vmem:[#allocation222_spill] sm:$0xff]  ;;  %v21413_v22 = vld [vmem:[#allocation129_spill] sm:$0xff]  ;;  %v21414_v5 = vld [vmem:[#allocation131_spill] sm:$0xff] }
 0x928   : > { %v10545_v2 = vsel %vm10515_vm1, %v21403_v9, %v10544_v58  ;;  %v10554_v37 = vsel %vm10505_vm12, %v18506_v11, %v18504_v46  ;;  %10770 = vst.msk [vmem:[%s13155_s14 + $0x10] sm:$0xff] %vm2722_vm4, %v10532_v20  ;;  %v10549_v36 = vsel %vm10509_vm14, %v21406_v54, %v10548_v13  ;;  %v10561_v56 = vsel %vm10505_vm12, %v18550_v43, %v21408_v55  ;;  %v21410_v11 = vld [vmem:[#allocation218_spill] sm:$0xff]  ;;  %v21416_v29 = vld [vmem:[#allocation215_spill] sm:$0xff]  ;;  %v21420_v58 = vld [vmem:[#allocation216_spill] sm:$0xff] }
 0x929   : > { %v10546_v30 = vsel %vm10517_vm2, %v21405_v42, %v10545_v2  ;;  %v10555_v51 = vsel %vm10507_vm13, %v21407_v45, %v10554_v37  ;;  %10771 = vst.msk [vmem:[%s13155_s14 + $0x18] sm:$0xff] %vm2722_vm4, %v10539_v17  ;;  %v10550_v46 = vsel %vm10511_vm15, %v21409_v31, %v10549_v36  ;;  %v10562_v33 = vsel %vm10507_vm13, %v21411_v32, %v10561_v56  ;;  %v21412_v19 = vld [vmem:[#allocation214_spill] sm:$0xff]  ;;  %v21417_v53 = vld [vmem:[#allocation219_spill] sm:$0xff]  ;;  %v21421_v15 = vld [vmem:[#allocation220_spill] sm:$0xff] }
 0x92a   : > { %v10556_v52 = vsel %vm10509_vm14, %v21410_v11, %v10555_v51  ;;  %v10568_v25 = vsel %vm10505_vm12, %v18590_v21, %v18584_v35  ;;  %10772 = vst.msk [vmem:[%s13155_s14 + $0x20] sm:$0xff] %vm2722_vm4, %v10546_v30  ;;  %v10551_v43 = vsel %vm10513_vm0, %v21412_v19, %v10550_v46  ;;  %v10563_v44 = vsel %vm10509_vm14, %v21414_v5, %v10562_v33  ;;  %v21415_v12 = vld [vmem:[#allocation226_spill] sm:$0xff]  ;;  %v21418_v21 = vld [vmem:[#allocation132_spill] sm:$0xff]  ;;  %v21419_v26 = vld [vmem:[#allocation227_spill] sm:$0xff] }
 0x92b   : > { %v10557_v48 = vsel %vm10511_vm15, %v21413_v22, %v10556_v52  ;;  %v10569_v16 = vsel %vm10507_vm13, %v21415_v12, %v10568_v25  ;;  %v10552_v63 = vsel %vm10515_vm1, %v21416_v29, %v10551_v43  ;;  %v10564_v20 = vsel %vm10511_vm15, %v21418_v21, %v10563_v44  ;;  %v21422_v9 = vld [vmem:[#allocation223_spill] sm:$0xff]  ;;  %v21423_v0 = vld [vmem:[#allocation133_spill] sm:$0xff]  ;;  %v21425_v30 = vld [vmem:[#allocation224_spill] sm:$0xff] }
 0x92c   : > { %v10558_v35 = vsel %vm10513_vm0, %v21417_v53, %v10557_v48  ;;  %v10570_v47 = vsel %vm10509_vm14, %v21419_v26, %v10569_v16  ;;  %v10553_v27 = vsel %vm10517_vm2, %v21420_v58, %v10552_v63  ;;  %v10565_v2 = vsel %vm10513_vm0, %v21422_v9, %v10564_v20  ;;  %v21424_v37 = vld [vmem:[#allocation221_spill] sm:$0xff]  ;;  %v21426_v36 = vld [vmem:[#allocation228_spill] sm:$0xff]  ;;  %v21430_v33 = vld [vmem:[#allocation230_spill] sm:$0xff] }
 0x92d   : > { %v10559_v17 = vsel %vm10515_vm1, %v21421_v15, %v10558_v35  ;;  %v10571_v13 = vsel %vm10511_vm15, %v21423_v0, %v10570_v47  ;;  %v10566_v54 = vsel %vm10515_vm1, %v21425_v30, %v10565_v2  ;;  %v10575_v51 = vsel %vm10505_vm12, %v18630_v50, %v18624_v23  ;;  %10773 = vst.msk [vmem:[%s13155_s14 + $0x28] sm:$0xff] %vm2722_vm4, %v10553_v27  ;;  %v21427_v55 = vld [vmem:[#allocation225_spill] sm:$0xff]  ;;  %v21431_v50 = vld [vmem:[#allocation134_spill] sm:$0xff]  ;;  %v21434_v48 = vld [vmem:[#allocation235_spill] sm:$0xff] }
 0x92e   : > { %v10560_v42 = vsel %vm10517_vm2, %v21424_v37, %v10559_v17  ;;  %v10572_v45 = vsel %vm10513_vm0, %v21426_v36, %v10571_v13  ;;  %v10567_v56 = vsel %vm10517_vm2, %v21427_v55, %v10566_v54  ;;  %v21428_v31 = vld [vmem:[#allocation229_spill] sm:$0xff]  ;;  %v10576_v11 = vsel %vm10507_vm13, %v18632_v8, %v10575_v51  ;;  %v21432_v19 = vld [vmem:[#allocation234_spill] sm:$0xff]  ;;  %v21433_v8 = vld [vmem:[#allocation135_spill] sm:$0xff] }
 0x92f   : > { %v10573_v46 = vsel %vm10515_vm1, %v21428_v31, %v10572_v45  ;;  %v21429_v52 = vld [vmem:[#allocation233_spill] sm:$0xff]  ;;  %10774 = vst.msk [vmem:[%s13155_s14 + $0x30] sm:$0xff] %vm2722_vm4, %v10560_v42  ;;  %v10577_v25 = vsel %vm10509_vm14, %v21431_v50, %v10576_v11  ;;  %v10589_v22 = vsel %vm10505_vm12, %v18706_v18, %v18704_v34  ;;  %10775 = vst.msk [vmem:[%s13155_s14 + $0x38] sm:$0xff] %vm2722_vm4, %v10567_v56  ;;  %v21435_v16 = vld [vmem:[#allocation136_spill] sm:$0xff] }
 0x930   : > { %v10582_v32 = vsel %vm10505_vm12, %v21429_v52, %v18664_v10  ;;  %v10574_v23 = vsel %vm10517_vm2, %v21430_v33, %v10573_v46  ;;  %v10578_v10 = vsel %vm10511_vm15, %v21433_v8, %v10577_v25  ;;  %v10590_v44 = vsel %vm10507_vm13, %v18712_v49, %v10589_v22  ;;  %v21436_v34 = vld [vmem:[#allocation137_spill] sm:$0xff]  ;;  %v21437_v63 = vld [vmem:[#allocation138_spill] sm:$0xff]  ;;  %v21439_v49 = vld [vmem:[#allocation231_spill] sm:$0xff] }
 0x931   : > { %v10583_v43 = vsel %vm10507_vm13, %v21432_v19, %v10582_v32  ;;  %v10596_v12 = vsel %vm10505_vm12, %v18746_v6, %v18744_v57  ;;  %10776 = vst.msk [vmem:[%s13155_s14 + $0x40] sm:$0xff] %vm2722_vm4, %v10574_v23  ;;  %v10579_v18 = vsel %vm10513_vm0, %v21435_v16, %v10578_v10  ;;  %v10591_v53 = vsel %vm10509_vm14, %v21437_v63, %v10590_v44  ;;  %v21438_v35 = vld [vmem:[#allocation241_spill] sm:$0xff]  ;;  %v21440_v26 = vld [vmem:[#allocation236_spill] sm:$0xff]  ;;  %v21441_v6 = vld [vmem:[#allocation139_spill] sm:$0xff] }
 0x932   : > { %v10584_v5 = vsel %vm10509_vm14, %v21434_v48, %v10583_v43  ;;  %v10597_v21 = vsel %vm10507_vm13, %v21438_v35, %v10596_v12  ;;  %v10580_v20 = vsel %vm10515_vm1, %v21439_v49, %v10579_v18  ;;  %v10592_v47 = vsel %vm10511_vm15, %v21441_v6, %v10591_v53  ;;  %v21442_v58 = vld [vmem:[#allocation242_spill] sm:$0xff]  ;;  %v21443_v15 = vld [vmem:[#allocation232_spill] sm:$0xff]  ;;  %v21444_v9 = vld [vmem:[#allocation237_spill] sm:$0xff] }
 0x933   : > { %v10585_v29 = vsel %vm10511_vm15, %v21436_v34, %v10584_v5  ;;  %v10598_v27 = vsel %vm10509_vm14, %v21442_v58, %v10597_v21  ;;  %v10581_v17 = vsel %vm10517_vm2, %v21443_v15, %v10580_v20  ;;  %v21445_v0 = vld [vmem:[#allocation140_spill] sm:$0xff]  ;;  %v21446_v37 = vld [vmem:[#allocation141_spill] sm:$0xff]  ;;  %v21447_v30 = vld [vmem:[#allocation238_spill] sm:$0xff]  ;;  %v10617_v12 = vsel %vm10505_vm12, %v18870_v7, %v18864_v4 }
 0x934   : > { %v10586_v57 = vsel %vm10513_vm0, %v21440_v26, %v10585_v29  ;;  %v10593_v13 = vsel %vm10513_vm0, %v21445_v0, %v10592_v47  ;;  %v10599_v42 = vsel %vm10511_vm15, %v21446_v37, %v10598_v27  ;;  %v21448_v36 = vld [vmem:[#allocation239_spill] sm:$0xff]  ;;  %v21450_v56 = vld [vmem:[#allocation142_spill] sm:$0xff]  ;;  %10777 = vst.msk [vmem:[%s13155_s14 + $0x48] sm:$0xff] %vm2722_vm4, %v10581_v17  ;;  %v21452_v11 = vld [vmem:[#allocation240_spill] sm:$0xff] }
 0x935   : > { %v10587_v2 = vsel %vm10515_vm1, %v21444_v9, %v10586_v57  ;;  %v10594_v45 = vsel %vm10515_vm1, %v21448_v36, %v10593_v13  ;;  %v21449_v51 = vld [vmem:[#allocation243_spill] sm:$0xff]  ;;  %v21451_v31 = vld [vmem:[#allocation246_spill] sm:$0xff]  ;;  %v21453_v32 = vld [vmem:[#allocation244_spill] sm:$0xff] }
 0x936   : > { %v10588_v54 = vsel %vm10517_vm2, %v21447_v30, %v10587_v2  ;;  %v10600_v55 = vsel %vm10513_vm0, %v21449_v51, %v10599_v42  ;;  %v10603_v46 = vsel %vm10505_vm12, %v21451_v31, %v21450_v56  ;;  %v10595_v52 = vsel %vm10517_vm2, %v21452_v11, %v10594_v45  ;;  %v21454_v23 = vld [vmem:[#allocation247_spill] sm:$0xff]  ;;  %v21455_v25 = vld [vmem:[#allocation145_spill] sm:$0xff]  ;;  %v21459_v5 = vld [vmem:[#allocation252_spill] sm:$0xff] }
 0x937   : > { %v10601_v33 = vsel %vm10515_vm1, %v21453_v32, %v10600_v55  ;;  %v10604_v50 = vsel %vm10507_vm13, %v21454_v23, %v10603_v46  ;;  %v21456_v19 = vld [vmem:[#allocation251_spill] sm:$0xff]  ;;  %10778 = vst.msk [vmem:[%s13155_s14 + $0x50] sm:$0xff] %vm2722_vm4, %v10588_v54  ;;  %v21457_v22 = vld [vmem:[#allocation245_spill] sm:$0xff]  ;;  %10779 = vst.msk [vmem:[%s13155_s14 + $0x58] sm:$0xff] %vm2722_vm4, %v10595_v52 }
 0x938   : > { %v10610_v43 = vsel %vm10505_vm12, %v21456_v19, %v21455_v25  ;;  %v10602_v8 = vsel %vm10517_vm2, %v21457_v22, %v10601_v33  ;;  %v21458_v10 = vld [vmem:[#allocation143_spill] sm:$0xff]  ;;  %v21460_v16 = vld [vmem:[#allocation144_spill] sm:$0xff]  ;;  %v21461_v34 = vld [vmem:[#allocation146_spill] sm:$0xff] }
 0x939   : > { %v10605_v48 = vsel %vm10509_vm14, %v21458_v10, %v10604_v50  ;;  %v10611_v44 = vsel %vm10507_vm13, %v21459_v5, %v10610_v43  ;;  %v21462_v63 = vld [vmem:[#allocation149_spill] sm:$0xff]  ;;  %v21464_v21 = vld [vmem:[#allocation258_spill] sm:$0xff]  ;;  %10780 = vst.msk [vmem:[%s13155_s14 + $0x60] sm:$0xff] %vm2722_vm4, %v10602_v8  ;;  %v21465_v20 = vld [vmem:[#allocation248_spill] sm:$0xff] }
 0x93a   : > { %v10606_v18 = vsel %vm10511_vm15, %v21460_v16, %v10605_v48  ;;  %v10612_v29 = vsel %vm10509_vm14, %v21461_v34, %v10611_v44  ;;  %v10618_v53 = vsel %vm10507_vm13, %v21462_v63, %v10617_v12  ;;  %v21463_v35 = vld [vmem:[#allocation257_spill] sm:$0xff]  ;;  %v21466_v7 = vld [vmem:[#allocation147_spill] sm:$0xff]  ;;  %v21467_v57 = vld [vmem:[#allocation150_spill] sm:$0xff] }
 0x93b   : > { %v10624_v49 = vsel %vm10505_vm12, %v21464_v21, %v21463_v35  ;;  %v10607_v4 = vsel %vm10513_vm0, %v21465_v20, %v10606_v18  ;;  %v10613_v26 = vsel %vm10511_vm15, %v21466_v7, %v10612_v29  ;;  %v10619_v6 = vsel %vm10509_vm14, %v21467_v57, %v10618_v53  ;;  %v21468_v47 = vld [vmem:[#allocation259_spill] sm:$0xff]  ;;  %v21469_v27 = vld [vmem:[#allocation249_spill] sm:$0xff]  ;;  %v21472_v13 = vld [vmem:[#allocation260_spill] sm:$0xff] }
 0x93c   : > { %v10625_v58 = vsel %vm10507_vm13, %v21468_v47, %v10624_v49  ;;  %v10608_v15 = vsel %vm10515_vm1, %v21469_v27, %v10607_v4  ;;  %v21470_v17 = vld [vmem:[#allocation253_spill] sm:$0xff]  ;;  %v21471_v2 = vld [vmem:[#allocation255_spill] sm:$0xff]  ;;  %v21473_v42 = vld [vmem:[#allocation250_spill] sm:$0xff] }
 0x93d   : > { %v10614_v9 = vsel %vm10513_vm0, %v21470_v17, %v10613_v26  ;;  %v10620_v0 = vsel %vm10511_vm15, %v21471_v2, %v10619_v6  ;;  %v10626_v37 = vsel %vm10509_vm14, %v21472_v13, %v10625_v58  ;;  %v10609_v30 = vsel %vm10517_vm2, %v21473_v42, %v10608_v15  ;;  %v21474_v54 = vld [vmem:[#allocation254_spill] sm:$0xff]  ;;  %v21475_v45 = vld [vmem:[#allocation151_spill] sm:$0xff]  ;;  %v21476_v55 = vld [vmem:[#allocation109_spill] sm:$0xff] }
 0x93e   : > { %v10615_v36 = vsel %vm10515_vm1, %v21474_v54, %v10614_v9  ;;  %v10621_v51 = vsel %vm10513_vm0, %v21475_v45, %v10620_v0  ;;  %v10627_v56 = vsel %vm10511_vm15, %v21476_v55, %v10626_v37  ;;  %v21477_v31 = vld [vmem:[#allocation148_spill] sm:$0xff]  ;;  %v21479_v32 = vld [vmem:[#allocation153_spill] sm:$0xff]  ;;  %v21480_v23 = vld [vmem:[#allocation110_spill] sm:$0xff]  ;;  %10781 = vst.msk [vmem:[%s13155_s14 + $0x68] sm:$0xff] %vm2722_vm4, %v10609_v30 }
 0x93f   : > { %v10616_v46 = vsel %vm10517_vm2, %v21477_v31, %v10615_v36  ;;  %v21478_v11 = vld [vmem:[#allocation152_spill] sm:$0xff]  ;;  %v10628_v33 = vsel %vm10513_vm0, %v21479_v32, %v10627_v56  ;;  %v21481_v50 = vld [vmem:[#allocation263_spill] sm:$0xff]  ;;  %v21483_v22 = vld [vmem:[#allocation261_spill] sm:$0xff] }
 0x940   : > { %v10622_v52 = vsel %vm10515_vm1, %v21478_v11, %v10621_v51  ;;  %v10631_v25 = vsel %vm10505_vm12, %v21481_v50, %v21480_v23  ;;  %v21482_v19 = vld [vmem:[#allocation256_spill] sm:$0xff]  ;;  %v10629_v8 = vsel %vm10515_vm1, %v21483_v22, %v10628_v33  ;;  %v21486_v44 = vld [vmem:[#allocation267_spill] sm:$0xff]  ;;  %10782 = vst.msk [vmem:[%s13155_s14 + $0x70] sm:$0xff] %vm2722_vm4, %v10616_v46  ;;  %v21487_v16 = vld [vmem:[#allocation262_spill] sm:$0xff] }
 0x941   : > { %v10623_v43 = vsel %vm10517_vm2, %v21482_v19, %v10622_v52  ;;  %v21484_v10 = vld [vmem:[#allocation264_spill] sm:$0xff]  ;;  %v10630_v18 = vsel %vm10517_vm2, %v21487_v16, %v10629_v8  ;;  %v21488_v34 = vld [vmem:[#allocation111_spill] sm:$0xff]  ;;  %v21490_v35 = vld [vmem:[#allocation158_spill] sm:$0xff] }
 0x942   : > { %v10632_v48 = vsel %vm10507_vm13, %v21484_v10, %v10631_v25  ;;  %v21485_v5 = vld [vmem:[#allocation112_spill] sm:$0xff]  ;;  %v21491_v21 = vld [vmem:[#allocation271_spill] sm:$0xff]  ;;  %10783 = vst.msk [vmem:[%s13155_s14 + $0x78] sm:$0xff] %vm2722_vm4, %v10623_v43  ;;  %v21492_v20 = vld [vmem:[#allocation154_spill] sm:$0xff] }
 0x943   : > { %v10638_v12 = vsel %vm10505_vm12, %v21486_v44, %v21485_v5  ;;  %v10633_v29 = vsel %vm10509_vm14, %v21488_v34, %v10632_v48  ;;  %v21489_v63 = vld [vmem:[#allocation268_spill] sm:$0xff]  ;;  %v10645_v49 = vsel %vm10505_vm12, %v21491_v21, %v21490_v35  ;;  %v21495_v47 = vld [vmem:[#allocation162_spill] sm:$0xff]  ;;  %v21496_v58 = vld [vmem:[#allocation275_spill] sm:$0xff]  ;;  %10784 = vst.msk [vmem:[%s13155_s14 + $0x80] sm:$0xff] %vm2722_vm4, %v10630_v18 }
 0x944   : > { %v10639_v53 = vsel %vm10507_vm13, %v21489_v63, %v10638_v12  ;;  %v10634_v4 = vsel %vm10511_vm15, %v21492_v20, %v10633_v29  ;;  %v21493_v7 = vld [vmem:[#allocation116_spill] sm:$0xff]  ;;  %v10652_v27 = vsel %vm10505_vm12, %v21496_v58, %v21495_v47  ;;  %v21497_v15 = vld [vmem:[#allocation265_spill] sm:$0xff]  ;;  %v21499_v0 = vld [vmem:[#allocation159_spill] sm:$0xff] }
 0x945   : > { %v10640_v26 = vsel %vm10509_vm14, %v21493_v7, %v10639_v53  ;;  %v21494_v57 = vld [vmem:[#allocation272_spill] sm:$0xff]  ;;  %v10635_v17 = vsel %vm10513_vm0, %v21497_v15, %v10634_v4  ;;  %v21501_v30 = vld [vmem:[#allocation266_spill] sm:$0xff]  ;;  %v21502_v36 = vld [vmem:[#allocation269_spill] sm:$0xff] }
 0x946   : > { %v10646_v6 = vsel %vm10507_vm13, %v21494_v57, %v10645_v49  ;;  %v21498_v9 = vld [vmem:[#allocation156_spill] sm:$0xff]  ;;  %v10636_v54 = vsel %vm10515_vm1, %v21501_v30, %v10635_v17  ;;  %v21504_v56 = vld [vmem:[#allocation163_spill] sm:$0xff]  ;;  %v21506_v52 = vld [vmem:[#allocation270_spill] sm:$0xff] }
 0x947   : > { %v10641_v2 = vsel %vm10511_vm15, %v21498_v9, %v10640_v26  ;;  %v10647_v13 = vsel %vm10509_vm14, %v21499_v0, %v10646_v6  ;;  %v21500_v37 = vld [vmem:[#allocation276_spill] sm:$0xff]  ;;  %v21505_v46 = vld [vmem:[#allocation155_spill] sm:$0xff]  ;;  %v21507_v33 = vld [vmem:[#allocation273_spill] sm:$0xff] }
 0x948   : > { %v10653_v42 = vsel %vm10507_vm13, %v21500_v37, %v10652_v27  ;;  %v10642_v45 = vsel %vm10513_vm0, %v21502_v36, %v10641_v2  ;;  %v21503_v51 = vld [vmem:[#allocation160_spill] sm:$0xff]  ;;  %v10637_v11 = vsel %vm10517_vm2, %v21505_v46, %v10636_v54  ;;  %v21509_v19 = vld [vmem:[#allocation157_spill] sm:$0xff]  ;;  %v21510_v22 = vld [vmem:[#allocation274_spill] sm:$0xff] }
 0x949   : > { %v10648_v55 = vsel %vm10511_vm15, %v21503_v51, %v10647_v13  ;;  %v10654_v31 = vsel %vm10509_vm14, %v21504_v56, %v10653_v42  ;;  %v10643_v32 = vsel %vm10515_vm1, %v21506_v52, %v10642_v45  ;;  %v21508_v50 = vld [vmem:[#allocation164_spill] sm:$0xff]  ;;  %v21511_v10 = vld [vmem:[#allocation277_spill] sm:$0xff]  ;;  %v21512_v5 = vld [vmem:[#allocation166_spill] sm:$0xff]  ;;  %10785 = vst.msk [vmem:[%s13155_s14 + $0x88] sm:$0xff] %vm2722_vm4, %v10637_v11 }
 0x94a   : > { %v10649_v23 = vsel %vm10513_vm0, %v21507_v33, %v10648_v55  ;;  %v10655_v25 = vsel %vm10511_vm15, %v21508_v50, %v10654_v31  ;;  %v10644_v43 = vsel %vm10517_vm2, %v21509_v19, %v10643_v32  ;;  %v21513_v44 = vld [vmem:[#allocation279_spill] sm:$0xff]  ;;  %v21514_v16 = vld [vmem:[#allocation161_spill] sm:$0xff]  ;;  %v21515_v34 = vld [vmem:[#allocation278_spill] sm:$0xff] }
 0x94b   : > { %v10650_v8 = vsel %vm10515_vm1, %v21510_v22, %v10649_v23  ;;  %v10656_v48 = vsel %vm10513_vm0, %v21511_v10, %v10655_v25  ;;  %v10659_v12 = vsel %vm10505_vm12, %v21513_v44, %v21512_v5  ;;  %v21516_v63 = vld [vmem:[#allocation280_spill] sm:$0xff]  ;;  %v21517_v35 = vld [vmem:[#allocation170_spill] sm:$0xff]  ;;  %v21518_v21 = vld [vmem:[#allocation283_spill] sm:$0xff]  ;;  %10786 = vst.msk [vmem:[%s13155_s14 + $0x90] sm:$0xff] %vm2722_vm4, %v10644_v43 }
 0x94c   : > { %v10651_v18 = vsel %vm10517_vm2, %v21514_v16, %v10650_v8  ;;  %v10657_v29 = vsel %vm10515_vm1, %v21515_v34, %v10656_v48  ;;  %v10660_v53 = vsel %vm10507_vm13, %v21516_v63, %v10659_v12  ;;  %v10666_v49 = vsel %vm10505_vm12, %v21518_v21, %v21517_v35  ;;  %v21519_v20 = vld [vmem:[#allocation165_spill] sm:$0xff]  ;;  %v21520_v7 = vld [vmem:[#allocation167_spill] sm:$0xff]  ;;  %v21521_v57 = vld [vmem:[#allocation284_spill] sm:$0xff] }
 0x94d   : > { %v10658_v4 = vsel %vm10517_vm2, %v21519_v20, %v10657_v29  ;;  %v10661_v26 = vsel %vm10509_vm14, %v21520_v7, %v10660_v53  ;;  %v10667_v6 = vsel %vm10507_vm13, %v21521_v57, %v10666_v49  ;;  %v21522_v47 = vld [vmem:[#allocation174_spill] sm:$0xff]  ;;  %v21523_v58 = vld [vmem:[#allocation287_spill] sm:$0xff]  ;;  %10787 = vst.msk [vmem:[%s13155_s14 + $0x98] sm:$0xff] %vm2722_vm4, %v10651_v18  ;;  %v21524_v15 = vld [vmem:[#allocation281_spill] sm:$0xff] }
 0x94e   : > { %v10673_v27 = vsel %vm10505_vm12, %v21523_v58, %v21522_v47  ;;  %v10662_v17 = vsel %vm10511_vm15, %v21524_v15, %v10661_v26  ;;  %v21525_v9 = vld [vmem:[#allocation285_spill] sm:$0xff]  ;;  %v21526_v0 = vld [vmem:[#allocation288_spill] sm:$0xff]  ;;  %v21527_v37 = vld [vmem:[#allocation178_spill] sm:$0xff]  ;;  %10788 = vst.msk [vmem:[%s13155_s14 + $0xa0] sm:$0xff] %vm2722_vm4, %v10658_v4 }
 0x94f   : > { %v10668_v2 = vsel %vm10509_vm14, %v21525_v9, %v10667_v6  ;;  %v10674_v13 = vsel %vm10507_vm13, %v21526_v0, %v10673_v27  ;;  %v21528_v42 = vld [vmem:[#allocation291_spill] sm:$0xff]  ;;  %v21529_v54 = vld [vmem:[#allocation168_spill] sm:$0xff]  ;;  %v21533_v11 = vld [vmem:[#allocation169_spill] sm:$0xff] }
 0x950   : > { %v10680_v30 = vsel %vm10505_vm12, %v21528_v42, %v21527_v37  ;;  %v10663_v36 = vsel %vm10513_vm0, %v21529_v54, %v10662_v17  ;;  %v21530_v45 = vld [vmem:[#allocation171_spill] sm:$0xff]  ;;  %v21532_v31 = vld [vmem:[#allocation292_spill] sm:$0xff]  ;;  %v21536_v25 = vld [vmem:[#allocation113_spill] sm:$0xff] }
 0x951   : > { %v10669_v51 = vsel %vm10511_vm15, %v21530_v45, %v10668_v2  ;;  %v21531_v55 = vld [vmem:[#allocation175_spill] sm:$0xff]  ;;  %v10681_v46 = vsel %vm10507_vm13, %v21532_v31, %v10680_v30  ;;  %v10664_v52 = vsel %vm10515_vm1, %v21533_v11, %v10663_v36  ;;  %v21534_v32 = vld [vmem:[#allocation172_spill] sm:$0xff]  ;;  %v21537_v43 = vld [vmem:[#allocation282_spill] sm:$0xff] }
 0x952   : > { %v10675_v56 = vsel %vm10509_vm14, %v21531_v55, %v10674_v13  ;;  %v10670_v33 = vsel %vm10513_vm0, %v21534_v32, %v10669_v51  ;;  %v21535_v23 = vld [vmem:[#allocation176_spill] sm:$0xff]  ;;  %v10682_v19 = vsel %vm10509_vm14, %v21536_v25, %v10681_v46  ;;  %v10665_v22 = vsel %vm10517_vm2, %v21537_v43, %v10664_v52  ;;  %v21538_v8 = vld [vmem:[#allocation286_spill] sm:$0xff]  ;;  %v21539_v48 = vld [vmem:[#allocation289_spill] sm:$0xff] }
 0x953   : > { %v10676_v50 = vsel %vm10511_vm15, %v21535_v23, %v10675_v56  ;;  %v10671_v10 = vsel %vm10515_vm1, %v21538_v8, %v10670_v33  ;;  %v21540_v44 = vld [vmem:[#allocation179_spill] sm:$0xff]  ;;  %v21541_v16 = vld [vmem:[#allocation173_spill] sm:$0xff]  ;;  %v21542_v34 = vld [vmem:[#allocation290_spill] sm:$0xff]  ;;  %10789 = vst.msk [vmem:[%s13155_s14 + $0xa8] sm:$0xff] %vm2722_vm4, %v10665_v22 }
 0x954   : > { %v10677_v5 = vsel %vm10513_vm0, %v21539_v48, %v10676_v50  ;;  %v10683_v12 = vsel %vm10511_vm15, %v21540_v44, %v10682_v19  ;;  %v10672_v18 = vsel %vm10517_vm2, %v21541_v16, %v10671_v10  ;;  %v21543_v63 = vld [vmem:[#allocation293_spill] sm:$0xff]  ;;  %v21545_v21 = vld [vmem:[#allocation295_spill] sm:$0xff]  ;;  %v21547_v7 = vld [vmem:[#allocation294_spill] sm:$0xff] }
 0x955   : > { %v10678_v29 = vsel %vm10515_vm1, %v21542_v34, %v10677_v5  ;;  %v10684_v53 = vsel %vm10513_vm0, %v21543_v63, %v10683_v12  ;;  %v21544_v35 = vld [vmem:[#allocation181_spill] sm:$0xff]  ;;  %v21548_v57 = vld [vmem:[#allocation296_spill] sm:$0xff]  ;;  %v21549_v47 = vld [vmem:[#allocation114_spill] sm:$0xff]  ;;  %10790 = vst.msk [vmem:[%s13155_s14 + $0xb0] sm:$0xff] %vm2722_vm4, %v10672_v18 }
 0x956   : > { %v10687_v49 = vsel %vm10505_vm12, %v21545_v21, %v21544_v35  ;;  %v21546_v20 = vld [vmem:[#allocation177_spill] sm:$0xff]  ;;  %v10685_v26 = vsel %vm10515_vm1, %v21547_v7, %v10684_v53  ;;  %v21550_v58 = vld [vmem:[#allocation299_spill] sm:$0xff]  ;;  %v21551_v15 = vld [vmem:[#allocation180_spill] sm:$0xff] }
 0x957   : > { %v10679_v4 = vsel %vm10517_vm2, %v21546_v20, %v10678_v29  ;;  %v10688_v6 = vsel %vm10507_vm13, %v21548_v57, %v10687_v49  ;;  %v10694_v27 = vsel %vm10505_vm12, %v21550_v58, %v21549_v47  ;;  %v10686_v17 = vsel %vm10517_vm2, %v21551_v15, %v10685_v26  ;;  %v21552_v9 = vld [vmem:[#allocation182_spill] sm:$0xff]  ;;  %v21553_v0 = vld [vmem:[#allocation300_spill] sm:$0xff]  ;;  %v21554_v37 = vld [vmem:[#allocation187_spill] sm:$0xff] }
 0x958   : > { %v10689_v2 = vsel %vm10509_vm14, %v21552_v9, %v10688_v6  ;;  %v10695_v13 = vsel %vm10507_vm13, %v21553_v0, %v10694_v27  ;;  %v21555_v42 = vld [vmem:[#allocation303_spill] sm:$0xff]  ;;  %10791 = vst.msk [vmem:[%s13155_s14 + $0xb8] sm:$0xff] %vm2722_vm4, %v10679_v4  ;;  %v21557_v45 = vld [vmem:[#allocation185_spill] sm:$0xff]  ;;  %v21558_v55 = vld [vmem:[#allocation304_spill] sm:$0xff] }
 0x959   : > { %v10701_v30 = vsel %vm10505_vm12, %v21555_v42, %v21554_v37  ;;  %v21556_v54 = vld [vmem:[#allocation183_spill] sm:$0xff]  ;;  %v10696_v51 = vsel %vm10509_vm14, %v21557_v45, %v10695_v13  ;;  %v21559_v31 = vld [vmem:[#allocation104_spill] sm:$0xff]  ;;  %10792 = vst.msk [vmem:[%s13155_s14 + $0xc0] sm:$0xff] %vm2722_vm4, %v10686_v17  ;;  %v21561_v52 = vld [vmem:[#allocation297_spill] sm:$0xff] }
 0x95a   : > { %v10690_v36 = vsel %vm10511_vm15, %v21556_v54, %v10689_v2  ;;  %v10702_v56 = vsel %vm10507_vm13, %v21558_v55, %v10701_v30  ;;  %v21560_v46 = vld [vmem:[#allocation307_spill] sm:$0xff]  ;;  %v21562_v33 = vld [vmem:[#allocation186_spill] sm:$0xff]  ;;  %v21563_v50 = vld [vmem:[#allocation188_spill] sm:$0xff]  ;;  %v10729_v55 = vsel %vm10505_vm12, %v19511_v1, %v19502_v24  ;;  %v10248_v24 = vmax.f32 %v19519_v60, %v10247_v59 }
 0x95b   : > { %v10708_v11 = vsel %vm10505_vm12, %v21560_v46, %v21559_v31  ;;  %v10691_v32 = vsel %vm10513_vm0, %v21561_v52, %v10690_v36  ;;  %v10697_v23 = vsel %vm10511_vm15, %v21562_v33, %v10696_v51  ;;  %v10703_v25 = vsel %vm10509_vm14, %v21563_v50, %v10702_v56  ;;  %v21564_v19 = vld [vmem:[#allocation308_spill] sm:$0xff]  ;;  %v21565_v22 = vld [vmem:[#allocation298_spill] sm:$0xff]  ;;  %v21566_v10 = vld [vmem:[#allocation301_spill] sm:$0xff] }
 0x95c   : > { %v10709_v43 = vsel %vm10507_vm13, %v21564_v19, %v10708_v11  ;;  %v10692_v8 = vsel %vm10515_vm1, %v21565_v22, %v10691_v32  ;;  %v10698_v48 = vsel %vm10513_vm0, %v21566_v10, %v10697_v23  ;;  %v21567_v5 = vld [vmem:[#allocation305_spill] sm:$0xff]  ;;  %v21569_v18 = vld [vmem:[#allocation184_spill] sm:$0xff]  ;;  %v21570_v29 = vld [vmem:[#allocation302_spill] sm:$0xff]  ;;  %v10241_v56 = vmax.f32 %v19507_v14, %v10240_v41 }
 0x95d   : > { %v10704_v44 = vsel %vm10511_vm15, %v21567_v5, %v10703_v25  ;;  %v21568_v12 = vld [vmem:[#allocation309_spill] sm:$0xff]  ;;  %v10693_v34 = vsel %vm10517_vm2, %v21569_v18, %v10692_v8  ;;  %v10699_v63 = vsel %vm10515_vm1, %v21570_v29, %v10698_v48  ;;  %v21573_v20 = vld [vmem:[#allocation115_spill] sm:$0xff]  ;;  %v21574_v7 = vld [vmem:[#allocation190_spill] sm:$0xff]  ;;  %v10730_v32 = vsel %vm10507_vm13, %v19513_v38, %v10729_v55 }
 0x95e   : > { %v10710_v16 = vsel %vm10509_vm14, %v21568_v12, %v10709_v43  ;;  %v21571_v53 = vld [vmem:[#allocation189_spill] sm:$0xff]  ;;  %v10700_v4 = vsel %vm10517_vm2, %v21573_v20, %v10699_v63  ;;  %v21575_v6 = vld [vmem:[#allocation192_spill] sm:$0xff]  ;;  %v21576_v47 = vld [vmem:[#allocation310_spill] sm:$0xff]  ;;  %10793 = vst.msk [vmem:[%s13155_s14 + $0xc8] sm:$0xff] %vm2722_vm4, %v10693_v34  ;;  %v10731_v23 = vsel %vm10509_vm14, %v19517_v28, %v10730_v32 }
 0x95f   : > { %v10705_v35 = vsel %vm10513_vm0, %v21571_v53, %v10704_v44  ;;  %v21572_v21 = vld [vmem:[#allocation105_spill] sm:$0xff]  ;;  %v10715_v58 = vsel %vm10505_vm12, %v21576_v47, %v21575_v6  ;;  %v21577_v27 = vld [vmem:[#allocation306_spill] sm:$0xff]  ;;  %v21578_v17 = vld [vmem:[#allocation191_spill] sm:$0xff]  ;;  %10794 = vst.msk [vmem:[%s13155_s14 + $0xd0] sm:$0xff] %vm2722_vm4, %v10700_v4  ;;  %v10732_v19 = vsel %vm10511_vm15, %v19521_v40, %v10731_v23 }
 0x960   : > { %v10711_v49 = vsel %vm10511_vm15, %v21572_v21, %v10710_v16  ;;  %v10706_v26 = vsel %vm10515_vm1, %v21574_v7, %v10705_v35  ;;  %v21579_v2 = vld [vmem:[#allocation311_spill] sm:$0xff]  ;;  %v21581_v37 = vld [vmem:[#allocation314_spill] sm:$0xff]  ;;  %v21585_v31 = vld [vmem:[#allocation193_spill] sm:$0xff]  ;;  %v10733_v22 = vsel %vm10513_vm0, %v19525_v61, %v10732_v19 }
 0x961   : > { %v10712_v57 = vsel %vm10513_vm0, %v19410_v3, %v10711_v49  ;;  %v10707_v15 = vsel %vm10517_vm2, %v21577_v27, %v10706_v26  ;;  %v10716_v0 = vsel %vm10507_vm13, %v21579_v2, %v10715_v58  ;;  %v21580_v13 = vld [vmem:[#allocation195_spill] sm:$0xff]  ;;  %v21582_v42 = vld [vmem:[#allocation106_spill] sm:$0xff]  ;;  %v21586_v11 = vld [vmem:[#allocation196_spill] sm:$0xff]  ;;  %v10734_v10 = vsel %vm10515_vm1, %v10241_v56, %v10733_v22 }
 0x962   : > { %v10713_v9 = vsel %vm10515_vm1, %v21578_v17, %v10712_v57  ;;  %v10722_v3 = vsel %vm10505_vm12, %v21581_v37, %v21580_v13  ;;  %v21583_v54 = vld [vmem:[#allocation107_spill] sm:$0xff]  ;;  %10795 = vst.msk [vmem:[%s13155_s14 + $0xd8] sm:$0xff] %vm2722_vm4, %v10707_v15  ;;  %v21587_v1 = vld [vmem:[#allocation312_spill] sm:$0xff]  ;;  %v21588_v41 = vld [vmem:[#allocation197_spill] sm:$0xff] }
 0x963   : > { %v10714_v30 = vsel %vm10517_vm2, %v21582_v42, %v10713_v9  ;;  %v10717_v36 = vsel %vm10509_vm14, %v21583_v54, %v10716_v0  ;;  %v21584_v45 = vld [vmem:[#allocation315_spill] sm:$0xff]  ;;  %v21589_v50 = vld [vmem:[#allocation313_spill] sm:$0xff]  ;;  %v21590_v43 = vld [vmem:[#allocation194_spill] sm:$0xff] }
 0x964   : > { %v10723_v51 = vsel %vm10507_vm13, %v21584_v45, %v10722_v3  ;;  %v10718_v46 = vsel %vm10511_vm15, %v21585_v31, %v10717_v36  ;;  %10796 = vst.msk [vmem:[%s13155_s14 + $0xe0] sm:$0xff] %vm2722_vm4, %v10714_v30  ;;  %v21591_v8 = vld [vmem:[#allocation198_spill] sm:$0xff] }
 0x965   : > { %v10724_v52 = vsel %vm10509_vm14, %v21586_v11, %v10723_v51  ;;  %v10719_v14 = vsel %vm10513_vm0, %v21587_v1, %v10718_v46 }
 0x966   : > { %v10725_v33 = vsel %vm10511_vm15, %v21588_v41, %v10724_v52  ;;  %v10720_v38 = vsel %vm10515_vm1, %v21589_v50, %v10719_v14 }
 0x967   : > { %v10726_v25 = vsel %vm10513_vm0, %v19490_v39, %v10725_v33  ;;  %v10721_v60 = vsel %vm10517_vm2, %v21590_v43, %v10720_v38  ;;  %v10735_v39 = vsel %vm10517_vm2, %v10248_v24, %v10734_v10 }
 0x968   : > { %v10727_v59 = vsel %vm10515_vm1, %v19492_v62, %v10726_v25  ;;  %10797 = vst.msk [vmem:[%s13155_s14 + $0xe8] sm:$0xff] %vm2722_vm4, %v10721_v60  ;;  %10799 = vst.msk [vmem:[%s13155_s14 + $0xf8] sm:$0xff] %vm2722_vm4, %v10735_v39 }
 0x969   : > { %v10728_v28 = vsel %vm10517_vm2, %v21591_v8, %v10727_v59 }
 0x96a   : > { %10798 = vst.msk [vmem:[%s13155_s14 + $0xf0] sm:$0xff] %vm2722_vm4, %v10728_v28 }
 0x96b PF: > { %s15_s24 = sadd.s32 1, %s13053_s24   ;;  %s21592_s18 = smov %s13041_s21 }
 0x96c   : > { %p12_p3 = scmp.ge.s32.totalorder %s15_s24, 18   ;;  %s21593_s19 = smov %s13045_s22 }
 0x96d   : > { %s21594_s20 = smov %s13049_s23  ;;  %s21595_s21 = smov %s21599_s25 }
 0x96e   : > { %s21596_s22 = smov %s21603_s26  ;;  %s21597_s23 = smov %s21607_s27 }
 0x96f   :  { %14 = sbr.rel (!%p12_p3) target bundleno = 4 (0x4), region = 93 }

</bundles_post_ra>
